<compile_context>
chip_gen: v7x
topology: tpu7x:2x2x1
jax: 0.10.0
libtpu: 0.0.40
codegen_flags: <defaults>
</compile_context>

<pallas_src>
import functools
import math

import jax
import jax.numpy as jnp
from jax import lax
from jax.experimental import pallas as pl
from jax.experimental.pallas import tpu as pltpu

HP = 128   # padded per-gate hidden width (lane-aligned)
VP = 128   # padded vocab width (lane-dense output stores)


def bilstm_kernel(x_ref, wih_ref, b_ref, wrec_ref, wout_ref, bout_ref, out_ref,
                  *, T, B, Hp):
    """Fused bidirectional LSTM + output Linear.

    x_ref    : (T*B, E)        time-major flattened embedded input
    wih_ref  : (E, 8*Hp)       [fwd i,f,g,o | bwd i,f,g,o], each gate padded to Hp lanes
    b_ref    : (1, 8*Hp)       combined (b_ih + b_hh) biases, same layout
    wrec_ref : (2*Hp, 8*Hp)    block_diag(W_hh_f_pad, W_hh_b_pad)
    wout_ref : (2*Hp, Vp)      output Linear weight, [fwd rows | bwd rows], zero-padded
    bout_ref : (1, Vp)         output Linear bias, zero-padded
    out_ref  : (T*B, Vp)       padded logits
    """
    G = 4 * Hp

    # ---- hoisted input projection: one MXU matmul for both directions, bias folded in
    gx = jnp.dot(x_ref[...], wih_ref[...],
                 preferred_element_type=jnp.float32) + b_ref[...]      # (T*B, 2G)

    w_rec = wrec_ref[...]                                              # (2Hp, 2G)

    h_cat = jnp.zeros((B, 2 * Hp), jnp.float32)   # [h_fwd | h_bwd]
    c_f = jnp.zeros((B, Hp), jnp.float32)
    c_b = jnp.zeros((B, Hp), jnp.float32)
    hf = [None] * T
    hb = [None] * T

    def lstm_update(g, c):
        # each slice is a full 128-lane block (lane-aligned)
        i = jax.nn.sigmoid(g[:, 0:Hp])
        f = jax.nn.sigmoid(g[:, Hp:2 * Hp])
        gg = jnp.tanh(g[:, 2 * Hp:3 * Hp])
        o = jax.nn.sigmoid(g[:, 3 * Hp:4 * Hp])
        c_new = f * c + i * gg
        h_new = o * jnp.tanh(c_new)
        return h_new, c_new

    # ---- fused fwd/bwd recurrence, fully unrolled (T static, all slices static)
    for s in range(T):
        tf = s
        tb = T - 1 - s
        # one matmul for both directions' recurrent term
        g_rec = jnp.dot(h_cat, w_rec, preferred_element_type=jnp.float32)  # (B, 2G)
        gf = gx[tf * B:(tf + 1) * B, 0:G] + g_rec[:, 0:G]
        gb = gx[tb * B:(tb + 1) * B, G:2 * G] + g_rec[:, G:2 * G]
        h_f, c_f = lstm_update(gf, c_f)
        h_b, c_b = lstm_update(gb, c_b)
        hf[tf] = h_f
        hb[tb] = h_b
        h_cat = jnp.concatenate([h_f, h_b], axis=1)

    # ---- single contiguous assembly of [h_fwd | h_bwd] per time step, then one
    #      lane-dense output matmul (no scratch, no masked partial stores).
    h_all = jnp.concatenate(
        [jnp.concatenate([hf[t], hb[t]], axis=1) for t in range(T)], axis=0)  # (T*B, 2Hp)
    out_ref[...] = (jnp.dot(h_all, wout_ref[...], preferred_element_type=jnp.float32)
                    + bout_ref[...])


def bilstm_forward(X, packed):
    """X: (B, T) int32 token ids.  Returns (1, V, T*B) float32 (matches torch)."""
    emb = packed["embedding"][X]                               # (B, T, E) gather (glue)
    x = jnp.transpose(emb, (1, 0, 2)).astype(jnp.float32)      # (T, B, E) time-major
    T, B, E = x.shape
    x_flat = x.reshape(T * B, E)
    Hp, V, Vp = packed["Hp"], packed["V"], packed["Vp"]

    vmem = pl.BlockSpec(memory_space=pltpu.MemorySpace.VMEM)
    kernel = functools.partial(bilstm_kernel, T=T, B=B, Hp=Hp)
    logits_p = pl.pallas_call(
        kernel,
        out_shape=jax.ShapeDtypeStruct((T * B, Vp), jnp.float32),
        in_specs=[vmem] * 6,
        out_specs=vmem,
    )(x_flat, packed["wih"], packed["b"], packed["w_rec"],
      packed["w_out"], packed["b_out"])

    logits = logits_p[:, :V]                                   # strip vocab padding
    # torch: outputs.view(1, V, T*B) — row-major reinterpretation of (T*B, V)
    return jnp.reshape(logits, (1, V, T * B))


def init_params(key, vocab_size, embedding_dim, n_hidden):
    """Deterministic synthetic parameters in PyTorch layout (shapes match the nn.Module)."""
    ks = jax.random.split(key, 12)
    E, H, V = embedding_dim, n_hidden, vocab_size
    k_lstm = 1.0 / math.sqrt(H)          # PyTorch LSTM default uniform bound
    xav = math.sqrt(6.0 / (2 * H + V))   # xavier_uniform_ for the Linear weight
    k_lin = 1.0 / math.sqrt(2 * H)       # Linear default bias bound

    def u(k, shape, bound):
        return jax.random.uniform(k, shape, jnp.float32, -bound, bound)

    return {
        # frozen pretrained embedding (synthetic)
        "embedding": jax.random.normal(ks[0], (V, E), jnp.float32),
        # forward direction: W_ih (4H, E) / W_hh (4H, H) stored transposed, gate order i,f,g,o
        "wih_f": u(ks[1], (4 * H, E), k_lstm).T,
        "whh_f": u(ks[2], (4 * H, H), k_lstm).T,
        "b_f": (u(ks[3], (4 * H,), k_lstm) + u(ks[4], (4 * H,), k_lstm)).reshape(1, 4 * H),
        # reverse direction
        "wih_b": u(ks[5], (4 * H, E), k_lstm).T,
        "whh_b": u(ks[6], (4 * H, H), k_lstm).T,
        "b_b": (u(ks[7], (4 * H,), k_lstm) + u(ks[8], (4 * H,), k_lstm)).reshape(1, 4 * H),
        # output Linear (V, 2H) xavier-uniform, stored transposed -> (2H, V)
        "w_out": u(ks[9], (V, 2 * H), xav).T,
        "b_out": u(ks[10], (V,), k_lin).reshape(1, V),
    }


def pack_params(params, Hp=HP, Vp=VP):
    """One-time re-layout: lane-align each gate to Hp lanes, fuse directions,
    block-diag the recurrent weights, pad the vocab dim to Vp lanes."""
    H = params["whh_f"].shape[0]
    V = params["w_out"].shape[1]

    def pad_gate_cols(w):
        # w: (rows, 4H) -> (rows, 4*Hp), gate g occupies lanes [g*Hp, g*Hp+H)
        rows = w.shape[0]
        out = jnp.zeros((rows, 4 * Hp), w.dtype)
        for g in range(4):
            out = out.at[:, g * Hp:g * Hp + H].set(w[:, g * H:(g + 1) * H])
        return out

    wih = jnp.concatenate([pad_gate_cols(params["wih_f"]),
                           pad_gate_cols(params["wih_b"])], axis=1)      # (E, 8Hp)
    b = jnp.concatenate([pad_gate_cols(params["b_f"]),
                         pad_gate_cols(params["b_b"])], axis=1)          # (1, 8Hp)

    w_rec = jnp.zeros((2 * Hp, 8 * Hp), jnp.float32)
    w_rec = w_rec.at[0:H, 0:4 * Hp].set(pad_gate_cols(params["whh_f"]))
    w_rec = w_rec.at[Hp:Hp + H, 4 * Hp:8 * Hp].set(pad_gate_cols(params["whh_b"]))

    w_out = jnp.zeros((2 * Hp, Vp), jnp.float32)
    w_out = w_out.at[0:H, 0:V].set(params["w_out"][0:H, :])
    w_out = w_out.at[Hp:Hp + H, 0:V].set(params["w_out"][H:2 * H, :])
    b_out = jnp.zeros((1, Vp), jnp.float32).at[0, 0:V].set(params["b_out"][0])

    return {"embedding": params["embedding"], "wih": wih, "b": b,
            "w_rec": w_rec, "w_out": w_out, "b_out": b_out,
            "H": H, "Hp": Hp, "V": V, "Vp": Vp}


def bilstm_reference(X, params):
    """Pure-JAX reference (unpadded, per-direction scan) for correctness."""
    emb = params["embedding"][X]
    x = jnp.transpose(emb, (1, 0, 2)).astype(jnp.float32)      # (T, B, E)
    T, B, _ = x.shape
    H = params["whh_f"].shape[0]
    V = params["w_out"].shape[1]
    hp = lax.Precision.HIGHEST

    def run(wih, whh, b, xs):
        def step(carry, x_t):
            h, c = carry
            g = (jnp.dot(x_t, wih, precision=hp)
                 + jnp.dot(h, whh, precision=hp) + b)
            i = jax.nn.sigmoid(g[:, 0:H])
            f = jax.nn.sigmoid(g[:, H:2 * H])
            gg = jnp.tanh(g[:, 2 * H:3 * H])
            o = jax.nn.sigmoid(g[:, 3 * H:4 * H])
            c = f * c + i * gg
            h = o * jnp.tanh(c)
            return (h, c), h
        init = (jnp.zeros((B, H), jnp.float32), jnp.zeros((B, H), jnp.float32))
        _, hs = lax.scan(step, init, xs)
        return hs

    hf = run(params["wih_f"], params["whh_f"], params["b_f"], x)          # (T, B, H)
    hb = run(params["wih_b"], params["whh_b"], params["b_b"], x[::-1])[::-1]
    h = jnp.concatenate([hf, hb], axis=-1).reshape(T * B, 2 * H)
    logits = jnp.dot(h, params["w_out"], precision=hp) + params["b_out"]
    return jnp.reshape(logits, (1, V, T * B))


if __name__ == "__main__":
    vocab_size = 50
    embedding_dim = 300   # as in the module
    n_hidden = 16         # as in the module
    batch, seq_len = 2, 8

    key = jax.random.PRNGKey(0)
    k_param, k_x = jax.random.split(key)
    params = init_params(k_param, vocab_size, embedding_dim, n_hidden)
    packed = pack_params(params)
    X = jax.random.randint(k_x, (batch, seq_len), 0, vocab_size, dtype=jnp.int32)

    out = bilstm_forward(X, packed)
    out = jax.block_until_ready(out)

    expected_shape = (1, vocab_size, seq_len * batch)
    assert out.shape == expected_shape, (out.shape, expected_shape)
    assert out.dtype == jnp.float32
    assert bool(jnp.all(jnp.isfinite(out)))

    # correctness vs. pure-JAX reference (loose tol to allow MXU precision-mode deltas)
    ref = bilstm_reference(X, params)
    max_err = float(jnp.max(jnp.abs(out - ref)))
    assert max_err < 5e-2, f"max abs error {max_err}"

    print("KERNEL_OK")
</pallas_src>

<mosaic_0001>
module attributes {stable_mosaic.version = 11 : i64} {
  func.func @bilstm_kernel(%arg0: memref<16x300xf32, #tpu.memory_space<vmem>>, %arg1: memref<300x1024xf32, #tpu.memory_space<vmem>>, %arg2: memref<1x1024xf32, #tpu.memory_space<vmem>>, %arg3: memref<256x1024xf32, #tpu.memory_space<vmem>>, %arg4: memref<256x128xf32, #tpu.memory_space<vmem>>, %arg5: memref<1x128xf32, #tpu.memory_space<vmem>>, %arg6: memref<16x128xf32, #tpu.memory_space<vmem>>) attributes {dimension_semantics = [], scalar_prefetch = 0 : i64, scratch_operands = 0 : i64, tpu.core_type = #tpu.core_type<tc>} {
    %c0 = arith.constant 0 : index
    %c0_0 = arith.constant 0 : index
    %0 = vector.load %arg0[%c0, %c0_0] : memref<16x300xf32, #tpu.memory_space<vmem>>, vector<16x300xf32>
    %c0_1 = arith.constant 0 : index
    %c0_2 = arith.constant 0 : index
    %1 = vector.load %arg1[%c0_1, %c0_2] : memref<300x1024xf32, #tpu.memory_space<vmem>>, vector<300x1024xf32>
    %cst = arith.constant dense<0.000000e+00> : vector<16x1024xf32>
    %2 = tpu.matmul %0, %1, %cst {dimension_numbers = #tpu.dot_dimension_numbers<[1], [0], [0], [1], [0, 0, 1, 1], [], []>} : vector<16x300xf32>, vector<300x1024xf32>, vector<16x1024xf32> -> vector<16x1024xf32>
    %c0_3 = arith.constant 0 : index
    %c0_4 = arith.constant 0 : index
    %3 = vector.load %arg2[%c0_3, %c0_4] : memref<1x1024xf32, #tpu.memory_space<vmem>>, vector<1x1024xf32>
    %4 = vector.broadcast %3 : vector<1x1024xf32> to vector<16x1024xf32>
    %5 = arith.addf %2, %4 : vector<16x1024xf32>
    %c0_5 = arith.constant 0 : index
    %c0_6 = arith.constant 0 : index
    %6 = vector.load %arg3[%c0_5, %c0_6] : memref<256x1024xf32, #tpu.memory_space<vmem>>, vector<256x1024xf32>
    %cst_7 = arith.constant 0.000000e+00 : f32
    %7 = vector.broadcast %cst_7 : f32 to vector<2x256xf32>
    %cst_8 = arith.constant 0.000000e+00 : f32
    %8 = vector.broadcast %cst_8 : f32 to vector<2x128xf32>
    %cst_9 = arith.constant 0.000000e+00 : f32
    %9 = vector.broadcast %cst_9 : f32 to vector<2x128xf32>
    %cst_10 = arith.constant dense<0.000000e+00> : vector<2x1024xf32>
    %10 = tpu.matmul %7, %6, %cst_10 {dimension_numbers = #tpu.dot_dimension_numbers<[1], [0], [0], [1], [0, 0, 1, 1], [], []>} : vector<2x256xf32>, vector<256x1024xf32>, vector<2x1024xf32> -> vector<2x1024xf32>
    %11 = vector.extract_strided_slice %5 {offsets = [0, 0], sizes = [2, 512], strides = [1, 1]} : vector<16x1024xf32> to vector<2x512xf32>
    %12 = vector.extract_strided_slice %10 {offsets = [0, 0], sizes = [2, 512], strides = [1, 1]} : vector<2x1024xf32> to vector<2x512xf32>
    %13 = arith.addf %11, %12 : vector<2x512xf32>
    %14 = vector.extract_strided_slice %5 {offsets = [14, 512], sizes = [2, 512], strides = [1, 1]} : vector<16x1024xf32> to vector<2x512xf32>
    %15 = vector.extract_strided_slice %10 {offsets = [0, 512], sizes = [2, 512], strides = [1, 1]} : vector<2x1024xf32> to vector<2x512xf32>
    %16 = arith.addf %14, %15 : vector<2x512xf32>
    %17 = vector.extract_strided_slice %13 {offsets = [0, 0], sizes = [2, 128], strides = [1, 1]} : vector<2x512xf32> to vector<2x128xf32>
    %18 = arith.negf %17 : vector<2x128xf32>
    %19 = math.exp %18 : vector<2x128xf32>
    %cst_11 = arith.constant 1.000000e+00 : f32
    %20 = vector.broadcast %cst_11 : f32 to vector<2x128xf32>
    %21 = arith.addf %20, %19 : vector<2x128xf32>
    %22 = arith.divf %20, %21 : vector<2x128xf32>
    %23 = vector.extract_strided_slice %13 {offsets = [0, 128], sizes = [2, 128], strides = [1, 1]} : vector<2x512xf32> to vector<2x128xf32>
    %24 = arith.negf %23 : vector<2x128xf32>
    %25 = math.exp %24 : vector<2x128xf32>
    %cst_12 = arith.constant 1.000000e+00 : f32
    %26 = vector.broadcast %cst_12 : f32 to vector<2x128xf32>
    %27 = arith.addf %26, %25 : vector<2x128xf32>
    %28 = arith.divf %26, %27 : vector<2x128xf32>
    %29 = vector.extract_strided_slice %13 {offsets = [0, 256], sizes = [2, 128], strides = [1, 1]} : vector<2x512xf32> to vector<2x128xf32>
    %30 = math.tanh %29 : vector<2x128xf32>
    %31 = vector.extract_strided_slice %13 {offsets = [0, 384], sizes = [2, 128], strides = [1, 1]} : vector<2x512xf32> to vector<2x128xf32>
    %32 = arith.negf %31 : vector<2x128xf32>
    %33 = math.exp %32 : vector<2x128xf32>
    %cst_13 = arith.constant 1.000000e+00 : f32
    %34 = vector.broadcast %cst_13 : f32 to vector<2x128xf32>
    %35 = arith.addf %34, %33 : vector<2x128xf32>
    %36 = arith.divf %34, %35 : vector<2x128xf32>
    %37 = arith.mulf %28, %8 : vector<2x128xf32>
    %38 = arith.mulf %22, %30 : vector<2x128xf32>
    %39 = arith.addf %37, %38 : vector<2x128xf32>
    %40 = math.tanh %39 : vector<2x128xf32>
    %41 = arith.mulf %36, %40 : vector<2x128xf32>
    %42 = vector.extract_strided_slice %16 {offsets = [0, 0], sizes = [2, 128], strides = [1, 1]} : vector<2x512xf32> to vector<2x128xf32>
    %43 = arith.negf %42 : vector<2x128xf32>
    %44 = math.exp %43 : vector<2x128xf32>
    %cst_14 = arith.constant 1.000000e+00 : f32
    %45 = vector.broadcast %cst_14 : f32 to vector<2x128xf32>
    %46 = arith.addf %45, %44 : vector<2x128xf32>
    %47 = arith.divf %45, %46 : vector<2x128xf32>
    %48 = vector.extract_strided_slice %16 {offsets = [0, 128], sizes = [2, 128], strides = [1, 1]} : vector<2x512xf32> to vector<2x128xf32>
    %49 = arith.negf %48 : vector<2x128xf32>
    %50 = math.exp %49 : vector<2x128xf32>
    %cst_15 = arith.constant 1.000000e+00 : f32
    %51 = vector.broadcast %cst_15 : f32 to vector<2x128xf32>
    %52 = arith.addf %51, %50 : vector<2x128xf32>
    %53 = arith.divf %51, %52 : vector<2x128xf32>
    %54 = vector.extract_strided_slice %16 {offsets = [0, 256], sizes = [2, 128], strides = [1, 1]} : vector<2x512xf32> to vector<2x128xf32>
    %55 = math.tanh %54 : vector<2x128xf32>
    %56 = vector.extract_strided_slice %16 {offsets = [0, 384], sizes = [2, 128], strides = [1, 1]} : vector<2x512xf32> to vector<2x128xf32>
    %57 = arith.negf %56 : vector<2x128xf32>
    %58 = math.exp %57 : vector<2x128xf32>
    %cst_16 = arith.constant 1.000000e+00 : f32
    %59 = vector.broadcast %cst_16 : f32 to vector<2x128xf32>
    %60 = arith.addf %59, %58 : vector<2x128xf32>
    %61 = arith.divf %59, %60 : vector<2x128xf32>
    %62 = arith.mulf %53, %9 : vector<2x128xf32>
    %63 = arith.mulf %47, %55 : vector<2x128xf32>
    %64 = arith.addf %62, %63 : vector<2x128xf32>
    %65 = math.tanh %64 : vector<2x128xf32>
    %66 = arith.mulf %61, %65 : vector<2x128xf32>
    %67 = tpu.concatenate %41, %66 in 1 : vector<2x128xf32>, vector<2x128xf32> -> vector<2x256xf32>
    %cst_17 = arith.constant dense<0.000000e+00> : vector<2x1024xf32>
    %68 = tpu.matmul %67, %6, %cst_17 {dimension_numbers = #tpu.dot_dimension_numbers<[1], [0], [0], [1], [0, 0, 1, 1], [], []>} : vector<2x256xf32>, vector<256x1024xf32>, vector<2x1024xf32> -> vector<2x1024xf32>
    %69 = vector.extract_strided_slice %5 {offsets = [2, 0], sizes = [2, 512], strides = [1, 1]} : vector<16x1024xf32> to vector<2x512xf32>
    %70 = vector.extract_strided_slice %68 {offsets = [0, 0], sizes = [2, 512], strides = [1, 1]} : vector<2x1024xf32> to vector<2x512xf32>
    %71 = arith.addf %69, %70 : vector<2x512xf32>
    %72 = vector.extract_strided_slice %5 {offsets = [12, 512], sizes = [2, 512], strides = [1, 1]} : vector<16x1024xf32> to vector<2x512xf32>
    %73 = vector.extract_strided_slice %68 {offsets = [0, 512], sizes = [2, 512], strides = [1, 1]} : vector<2x1024xf32> to vector<2x512xf32>
    %74 = arith.addf %72, %73 : vector<2x512xf32>
    %75 = vector.extract_strided_slice %71 {offsets = [0, 0], sizes = [2, 128], strides = [1, 1]} : vector<2x512xf32> to vector<2x128xf32>
    %76 = arith.negf %75 : vector<2x128xf32>
    %77 = math.exp %76 : vector<2x128xf32>
    %cst_18 = arith.constant 1.000000e+00 : f32
    %78 = vector.broadcast %cst_18 : f32 to vector<2x128xf32>
    %79 = arith.addf %78, %77 : vector<2x128xf32>
    %80 = arith.divf %78, %79 : vector<2x128xf32>
    %81 = vector.extract_strided_slice %71 {offsets = [0, 128], sizes = [2, 128], strides = [1, 1]} : vector<2x512xf32> to vector<2x128xf32>
    %82 = arith.negf %81 : vector<2x128xf32>
    %83 = math.exp %82 : vector<2x128xf32>
    %cst_19 = arith.constant 1.000000e+00 : f32
    %84 = vector.broadcast %cst_19 : f32 to vector<2x128xf32>
    %85 = arith.addf %84, %83 : vector<2x128xf32>
    %86 = arith.divf %84, %85 : vector<2x128xf32>
    %87 = vector.extract_strided_slice %71 {offsets = [0, 256], sizes = [2, 128], strides = [1, 1]} : vector<2x512xf32> to vector<2x128xf32>
    %88 = math.tanh %87 : vector<2x128xf32>
    %89 = vector.extract_strided_slice %71 {offsets = [0, 384], sizes = [2, 128], strides = [1, 1]} : vector<2x512xf32> to vector<2x128xf32>
    %90 = arith.negf %89 : vector<2x128xf32>
    %91 = math.exp %90 : vector<2x128xf32>
    %cst_20 = arith.constant 1.000000e+00 : f32
    %92 = vector.broadcast %cst_20 : f32 to vector<2x128xf32>
    %93 = arith.addf %92, %91 : vector<2x128xf32>
    %94 = arith.divf %92, %93 : vector<2x128xf32>
    %95 = arith.mulf %86, %39 : vector<2x128xf32>
    %96 = arith.mulf %80, %88 : vector<2x128xf32>
    %97 = arith.addf %95, %96 : vector<2x128xf32>
    %98 = math.tanh %97 : vector<2x128xf32>
    %99 = arith.mulf %94, %98 : vector<2x128xf32>
    %100 = vector.extract_strided_slice %74 {offsets = [0, 0], sizes = [2, 128], strides = [1, 1]} : vector<2x512xf32> to vector<2x128xf32>
    %101 = arith.negf %100 : vector<2x128xf32>
    %102 = math.exp %101 : vector<2x128xf32>
    %cst_21 = arith.constant 1.000000e+00 : f32
    %103 = vector.broadcast %cst_21 : f32 to vector<2x128xf32>
    %104 = arith.addf %103, %102 : vector<2x128xf32>
    %105 = arith.divf %103, %104 : vector<2x128xf32>
    %106 = vector.extract_strided_slice %74 {offsets = [0, 128], sizes = [2, 128], strides = [1, 1]} : vector<2x512xf32> to vector<2x128xf32>
    %107 = arith.negf %106 : vector<2x128xf32>
    %108 = math.exp %107 : vector<2x128xf32>
    %cst_22 = arith.constant 1.000000e+00 : f32
    %109 = vector.broadcast %cst_22 : f32 to vector<2x128xf32>
    %110 = arith.addf %109, %108 : vector<2x128xf32>
    %111 = arith.divf %109, %110 : vector<2x128xf32>
    %112 = vector.extract_strided_slice %74 {offsets = [0, 256], sizes = [2, 128], strides = [1, 1]} : vector<2x512xf32> to vector<2x128xf32>
    %113 = math.tanh %112 : vector<2x128xf32>
    %114 = vector.extract_strided_slice %74 {offsets = [0, 384], sizes = [2, 128], strides = [1, 1]} : vector<2x512xf32> to vector<2x128xf32>
    %115 = arith.negf %114 : vector<2x128xf32>
    %116 = math.exp %115 : vector<2x128xf32>
    %cst_23 = arith.constant 1.000000e+00 : f32
    %117 = vector.broadcast %cst_23 : f32 to vector<2x128xf32>
    %118 = arith.addf %117, %116 : vector<2x128xf32>
    %119 = arith.divf %117, %118 : vector<2x128xf32>
    %120 = arith.mulf %111, %64 : vector<2x128xf32>
    %121 = arith.mulf %105, %113 : vector<2x128xf32>
    %122 = arith.addf %120, %121 : vector<2x128xf32>
    %123 = math.tanh %122 : vector<2x128xf32>
    %124 = arith.mulf %119, %123 : vector<2x128xf32>
    %125 = tpu.concatenate %99, %124 in 1 : vector<2x128xf32>, vector<2x128xf32> -> vector<2x256xf32>
    %cst_24 = arith.constant dense<0.000000e+00> : vector<2x1024xf32>
    %126 = tpu.matmul %125, %6, %cst_24 {dimension_numbers = #tpu.dot_dimension_numbers<[1], [0], [0], [1], [0, 0, 1, 1], [], []>} : vector<2x256xf32>, vector<256x1024xf32>, vector<2x1024xf32> -> vector<2x1024xf32>
    %127 = vector.extract_strided_slice %5 {offsets = [4, 0], sizes = [2, 512], strides = [1, 1]} : vector<16x1024xf32> to vector<2x512xf32>
    %128 = vector.extract_strided_slice %126 {offsets = [0, 0], sizes = [2, 512], strides = [1, 1]} : vector<2x1024xf32> to vector<2x512xf32>
    %129 = arith.addf %127, %128 : vector<2x512xf32>
    %130 = vector.extract_strided_slice %5 {offsets = [10, 512], sizes = [2, 512], strides = [1, 1]} : vector<16x1024xf32> to vector<2x512xf32>
    %131 = vector.extract_strided_slice %126 {offsets = [0, 512], sizes = [2, 512], strides = [1, 1]} : vector<2x1024xf32> to vector<2x512xf32>
    %132 = arith.addf %130, %131 : vector<2x512xf32>
    %133 = vector.extract_strided_slice %129 {offsets = [0, 0], sizes = [2, 128], strides = [1, 1]} : vector<2x512xf32> to vector<2x128xf32>
    %134 = arith.negf %133 : vector<2x128xf32>
    %135 = math.exp %134 : vector<2x128xf32>
    %cst_25 = arith.constant 1.000000e+00 : f32
    %136 = vector.broadcast %cst_25 : f32 to vector<2x128xf32>
    %137 = arith.addf %136, %135 : vector<2x128xf32>
    %138 = arith.divf %136, %137 : vector<2x128xf32>
    %139 = vector.extract_strided_slice %129 {offsets = [0, 128], sizes = [2, 128], strides = [1, 1]} : vector<2x512xf32> to vector<2x128xf32>
    %140 = arith.negf %139 : vector<2x128xf32>
    %141 = math.exp %140 : vector<2x128xf32>
    %cst_26 = arith.constant 1.000000e+00 : f32
    %142 = vector.broadcast %cst_26 : f32 to vector<2x128xf32>
    %143 = arith.addf %142, %141 : vector<2x128xf32>
    %144 = arith.divf %142, %143 : vector<2x128xf32>
    %145 = vector.extract_strided_slice %129 {offsets = [0, 256], sizes = [2, 128], strides = [1, 1]} : vector<2x512xf32> to vector<2x128xf32>
    %146 = math.tanh %145 : vector<2x128xf32>
    %147 = vector.extract_strided_slice %129 {offsets = [0, 384], sizes = [2, 128], strides = [1, 1]} : vector<2x512xf32> to vector<2x128xf32>
    %148 = arith.negf %147 : vector<2x128xf32>
    %149 = math.exp %148 : vector<2x128xf32>
    %cst_27 = arith.constant 1.000000e+00 : f32
    %150 = vector.broadcast %cst_27 : f32 to vector<2x128xf32>
    %151 = arith.addf %150, %149 : vector<2x128xf32>
    %152 = arith.divf %150, %151 : vector<2x128xf32>
    %153 = arith.mulf %144, %97 : vector<2x128xf32>
    %154 = arith.mulf %138, %146 : vector<2x128xf32>
    %155 = arith.addf %153, %154 : vector<2x128xf32>
    %156 = math.tanh %155 : vector<2x128xf32>
    %157 = arith.mulf %152, %156 : vector<2x128xf32>
    %158 = vector.extract_strided_slice %132 {offsets = [0, 0], sizes = [2, 128], strides = [1, 1]} : vector<2x512xf32> to vector<2x128xf32>
    %159 = arith.negf %158 : vector<2x128xf32>
    %160 = math.exp %159 : vector<2x128xf32>
    %cst_28 = arith.constant 1.000000e+00 : f32
    %161 = vector.broadcast %cst_28 : f32 to vector<2x128xf32>
    %162 = arith.addf %161, %160 : vector<2x128xf32>
    %163 = arith.divf %161, %162 : vector<2x128xf32>
    %164 = vector.extract_strided_slice %132 {offsets = [0, 128], sizes = [2, 128], strides = [1, 1]} : vector<2x512xf32> to vector<2x128xf32>
    %165 = arith.negf %164 : vector<2x128xf32>
    %166 = math.exp %165 : vector<2x128xf32>
    %cst_29 = arith.constant 1.000000e+00 : f32
    %167 = vector.broadcast %cst_29 : f32 to vector<2x128xf32>
    %168 = arith.addf %167, %166 : vector<2x128xf32>
    %169 = arith.divf %167, %168 : vector<2x128xf32>
    %170 = vector.extract_strided_slice %132 {offsets = [0, 256], sizes = [2, 128], strides = [1, 1]} : vector<2x512xf32> to vector<2x128xf32>
    %171 = math.tanh %170 : vector<2x128xf32>
    %172 = vector.extract_strided_slice %132 {offsets = [0, 384], sizes = [2, 128], strides = [1, 1]} : vector<2x512xf32> to vector<2x128xf32>
    %173 = arith.negf %172 : vector<2x128xf32>
    %174 = math.exp %173 : vector<2x128xf32>
    %cst_30 = arith.constant 1.000000e+00 : f32
    %175 = vector.broadcast %cst_30 : f32 to vector<2x128xf32>
    %176 = arith.addf %175, %174 : vector<2x128xf32>
    %177 = arith.divf %175, %176 : vector<2x128xf32>
    %178 = arith.mulf %169, %122 : vector<2x128xf32>
    %179 = arith.mulf %163, %171 : vector<2x128xf32>
    %180 = arith.addf %178, %179 : vector<2x128xf32>
    %181 = math.tanh %180 : vector<2x128xf32>
    %182 = arith.mulf %177, %181 : vector<2x128xf32>
    %183 = tpu.concatenate %157, %182 in 1 : vector<2x128xf32>, vector<2x128xf32> -> vector<2x256xf32>
    %cst_31 = arith.constant dense<0.000000e+00> : vector<2x1024xf32>
    %184 = tpu.matmul %183, %6, %cst_31 {dimension_numbers = #tpu.dot_dimension_numbers<[1], [0], [0], [1], [0, 0, 1, 1], [], []>} : vector<2x256xf32>, vector<256x1024xf32>, vector<2x1024xf32> -> vector<2x1024xf32>
    %185 = vector.extract_strided_slice %5 {offsets = [6, 0], sizes = [2, 512], strides = [1, 1]} : vector<16x1024xf32> to vector<2x512xf32>
    %186 = vector.extract_strided_slice %184 {offsets = [0, 0], sizes = [2, 512], strides = [1, 1]} : vector<2x1024xf32> to vector<2x512xf32>
    %187 = arith.addf %185, %186 : vector<2x512xf32>
    %188 = vector.extract_strided_slice %5 {offsets = [8, 512], sizes = [2, 512], strides = [1, 1]} : vector<16x1024xf32> to vector<2x512xf32>
    %189 = vector.extract_strided_slice %184 {offsets = [0, 512], sizes = [2, 512], strides = [1, 1]} : vector<2x1024xf32> to vector<2x512xf32>
    %190 = arith.addf %188, %189 : vector<2x512xf32>
    %191 = vector.extract_strided_slice %187 {offsets = [0, 0], sizes = [2, 128], strides = [1, 1]} : vector<2x512xf32> to vector<2x128xf32>
    %192 = arith.negf %191 : vector<2x128xf32>
    %193 = math.exp %192 : vector<2x128xf32>
    %cst_32 = arith.constant 1.000000e+00 : f32
    %194 = vector.broadcast %cst_32 : f32 to vector<2x128xf32>
    %195 = arith.addf %194, %193 : vector<2x128xf32>
    %196 = arith.divf %194, %195 : vector<2x128xf32>
    %197 = vector.extract_strided_slice %187 {offsets = [0, 128], sizes = [2, 128], strides = [1, 1]} : vector<2x512xf32> to vector<2x128xf32>
    %198 = arith.negf %197 : vector<2x128xf32>
    %199 = math.exp %198 : vector<2x128xf32>
    %cst_33 = arith.constant 1.000000e+00 : f32
    %200 = vector.broadcast %cst_33 : f32 to vector<2x128xf32>
    %201 = arith.addf %200, %199 : vector<2x128xf32>
    %202 = arith.divf %200, %201 : vector<2x128xf32>
    %203 = vector.extract_strided_slice %187 {offsets = [0, 256], sizes = [2, 128], strides = [1, 1]} : vector<2x512xf32> to vector<2x128xf32>
    %204 = math.tanh %203 : vector<2x128xf32>
    %205 = vector.extract_strided_slice %187 {offsets = [0, 384], sizes = [2, 128], strides = [1, 1]} : vector<2x512xf32> to vector<2x128xf32>
    %206 = arith.negf %205 : vector<2x128xf32>
    %207 = math.exp %206 : vector<2x128xf32>
    %cst_34 = arith.constant 1.000000e+00 : f32
    %208 = vector.broadcast %cst_34 : f32 to vector<2x128xf32>
    %209 = arith.addf %208, %207 : vector<2x128xf32>
    %210 = arith.divf %208, %209 : vector<2x128xf32>
    %211 = arith.mulf %202, %155 : vector<2x128xf32>
    %212 = arith.mulf %196, %204 : vector<2x128xf32>
    %213 = arith.addf %211, %212 : vector<2x128xf32>
    %214 = math.tanh %213 : vector<2x128xf32>
    %215 = arith.mulf %210, %214 : vector<2x128xf32>
    %216 = vector.extract_strided_slice %190 {offsets = [0, 0], sizes = [2, 128], strides = [1, 1]} : vector<2x512xf32> to vector<2x128xf32>
    %217 = arith.negf %216 : vector<2x128xf32>
    %218 = math.exp %217 : vector<2x128xf32>
    %cst_35 = arith.constant 1.000000e+00 : f32
    %219 = vector.broadcast %cst_35 : f32 to vector<2x128xf32>
    %220 = arith.addf %219, %218 : vector<2x128xf32>
    %221 = arith.divf %219, %220 : vector<2x128xf32>
    %222 = vector.extract_strided_slice %190 {offsets = [0, 128], sizes = [2, 128], strides = [1, 1]} : vector<2x512xf32> to vector<2x128xf32>
    %223 = arith.negf %222 : vector<2x128xf32>
    %224 = math.exp %223 : vector<2x128xf32>
    %cst_36 = arith.constant 1.000000e+00 : f32
    %225 = vector.broadcast %cst_36 : f32 to vector<2x128xf32>
    %226 = arith.addf %225, %224 : vector<2x128xf32>
    %227 = arith.divf %225, %226 : vector<2x128xf32>
    %228 = vector.extract_strided_slice %190 {offsets = [0, 256], sizes = [2, 128], strides = [1, 1]} : vector<2x512xf32> to vector<2x128xf32>
    %229 = math.tanh %228 : vector<2x128xf32>
    %230 = vector.extract_strided_slice %190 {offsets = [0, 384], sizes = [2, 128], strides = [1, 1]} : vector<2x512xf32> to vector<2x128xf32>
    %231 = arith.negf %230 : vector<2x128xf32>
    %232 = math.exp %231 : vector<2x128xf32>
    %cst_37 = arith.constant 1.000000e+00 : f32
    %233 = vector.broadcast %cst_37 : f32 to vector<2x128xf32>
    %234 = arith.addf %233, %232 : vector<2x128xf32>
    %235 = arith.divf %233, %234 : vector<2x128xf32>
    %236 = arith.mulf %227, %180 : vector<2x128xf32>
    %237 = arith.mulf %221, %229 : vector<2x128xf32>
    %238 = arith.addf %236, %237 : vector<2x128xf32>
    %239 = math.tanh %238 : vector<2x128xf32>
    %240 = arith.mulf %235, %239 : vector<2x128xf32>
    %241 = tpu.concatenate %215, %240 in 1 : vector<2x128xf32>, vector<2x128xf32> -> vector<2x256xf32>
    %cst_38 = arith.constant dense<0.000000e+00> : vector<2x1024xf32>
    %242 = tpu.matmul %241, %6, %cst_38 {dimension_numbers = #tpu.dot_dimension_numbers<[1], [0], [0], [1], [0, 0, 1, 1], [], []>} : vector<2x256xf32>, vector<256x1024xf32>, vector<2x1024xf32> -> vector<2x1024xf32>
    %243 = vector.extract_strided_slice %5 {offsets = [8, 0], sizes = [2, 512], strides = [1, 1]} : vector<16x1024xf32> to vector<2x512xf32>
    %244 = vector.extract_strided_slice %242 {offsets = [0, 0], sizes = [2, 512], strides = [1, 1]} : vector<2x1024xf32> to vector<2x512xf32>
    %245 = arith.addf %243, %244 : vector<2x512xf32>
    %246 = vector.extract_strided_slice %5 {offsets = [6, 512], sizes = [2, 512], strides = [1, 1]} : vector<16x1024xf32> to vector<2x512xf32>
    %247 = vector.extract_strided_slice %242 {offsets = [0, 512], sizes = [2, 512], strides = [1, 1]} : vector<2x1024xf32> to vector<2x512xf32>
    %248 = arith.addf %246, %247 : vector<2x512xf32>
    %249 = vector.extract_strided_slice %245 {offsets = [0, 0], sizes = [2, 128], strides = [1, 1]} : vector<2x512xf32> to vector<2x128xf32>
    %250 = arith.negf %249 : vector<2x128xf32>
    %251 = math.exp %250 : vector<2x128xf32>
    %cst_39 = arith.constant 1.000000e+00 : f32
    %252 = vector.broadcast %cst_39 : f32 to vector<2x128xf32>
    %253 = arith.addf %252, %251 : vector<2x128xf32>
    %254 = arith.divf %252, %253 : vector<2x128xf32>
    %255 = vector.extract_strided_slice %245 {offsets = [0, 128], sizes = [2, 128], strides = [1, 1]} : vector<2x512xf32> to vector<2x128xf32>
    %256 = arith.negf %255 : vector<2x128xf32>
    %257 = math.exp %256 : vector<2x128xf32>
    %cst_40 = arith.constant 1.000000e+00 : f32
    %258 = vector.broadcast %cst_40 : f32 to vector<2x128xf32>
    %259 = arith.addf %258, %257 : vector<2x128xf32>
    %260 = arith.divf %258, %259 : vector<2x128xf32>
    %261 = vector.extract_strided_slice %245 {offsets = [0, 256], sizes = [2, 128], strides = [1, 1]} : vector<2x512xf32> to vector<2x128xf32>
    %262 = math.tanh %261 : vector<2x128xf32>
    %263 = vector.extract_strided_slice %245 {offsets = [0, 384], sizes = [2, 128], strides = [1, 1]} : vector<2x512xf32> to vector<2x128xf32>
    %264 = arith.negf %263 : vector<2x128xf32>
    %265 = math.exp %264 : vector<2x128xf32>
    %cst_41 = arith.constant 1.000000e+00 : f32
    %266 = vector.broadcast %cst_41 : f32 to vector<2x128xf32>
    %267 = arith.addf %266, %265 : vector<2x128xf32>
    %268 = arith.divf %266, %267 : vector<2x128xf32>
    %269 = arith.mulf %260, %213 : vector<2x128xf32>
    %270 = arith.mulf %254, %262 : vector<2x128xf32>
    %271 = arith.addf %269, %270 : vector<2x128xf32>
    %272 = math.tanh %271 : vector<2x128xf32>
    %273 = arith.mulf %268, %272 : vector<2x128xf32>
    %274 = vector.extract_strided_slice %248 {offsets = [0, 0], sizes = [2, 128], strides = [1, 1]} : vector<2x512xf32> to vector<2x128xf32>
    %275 = arith.negf %274 : vector<2x128xf32>
    %276 = math.exp %275 : vector<2x128xf32>
    %cst_42 = arith.constant 1.000000e+00 : f32
    %277 = vector.broadcast %cst_42 : f32 to vector<2x128xf32>
    %278 = arith.addf %277, %276 : vector<2x128xf32>
    %279 = arith.divf %277, %278 : vector<2x128xf32>
    %280 = vector.extract_strided_slice %248 {offsets = [0, 128], sizes = [2, 128], strides = [1, 1]} : vector<2x512xf32> to vector<2x128xf32>
    %281 = arith.negf %280 : vector<2x128xf32>
    %282 = math.exp %281 : vector<2x128xf32>
    %cst_43 = arith.constant 1.000000e+00 : f32
    %283 = vector.broadcast %cst_43 : f32 to vector<2x128xf32>
    %284 = arith.addf %283, %282 : vector<2x128xf32>
    %285 = arith.divf %283, %284 : vector<2x128xf32>
    %286 = vector.extract_strided_slice %248 {offsets = [0, 256], sizes = [2, 128], strides = [1, 1]} : vector<2x512xf32> to vector<2x128xf32>
    %287 = math.tanh %286 : vector<2x128xf32>
    %288 = vector.extract_strided_slice %248 {offsets = [0, 384], sizes = [2, 128], strides = [1, 1]} : vector<2x512xf32> to vector<2x128xf32>
    %289 = arith.negf %288 : vector<2x128xf32>
    %290 = math.exp %289 : vector<2x128xf32>
    %cst_44 = arith.constant 1.000000e+00 : f32
    %291 = vector.broadcast %cst_44 : f32 to vector<2x128xf32>
    %292 = arith.addf %291, %290 : vector<2x128xf32>
    %293 = arith.divf %291, %292 : vector<2x128xf32>
    %294 = arith.mulf %285, %238 : vector<2x128xf32>
    %295 = arith.mulf %279, %287 : vector<2x128xf32>
    %296 = arith.addf %294, %295 : vector<2x128xf32>
    %297 = math.tanh %296 : vector<2x128xf32>
    %298 = arith.mulf %293, %297 : vector<2x128xf32>
    %299 = tpu.concatenate %273, %298 in 1 : vector<2x128xf32>, vector<2x128xf32> -> vector<2x256xf32>
    %cst_45 = arith.constant dense<0.000000e+00> : vector<2x1024xf32>
    %300 = tpu.matmul %299, %6, %cst_45 {dimension_numbers = #tpu.dot_dimension_numbers<[1], [0], [0], [1], [0, 0, 1, 1], [], []>} : vector<2x256xf32>, vector<256x1024xf32>, vector<2x1024xf32> -> vector<2x1024xf32>
    %301 = vector.extract_strided_slice %5 {offsets = [10, 0], sizes = [2, 512], strides = [1, 1]} : vector<16x1024xf32> to vector<2x512xf32>
    %302 = vector.extract_strided_slice %300 {offsets = [0, 0], sizes = [2, 512], strides = [1, 1]} : vector<2x1024xf32> to vector<2x512xf32>
    %303 = arith.addf %301, %302 : vector<2x512xf32>
    %304 = vector.extract_strided_slice %5 {offsets = [4, 512], sizes = [2, 512], strides = [1, 1]} : vector<16x1024xf32> to vector<2x512xf32>
    %305 = vector.extract_strided_slice %300 {offsets = [0, 512], sizes = [2, 512], strides = [1, 1]} : vector<2x1024xf32> to vector<2x512xf32>
    %306 = arith.addf %304, %305 : vector<2x512xf32>
    %307 = vector.extract_strided_slice %303 {offsets = [0, 0], sizes = [2, 128], strides = [1, 1]} : vector<2x512xf32> to vector<2x128xf32>
    %308 = arith.negf %307 : vector<2x128xf32>
    %309 = math.exp %308 : vector<2x128xf32>
    %cst_46 = arith.constant 1.000000e+00 : f32
    %310 = vector.broadcast %cst_46 : f32 to vector<2x128xf32>
    %311 = arith.addf %310, %309 : vector<2x128xf32>
    %312 = arith.divf %310, %311 : vector<2x128xf32>
    %313 = vector.extract_strided_slice %303 {offsets = [0, 128], sizes = [2, 128], strides = [1, 1]} : vector<2x512xf32> to vector<2x128xf32>
    %314 = arith.negf %313 : vector<2x128xf32>
    %315 = math.exp %314 : vector<2x128xf32>
    %cst_47 = arith.constant 1.000000e+00 : f32
    %316 = vector.broadcast %cst_47 : f32 to vector<2x128xf32>
    %317 = arith.addf %316, %315 : vector<2x128xf32>
    %318 = arith.divf %316, %317 : vector<2x128xf32>
    %319 = vector.extract_strided_slice %303 {offsets = [0, 256], sizes = [2, 128], strides = [1, 1]} : vector<2x512xf32> to vector<2x128xf32>
    %320 = math.tanh %319 : vector<2x128xf32>
    %321 = vector.extract_strided_slice %303 {offsets = [0, 384], sizes = [2, 128], strides = [1, 1]} : vector<2x512xf32> to vector<2x128xf32>
    %322 = arith.negf %321 : vector<2x128xf32>
    %323 = math.exp %322 : vector<2x128xf32>
    %cst_48 = arith.constant 1.000000e+00 : f32
    %324 = vector.broadcast %cst_48 : f32 to vector<2x128xf32>
    %325 = arith.addf %324, %323 : vector<2x128xf32>
    %326 = arith.divf %324, %325 : vector<2x128xf32>
    %327 = arith.mulf %318, %271 : vector<2x128xf32>
    %328 = arith.mulf %312, %320 : vector<2x128xf32>
    %329 = arith.addf %327, %328 : vector<2x128xf32>
    %330 = math.tanh %329 : vector<2x128xf32>
    %331 = arith.mulf %326, %330 : vector<2x128xf32>
    %332 = vector.extract_strided_slice %306 {offsets = [0, 0], sizes = [2, 128], strides = [1, 1]} : vector<2x512xf32> to vector<2x128xf32>
    %333 = arith.negf %332 : vector<2x128xf32>
    %334 = math.exp %333 : vector<2x128xf32>
    %cst_49 = arith.constant 1.000000e+00 : f32
    %335 = vector.broadcast %cst_49 : f32 to vector<2x128xf32>
    %336 = arith.addf %335, %334 : vector<2x128xf32>
    %337 = arith.divf %335, %336 : vector<2x128xf32>
    %338 = vector.extract_strided_slice %306 {offsets = [0, 128], sizes = [2, 128], strides = [1, 1]} : vector<2x512xf32> to vector<2x128xf32>
    %339 = arith.negf %338 : vector<2x128xf32>
    %340 = math.exp %339 : vector<2x128xf32>
    %cst_50 = arith.constant 1.000000e+00 : f32
    %341 = vector.broadcast %cst_50 : f32 to vector<2x128xf32>
    %342 = arith.addf %341, %340 : vector<2x128xf32>
    %343 = arith.divf %341, %342 : vector<2x128xf32>
    %344 = vector.extract_strided_slice %306 {offsets = [0, 256], sizes = [2, 128], strides = [1, 1]} : vector<2x512xf32> to vector<2x128xf32>
    %345 = math.tanh %344 : vector<2x128xf32>
    %346 = vector.extract_strided_slice %306 {offsets = [0, 384], sizes = [2, 128], strides = [1, 1]} : vector<2x512xf32> to vector<2x128xf32>
    %347 = arith.negf %346 : vector<2x128xf32>
    %348 = math.exp %347 : vector<2x128xf32>
    %cst_51 = arith.constant 1.000000e+00 : f32
    %349 = vector.broadcast %cst_51 : f32 to vector<2x128xf32>
    %350 = arith.addf %349, %348 : vector<2x128xf32>
    %351 = arith.divf %349, %350 : vector<2x128xf32>
    %352 = arith.mulf %343, %296 : vector<2x128xf32>
    %353 = arith.mulf %337, %345 : vector<2x128xf32>
    %354 = arith.addf %352, %353 : vector<2x128xf32>
    %355 = math.tanh %354 : vector<2x128xf32>
    %356 = arith.mulf %351, %355 : vector<2x128xf32>
    %357 = tpu.concatenate %331, %356 in 1 : vector<2x128xf32>, vector<2x128xf32> -> vector<2x256xf32>
    %cst_52 = arith.constant dense<0.000000e+00> : vector<2x1024xf32>
    %358 = tpu.matmul %357, %6, %cst_52 {dimension_numbers = #tpu.dot_dimension_numbers<[1], [0], [0], [1], [0, 0, 1, 1], [], []>} : vector<2x256xf32>, vector<256x1024xf32>, vector<2x1024xf32> -> vector<2x1024xf32>
    %359 = vector.extract_strided_slice %5 {offsets = [12, 0], sizes = [2, 512], strides = [1, 1]} : vector<16x1024xf32> to vector<2x512xf32>
    %360 = vector.extract_strided_slice %358 {offsets = [0, 0], sizes = [2, 512], strides = [1, 1]} : vector<2x1024xf32> to vector<2x512xf32>
    %361 = arith.addf %359, %360 : vector<2x512xf32>
    %362 = vector.extract_strided_slice %5 {offsets = [2, 512], sizes = [2, 512], strides = [1, 1]} : vector<16x1024xf32> to vector<2x512xf32>
    %363 = vector.extract_strided_slice %358 {offsets = [0, 512], sizes = [2, 512], strides = [1, 1]} : vector<2x1024xf32> to vector<2x512xf32>
    %364 = arith.addf %362, %363 : vector<2x512xf32>
    %365 = vector.extract_strided_slice %361 {offsets = [0, 0], sizes = [2, 128], strides = [1, 1]} : vector<2x512xf32> to vector<2x128xf32>
    %366 = arith.negf %365 : vector<2x128xf32>
    %367 = math.exp %366 : vector<2x128xf32>
    %cst_53 = arith.constant 1.000000e+00 : f32
    %368 = vector.broadcast %cst_53 : f32 to vector<2x128xf32>
    %369 = arith.addf %368, %367 : vector<2x128xf32>
    %370 = arith.divf %368, %369 : vector<2x128xf32>
    %371 = vector.extract_strided_slice %361 {offsets = [0, 128], sizes = [2, 128], strides = [1, 1]} : vector<2x512xf32> to vector<2x128xf32>
    %372 = arith.negf %371 : vector<2x128xf32>
    %373 = math.exp %372 : vector<2x128xf32>
    %cst_54 = arith.constant 1.000000e+00 : f32
    %374 = vector.broadcast %cst_54 : f32 to vector<2x128xf32>
    %375 = arith.addf %374, %373 : vector<2x128xf32>
    %376 = arith.divf %374, %375 : vector<2x128xf32>
    %377 = vector.extract_strided_slice %361 {offsets = [0, 256], sizes = [2, 128], strides = [1, 1]} : vector<2x512xf32> to vector<2x128xf32>
    %378 = math.tanh %377 : vector<2x128xf32>
    %379 = vector.extract_strided_slice %361 {offsets = [0, 384], sizes = [2, 128], strides = [1, 1]} : vector<2x512xf32> to vector<2x128xf32>
    %380 = arith.negf %379 : vector<2x128xf32>
    %381 = math.exp %380 : vector<2x128xf32>
    %cst_55 = arith.constant 1.000000e+00 : f32
    %382 = vector.broadcast %cst_55 : f32 to vector<2x128xf32>
    %383 = arith.addf %382, %381 : vector<2x128xf32>
    %384 = arith.divf %382, %383 : vector<2x128xf32>
    %385 = arith.mulf %376, %329 : vector<2x128xf32>
    %386 = arith.mulf %370, %378 : vector<2x128xf32>
    %387 = arith.addf %385, %386 : vector<2x128xf32>
    %388 = math.tanh %387 : vector<2x128xf32>
    %389 = arith.mulf %384, %388 : vector<2x128xf32>
    %390 = vector.extract_strided_slice %364 {offsets = [0, 0], sizes = [2, 128], strides = [1, 1]} : vector<2x512xf32> to vector<2x128xf32>
    %391 = arith.negf %390 : vector<2x128xf32>
    %392 = math.exp %391 : vector<2x128xf32>
    %cst_56 = arith.constant 1.000000e+00 : f32
    %393 = vector.broadcast %cst_56 : f32 to vector<2x128xf32>
    %394 = arith.addf %393, %392 : vector<2x128xf32>
    %395 = arith.divf %393, %394 : vector<2x128xf32>
    %396 = vector.extract_strided_slice %364 {offsets = [0, 128], sizes = [2, 128], strides = [1, 1]} : vector<2x512xf32> to vector<2x128xf32>
    %397 = arith.negf %396 : vector<2x128xf32>
    %398 = math.exp %397 : vector<2x128xf32>
    %cst_57 = arith.constant 1.000000e+00 : f32
    %399 = vector.broadcast %cst_57 : f32 to vector<2x128xf32>
    %400 = arith.addf %399, %398 : vector<2x128xf32>
    %401 = arith.divf %399, %400 : vector<2x128xf32>
    %402 = vector.extract_strided_slice %364 {offsets = [0, 256], sizes = [2, 128], strides = [1, 1]} : vector<2x512xf32> to vector<2x128xf32>
    %403 = math.tanh %402 : vector<2x128xf32>
    %404 = vector.extract_strided_slice %364 {offsets = [0, 384], sizes = [2, 128], strides = [1, 1]} : vector<2x512xf32> to vector<2x128xf32>
    %405 = arith.negf %404 : vector<2x128xf32>
    %406 = math.exp %405 : vector<2x128xf32>
    %cst_58 = arith.constant 1.000000e+00 : f32
    %407 = vector.broadcast %cst_58 : f32 to vector<2x128xf32>
    %408 = arith.addf %407, %406 : vector<2x128xf32>
    %409 = arith.divf %407, %408 : vector<2x128xf32>
    %410 = arith.mulf %401, %354 : vector<2x128xf32>
    %411 = arith.mulf %395, %403 : vector<2x128xf32>
    %412 = arith.addf %410, %411 : vector<2x128xf32>
    %413 = math.tanh %412 : vector<2x128xf32>
    %414 = arith.mulf %409, %413 : vector<2x128xf32>
    %415 = tpu.concatenate %389, %414 in 1 : vector<2x128xf32>, vector<2x128xf32> -> vector<2x256xf32>
    %cst_59 = arith.constant dense<0.000000e+00> : vector<2x1024xf32>
    %416 = tpu.matmul %415, %6, %cst_59 {dimension_numbers = #tpu.dot_dimension_numbers<[1], [0], [0], [1], [0, 0, 1, 1], [], []>} : vector<2x256xf32>, vector<256x1024xf32>, vector<2x1024xf32> -> vector<2x1024xf32>
    %417 = vector.extract_strided_slice %5 {offsets = [14, 0], sizes = [2, 512], strides = [1, 1]} : vector<16x1024xf32> to vector<2x512xf32>
    %418 = vector.extract_strided_slice %416 {offsets = [0, 0], sizes = [2, 512], strides = [1, 1]} : vector<2x1024xf32> to vector<2x512xf32>
    %419 = arith.addf %417, %418 : vector<2x512xf32>
    %420 = vector.extract_strided_slice %5 {offsets = [0, 512], sizes = [2, 512], strides = [1, 1]} : vector<16x1024xf32> to vector<2x512xf32>
    %421 = vector.extract_strided_slice %416 {offsets = [0, 512], sizes = [2, 512], strides = [1, 1]} : vector<2x1024xf32> to vector<2x512xf32>
    %422 = arith.addf %420, %421 : vector<2x512xf32>
    %423 = vector.extract_strided_slice %419 {offsets = [0, 0], sizes = [2, 128], strides = [1, 1]} : vector<2x512xf32> to vector<2x128xf32>
    %424 = arith.negf %423 : vector<2x128xf32>
    %425 = math.exp %424 : vector<2x128xf32>
    %cst_60 = arith.constant 1.000000e+00 : f32
    %426 = vector.broadcast %cst_60 : f32 to vector<2x128xf32>
    %427 = arith.addf %426, %425 : vector<2x128xf32>
    %428 = arith.divf %426, %427 : vector<2x128xf32>
    %429 = vector.extract_strided_slice %419 {offsets = [0, 128], sizes = [2, 128], strides = [1, 1]} : vector<2x512xf32> to vector<2x128xf32>
    %430 = arith.negf %429 : vector<2x128xf32>
    %431 = math.exp %430 : vector<2x128xf32>
    %cst_61 = arith.constant 1.000000e+00 : f32
    %432 = vector.broadcast %cst_61 : f32 to vector<2x128xf32>
    %433 = arith.addf %432, %431 : vector<2x128xf32>
    %434 = arith.divf %432, %433 : vector<2x128xf32>
    %435 = vector.extract_strided_slice %419 {offsets = [0, 256], sizes = [2, 128], strides = [1, 1]} : vector<2x512xf32> to vector<2x128xf32>
    %436 = math.tanh %435 : vector<2x128xf32>
    %437 = vector.extract_strided_slice %419 {offsets = [0, 384], sizes = [2, 128], strides = [1, 1]} : vector<2x512xf32> to vector<2x128xf32>
    %438 = arith.negf %437 : vector<2x128xf32>
    %439 = math.exp %438 : vector<2x128xf32>
    %cst_62 = arith.constant 1.000000e+00 : f32
    %440 = vector.broadcast %cst_62 : f32 to vector<2x128xf32>
    %441 = arith.addf %440, %439 : vector<2x128xf32>
    %442 = arith.divf %440, %441 : vector<2x128xf32>
    %443 = arith.mulf %434, %387 : vector<2x128xf32>
    %444 = arith.mulf %428, %436 : vector<2x128xf32>
    %445 = arith.addf %443, %444 : vector<2x128xf32>
    %446 = math.tanh %445 : vector<2x128xf32>
    %447 = arith.mulf %442, %446 : vector<2x128xf32>
    %448 = vector.extract_strided_slice %422 {offsets = [0, 0], sizes = [2, 128], strides = [1, 1]} : vector<2x512xf32> to vector<2x128xf32>
    %449 = arith.negf %448 : vector<2x128xf32>
    %450 = math.exp %449 : vector<2x128xf32>
    %cst_63 = arith.constant 1.000000e+00 : f32
    %451 = vector.broadcast %cst_63 : f32 to vector<2x128xf32>
    %452 = arith.addf %451, %450 : vector<2x128xf32>
    %453 = arith.divf %451, %452 : vector<2x128xf32>
    %454 = vector.extract_strided_slice %422 {offsets = [0, 128], sizes = [2, 128], strides = [1, 1]} : vector<2x512xf32> to vector<2x128xf32>
    %455 = arith.negf %454 : vector<2x128xf32>
    %456 = math.exp %455 : vector<2x128xf32>
    %cst_64 = arith.constant 1.000000e+00 : f32
    %457 = vector.broadcast %cst_64 : f32 to vector<2x128xf32>
    %458 = arith.addf %457, %456 : vector<2x128xf32>
    %459 = arith.divf %457, %458 : vector<2x128xf32>
    %460 = vector.extract_strided_slice %422 {offsets = [0, 256], sizes = [2, 128], strides = [1, 1]} : vector<2x512xf32> to vector<2x128xf32>
    %461 = math.tanh %460 : vector<2x128xf32>
    %462 = vector.extract_strided_slice %422 {offsets = [0, 384], sizes = [2, 128], strides = [1, 1]} : vector<2x512xf32> to vector<2x128xf32>
    %463 = arith.negf %462 : vector<2x128xf32>
    %464 = math.exp %463 : vector<2x128xf32>
    %cst_65 = arith.constant 1.000000e+00 : f32
    %465 = vector.broadcast %cst_65 : f32 to vector<2x128xf32>
    %466 = arith.addf %465, %464 : vector<2x128xf32>
    %467 = arith.divf %465, %466 : vector<2x128xf32>
    %468 = arith.mulf %459, %412 : vector<2x128xf32>
    %469 = arith.mulf %453, %461 : vector<2x128xf32>
    %470 = arith.addf %468, %469 : vector<2x128xf32>
    %471 = math.tanh %470 : vector<2x128xf32>
    %472 = arith.mulf %467, %471 : vector<2x128xf32>
    %473 = tpu.concatenate %41, %472 in 1 : vector<2x128xf32>, vector<2x128xf32> -> vector<2x256xf32>
    %474 = tpu.concatenate %99, %414 in 1 : vector<2x128xf32>, vector<2x128xf32> -> vector<2x256xf32>
    %475 = tpu.concatenate %157, %356 in 1 : vector<2x128xf32>, vector<2x128xf32> -> vector<2x256xf32>
    %476 = tpu.concatenate %215, %298 in 1 : vector<2x128xf32>, vector<2x128xf32> -> vector<2x256xf32>
    %477 = tpu.concatenate %273, %240 in 1 : vector<2x128xf32>, vector<2x128xf32> -> vector<2x256xf32>
    %478 = tpu.concatenate %331, %182 in 1 : vector<2x128xf32>, vector<2x128xf32> -> vector<2x256xf32>
    %479 = tpu.concatenate %389, %124 in 1 : vector<2x128xf32>, vector<2x128xf32> -> vector<2x256xf32>
    %480 = tpu.concatenate %447, %66 in 1 : vector<2x128xf32>, vector<2x128xf32> -> vector<2x256xf32>
    %481 = tpu.concatenate %473, %474, %475, %476, %477, %478, %479, %480 in 0 : vector<2x256xf32>, vector<2x256xf32>, vector<2x256xf32>, vector<2x256xf32>, vector<2x256xf32>, vector<2x256xf32>, vector<2x256xf32>, vector<2x256xf32> -> vector<16x256xf32>
    %c0_66 = arith.constant 0 : index
    %c0_67 = arith.constant 0 : index
    %482 = vector.load %arg4[%c0_66, %c0_67] : memref<256x128xf32, #tpu.memory_space<vmem>>, vector<256x128xf32>
    %cst_68 = arith.constant dense<0.000000e+00> : vector<16x128xf32>
    %483 = tpu.matmul %481, %482, %cst_68 {dimension_numbers = #tpu.dot_dimension_numbers<[1], [0], [0], [1], [0, 0, 1, 1], [], []>} : vector<16x256xf32>, vector<256x128xf32>, vector<16x128xf32> -> vector<16x128xf32>
    %c0_69 = arith.constant 0 : index
    %c0_70 = arith.constant 0 : index
    %484 = vector.load %arg5[%c0_69, %c0_70] : memref<1x128xf32, #tpu.memory_space<vmem>>, vector<1x128xf32>
    %485 = vector.broadcast %484 : vector<1x128xf32> to vector<16x128xf32>
    %486 = arith.addf %483, %485 : vector<16x128xf32>
    %c0_71 = arith.constant 0 : index
    %c0_72 = arith.constant 0 : index
    %487 = vector.load %arg6[%c0_71, %c0_72] : memref<16x128xf32, #tpu.memory_space<vmem>>, vector<16x128xf32>
    tpu.vector_store %arg6[%c0_71, %c0_72], %486 {strides = array<i32>} : memref<16x128xf32, #tpu.memory_space<vmem>>, vector<16x128xf32>,
    return
  }
}

</mosaic_0001>

<bundles_post_ra>
// kernel: tpu_custom_call.1
= control target key start
LH: loop header
LB: loop body
LE: loop exit
PB: predicated region body
PF: predicated region fallthrough
CT: control target
= control target key end

     0   :  { %11 = vsyncpa [#allocation3], 0  ;;  %s9224_s0 = inlined_call_operand.hbm [shape: f32[16,300], index: 0, kind: input, shape index: {}]   ;;  %s9225_s1 = inlined_call_operand.hbm [shape: f32[300,1024], index: 1, kind: input, shape index: {}]   ;;  %s9226_s2 = inlined_call_operand.hbm [shape: f32[1,1024], index: 2, kind: input, shape index: {}]   ;;  %s9227_s3 = inlined_call_operand.hbm [shape: f32[256,1024], index: 3, kind: input, shape index: {}]   ;;  %s9228_s4 = inlined_call_operand.hbm [shape: f32[256,128], index: 4, kind: input, shape index: {}]   ;;  %s9229_s5 = inlined_call_operand.hbm [shape: f32[1,128], index: 5, kind: input, shape index: {}]   ;;  %s9230_s6 = inlined_call_operand.hbm [shape: f32[16,128], index: 6, kind: output, shape index: {}]  }
   0x1   :  { %12 = vsyncpa [#allocation6], 0 }
   0x2   :  { %13 = vsyncpa [#allocation9], 0 }
   0x3   :  { %14 = vsyncpa [#allocation12], 0 }
   0x4   :  { %15 = vsyncpa [#allocation4], 0  ;;  %s7419_s21 = smov [#allocation5]   ;;  %s7255_s25 = scalar_lea.hbm %s9225_s1, 38912 }
   0x5   :  { %s33_s22 = sshll.u32 %s7419_s21, 4  ;;  %p7256_p0 = scmp.ne.s32.totalorder %s9225_s1, %s7255_s25  ;;  %s34_s22 = int_to_ptr.vmem [resolvable:$true] %s33_s22 }
   0x6   :  { %p7259_p1 = scmp.lt.u32.totalorder %s7255_s25, %s9225_s1 }
   0x8   :  { %p7261_p2 = pnand %p7259_p1, %p7256_p0 }
   0xa   :  { %7264 = shalt.err (!%p7261_p2)
}
   0xb   :  { %s7265_s30 = scalar_lea.vmem %s34_s22, 38912  ;;  %p7270_p4 = scmp.lt.s32.totalorder %s34_s22, %s34_s22 }
   0xc   :  { %p7266_p3 = scmp.ne.s32.totalorder %s34_s22, %s7265_s30  ;;  %p7271_p5 = scmp.lt.s32.totalorder %s7265_s30, %s7265_s30 }
   0xe   :  { %p7272_p6 = por %p7271_p5, %p7270_p4 }
  0x10   :  { %p7273_p7 = pnand %p7272_p6, %p7266_p3 }
  0x12   :  { %7276 = shalt.err (!%p7273_p7)
}
  0x13   :  { %s7420_s7 = smov 1024   ;;  %s7421_s8 = smov 64  }
  0x14   :  { %39 = dma.hbm_to_vmem [thread:$0]  %s9225_s1, 38912, %s34_s22, [#allocation6], %s7420_s7, %s7420_s7, %s7421_s8  }
  0x15   :  { %s7422_s11 = smov [#allocation8]   ;;  %s7423_s13 = smov [#allocation2]  }
  0x16   :  { %s55_s12 = sshll.u32 %s7422_s11, 4  ;;  %s21_s14 = sshll.u32 %s7423_s13, 4  ;;  %s56_s12 = int_to_ptr.vmem [resolvable:$true] %s55_s12  ;;  %s22_s14 = int_to_ptr.vmem [resolvable:$true] %s21_s14 }
  0x17   :  { %s7277_s17 = scalar_lea.hbm %s9227_s3, 32768 }
  0x18   :  { %p7278_p8 = scmp.ne.s32.totalorder %s9227_s3, %s7277_s17  ;;  %p7281_p9 = scmp.lt.u32.totalorder %s7277_s17, %s9227_s3 }
  0x1a   :  { %p7283_p10 = pnand %p7281_p9, %p7278_p8 }
  0x1c   :  { %7286 = shalt.err (!%p7283_p10)
}
  0x1d   :  { %s7287_s1 = scalar_lea.vmem %s56_s12, 32768  ;;  %p7292_p12 = scmp.lt.s32.totalorder %s56_s12, %s56_s12 }
  0x1e   :  { %p7288_p11 = scmp.ne.s32.totalorder %s56_s12, %s7287_s1  ;;  %p7293_p13 = scmp.lt.s32.totalorder %s7287_s1, %s7287_s1 }
  0x20   :  { %p7294_p0 = por %p7293_p13, %p7292_p12 }
  0x22   :  { %p7295_p1 = pnand %p7294_p0, %p7288_p11 }
  0x24   :  { %7298 = shalt.err (!%p7295_p1)
}
  0x25   :  { %61 = dma.hbm_to_vmem [thread:$0]  %s9227_s3, 32768, %s56_s12, [#allocation9], %s7420_s7, %s7420_s7, %s7421_s8  }
  0x26   :  { %s7299_s26 = scalar_lea.hbm %s9224_s0, 768 }
  0x27   :  { %p7300_p2 = scmp.ne.s32.totalorder %s9224_s0, %s7299_s26  ;;  %p7303_p3 = scmp.lt.u32.totalorder %s7299_s26, %s9224_s0 }
  0x29   :  { %p7305_p4 = pnand %p7303_p3, %p7300_p2 }
  0x2b   :  { %7308 = shalt.err (!%p7305_p4)
}
  0x2c   :  { %s7309_s9 = scalar_lea.vmem %s22_s14, 768  ;;  %p7314_p6 = scmp.lt.s32.totalorder %s22_s14, %s22_s14 }
  0x2d   :  { %p7310_p5 = scmp.ne.s32.totalorder %s22_s14, %s7309_s9  ;;  %p7315_p7 = scmp.lt.s32.totalorder %s7309_s9, %s7309_s9 }
  0x2f   :  { %p7316_p8 = por %p7315_p7, %p7314_p6 }
  0x31   :  { %p7317_p9 = pnand %p7316_p8, %p7310_p5 }
  0x33   :  { %7320 = shalt.err (!%p7317_p9)
}
  0x34   :  { %s7424_s3 = smov 384   ;;  %s7425_s7 = smov 24  }
  0x35   :  { %27 = dma.hbm_to_vmem [thread:$0]  %s9224_s0, 768, %s22_s14, [#allocation3], %s7424_s3, %s7424_s3, %s7425_s7  }
  0x36   :  { %s7426_s11 = smov [#allocation7]   ;;  %s7427_s13 = smov [#allocation10]  }
  0x37   :  { %s46_s12 = sshll.u32 %s7426_s11, 4  ;;  %s67_s15 = sshll.u32 %s7427_s13, 4  ;;  %s47_s12 = int_to_ptr.vmem [resolvable:$true] %s46_s12  ;;  %s68_s15 = int_to_ptr.vmem [resolvable:$true] %s67_s15 }
  0x38   :  { %s7321_s18 = scalar_lea.hbm %s9226_s2, 128 }
  0x39   :  { %p7322_p10 = scmp.ne.s32.totalorder %s9226_s2, %s7321_s18  ;;  %p7325_p11 = scmp.lt.u32.totalorder %s7321_s18, %s9226_s2 }
  0x3b   :  { %p7327_p12 = pnand %p7325_p11, %p7322_p10 }
  0x3d   :  { %7330 = shalt.err (!%p7327_p12)
}
  0x3e   :  { %s7331_s0 = scalar_lea.vmem %s47_s12, 128  ;;  %p7336_p0 = scmp.lt.s32.totalorder %s47_s12, %s47_s12 }
  0x3f   :  { %p7332_p13 = scmp.ne.s32.totalorder %s47_s12, %s7331_s0  ;;  %p7337_p1 = scmp.lt.s32.totalorder %s7331_s0, %s7331_s0 }
  0x41   :  { %p7338_p2 = por %p7337_p1, %p7336_p0 }
  0x43   :  { %p7339_p3 = pnand %p7338_p2, %p7332_p13 }
  0x45   :  { %7342 = shalt.err (!%p7339_p3)
}
  0x46   :  { %49 = dma.hbm_to_vmem [thread:$0]  %s9226_s2, 128, %s47_s12, [#allocation6]  }
  0x47   :  { %s7343_s25 = scalar_lea.hbm %s9228_s4, 4096 }
  0x48   :  { %p7344_p4 = scmp.ne.s32.totalorder %s9228_s4, %s7343_s25  ;;  %p7347_p5 = scmp.lt.u32.totalorder %s7343_s25, %s9228_s4 }
  0x4a   :  { %p7349_p6 = pnand %p7347_p5, %p7344_p4 }
  0x4c   :  { %7352 = shalt.err (!%p7349_p6)
}
  0x4d   :  { %s7353_s30 = scalar_lea.vmem %s68_s15, 4096  ;;  %p7358_p8 = scmp.lt.s32.totalorder %s68_s15, %s68_s15 }
  0x4e   :  { %p7354_p7 = scmp.ne.s32.totalorder %s68_s15, %s7353_s30  ;;  %p7359_p9 = scmp.lt.s32.totalorder %s7353_s30, %s7353_s30 }
  0x50   :  { %p7360_p10 = por %p7359_p9, %p7358_p8 }
  0x52   :  { %p7361_p11 = pnand %p7360_p10, %p7354_p7 }
  0x54   :  { %7364 = shalt.err (!%p7361_p11)
}
  0x55   :  { %s7428_s2 = smov 128   ;;  %s7429_s9 = smov 8  }
  0x56   :  { %73 = dma.hbm_to_vmem [thread:$0]  %s9228_s4, 4096, %s68_s15, [#allocation9], %s7428_s2, %s7428_s2, %s7429_s9  }
  0x57   :  { %s7430_s8 = smov [#allocation11]   ;;  %s7365_s13 = scalar_lea.hbm %s9229_s5, 16 }
  0x58   :  { %s80_s10 = sshll.u32 %s7430_s8, 4  ;;  %p7366_p12 = scmp.ne.s32.totalorder %s9229_s5, %s7365_s13  ;;  %s81_s10 = int_to_ptr.vmem [resolvable:$true] %s80_s10 }
  0x59   :  { %p7369_p13 = scmp.lt.u32.totalorder %s7365_s13, %s9229_s5 }
  0x5b   :  { %p7371_p0 = pnand %p7369_p13, %p7366_p12 }
  0x5d   :  { %7374 = shalt.err (!%p7371_p0)
}
  0x5e   :  { %s7375_s20 = scalar_lea.vmem %s81_s10, 16  ;;  %s7379_s4 = scalar_lea.vmem %s81_s10, 32 }
  0x5f   :  { %p7376_p1 = scmp.ne.s32.totalorder %s81_s10, %s7375_s20  ;;  %p7380_p2 = scmp.lt.s32.totalorder %s81_s10, %s81_s10 }
  0x60   :  { %p7381_p3 = scmp.lt.s32.totalorder %s7379_s4, %s7375_s20 }
  0x62   :  { %p7382_p4 = por %p7381_p3, %p7380_p2 }
  0x64   :  { %p7383_p5 = pnand %p7382_p4, %p7376_p1 }
  0x66   :  { %7386 = shalt.err (!%p7383_p5)
}
  0x67   :  { %83 = dma.hbm_to_vmem [thread:$0]  %s9229_s5, 16, %s81_s10, [#allocation12]  }
  0x68   :  { %7409 = dma.done.wait [#allocation3], 768  }
  0x69   :  { %7410 = vsyncadd [#allocation3], 4294966528 }
  0x6a   :  { %7411 = dma.done.wait [#allocation6], 39040  }
  0x6b   :  { %7412 = vsyncadd [#allocation6], 4294928256 }
  0x6c   :  { %7413 = dma.done.wait [#allocation9], 36864  }
  0x6d   :  { %7414 = vsyncadd [#allocation9], 4294930432 }
  0x6e   :  { %7415 = dma.done.wait [#allocation12], 16  }
  0x6f   :  { %7416 = vsyncadd [#allocation12], 4294967280  ;;  %v9231_v0 = vmov 0.0   ;;  %vm461_vm0 = vcmask 1043456   ;;  %vm7432_vm1 = vmmov 1   ;;  %v109_v2 = vld [vmem:[#allocation5 + $0x8] sm:$0xff] }
  0x70   :  { %627 = vmatprep.mubr.f32.mxu1 %v9231_v0  ;;  %vm7546_vm2 = vmpackc.low %vm461_vm0, %vm7432_vm1  ;;  %v117_v3 = vld [vmem:[#allocation5 + $0x48] sm:$0xff]  ;;  %v108_v7 = vld [vmem:[#allocation5] sm:$0xff]  ;;  %vm454_vm3 = vcmask 359424   ;;  %vm4305_vm4 = vcmask 1041408   ;;  %vm4310_vm5 = vcmask 1045504   ;;  %s7433_s5 = smov [#allocation13]  }
  0x71   :  { %v365_v4 = vld [vmem:[#allocation5 + $0x808] sm:$0xff]  ;;  %v4558_v5 = vpack.c.bf16 %v117_v3, %v109_v2  ;;  %v116_v8 = vld [vmem:[#allocation5 + $0x40] sm:$0xff]  ;;  %v111_v41 = vld [vmem:[#allocation5 + $0x18] sm:$0xff]  ;;  %s4440_s1 = sshll.u32 %s7433_s5, 4  ;;  %s4441_s1 = int_to_ptr.vmem [resolvable:$true] %s4440_s1 }
  0x72   :  { %v373_v6 = vld [vmem:[#allocation5 + $0x848] sm:$0xff]  ;;  %v4560_v10 = vpack.c.bf16 %v116_v8, %v108_v7  ;;  %v364_v11 = vld [vmem:[#allocation5 + $0x800] sm:$0xff]  ;;  %v119_v42 = vld [vmem:[#allocation5 + $0x58] sm:$0xff]  ;;  %s7387_s0 = scalar_lea.vmem %s4441_s1, 256  ;;  %p7392_p7 = scmp.lt.s32.totalorder %s4441_s1, %s4441_s1 }
  0x73   :  { %v4622_v9 = vpack.c.bf16 %v373_v6, %v365_v4  ;;  %v372_v12 = vld [vmem:[#allocation5 + $0x840] sm:$0xff]  ;;  %v125_v13 = vld [vmem:[#allocation5 + $0x88] sm:$0xff]  ;;  %4559 = vmatprep.subr.bf16.mxu0 %v4558_v5  ;;  %v4636_v44 = vpack.c.bf16 %v119_v42, %v111_v41  ;;  %v110_v46 = vld [vmem:[#allocation5 + $0x10] sm:$0xff]  ;;  %p7388_p6 = scmp.ne.s32.totalorder %s4441_s1, %s7387_s0  ;;  %p7393_p8 = scmp.lt.s32.totalorder %s7387_s0, %s7387_s0 }
  0x74   :  { %v4624_v14 = vpack.c.bf16 %v372_v12, %v364_v11  ;;  %v133_v15 = vld [vmem:[#allocation5 + $0xc8] sm:$0xff]  ;;  %4561 = vmatpush1.bf16.msra.mxu0 %v4560_v10  ;;  %v124_v20 = vld [vmem:[#allocation5 + $0x80] sm:$0xff]  ;;  %v118_v47 = vld [vmem:[#allocation5 + $0x50] sm:$0xff] }
  0x75   :  { %v381_v16 = vld [vmem:[#allocation5 + $0x888] sm:$0xff]  ;;  %4623 = vmatprep.subr.bf16.mxu1 %v4622_v9  ;;  %v4562_v18 = vpack.c.bf16 %v133_v15, %v125_v13  ;;  %v132_v21 = vld [vmem:[#allocation5 + $0xc0] sm:$0xff]  ;;  %v127_v50 = vld [vmem:[#allocation5 + $0x98] sm:$0xff]  ;;  %v4638_v54 = vpack.c.bf16 %v118_v47, %v110_v46  ;;  %p7394_p9 = por %p7393_p8, %p7392_p7 }
  0x76   :  { %v389_v17 = vld [vmem:[#allocation5 + $0x8c8] sm:$0xff]  ;;  %v380_v22 = vld [vmem:[#allocation5 + $0x880] sm:$0xff]  ;;  %4625 = vmatpush1.bf16.msra.mxu1 %v4624_v14  ;;  %v4564_v23 = vpack.c.bf16 %v132_v21, %v124_v20  ;;  %v135_v53 = vld [vmem:[#allocation5 + $0xd8] sm:$0xff] }
  0x77   :  { %v4626_v19 = vpack.c.bf16 %v389_v17, %v381_v16  ;;  %v388_v24 = vld [vmem:[#allocation5 + $0x8c0] sm:$0xff]  ;;  %v141_v25 = vld [vmem:[#allocation5 + $0x108] sm:$0xff]  ;;  %4563 = vmatprep.subr.bf16.mxu0 %v4562_v18  ;;  %v126_v58 = vld [vmem:[#allocation5 + $0x90] sm:$0xff]  ;;  %v4640_v59 = vpack.c.bf16 %v135_v53, %v127_v50  ;;  %p7395_p10 = pnand %p7394_p9, %p7388_p6 }
  0x78   :  { %v149_v26 = vld [vmem:[#allocation5 + $0x148] sm:$0xff]  ;;  %v4628_v27 = vpack.c.bf16 %v388_v24, %v380_v22  ;;  %v140_v31 = vld [vmem:[#allocation5 + $0x100] sm:$0xff]  ;;  %4565 = vmatpush1.bf16.msra.mxu0 %v4564_v23  ;;  %v134_v60 = vld [vmem:[#allocation5 + $0xd0] sm:$0xff] }
  0x79   :  { %4627 = vmatprep.subr.bf16.mxu1 %v4626_v19  ;;  %v4566_v28 = vpack.c.bf16 %v149_v26, %v141_v25  ;;  %v397_v29 = vld [vmem:[#allocation5 + $0x908] sm:$0xff]  ;;  %v148_v33 = vld [vmem:[#allocation5 + $0x140] sm:$0xff]  ;;  %v143_v63 = vld [vmem:[#allocation5 + $0x118] sm:$0xff]  ;;  %v4642_v4 = vpack.c.bf16 %v134_v60, %v126_v58 }
  0x7a   :  { %v405_v30 = vld [vmem:[#allocation5 + $0x948] sm:$0xf]  ;;  %v396_v34 = vld [vmem:[#allocation5 + $0x900] sm:$0xff]  ;;  %v4568_v36 = vpack.c.bf16 %v148_v33, %v140_v31  ;;  %4629 = vmatpush1.bf16.msra.mxu1 %v4628_v27  ;;  %v151_v2 = vld [vmem:[#allocation5 + $0x158] sm:$0xff] }
  0x7b   :  { %v4630_v32 = vpack.c.bf16 %v405_v30, %v397_v29  ;;  %v404_v35 = vld [vmem:[#allocation5 + $0x940] sm:$0xf]  ;;  %v157_v37 = vld [vmem:[#allocation5 + $0x188] sm:$0xff]  ;;  %4567 = vmatprep.subr.bf16.mxu0 %v4566_v28  ;;  %v142_v8 = vld [vmem:[#allocation5 + $0x110] sm:$0xff]  ;;  %v4644_v9 = vpack.c.bf16 %v151_v2, %v143_v63 }
  0x7c   :  { %v165_v38 = vld [vmem:[#allocation5 + $0x1c8] sm:$0xff]  ;;  %v4633_v39 = vpack.c.bf16 %v404_v35, %v396_v34  ;;  %v156_v43 = vld [vmem:[#allocation5 + $0x180] sm:$0xff]  ;;  %4569 = vmatpush1.bf16.msra.mxu0 %v4568_v36  ;;  %v150_v10 = vld [vmem:[#allocation5 + $0x150] sm:$0xff] }
  0x7d   :  { %v4570_v40 = vpack.c.bf16 %v165_v38, %v157_v37  ;;  %4632 = vmatprep.subr.msk.bf16.mxu1 %vm7546_vm2, %v4630_v32  ;;  %v164_v45 = vld [vmem:[#allocation5 + $0x1c0] sm:$0xff]  ;;  %v173_v48 = vld [vmem:[#allocation5 + $0x208] sm:$0xff]  ;;  %v159_v13 = vld [vmem:[#allocation5 + $0x198] sm:$0xff]  ;;  %v4646_v16 = vpack.c.bf16 %v150_v10, %v142_v8 }
  0x7e   :  { %v181_v49 = vld [vmem:[#allocation5 + $0x248] sm:$0xff]  ;;  %v7552_v51 = vld [vmem:[#allocation2 + $0x10] sm:$0xff]  ;;  %v4572_v52 = vpack.c.bf16 %v164_v45, %v156_v43  ;;  %4635 = vmatpush1.bf16.msk.msra.mxu1 %vm7546_vm2, %v4633_v39  ;;  %v167_v14 = vld [vmem:[#allocation5 + $0x1d8] sm:$0xff] }
  0x7f   :  { %4571 = vmatprep.subr.bf16.mxu0 %v4570_v40  ;;  %v4574_v55 = vpack.c.bf16 %v181_v49, %v173_v48  ;;  %v172_v56 = vld [vmem:[#allocation5 + $0x200] sm:$0xff]  ;;  %4637 = vmatprep.subr.bf16.mxu1 %v4636_v44  ;;  %v189_v61 = vld [vmem:[#allocation5 + $0x288] sm:$0xff]  ;;  %v158_v20 = vld [vmem:[#allocation5 + $0x190] sm:$0xff]  ;;  %v4648_v21 = vpack.c.bf16 %v167_v14, %v159_v13 }
  0x80   :  { %v180_v57 = vld [vmem:[#allocation5 + $0x240] sm:$0xff]  ;;  %v197_v62 = vld [vmem:[#allocation5 + $0x2c8] sm:$0xff]  ;;  %4573 = vmatpush1.bf16.msra.mxu0 %v4572_v52  ;;  %v166_v22 = vld [vmem:[#allocation5 + $0x1d0] sm:$0xff] }
  0x81   :  { %4457 = vmatmul.mubr.msk.f32.vlgmr.msra.gmra.mrb[0].mxu1 %vm454_vm3, %v7552_v51  ;;  %v4576_v3 = vpack.c.bf16 %v180_v57, %v172_v56  ;;  %4575 = vmatprep.subr.bf16.mxu0 %v4574_v55  ;;  %v4578_v5 = vpack.c.bf16 %v197_v62, %v189_v61  ;;  %v188_v6 = vld [vmem:[#allocation5 + $0x280] sm:$0xff]  ;;  %v205_v11 = vld [vmem:[#allocation5 + $0x308] sm:$0xff]  ;;  %v175_v25 = vld [vmem:[#allocation5 + $0x218] sm:$0xff]  ;;  %v4650_v28 = vpack.c.bf16 %v166_v22, %v158_v20 }
  0x82   :  { %4639 = vmatpush1.bf16.msra.mxu1 %v4638_v54  ;;  %v196_v7 = vld [vmem:[#allocation5 + $0x2c0] sm:$0xff]  ;;  %v213_v12 = vld [vmem:[#allocation5 + $0x348] sm:$0xff]  ;;  %633 = vmatprep.mubr.f32.mxu1 %v9231_v0  ;;  %v183_v26 = vld [vmem:[#allocation5 + $0x258] sm:$0xff] }
  0x83   :  { %4641 = vmatprep.subr.bf16.mxu1 %v4640_v59  ;;  %v4580_v15 = vpack.c.bf16 %v196_v7, %v188_v6  ;;  %v4582_v17 = vpack.c.bf16 %v213_v12, %v205_v11  ;;  %v204_v18 = vld [vmem:[#allocation5 + $0x300] sm:$0xff]  ;;  %v221_v23 = vld [vmem:[#allocation5 + $0x388] sm:$0xff]  ;;  %v174_v32 = vld [vmem:[#allocation5 + $0x210] sm:$0xff]  ;;  %v4652_v33 = vpack.c.bf16 %v183_v26, %v175_v25 }
  0x84   :  { %4577 = vmatpush1.bf16.msra.mxu0 %v4576_v3  ;;  %v212_v19 = vld [vmem:[#allocation5 + $0x340] sm:$0xff]  ;;  %v229_v24 = vld [vmem:[#allocation5 + $0x3c8] sm:$0xff]  ;;  %v182_v34 = vld [vmem:[#allocation5 + $0x250] sm:$0xff] }
  0x85   :  { %4579 = vmatprep.subr.bf16.mxu0 %v4578_v5  ;;  %v4584_v27 = vpack.c.bf16 %v212_v19, %v204_v18  ;;  %v4586_v29 = vpack.c.bf16 %v229_v24, %v221_v23  ;;  %v220_v30 = vld [vmem:[#allocation5 + $0x380] sm:$0xff]  ;;  %v237_v35 = vld [vmem:[#allocation5 + $0x408] sm:$0xff]  ;;  %v191_v37 = vld [vmem:[#allocation5 + $0x298] sm:$0xff]  ;;  %v4654_v40 = vpack.c.bf16 %v182_v34, %v174_v32 }
  0x86   :  { %4643 = vmatpush1.bf16.msra.mxu1 %v4642_v4  ;;  %v228_v31 = vld [vmem:[#allocation5 + $0x3c0] sm:$0xff]  ;;  %v245_v36 = vld [vmem:[#allocation5 + $0x448] sm:$0xff]  ;;  %v199_v38 = vld [vmem:[#allocation5 + $0x2d8] sm:$0xff] }
  0x87   :  { %4645 = vmatprep.subr.bf16.mxu1 %v4644_v9  ;;  %v4588_v39 = vpack.c.bf16 %v228_v31, %v220_v30  ;;  %v4590_v41 = vpack.c.bf16 %v245_v36, %v237_v35  ;;  %v236_v42 = vld [vmem:[#allocation5 + $0x400] sm:$0xff]  ;;  %v190_v44 = vld [vmem:[#allocation5 + $0x290] sm:$0xff]  ;;  %v4656_v45 = vpack.c.bf16 %v199_v38, %v191_v37  ;;  %v253_v47 = vld [vmem:[#allocation5 + $0x488] sm:$0xff] }
  0x88   :  { %4581 = vmatpush1.bf16.msra.mxu0 %v4580_v15  ;;  %v244_v43 = vld [vmem:[#allocation5 + $0x440] sm:$0xff]  ;;  %v198_v46 = vld [vmem:[#allocation5 + $0x2d0] sm:$0xff]  ;;  %v261_v48 = vld [vmem:[#allocation5 + $0x4c8] sm:$0xff] }
  0x89   :  { %4583 = vmatprep.subr.bf16.mxu0 %v4582_v17  ;;  %v207_v49 = vld [vmem:[#allocation5 + $0x318] sm:$0xff]  ;;  %v4592_v52 = vpack.c.bf16 %v244_v43, %v236_v42  ;;  %v4658_v53 = vpack.c.bf16 %v198_v46, %v190_v44  ;;  %v4594_v54 = vpack.c.bf16 %v261_v48, %v253_v47  ;;  %v252_v55 = vld [vmem:[#allocation5 + $0x480] sm:$0xff]  ;;  %v206_v57 = vld [vmem:[#allocation5 + $0x310] sm:$0xff] }
  0x8a   :  { %4647 = vmatpush1.bf16.msra.mxu1 %v4646_v16  ;;  %v215_v50 = vld [vmem:[#allocation5 + $0x358] sm:$0xff]  ;;  %v260_v56 = vld [vmem:[#allocation5 + $0x4c0] sm:$0xff]  ;;  %v214_v59 = vld [vmem:[#allocation5 + $0x350] sm:$0xff] }
  0x8b   :  { %4649 = vmatprep.subr.bf16.mxu1 %v4648_v21  ;;  %v4660_v58 = vpack.c.bf16 %v215_v50, %v207_v49  ;;  %v269_v60 = vld [vmem:[#allocation5 + $0x508] sm:$0xff]  ;;  %v223_v62 = vld [vmem:[#allocation5 + $0x398] sm:$0xff]  ;;  %v4596_v2 = vpack.c.bf16 %v260_v56, %v252_v55  ;;  %v4662_v3 = vpack.c.bf16 %v214_v59, %v206_v57  ;;  %v268_v5 = vld [vmem:[#allocation5 + $0x500] sm:$0xff] }
  0x8c   :  { %4585 = vmatpush1.bf16.msra.mxu0 %v4584_v27  ;;  %v277_v61 = vld [vmem:[#allocation5 + $0x548] sm:$0xff]  ;;  %v231_v63 = vld [vmem:[#allocation5 + $0x3d8] sm:$0xff]  ;;  %v276_v6 = vld [vmem:[#allocation5 + $0x540] sm:$0xff] }
  0x8d   :  { %4587 = vmatprep.subr.bf16.mxu0 %v4586_v29  ;;  %v4598_v4 = vpack.c.bf16 %v277_v61, %v269_v60  ;;  %v222_v7 = vld [vmem:[#allocation5 + $0x390] sm:$0xff]  ;;  %v4664_v8 = vpack.c.bf16 %v231_v63, %v223_v62  ;;  %v285_v10 = vld [vmem:[#allocation5 + $0x588] sm:$0xff]  ;;  %v239_v12 = vld [vmem:[#allocation5 + $0x418] sm:$0xff]  ;;  %v4600_v14 = vpack.c.bf16 %v276_v6, %v268_v5 }
  0x8e   :  { %4651 = vmatpush1.bf16.msra.mxu1 %v4650_v28  ;;  %v230_v9 = vld [vmem:[#allocation5 + $0x3d0] sm:$0xff]  ;;  %v293_v11 = vld [vmem:[#allocation5 + $0x5c8] sm:$0xff]  ;;  %v247_v13 = vld [vmem:[#allocation5 + $0x458] sm:$0xff] }
  0x8f   :  { %4653 = vmatprep.subr.bf16.mxu1 %v4652_v33  ;;  %v4666_v15 = vpack.c.bf16 %v230_v9, %v222_v7  ;;  %v4602_v16 = vpack.c.bf16 %v293_v11, %v285_v10  ;;  %v284_v17 = vld [vmem:[#allocation5 + $0x580] sm:$0xff]  ;;  %v238_v19 = vld [vmem:[#allocation5 + $0x410] sm:$0xff]  ;;  %v4668_v20 = vpack.c.bf16 %v247_v13, %v239_v12  ;;  %v301_v22 = vld [vmem:[#allocation5 + $0x608] sm:$0xff] }
  0x90   :  { %4589 = vmatpush1.bf16.msra.mxu0 %v4588_v39  ;;  %v292_v18 = vld [vmem:[#allocation5 + $0x5c0] sm:$0xff]  ;;  %v246_v21 = vld [vmem:[#allocation5 + $0x450] sm:$0xff]  ;;  %v309_v23 = vld [vmem:[#allocation5 + $0x648] sm:$0xff] }
  0x91   :  { %4591 = vmatprep.subr.bf16.mxu0 %v4590_v41  ;;  %v255_v24 = vld [vmem:[#allocation5 + $0x498] sm:$0xff]  ;;  %v4604_v27 = vpack.c.bf16 %v292_v18, %v284_v17  ;;  %v4670_v28 = vpack.c.bf16 %v246_v21, %v238_v19  ;;  %v4606_v29 = vpack.c.bf16 %v309_v23, %v301_v22  ;;  %v300_v30 = vld [vmem:[#allocation5 + $0x600] sm:$0xff]  ;;  %v254_v32 = vld [vmem:[#allocation5 + $0x490] sm:$0xff] }
  0x92   :  { %4655 = vmatpush1.bf16.msra.mxu1 %v4654_v40  ;;  %v263_v25 = vld [vmem:[#allocation5 + $0x4d8] sm:$0xff]  ;;  %v308_v31 = vld [vmem:[#allocation5 + $0x640] sm:$0xff]  ;;  %v262_v34 = vld [vmem:[#allocation5 + $0x4d0] sm:$0xff] }
  0x93   :  { %4657 = vmatprep.subr.bf16.mxu1 %v4656_v45  ;;  %v7559_v26 = vld [vmem:[#allocation2 + $0x8] sm:$0xff]  ;;  %v4672_v33 = vpack.c.bf16 %v263_v25, %v255_v24  ;;  %v317_v35 = vld [vmem:[#allocation5 + $0x688] sm:$0xff]  ;;  %v4608_v39 = vpack.c.bf16 %v308_v31, %v300_v30  ;;  %v316_v40 = vld [vmem:[#allocation5 + $0x680] sm:$0xff]  ;;  %v4674_v41 = vpack.c.bf16 %v262_v34, %v254_v32 }
  0x94   :  { %4593 = vmatpush1.bf16.msra.mxu0 %v4592_v52  ;;  %550 = vmatprep.mubr.f32.mxu0 %v7559_v26  ;;  %v325_v36 = vld [vmem:[#allocation5 + $0x6c8] sm:$0xff]  ;;  %v271_v37 = vld [vmem:[#allocation5 + $0x518] sm:$0xff]  ;;  %v324_v43 = vld [vmem:[#allocation5 + $0x6c0] sm:$0xff] }
  0x95   :  { %4595 = vmatprep.subr.bf16.mxu0 %v4594_v54  ;;  %v279_v38 = vld [vmem:[#allocation5 + $0x558] sm:$0xff]  ;;  %v4610_v42 = vpack.c.bf16 %v325_v36, %v317_v35  ;;  %v270_v44 = vld [vmem:[#allocation5 + $0x510] sm:$0xff]  ;;  %v333_v48 = vld [vmem:[#allocation5 + $0x708] sm:$0xff] }
  0x96   :  { %4659 = vmatpush1.bf16.msra.mxu1 %v4658_v53  ;;  %v7562_v45 = vld [vmem:[#allocation2 + $0x28] sm:$0xff]  ;;  %v4676_v46 = vpack.c.bf16 %v279_v38, %v271_v37  ;;  %v278_v47 = vld [vmem:[#allocation5 + $0x550] sm:$0xff]  ;;  %v341_v49 = vld [vmem:[#allocation5 + $0x748] sm:$0xff]  ;;  %v4612_v53 = vpack.c.bf16 %v324_v43, %v316_v40 }
  0x97   :  { %4661 = vmatprep.subr.bf16.mxu1 %v4660_v58  ;;  %4458 = vmatmul.mubr.msk.f32.gmra.mrb[2].mxu1 %vm454_vm3, %v7562_v45  ;;  %v287_v50 = vld [vmem:[#allocation5 + $0x598] sm:$0xff]  ;;  %v4678_v54 = vpack.c.bf16 %v278_v47, %v270_v44  ;;  %v4614_v55 = vpack.c.bf16 %v341_v49, %v333_v48  ;;  %v332_v56 = vld [vmem:[#allocation5 + $0x700] sm:$0xff]  ;;  %v286_v58 = vld [vmem:[#allocation5 + $0x590] sm:$0xff] }
  0x98   :  { %4597 = vmatpush1.bf16.msra.mxu0 %v4596_v2  ;;  %v295_v52 = vld [vmem:[#allocation5 + $0x5d8] sm:$0xff]  ;;  %704 = vmatprep.mubr.f32.mxu1 %v7559_v26  ;;  %v340_v57 = vld [vmem:[#allocation5 + $0x740] sm:$0xff]  ;;  %v294_v60 = vld [vmem:[#allocation5 + $0x5d0] sm:$0xff] }
  0x99   :  { %4599 = vmatprep.subr.bf16.mxu0 %v4598_v4  ;;  %v4680_v59 = vpack.c.bf16 %v295_v52, %v287_v50  ;;  %v349_v61 = vld [vmem:[#allocation5 + $0x788] sm:$0xff]  ;;  %v303_v63 = vld [vmem:[#allocation5 + $0x618] sm:$0xff]  ;;  %v4682_v4 = vpack.c.bf16 %v294_v60, %v286_v58  ;;  %v348_v6 = vld [vmem:[#allocation5 + $0x780] sm:$0xff] }
  0x9a   :  { %4663 = vmatpush1.bf16.msra.mxu1 %v4662_v3  ;;  %v357_v62 = vld [vmem:[#allocation5 + $0x7c8] sm:$0xff]  ;;  %v311_v2 = vld [vmem:[#allocation5 + $0x658] sm:$0xff]  ;;  %v4616_v3 = vpack.c.bf16 %v340_v57, %v332_v56  ;;  %v356_v7 = vld [vmem:[#allocation5 + $0x7c0] sm:$0xff] }
  0x9b   :  { %4665 = vmatprep.subr.bf16.mxu1 %v4664_v8  ;;  %v4618_v5 = vpack.c.bf16 %v357_v62, %v349_v61  ;;  %v302_v8 = vld [vmem:[#allocation5 + $0x610] sm:$0xff]  ;;  %v4684_v9 = vpack.c.bf16 %v311_v2, %v303_v63  ;;  %v113_v11 = vld [vmem:[#allocation5 + $0x28] sm:$0xff]  ;;  %v319_v13 = vld [vmem:[#allocation5 + $0x698] sm:$0xff] }
  0x9c   :  { %4601 = vmatpush1.bf16.msra.mxu0 %v4600_v14  ;;  %v310_v10 = vld [vmem:[#allocation5 + $0x650] sm:$0xff]  ;;  %v121_v12 = vld [vmem:[#allocation5 + $0x68] sm:$0xff]  ;;  %v327_v14 = vld [vmem:[#allocation5 + $0x6d8] sm:$0xff] }
  0x9d   :  { %4603 = vmatprep.subr.bf16.mxu0 %v4602_v16  ;;  %v4686_v16 = vpack.c.bf16 %v310_v10, %v302_v8  ;;  %v4714_v17 = vpack.c.bf16 %v121_v12, %v113_v11  ;;  %v318_v18 = vld [vmem:[#allocation5 + $0x690] sm:$0xff]  ;;  %v112_v19 = vld [vmem:[#allocation5 + $0x20] sm:$0xff]  ;;  %v4688_v21 = vpack.c.bf16 %v327_v14, %v319_v13  ;;  %v129_v23 = vld [vmem:[#allocation5 + $0xa8] sm:$0xff] }
  0x9e   :  { %4667 = vmatpush1.bf16.msra.mxu1 %v4666_v15  ;;  %v4620_v15 = vpack.c.bf16 %v356_v7, %v348_v6  ;;  %v326_v22 = vld [vmem:[#allocation5 + $0x6d0] sm:$0xff]  ;;  %v137_v24 = vld [vmem:[#allocation5 + $0xe8] sm:$0xff]  ;;  %v335_v25 = vld [vmem:[#allocation5 + $0x718] sm:$0xff] }
  0x9f   :  { %4669 = vmatprep.subr.bf16.mxu1 %v4668_v20  ;;  %v120_v20 = vld [vmem:[#allocation5 + $0x60] sm:$0xff]  ;;  %v7569_v30 = vld [vmem:[#allocation2 + $0x20] sm:$0xff]  ;;  %v4690_v31 = vpack.c.bf16 %v326_v22, %v318_v18  ;;  %v4718_v32 = vpack.c.bf16 %v137_v24, %v129_v23  ;;  %v145_v38 = vld [vmem:[#allocation5 + $0x128] sm:$0xff] }
  0xa0   :  { %4605 = vmatpush1.bf16.msra.mxu0 %v4604_v27  ;;  %v343_v27 = vld [vmem:[#allocation5 + $0x758] sm:$0xff]  ;;  %v128_v34 = vld [vmem:[#allocation5 + $0xa0] sm:$0xff]  ;;  %v342_v37 = vld [vmem:[#allocation5 + $0x750] sm:$0xff] }
  0xa1   :  { %4607 = vmatprep.subr.bf16.mxu0 %v4606_v29  ;;  %v4716_v29 = vpack.c.bf16 %v120_v20, %v112_v19  ;;  %v136_v35 = vld [vmem:[#allocation5 + $0xe0] sm:$0xff]  ;;  %v4692_v36 = vpack.c.bf16 %v343_v27, %v335_v25  ;;  %v351_v40 = vld [vmem:[#allocation5 + $0x798] sm:$0xff]  ;;  %v7573_v43 = vld [vmem:[#allocation2 + $0x18] sm:$0xff] }
  0xa2   :  { %4671 = vmatpush1.bf16.msra.mxu1 %v4670_v28  ;;  %v7567_v28 = vld [vmem:[#allocation2] sm:$0xff]  ;;  %v144_v48 = vld [vmem:[#allocation5 + $0x120] sm:$0xff]  ;;  %v375_v56 = vld [vmem:[#allocation5 + $0x858] sm:$0xff] }
  0xa3   :  { %4673 = vmatprep.subr.bf16.mxu1 %v4672_v33  ;;  %v334_v33 = vld [vmem:[#allocation5 + $0x710] sm:$0xff]  ;;  %v152_v49 = vld [vmem:[#allocation5 + $0x160] sm:$0xff]  ;;  %v391_v6 = vld [vmem:[#allocation5 + $0x8d8] sm:$0xff] }
  0xa4   :  { %4609 = vmatpush1.bf16.msra.mxu0 %v4608_v39  ;;  %v153_v39 = vld [vmem:[#allocation5 + $0x168] sm:$0xff]  ;;  %v4694_v44 = vpack.c.bf16 %v342_v37, %v334_v33  ;;  %v350_v47 = vld [vmem:[#allocation5 + $0x790] sm:$0xff]  ;;  %v4724_v57 = vpack.c.bf16 %v152_v49, %v144_v48  ;;  %v160_v61 = vld [vmem:[#allocation5 + $0x1a0] sm:$0xff] }
  0xa5   :  { %4611 = vmatprep.subr.bf16.mxu0 %v4610_v42  ;;  %v4720_v42 = vpack.c.bf16 %v136_v35, %v128_v34  ;;  %v358_v52 = vld [vmem:[#allocation5 + $0x7d0] sm:$0xff]  ;;  %v168_v62 = vld [vmem:[#allocation5 + $0x1e0] sm:$0xff]  ;;  %v407_v18 = vld [vmem:[#allocation5 + $0x958] sm:$0xf] }
  0xa6   :  { %4675 = vmatpush1.bf16.msra.mxu1 %v4674_v41  ;;  %v359_v41 = vld [vmem:[#allocation5 + $0x7d8] sm:$0xff]  ;;  %v4698_v58 = vpack.c.bf16 %v358_v52, %v350_v47  ;;  %v366_v60 = vld [vmem:[#allocation5 + $0x810] sm:$0xff]  ;;  %v4728_v7 = vpack.c.bf16 %v168_v62, %v160_v61  ;;  %v176_v11 = vld [vmem:[#allocation5 + $0x220] sm:$0xff] }
  0xa7   :  { %4677 = vmatprep.subr.bf16.mxu1 %v4676_v46  ;;  %v4722_v46 = vpack.c.bf16 %v153_v39, %v145_v38  ;;  %v4696_v50 = vpack.c.bf16 %v359_v41, %v351_v40  ;;  %v374_v2 = vld [vmem:[#allocation5 + $0x850] sm:$0xff]  ;;  %v184_v12 = vld [vmem:[#allocation5 + $0x260] sm:$0xff]  ;;  %v123_v33 = vld [vmem:[#allocation5 + $0x78] sm:$0xff] }
  0xa8   :  { %4613 = vmatpush1.bf16.msra.mxu0 %v4612_v53  ;;  %v161_v53 = vld [vmem:[#allocation5 + $0x1a8] sm:$0xff]  ;;  %v4702_v8 = vpack.c.bf16 %v374_v2, %v366_v60  ;;  %v382_v10 = vld [vmem:[#allocation5 + $0x890] sm:$0xff]  ;;  %v4732_v19 = vpack.c.bf16 %v184_v12, %v176_v11  ;;  %v192_v23 = vld [vmem:[#allocation5 + $0x2a0] sm:$0xff] }
  0xa9   :  { %4615 = vmatprep.subr.bf16.mxu0 %v4614_v55  ;;  %v367_v55 = vld [vmem:[#allocation5 + $0x818] sm:$0xff]  ;;  %v390_v14 = vld [vmem:[#allocation5 + $0x8d0] sm:$0xff]  ;;  %v200_v24 = vld [vmem:[#allocation5 + $0x2e0] sm:$0xff] }
  0xaa   :  { %4679 = vmatpush1.bf16.msra.mxu1 %v4678_v54  ;;  %v169_v54 = vld [vmem:[#allocation5 + $0x1e8] sm:$0xff]  ;;  %v4700_v63 = vpack.c.bf16 %v375_v56, %v367_v55  ;;  %v4706_v20 = vpack.c.bf16 %v390_v14, %v382_v10  ;;  %v398_v22 = vld [vmem:[#allocation5 + $0x910] sm:$0xff]  ;;  %v4736_v34 = vpack.c.bf16 %v200_v24, %v192_v23  ;;  %v208_v37 = vld [vmem:[#allocation5 + $0x320] sm:$0xff] }
  0xab   :  { %4681 = vmatprep.subr.bf16.mxu1 %v4680_v59  ;;  %v4726_v59 = vpack.c.bf16 %v169_v54, %v161_v53  ;;  %v406_v27 = vld [vmem:[#allocation5 + $0x950] sm:$0xf]  ;;  %v216_v38 = vld [vmem:[#allocation5 + $0x360] sm:$0xff]  ;;  %v139_v47 = vld [vmem:[#allocation5 + $0xf8] sm:$0xff] }
  0xac   :  { %4617 = vmatpush1.bf16.msra.mxu0 %v4616_v3  ;;  %v177_v3 = vld [vmem:[#allocation5 + $0x228] sm:$0xff]  ;;  %v4711_v35 = vpack.c.bf16 %v406_v27, %v398_v22  ;;  %v114_v40 = vld [vmem:[#allocation5 + $0x30] sm:$0xff]  ;;  %v4740_v48 = vpack.c.bf16 %v216_v38, %v208_v37  ;;  %v232_v52 = vld [vmem:[#allocation5 + $0x3e0] sm:$0xff] }
  0xad   :  { %4619 = vmatprep.subr.bf16.mxu0 %v4618_v5  ;;  %v383_v5 = vld [vmem:[#allocation5 + $0x898] sm:$0xff]  ;;  %v122_v41 = vld [vmem:[#allocation5 + $0x70] sm:$0xff]  ;;  %v240_v2 = vld [vmem:[#allocation5 + $0x420] sm:$0xff] }
  0xae   :  { %4683 = vmatpush1.bf16.msra.mxu1 %v4682_v4  ;;  %v185_v4 = vld [vmem:[#allocation5 + $0x268] sm:$0xff]  ;;  %v4704_v13 = vpack.c.bf16 %v391_v6, %v383_v5  ;;  %v4794_v49 = vpack.c.bf16 %v122_v41, %v114_v40  ;;  %v130_v53 = vld [vmem:[#allocation5 + $0xb0] sm:$0xff]  ;;  %v155_v60 = vld [vmem:[#allocation5 + $0x178] sm:$0xff] }
  0xaf   :  { %4685 = vmatprep.subr.bf16.mxu1 %v4684_v9  ;;  %v4730_v9 = vpack.c.bf16 %v185_v4, %v177_v3  ;;  %v138_v56 = vld [vmem:[#allocation5 + $0xf0] sm:$0xff]  ;;  %v248_v3 = vld [vmem:[#allocation5 + $0x460] sm:$0xff]  ;;  %v171_v10 = vld [vmem:[#allocation5 + $0x1f8] sm:$0xff] }
  0xb0   :  { %4621 = vmatpush1.bf16.msra.mxu0 %v4620_v15  ;;  %v193_v15 = vld [vmem:[#allocation5 + $0x2a8] sm:$0xff]  ;;  %v4798_v62 = vpack.c.bf16 %v138_v56, %v130_v53  ;;  %v146_v4 = vld [vmem:[#allocation5 + $0x130] sm:$0xff]  ;;  %v264_v14 = vld [vmem:[#allocation5 + $0x4e0] sm:$0xff] }
  0xb1   :  { %4715 = vmatprep.subr.bf16.mxu0 %v4714_v17  ;;  %v399_v17 = vld [vmem:[#allocation5 + $0x918] sm:$0xff]  ;;  %v154_v6 = vld [vmem:[#allocation5 + $0x170] sm:$0xff]  ;;  %v280_v27 = vld [vmem:[#allocation5 + $0x560] sm:$0xff] }
  0xb2   :  { %4687 = vmatpush1.bf16.msra.mxu1 %v4686_v16  ;;  %v201_v16 = vld [vmem:[#allocation5 + $0x2e8] sm:$0xff]  ;;  %v4708_v25 = vpack.c.bf16 %v407_v18, %v399_v17  ;;  %v4802_v11 = vpack.c.bf16 %v154_v6, %v146_v4  ;;  %v170_v17 = vld [vmem:[#allocation5 + $0x1f0] sm:$0xff]  ;;  %v296_v40 = vld [vmem:[#allocation5 + $0x5e0] sm:$0xff] }
  0xb3   :  { %4689 = vmatprep.subr.bf16.mxu1 %v4688_v21  ;;  %551 = vmatmul.mubr.f32.vlgmr.msra.gmra.mrb[0].mxu0 %v7567_v28  ;;  %v4734_v21 = vpack.c.bf16 %v201_v16, %v193_v15  ;;  %v162_v15 = vld [vmem:[#allocation5 + $0x1b0] sm:$0xff]  ;;  %v273_v18 = vld [vmem:[#allocation5 + $0x528] sm:$0xff]  ;;  %v320_v4 = vld [vmem:[#allocation5 + $0x6a0] sm:$0xff] }
  0xb4   :  { %4717 = vmatpush1.bf16.msra.mxu0 %v4716_v29  ;;  %556 = vmatprep.mubr.f32.mxu0 %v7569_v30  ;;  %v209_v29 = vld [vmem:[#allocation5 + $0x328] sm:$0xff]  ;;  %v4806_v23 = vpack.c.bf16 %v170_v17, %v162_v15  ;;  %v194_v41 = vld [vmem:[#allocation5 + $0x2b0] sm:$0xff]  ;;  %v336_v15 = vld [vmem:[#allocation5 + $0x720] sm:$0xff] }
  0xb5   :  { %4719 = vmatprep.subr.bf16.mxu0 %v4718_v32  ;;  %v115_v32 = vld [vmem:[#allocation5 + $0x38] sm:$0xff]  ;;  %v210_v56 = vld [vmem:[#allocation5 + $0x330] sm:$0xff] }
  0xb6   :  { %4691 = vmatpush1.bf16.msra.mxu1 %v4690_v31  ;;  %v217_v31 = vld [vmem:[#allocation5 + $0x368] sm:$0xff]  ;;  %v4792_v39 = vpack.c.bf16 %v123_v33, %v115_v32  ;;  %v186_v32 = vld [vmem:[#allocation5 + $0x270] sm:$0xff] }
  0xb7   :  { %4693 = vmatprep.subr.bf16.mxu1 %v4692_v36  ;;  %557 = vmatmul.mubr.f32.gmra.mrb[2].mxu0 %v7573_v43  ;;  %v4738_v36 = vpack.c.bf16 %v217_v31, %v209_v29  ;;  %v178_v29 = vld [vmem:[#allocation5 + $0x230] sm:$0xff]  ;;  %v289_v33 = vld [vmem:[#allocation5 + $0x5a8] sm:$0xff] }
  0xb8   :  { %4721 = vmatpush1.bf16.msra.mxu0 %v4720_v42  ;;  %858 = vmatprep.mubr.f32.mxu0 %v7559_v26  ;;  %v225_v42 = vld [vmem:[#allocation5 + $0x3a8] sm:$0xff]  ;;  %v4810_v37 = vpack.c.bf16 %v186_v32, %v178_v29  ;;  %v226_v6 = vld [vmem:[#allocation5 + $0x3b0] sm:$0xff]  ;;  %v352_v29 = vld [vmem:[#allocation5 + $0x7a0] sm:$0xff] }
  0xb9   :  { %4723 = vmatprep.subr.bf16.mxu0 %v4722_v46  ;;  %v131_v46 = vld [vmem:[#allocation5 + $0xb8] sm:$0xff]  ;;  %v242_v17 = vld [vmem:[#allocation5 + $0x430] sm:$0xff] }
  0xba   :  { %4695 = vmatpush1.bf16.msra.mxu1 %v4694_v44  ;;  %v233_v44 = vld [vmem:[#allocation5 + $0x3e8] sm:$0xff]  ;;  %v4796_v55 = vpack.c.bf16 %v139_v47, %v131_v46  ;;  %v258_v32 = vld [vmem:[#allocation5 + $0x4b0] sm:$0xff] }
  0xbb   :  { %4697 = vmatprep.subr.bf16.mxu1 %v4696_v50  ;;  %v224_v50 = vld [vmem:[#allocation5 + $0x3a0] sm:$0xff]  ;;  %v4742_v54 = vpack.c.bf16 %v233_v44, %v225_v42  ;;  %v202_v44 = vld [vmem:[#allocation5 + $0x2f0] sm:$0xff]  ;;  %v305_v46 = vld [vmem:[#allocation5 + $0x628] sm:$0xff] }
  0xbc   :  { %4725 = vmatpush1.bf16.msra.mxu0 %v4724_v57  ;;  %v241_v57 = vld [vmem:[#allocation5 + $0x428] sm:$0xff]  ;;  %v4744_v61 = vpack.c.bf16 %v232_v52, %v224_v50  ;;  %v4814_v52 = vpack.c.bf16 %v202_v44, %v194_v41  ;;  %v368_v41 = vld [vmem:[#allocation5 + $0x820] sm:$0xff]  ;;  %v274_v44 = vld [vmem:[#allocation5 + $0x530] sm:$0xff] }
  0xbd   :  { %4727 = vmatprep.subr.bf16.mxu0 %v4726_v59  ;;  %v147_v59 = vld [vmem:[#allocation5 + $0x138] sm:$0xff]  ;;  %v313_v47 = vld [vmem:[#allocation5 + $0x668] sm:$0xff] }
  0xbe   :  { %4699 = vmatpush1.bf16.msra.mxu1 %v4698_v58  ;;  %v249_v58 = vld [vmem:[#allocation5 + $0x468] sm:$0xff]  ;;  %v4800_v5 = vpack.c.bf16 %v155_v60, %v147_v59  ;;  %v4762_v53 = vpack.c.bf16 %v313_v47, %v305_v46  ;;  %v282_v47 = vld [vmem:[#allocation5 + $0x570] sm:$0xff] }
  0xbf   :  { %4701 = vmatprep.subr.bf16.mxu1 %v4700_v63  ;;  %v4746_v63 = vpack.c.bf16 %v249_v58, %v241_v57  ;;  %v218_v58 = vld [vmem:[#allocation5 + $0x370] sm:$0xff]  ;;  %v321_v59 = vld [vmem:[#allocation5 + $0x6a8] sm:$0xff] }
  0xc0   :  { %4729 = vmatpush1.bf16.msra.mxu0 %v4728_v7  ;;  %v257_v7 = vld [vmem:[#allocation5 + $0x4a8] sm:$0xff] }
  0xc1   :  { %705 = vmatmul.mubr.f32.vlgmr.msra.gmra.mrb[4].mxu1 %v7567_v28  ;;  %4731 = vmatprep.subr.bf16.mxu0 %v4730_v9  ;;  %v163_v9 = vld [vmem:[#allocation5 + $0x1b8] sm:$0xff]  ;;  %v329_v60 = vld [vmem:[#allocation5 + $0x6e8] sm:$0xff] }
  0xc2   :  { %4703 = vmatpush1.bf16.msra.mxu1 %v4702_v8  ;;  %710 = vmatprep.mubr.f32.mxu1 %v7569_v30  ;;  %v265_v8 = vld [vmem:[#allocation5 + $0x4e8] sm:$0xff]  ;;  %v4804_v16 = vpack.c.bf16 %v171_v10, %v163_v9 }
  0xc3   :  { %4705 = vmatprep.subr.bf16.mxu1 %v4704_v13  ;;  %v4750_v12 = vpack.c.bf16 %v265_v8, %v257_v7  ;;  %v256_v13 = vld [vmem:[#allocation5 + $0x4a0] sm:$0xff]  ;;  %v234_v8 = vld [vmem:[#allocation5 + $0x3f0] sm:$0xff]  ;;  %v337_v9 = vld [vmem:[#allocation5 + $0x728] sm:$0xff] }
  0xc4   :  { %4733 = vmatpush1.bf16.msra.mxu0 %v4732_v19  ;;  %v281_v19 = vld [vmem:[#allocation5 + $0x568] sm:$0xff]  ;;  %v4752_v22 = vpack.c.bf16 %v264_v14, %v256_v13  ;;  %v4822_v13 = vpack.c.bf16 %v234_v8, %v226_v6  ;;  %v400_v6 = vld [vmem:[#allocation5 + $0x920] sm:$0xff]  ;;  %v306_v8 = vld [vmem:[#allocation5 + $0x630] sm:$0xff] }
  0xc5   :  { %711 = vmatmul.mubr.f32.gmra.mrb[6].mxu1 %v7573_v43  ;;  %4735 = vmatprep.subr.bf16.mxu0 %v4734_v21  ;;  %v187_v21 = vld [vmem:[#allocation5 + $0x278] sm:$0xff]  ;;  %v4754_v24 = vpack.c.bf16 %v281_v19, %v273_v18  ;;  %v345_v10 = vld [vmem:[#allocation5 + $0x768] sm:$0xff]  ;;  %v250_v19 = vld [vmem:[#allocation5 + $0x470] sm:$0xff] }
  0xc6   :  { %4707 = vmatpush1.bf16.msra.mxu1 %v4706_v20  ;;  %781 = vmatprep.mubr.f32.mxu1 %v9231_v0  ;;  %v179_v20 = vld [vmem:[#allocation5 + $0x238] sm:$0xff]  ;;  %v4770_v14 = vpack.c.bf16 %v345_v10, %v337_v9  ;;  %v314_v10 = vld [vmem:[#allocation5 + $0x670] sm:$0xff] }
  0xc7   :  { %4710 = vmatprep.subr.msk.bf16.mxu1 %vm7546_vm2, %v4708_v25  ;;  %v272_v25 = vld [vmem:[#allocation5 + $0x520] sm:$0xff]  ;;  %v4808_v31 = vpack.c.bf16 %v187_v21, %v179_v20  ;;  %v353_v20 = vld [vmem:[#allocation5 + $0x7a8] sm:$0xff] }
  0xc8   :  { %4737 = vmatpush1.bf16.msra.mxu0 %v4736_v34  ;;  %v297_v34 = vld [vmem:[#allocation5 + $0x5e8] sm:$0xff] }
  0xc9   :  { %4739 = vmatprep.subr.bf16.mxu0 %v4738_v36  ;;  %v203_v36 = vld [vmem:[#allocation5 + $0x2f8] sm:$0xff]  ;;  %v4758_v38 = vpack.c.bf16 %v297_v34, %v289_v33  ;;  %v361_v21 = vld [vmem:[#allocation5 + $0x7e8] sm:$0xff]  ;;  %v266_v34 = vld [vmem:[#allocation5 + $0x4f0] sm:$0xff] }
  0xca   :  { %4713 = vmatpush1.bf16.msk.msra.mxu1 %vm7546_vm2, %v4711_v35  ;;  %v195_v35 = vld [vmem:[#allocation5 + $0x2b8] sm:$0xff] }
  0xcb   :  { %4793 = vmatprep.subr.bf16.mxu1 %v4792_v39  ;;  %v288_v39 = vld [vmem:[#allocation5 + $0x5a0] sm:$0xff]  ;;  %v4812_v42 = vpack.c.bf16 %v203_v36, %v195_v35  ;;  %v369_v35 = vld [vmem:[#allocation5 + $0x828] sm:$0xff] }
  0xcc   :  { %4741 = vmatpush1.bf16.msra.mxu0 %v4740_v48  ;;  %v211_v48 = vld [vmem:[#allocation5 + $0x338] sm:$0xff]  ;;  %v4760_v50 = vpack.c.bf16 %v296_v40, %v288_v39  ;;  %v377_v36 = vld [vmem:[#allocation5 + $0x868] sm:$0xff]  ;;  %v4830_v39 = vpack.c.bf16 %v266_v34, %v258_v32  ;;  %v338_v32 = vld [vmem:[#allocation5 + $0x730] sm:$0xff] }
  0xcd   :  { %4461 = vmatmul.mubr.msk.f32.vlgmr.msra.gmra.mrb[4].mxu1 %vm454_vm3, %v7552_v51  ;;  %4743 = vmatprep.subr.bf16.mxu0 %v4742_v54  ;;  %v4748_v51 = vpack.c.bf16 %v248_v3, %v240_v2  ;;  %v304_v54 = vld [vmem:[#allocation5 + $0x620] sm:$0xff]  ;;  %v4818_v2 = vpack.c.bf16 %v218_v58, %v210_v56  ;;  %v4766_v3 = vpack.c.bf16 %v329_v60, %v321_v59  ;;  %v290_v58 = vld [vmem:[#allocation5 + $0x5b0] sm:$0xff]  ;;  %v1126_v34 = vld [vmem:[#allocation8 + $0xc0] sm:$0xff] }
  0xce   :  { %4795 = vmatpush1.bf16.msra.mxu1 %v4794_v49  ;;  %787 = vmatprep.mubr.f32.mxu1 %v9231_v0  ;;  %v219_v49 = vld [vmem:[#allocation5 + $0x378] sm:$0xff]  ;;  %v4778_v40 = vpack.c.bf16 %v377_v36, %v369_v35  ;;  %v384_v56 = vld [vmem:[#allocation5 + $0x8a0] sm:$0xff]  ;;  %v298_v60 = vld [vmem:[#allocation5 + $0x5f0] sm:$0xff] }
  0xcf   :  { %4797 = vmatprep.subr.bf16.mxu1 %v4796_v55  ;;  %v312_v55 = vld [vmem:[#allocation5 + $0x660] sm:$0xff]  ;;  %v4816_v57 = vpack.c.bf16 %v219_v49, %v211_v48  ;;  %v385_v48 = vld [vmem:[#allocation5 + $0x8a8] sm:$0xff]  ;;  %v346_v36 = vld [vmem:[#allocation5 + $0x770] sm:$0xff] }
  0xd0   :  { %4745 = vmatpush1.bf16.msra.mxu0 %v4744_v61  ;;  %v227_v61 = vld [vmem:[#allocation5 + $0x3b8] sm:$0xff]  ;;  %v393_v49 = vld [vmem:[#allocation5 + $0x8e8] sm:$0xff] }
  0xd1   :  { %4462 = vmatmul.mubr.msk.f32.gmra.mrb[6].mxu1 %vm454_vm3, %v7562_v45  ;;  %4747 = vmatprep.subr.bf16.mxu0 %v4746_v63  ;;  %v4764_v63 = vpack.c.bf16 %v312_v55, %v304_v54  ;;  %v4834_v54 = vpack.c.bf16 %v282_v47, %v274_v44  ;;  %v4782_v55 = vpack.c.bf16 %v393_v49, %v385_v48  ;;  %v1134_v47 = vld [vmem:[#allocation8 + $0x100] sm:$0xff] }
  0xd2   :  { %4799 = vmatpush1.bf16.msra.mxu1 %v4798_v62  ;;  %1012 = vmatprep.mubr.f32.mxu1 %v7559_v26  ;;  %v4756_v26 = vpack.c.bf16 %v280_v27, %v272_v25  ;;  %v235_v62 = vld [vmem:[#allocation5 + $0x3f8] sm:$0xff]  ;;  %v4826_v25 = vpack.c.bf16 %v250_v19, %v242_v17  ;;  %v4774_v27 = vpack.c.bf16 %v361_v21, %v353_v20  ;;  %v322_v17 = vld [vmem:[#allocation5 + $0x6b0] sm:$0xff]  ;;  %v1110_v19 = vld [vmem:[#allocation8 + $0x40] sm:$0xff] }
  0xd3   :  { %4801 = vmatprep.subr.bf16.mxu1 %v4800_v5  ;;  %v328_v5 = vld [vmem:[#allocation5 + $0x6e0] sm:$0xff]  ;;  %v4820_v7 = vpack.c.bf16 %v235_v62, %v227_v61  ;;  %v401_v61 = vld [vmem:[#allocation5 + $0x928] sm:$0xff]  ;;  %v330_v21 = vld [vmem:[#allocation5 + $0x6f0] sm:$0xff] }
  0xd4   :  { %4749 = vmatpush1.bf16.msra.mxu0 %v4748_v51  ;;  %v243_v51 = vld [vmem:[#allocation5 + $0x438] sm:$0xff]  ;;  %v409_v62 = vld [vmem:[#allocation5 + $0x968] sm:$0xf] }
  0xd5   :  { %4751 = vmatprep.subr.bf16.mxu0 %v4750_v12  ;;  %v4768_v12 = vpack.c.bf16 %v328_v5, %v320_v4  ;;  %v4838_v4 = vpack.c.bf16 %v298_v60, %v290_v58  ;;  %v4786_v5 = vpack.c.bf16 %v409_v62, %v401_v61  ;;  %v1142_v48 = vld [vmem:[#allocation8 + $0x140] sm:$0xff] }
  0xd6   :  { %4803 = vmatpush1.bf16.msra.mxu1 %v4802_v11  ;;  %v251_v11 = vld [vmem:[#allocation5 + $0x478] sm:$0xff]  ;;  %v1150_v60 = vld [vmem:[#allocation8 + $0x180] sm:$0xff] }
  0xd7   :  { %4805 = vmatprep.subr.bf16.mxu1 %v4804_v16  ;;  %v344_v16 = vld [vmem:[#allocation5 + $0x760] sm:$0xff]  ;;  %v4824_v18 = vpack.c.bf16 %v251_v11, %v243_v51  ;;  %v1103_v51 = vld [vmem:[#allocation8 + $0x8] sm:$0xff]  ;;  %v1158_v61 = vld [vmem:[#allocation8 + $0x1c0] sm:$0xff] }
  0xd8   :  { %4753 = vmatpush1.bf16.msra.mxu0 %v4752_v22  ;;  %v259_v22 = vld [vmem:[#allocation5 + $0x4b8] sm:$0xff]  ;;  %v1111_v11 = vld [vmem:[#allocation8 + $0x48] sm:$0xff] }
  0xd9   :  { %4755 = vmatprep.subr.bf16.mxu0 %v4754_v24  ;;  %v4772_v24 = vpack.c.bf16 %v344_v16, %v336_v15  ;;  %v4842_v15 = vpack.c.bf16 %v314_v10, %v306_v8  ;;  %v7597_v16 = vpack.c.bf16 %v1111_v11, %v1103_v51  ;;  %v386_v8 = vld [vmem:[#allocation5 + $0x8b0] sm:$0xff]  ;;  %v1174_v10 = vld [vmem:[#allocation8 + $0x240] sm:$0xff] }
  0xda   :  { %4807 = vmatpush1.bf16.msra.mxu1 %v4806_v23  ;;  %v267_v23 = vld [vmem:[#allocation5 + $0x4f8] sm:$0xff]  ;;  %v394_v11 = vld [vmem:[#allocation5 + $0x8f0] sm:$0xff] }
  0xdb   :  { %4809 = vmatprep.subr.bf16.mxu1 %v4808_v31  ;;  %v360_v31 = vld [vmem:[#allocation5 + $0x7e0] sm:$0xff]  ;;  %v4828_v33 = vpack.c.bf16 %v267_v23, %v259_v22  ;;  %9558 = vst [vmem:[#allocation19_spill] sm:$0xff] %v7597_v16  ;;  %v1119_v22 = vld [vmem:[#allocation8 + $0x88] sm:$0xff] }
  0xdc   :  { %4757 = vmatpush1.bf16.msra.mxu0 %v4756_v26  ;;  %v275_v26 = vld [vmem:[#allocation5 + $0x538] sm:$0xff]  ;;  %v1127_v23 = vld [vmem:[#allocation8 + $0xc8] sm:$0xff] }
  0xdd   :  { %4759 = vmatprep.subr.bf16.mxu0 %v4758_v38  ;;  %v4776_v38 = vpack.c.bf16 %v360_v31, %v352_v29  ;;  %v4846_v29 = vpack.c.bf16 %v330_v21, %v322_v17  ;;  %v7604_v31 = vpack.c.bf16 %v1127_v23, %v1119_v22  ;;  %v1182_v21 = vld [vmem:[#allocation8 + $0x280] sm:$0xff] }
  0xde   :  { %4811 = vmatpush1.bf16.msra.mxu1 %v4810_v37  ;;  %v283_v37 = vld [vmem:[#allocation5 + $0x578] sm:$0xff]  ;;  %v1190_v22 = vld [vmem:[#allocation8 + $0x2c0] sm:$0xff] }
  0xdf   :  { %4813 = vmatprep.subr.bf16.mxu1 %v4812_v42  ;;  %v376_v42 = vld [vmem:[#allocation5 + $0x860] sm:$0xff]  ;;  %v4832_v46 = vpack.c.bf16 %v283_v37, %v275_v26  ;;  %9560 = vst [vmem:[#allocation21_spill] sm:$0xff] %v7604_v31  ;;  %v1135_v26 = vld [vmem:[#allocation8 + $0x108] sm:$0xff] }
  0xe0   :  { %4761 = vmatpush1.bf16.msra.mxu0 %v4760_v50  ;;  %v291_v50 = vld [vmem:[#allocation5 + $0x5b8] sm:$0xff]  ;;  %v1143_v37 = vld [vmem:[#allocation8 + $0x148] sm:$0xff] }
  0xe1   :  { %4763 = vmatprep.subr.bf16.mxu0 %v4762_v53  ;;  %v4780_v53 = vpack.c.bf16 %v376_v42, %v368_v41  ;;  %v4850_v42 = vpack.c.bf16 %v346_v36, %v338_v32  ;;  %v7615_v44 = vpack.c.bf16 %v1143_v37, %v1135_v26  ;;  %v1113_v32 = vld [vmem:[#allocation8 + $0x58] sm:$0xff]  ;;  %v1198_v36 = vld [vmem:[#allocation8 + $0x300] sm:$0xff]  ;;  %v1104_v37 = vld [vmem:[#allocation8 + $0x10] sm:$0xff] }
  0xe2   :  { %4815 = vmatpush1.bf16.msra.mxu1 %v4814_v52  ;;  %v299_v52 = vld [vmem:[#allocation5 + $0x5f8] sm:$0xff] }
  0xe3   :  { %4817 = vmatprep.subr.bf16.mxu1 %v4816_v57  ;;  %v392_v57 = vld [vmem:[#allocation5 + $0x8e0] sm:$0xff]  ;;  %v4836_v59 = vpack.c.bf16 %v299_v52, %v291_v50  ;;  %9562 = vst [vmem:[#allocation23_spill] sm:$0xff] %v7615_v44  ;;  %v362_v50 = vld [vmem:[#allocation5 + $0x7f0] sm:$0xff] }
  0xe4   :  { %4765 = vmatpush1.bf16.msra.mxu0 %v4764_v63  ;;  %v307_v63 = vld [vmem:[#allocation5 + $0x638] sm:$0xff]  ;;  %v1151_v52 = vld [vmem:[#allocation8 + $0x188] sm:$0xff] }
  0xe5   :  { %4767 = vmatprep.subr.bf16.mxu0 %v4766_v3  ;;  %v4784_v3 = vpack.c.bf16 %v392_v57, %v384_v56  ;;  %v7620_v56 = vpack.c.bf16 %v1142_v48, %v1134_v47 }
  0xe6   :  { %4819 = vmatpush1.bf16.msra.mxu1 %v4818_v2  ;;  %v315_v2 = vld [vmem:[#allocation5 + $0x678] sm:$0xff] }
  0xe7   :  { %4821 = vmatprep.subr.bf16.mxu1 %v4820_v7  ;;  %v408_v7 = vld [vmem:[#allocation5 + $0x960] sm:$0xf]  ;;  %v4840_v9 = vpack.c.bf16 %v315_v2, %v307_v63  ;;  %9563 = vst [vmem:[#allocation24_spill] sm:$0xff] %v7620_v56  ;;  %v1167_v63 = vld [vmem:[#allocation8 + $0x208] sm:$0xff] }
  0xe8   :  { %4769 = vmatpush1.bf16.msra.mxu0 %v4768_v12  ;;  %v323_v12 = vld [vmem:[#allocation5 + $0x6b8] sm:$0xff]  ;;  %v1175_v2 = vld [vmem:[#allocation8 + $0x248] sm:$0xff] }
  0xe9   :  { %4771 = vmatprep.subr.bf16.mxu0 %v4770_v14  ;;  %v4789_v14 = vpack.c.bf16 %v408_v7, %v400_v6  ;;  %v7630_v7 = vpack.c.bf16 %v1175_v2, %v1167_v63  ;;  %v1230_v63 = vld [vmem:[#allocation8 + $0x400] sm:$0xff] }
  0xea   :  { %4823 = vmatpush1.bf16.msra.mxu1 %v4822_v13  ;;  %v331_v13 = vld [vmem:[#allocation5 + $0x6f8] sm:$0xff]  ;;  %v1238_v2 = vld [vmem:[#allocation8 + $0x440] sm:$0xff] }
  0xeb   :  { %4825 = vmatprep.subr.bf16.mxu1 %v4824_v18  ;;  %v1102_v18 = vld [vmem:[#allocation8] sm:$0xff]  ;;  %v4844_v20 = vpack.c.bf16 %v331_v13, %v323_v12  ;;  %9566 = vst [vmem:[#allocation27_spill] sm:$0xff] %v7630_v7  ;;  %v1183_v12 = vld [vmem:[#allocation8 + $0x288] sm:$0xff] }
  0xec   :  { %4773 = vmatpush1.bf16.msra.mxu0 %v4772_v24  ;;  %v339_v24 = vld [vmem:[#allocation5 + $0x738] sm:$0xff]  ;;  %v1191_v13 = vld [vmem:[#allocation8 + $0x2c8] sm:$0xff] }
  0xed   :  { %4775 = vmatprep.subr.bf16.mxu0 %v4774_v27  ;;  %v7601_v27 = vpack.c.bf16 %v1110_v19, %v1102_v18  ;;  %v4862_v18 = vpack.c.bf16 %v394_v11, %v386_v8  ;;  %v7637_v19 = vpack.c.bf16 %v1191_v13, %v1183_v12  ;;  %v1255_v8 = vld [vmem:[#allocation8 + $0x4c8] sm:$0xff]  ;;  %v7682_v11 = vpack.c.bf16 %v1238_v2, %v1230_v63 }
  0xee   :  { %4827 = vmatpush1.bf16.msra.mxu1 %v4826_v25  ;;  %v347_v25 = vld [vmem:[#allocation5 + $0x778] sm:$0xff]  ;;  %v1295_v63 = vld [vmem:[#allocation8 + $0x608] sm:$0xff] }
  0xef   :  { %4829 = vmatprep.subr.bf16.mxu1 %v4828_v33  ;;  %9559 = vst [vmem:[#allocation20_spill] sm:$0xff] %v7601_v27  ;;  %v1118_v33 = vld [vmem:[#allocation8 + $0x80] sm:$0xff]  ;;  %v4848_v35 = vpack.c.bf16 %v347_v25, %v339_v24  ;;  %9568 = vst [vmem:[#allocation29_spill] sm:$0xff] %v7637_v19  ;;  %v410_v24 = vld [vmem:[#allocation5 + $0x970] sm:$0xf] }
  0xf0   :  { %4777 = vmatpush1.bf16.msra.mxu0 %v4776_v38  ;;  %v7606_v38 = vld [vmem:[#allocation2 + $0x10] sm:$0xff]  ;;  %v7612_v41 = vpack.c.bf16 %v1126_v34, %v1118_v33  ;;  %v1199_v25 = vld [vmem:[#allocation8 + $0x308] sm:$0xff]  ;;  %v7642_v33 = vpack.c.bf16 %v1190_v22, %v1182_v21  ;;  %9580 = vst [vmem:[#allocation41_spill] sm:$0xff] %v7682_v11  ;;  %v1160_v21 = vld [vmem:[#allocation8 + $0x1d0] sm:$0xff] }
  0xf1   :  { %4779 = vmatprep.subr.bf16.mxu0 %v4778_v40  ;;  %v363_v40 = vld [vmem:[#allocation5 + $0x7f8] sm:$0xff]  ;;  %v1263_v22 = vld [vmem:[#allocation8 + $0x508] sm:$0xff] }
  0xf2   :  { %4831 = vmatpush1.bf16.msra.mxu1 %v4830_v39  ;;  %v355_v39 = vld [vmem:[#allocation5 + $0x7b8] sm:$0xff]  ;;  %9561 = vst [vmem:[#allocation22_spill] sm:$0xff] %v7612_v41  ;;  %9569 = vst [vmem:[#allocation30_spill] sm:$0xff] %v7642_v33  ;;  %v1303_v2 = vld [vmem:[#allocation8 + $0x648] sm:$0xff] }
  0xf3   :  { %4833 = vmatprep.subr.bf16.mxu1 %v4832_v46  ;;  %859 = vmatmul.mubr.f32.vlgmr.msra.gmra.mrb[4].mxu0 %v7567_v28  ;;  %v354_v46 = vld [vmem:[#allocation5 + $0x7b0] sm:$0xff]  ;;  %v4852_v49 = vpack.c.bf16 %v363_v40, %v355_v39  ;;  %v1112_v39 = vld [vmem:[#allocation8 + $0x50] sm:$0xff] }
  0xf4   :  { %4781 = vmatpush1.bf16.msra.mxu0 %v4780_v53  ;;  %864 = vmatprep.mubr.f32.mxu0 %v7569_v30  ;;  %v1159_v53 = vld [vmem:[#allocation8 + $0x1c8] sm:$0xff]  ;;  %v4854_v57 = vpack.c.bf16 %v362_v50, %v354_v46  ;;  %v1129_v46 = vld [vmem:[#allocation8 + $0xd8] sm:$0xff]  ;;  %v7658_v48 = vpack.c.bf16 %v1112_v39, %v1104_v37  ;;  %v1222_v50 = vld [vmem:[#allocation8 + $0x3c0] sm:$0xff] }
  0xf5   :  { %4783 = vmatprep.subr.bf16.mxu0 %v4782_v55  ;;  %v379_v55 = vld [vmem:[#allocation5 + $0x878] sm:$0xff]  ;;  %v7624_v58 = vpack.c.bf16 %v1159_v53, %v1151_v52  ;;  %v1223_v40 = vld [vmem:[#allocation8 + $0x3c8] sm:$0xff] }
  0xf6   :  { %4835 = vmatpush1.bf16.msra.mxu1 %v4834_v54  ;;  %v371_v54 = vld [vmem:[#allocation5 + $0x838] sm:$0xff]  ;;  %9573 = vst [vmem:[#allocation34_spill] sm:$0xff] %v7658_v48 }
  0xf7   :  { %4837 = vmatprep.subr.bf16.mxu1 %v4836_v59  ;;  %865 = vmatmul.mubr.f32.gmra.mrb[6].mxu0 %v7573_v43  ;;  %9564 = vst [vmem:[#allocation25_spill] sm:$0xff] %v7624_v58  ;;  %v370_v59 = vld [vmem:[#allocation5 + $0x830] sm:$0xff]  ;;  %v4856_v62 = vpack.c.bf16 %v379_v55, %v371_v54  ;;  %v1120_v52 = vld [vmem:[#allocation8 + $0x90] sm:$0xff] }
  0xf8   :  { %4785 = vmatpush1.bf16.msra.mxu0 %v4784_v3  ;;  %935 = vmatprep.mubr.f32.mxu0 %v9231_v0  ;;  %v387_v3 = vld [vmem:[#allocation5 + $0x8b8] sm:$0xff] }
  0xf9   :  { %4788 = vmatprep.subr.msk.bf16.mxu0 %vm7546_vm2, %v4786_v5  ;;  %v7627_v5 = vpack.c.bf16 %v1158_v61, %v1150_v60  ;;  %v1128_v55 = vld [vmem:[#allocation8 + $0xd0] sm:$0xff]  ;;  %v1137_v60 = vld [vmem:[#allocation8 + $0x118] sm:$0xff] }
  0xfa   :  { %4839 = vmatpush1.bf16.msra.mxu1 %v4838_v4  ;;  %v395_v4 = vld [vmem:[#allocation5 + $0x8f8] sm:$0xff]  ;;  %v1145_v61 = vld [vmem:[#allocation8 + $0x158] sm:$0xff] }
  0xfb   :  { %4841 = vmatprep.subr.bf16.mxu1 %v4840_v9  ;;  %9565 = vst [vmem:[#allocation26_spill] sm:$0xff] %v7627_v5  ;;  %v1166_v9 = vld [vmem:[#allocation8 + $0x200] sm:$0xff]  ;;  %v4860_v51 = vpack.c.bf16 %v395_v4, %v387_v3  ;;  %v1136_v3 = vld [vmem:[#allocation8 + $0x110] sm:$0xff] }
  0xfc   :  { %4791 = vmatpush1.bf16.msk.msra.mxu0 %vm7546_vm2, %v4789_v14  ;;  %v403_v14 = vld [vmem:[#allocation5 + $0x938] sm:$0xff]  ;;  %v7634_v17 = vpack.c.bf16 %v1174_v10, %v1166_v9  ;;  %v1153_v9 = vld [vmem:[#allocation8 + $0x198] sm:$0xff] }
  0xfd   :  { %4871 = vmatprep.subr.bf16.mxu0 %v7597_v16  ;;  %v1144_v4 = vld [vmem:[#allocation8 + $0x150] sm:$0xff]  ;;  %v1161_v10 = vld [vmem:[#allocation8 + $0x1d8] sm:$0xff] }
  0xfe   :  { %4843 = vmatpush1.bf16.msra.mxu1 %v4842_v15  ;;  %v411_v15 = vld [vmem:[#allocation5 + $0x978] sm:$0xf]  ;;  %9567 = vst [vmem:[#allocation28_spill] sm:$0xff] %v7634_v17  ;;  %v7686_v12 = vpack.c.bf16 %v1144_v4, %v1136_v3  ;;  %v1201_v3 = vld [vmem:[#allocation8 + $0x318] sm:$0xff] }
  0xff   :  { %4845 = vmatprep.subr.bf16.mxu1 %v4844_v20  ;;  %4465 = vmatmul.mubr.msk.f32.vlgmr.msra.gmra.mrb[4].mxu0 %vm454_vm3, %v7606_v38  ;;  %v402_v20 = vld [vmem:[#allocation5 + $0x930] sm:$0xff]  ;;  %v4864_v23 = vpack.c.bf16 %v411_v15, %v403_v14  ;;  %v1246_v14 = vld [vmem:[#allocation8 + $0x480] sm:$0xff]  ;;  %v1176_v39 = vld [vmem:[#allocation8 + $0x250] sm:$0xff] }
 0x100   :  { %4873 = vmatpush1.bf16.msra.mxu0 %v7601_v27  ;;  %941 = vmatprep.mubr.f32.mxu0 %v9231_v0  ;;  %v4867_v34 = vpack.c.bf16 %v410_v24, %v402_v20  ;;  %9581 = vst [vmem:[#allocation42_spill] sm:$0xff] %v7686_v12  ;;  %v1254_v15 = vld [vmem:[#allocation8 + $0x4c0] sm:$0xff]  ;;  %v7691_v20 = vpack.c.bf16 %v1161_v10, %v1153_v9  ;;  %v1169_v24 = vld [vmem:[#allocation8 + $0x218] sm:$0xff] }
 0x101   :  { %4875 = vmatprep.subr.bf16.mxu0 %v7604_v31  ;;  %v1209_v4 = vld [vmem:[#allocation8 + $0x358] sm:$0xff]  ;;  %v7725_v9 = vpack.c.bf16 %v1303_v2, %v1295_v63  ;;  %v1294_v10 = vld [vmem:[#allocation8 + $0x600] sm:$0xff] }
 0x102   :  { %4847 = vmatpush1.bf16.msra.mxu1 %v4846_v29  ;;  %v1105_v29 = vld [vmem:[#allocation8 + $0x18] sm:$0xff]  ;;  %9583 = vst [vmem:[#allocation44_spill] sm:$0xff] %v7691_v20 }
 0x103   :  { %4849 = vmatprep.subr.bf16.mxu1 %v4848_v35  ;;  %4466 = vmatmul.mubr.msk.f32.gmra.mrb[6].mxu0 %vm454_vm3, %v7562_v45  ;;  %v378_v45 = vld [vmem:[#allocation5 + $0x870] sm:$0xff]  ;;  %v7650_v26 = vpack.c.bf16 %v1113_v32, %v1105_v29  ;;  %9594 = vst [vmem:[#allocation55_spill] sm:$0xff] %v7725_v9 }
 0x104   :  { %4877 = vmatpush1.bf16.msra.mxu0 %v7612_v41  ;;  %1422 = vmatprep.mubr.f32.mxu0 %v9231_v0  ;;  %v4858_v6 = vpack.c.bf16 %v378_v45, %v370_v59  ;;  %v1239_v59 = vld [vmem:[#allocation8 + $0x448] sm:$0xff] }
 0x105   :  { %4879 = vmatprep.subr.bf16.mxu0 %v7615_v44  ;;  %9571 = vst [vmem:[#allocation32_spill] sm:$0xff] %v7650_v26 }
 0x106   :  { %4851 = vmatpush1.bf16.msra.mxu1 %v4850_v42  ;;  %v1121_v42 = vld [vmem:[#allocation8 + $0x98] sm:$0xff] }
 0x107   :  { %4853 = vmatprep.subr.bf16.mxu1 %v4852_v49  ;;  %v1214_v49 = vld [vmem:[#allocation8 + $0x380] sm:$0xff]  ;;  %v7663_v54 = vpack.c.bf16 %v1129_v46, %v1121_v42  ;;  %v1185_v42 = vld [vmem:[#allocation8 + $0x298] sm:$0xff] }
 0x108   :  { %4881 = vmatpush1.bf16.msra.mxu0 %v7620_v56  ;;  %v7668_v1 = vpack.c.bf16 %v1222_v50, %v1214_v49  ;;  %v1193_v46 = vld [vmem:[#allocation8 + $0x2d8] sm:$0xff] }
 0x109   :  { %4883 = vmatprep.subr.bf16.mxu0 %v7624_v58  ;;  %9575 = vst [vmem:[#allocation36_spill] sm:$0xff] %v7663_v54 }
 0x10a   :  { %4855 = vmatpush1.bf16.msra.mxu1 %v4854_v57  ;;  %v1231_v57 = vld [vmem:[#allocation8 + $0x408] sm:$0xff]  ;;  %9576 = vst [vmem:[#allocation37_spill] sm:$0xff] %v7668_v1 }
 0x10b   :  { %4857 = vmatprep.subr.bf16.mxu1 %v4856_v62  ;;  %v7672_v62 = vpack.c.bf16 %v1128_v55, %v1120_v52  ;;  %v7674_v45 = vpack.c.bf16 %v1239_v59, %v1231_v57  ;;  %v1278_v55 = vld [vmem:[#allocation8 + $0x580] sm:$0xff]  ;;  %v1184_v59 = vld [vmem:[#allocation8 + $0x290] sm:$0xff] }
 0x10c   :  { %4885 = vmatpush1.bf16.msra.mxu0 %v7627_v5  ;;  %v1286_v57 = vld [vmem:[#allocation8 + $0x5c0] sm:$0xff] }
 0x10d   :  { %1013 = vmatmul.mubr.f32.vlgmr.msra.gmra.mrb[8].mxu1 %v7567_v28  ;;  %4887 = vmatprep.subr.bf16.mxu0 %v7630_v7  ;;  %v1207_v28 = vld [vmem:[#allocation8 + $0x348] sm:$0xff]  ;;  %9577 = vst [vmem:[#allocation38_spill] sm:$0xff] %v7672_v62  ;;  %9578 = vst [vmem:[#allocation39_spill] sm:$0xff] %v7674_v45 }
 0x10e   :  { %4859 = vmatpush1.bf16.msra.mxu1 %v4858_v6  ;;  %1018 = vmatprep.mubr.f32.mxu1 %v7569_v30  ;;  %v7645_v35 = vpack.c.bf16 %v1207_v28, %v1199_v25  ;;  %v1206_v30 = vld [vmem:[#allocation8 + $0x340] sm:$0xff]  ;;  %v1247_v6 = vld [vmem:[#allocation8 + $0x488] sm:$0xff]  ;;  %v1177_v25 = vld [vmem:[#allocation8 + $0x258] sm:$0xff]  ;;  %v7695_v28 = vpack.c.bf16 %v1254_v15, %v1246_v14  ;;  %v7728_v15 = vpack.c.bf16 %v1209_v4, %v1201_v3 }
 0x10f   :  { %4861 = vmatprep.subr.bf16.mxu1 %v4860_v51  ;;  %v7653_v47 = vpack.c.bf16 %v1206_v30, %v1198_v36  ;;  %v7254_v51 = vld [vmem:[#allocation2 + $0x28] sm:$0xff]  ;;  %v7688_v13 = vpack.c.bf16 %v1255_v8, %v1247_v6  ;;  %v1270_v36 = vld [vmem:[#allocation8 + $0x540] sm:$0xff]  ;;  %v7704_v37 = vpack.c.bf16 %v1177_v25, %v1169_v24  ;;  %v7719_v6 = vpack.c.bf16 %v1286_v57, %v1278_v55  ;;  %v1225_v24 = vld [vmem:[#allocation8 + $0x3d8] sm:$0xff] }
 0x110   :  { %4889 = vmatpush1.bf16.msra.mxu0 %v7634_v17  ;;  %9570 = vst [vmem:[#allocation31_spill] sm:$0xff] %v7645_v35  ;;  %9584 = vst [vmem:[#allocation45_spill] sm:$0xff] %v7695_v28  ;;  %v1168_v30 = vld [vmem:[#allocation8 + $0x210] sm:$0xff]  ;;  %v1335_v55 = vld [vmem:[#allocation8 + $0x748] sm:$0xff] }
 0x111   :  { %1019 = vmatmul.mubr.f32.gmra.mrb[10].mxu1 %v7573_v43  ;;  %4891 = vmatprep.subr.bf16.mxu0 %v7637_v19  ;;  %v1215_v43 = vld [vmem:[#allocation8 + $0x388] sm:$0xff]  ;;  %9572 = vst [vmem:[#allocation33_spill] sm:$0xff] %v7653_v47  ;;  %9582 = vst [vmem:[#allocation43_spill] sm:$0xff] %v7688_v13  ;;  %v7711_v50 = vpack.c.bf16 %v1176_v39, %v1168_v30  ;;  %v1200_v14 = vld [vmem:[#allocation8 + $0x310] sm:$0xff] }
 0x112   :  { %4863 = vmatpush1.bf16.msra.mxu1 %v4862_v18  ;;  %1089 = vmatprep.mubr.f32.mxu1 %v9231_v0  ;;  %v7661_v53 = vpack.c.bf16 %v1223_v40, %v1215_v43  ;;  %v1152_v18 = vld [vmem:[#allocation8 + $0x190] sm:$0xff]  ;;  %9587 = vst [vmem:[#allocation48_spill] sm:$0xff] %v7704_v37  ;;  %v1279_v43 = vld [vmem:[#allocation8 + $0x588] sm:$0xff]  ;;  %9592 = vst [vmem:[#allocation53_spill] sm:$0xff] %v7719_v6 }
 0x113   :  { %4866 = vmatprep.subr.msk.bf16.mxu1 %vm7546_vm2, %v4864_v23  ;;  %v1271_v23 = vld [vmem:[#allocation8 + $0x548] sm:$0xff]  ;;  %v7699_v29 = vpack.c.bf16 %v1160_v21, %v1152_v18  ;;  %9589 = vst [vmem:[#allocation50_spill] sm:$0xff] %v7711_v50  ;;  %9595 = vst [vmem:[#allocation56_spill] sm:$0xff] %v7728_v15  ;;  %v1208_v18 = vld [vmem:[#allocation8 + $0x350] sm:$0xff] }
 0x114   :  { %4893 = vmatpush1.bf16.msra.mxu0 %v7642_v33  ;;  %9574 = vst [vmem:[#allocation35_spill] sm:$0xff] %v7661_v53  ;;  %v7701_v32 = vpack.c.bf16 %v1271_v23, %v1263_v22  ;;  %v1287_v40 = vld [vmem:[#allocation8 + $0x5c8] sm:$0xff]  ;;  %v1217_v23 = vld [vmem:[#allocation8 + $0x398] sm:$0xff]  ;;  %v1310_v30 = vld [vmem:[#allocation8 + $0x680] sm:$0xff] }
 0x115   :  { %4895 = vmatprep.subr.bf16.mxu0 %v7645_v35  ;;  %9585 = vst [vmem:[#allocation46_spill] sm:$0xff] %v7699_v29  ;;  %v7713_v52 = vpack.c.bf16 %v1287_v40, %v1279_v43  ;;  %v1311_v21 = vld [vmem:[#allocation8 + $0x688] sm:$0xff]  ;;  %v1318_v39 = vld [vmem:[#allocation8 + $0x6c0] sm:$0xff]  ;;  %v1216_v43 = vld [vmem:[#allocation8 + $0x390] sm:$0xff]  ;;  %v7740_v40 = vpack.c.bf16 %v1225_v24, %v1217_v23 }
 0x116   :  { %4869 = vmatpush1.bf16.msk.msra.mxu1 %vm7546_vm2, %v4867_v34  ;;  %9586 = vst [vmem:[#allocation47_spill] sm:$0xff] %v7701_v32  ;;  %v1262_v34 = vld [vmem:[#allocation8 + $0x500] sm:$0xff]  ;;  %v1319_v22 = vld [vmem:[#allocation8 + $0x6c8] sm:$0xff]  ;;  %v1233_v57 = vld [vmem:[#allocation8 + $0x418] sm:$0xff] }
 0x117   :  { %4935 = vmatprep.subr.bf16.mxu1 %v7650_v26  ;;  %v7707_v49 = vpack.c.bf16 %v1270_v36, %v1262_v34  ;;  %9590 = vst [vmem:[#allocation51_spill] sm:$0xff] %v7713_v52  ;;  %v7735_v34 = vpack.c.bf16 %v1208_v18, %v1200_v14  ;;  %v7737_v36 = vpack.c.bf16 %v1319_v22, %v1311_v21  ;;  %9599 = vst [vmem:[#allocation60_spill] sm:$0xff] %v7740_v40  ;;  %v1326_v3 = vld [vmem:[#allocation8 + $0x700] sm:$0xff]  ;;  %v1240_v14 = vld [vmem:[#allocation8 + $0x450] sm:$0xff] }
 0x118   :  { %4897 = vmatpush1.bf16.msra.mxu0 %v7653_v47  ;;  %v1334_v4 = vld [vmem:[#allocation8 + $0x740] sm:$0xff]  ;;  %v1343_v18 = vld [vmem:[#allocation8 + $0x788] sm:$0xff]  ;;  %v1249_v22 = vld [vmem:[#allocation8 + $0x498] sm:$0xff] }
 0x119   :  { %4469 = vmatmul.mubr.msk.f32.vlgmr.msra.gmra.mrb[8].mxu1 %vm454_vm3, %v7606_v38  ;;  %4899 = vmatprep.subr.bf16.mxu0 %v7661_v53  ;;  %v7678_v38 = vpack.c.bf16 %v1145_v61, %v1137_v60  ;;  %9588 = vst [vmem:[#allocation49_spill] sm:$0xff] %v7707_v49  ;;  %v7716_v60 = vpack.c.bf16 %v1193_v46, %v1185_v42  ;;  %v1192_v61 = vld [vmem:[#allocation8 + $0x2d0] sm:$0xff]  ;;  %9597 = vst [vmem:[#allocation58_spill] sm:$0xff] %v7735_v34  ;;  %v1327_v46 = vld [vmem:[#allocation8 + $0x708] sm:$0xff] }
 0x11a   :  { %4937 = vmatpush1.bf16.msra.mxu1 %v7658_v48  ;;  %1095 = vmatprep.mubr.f32.mxu1 %v9231_v0  ;;  %v7723_v8 = vpack.c.bf16 %v1192_v61, %v1184_v59  ;;  %9598 = vst [vmem:[#allocation59_spill] sm:$0xff] %v7737_v36  ;;  %v1224_v42 = vld [vmem:[#allocation8 + $0x3d0] sm:$0xff]  ;;  %v1241_v59 = vld [vmem:[#allocation8 + $0x458] sm:$0xff]  ;;  %v7743_v61 = vpack.c.bf16 %v1318_v39, %v1310_v30  ;;  %v1351_v21 = vld [vmem:[#allocation8 + $0x7c8] sm:$0xff] }
 0x11b   :  { %4939 = vmatprep.subr.bf16.mxu1 %v7663_v54  ;;  %9579 = vst [vmem:[#allocation40_spill] sm:$0xff] %v7678_v38  ;;  %9591 = vst [vmem:[#allocation52_spill] sm:$0xff] %v7716_v60  ;;  %v7747_v63 = vpack.c.bf16 %v1224_v42, %v1216_v43  ;;  %v7749_v2 = vpack.c.bf16 %v1335_v55, %v1327_v46  ;;  %v1257_v23 = vld [vmem:[#allocation8 + $0x4d8] sm:$0xff]  ;;  %v7755_v24 = vpack.c.bf16 %v1334_v4, %v1326_v3  ;;  %v1342_v43 = vld [vmem:[#allocation8 + $0x780] sm:$0xff] }
 0x11c   :  { %4901 = vmatpush1.bf16.msra.mxu0 %v7668_v1  ;;  %9593 = vst [vmem:[#allocation54_spill] sm:$0xff] %v7723_v8  ;;  %9600 = vst [vmem:[#allocation61_spill] sm:$0xff] %v7743_v61  ;;  %v7761_v39 = vpack.c.bf16 %v1351_v21, %v1343_v18  ;;  %v1350_v42 = vld [vmem:[#allocation8 + $0x7c0] sm:$0xff]  ;;  %v1248_v46 = vld [vmem:[#allocation8 + $0x490] sm:$0xff]  ;;  %v7764_v55 = vpack.c.bf16 %v1257_v23, %v1249_v22 }
 0x11d   :  { %4470 = vmatmul.mubr.msk.f32.gmra.mrb[10].mxu1 %vm454_vm3, %v7254_v51  ;;  %4903 = vmatprep.subr.bf16.mxu0 %v7674_v45  ;;  %v1302_v51 = vld [vmem:[#allocation8 + $0x640] sm:$0xff]  ;;  %9601 = vst [vmem:[#allocation62_spill] sm:$0xff] %v7747_v63  ;;  %9602 = vst [vmem:[#allocation63_spill] sm:$0xff] %v7749_v2  ;;  %v1265_v3 = vld [vmem:[#allocation8 + $0x518] sm:$0xff] }
 0x11e   :  { %4941 = vmatpush1.bf16.msra.mxu1 %v7672_v62  ;;  %1493 = vmatprep.mubr.f32.mxu1 %v9231_v0  ;;  %v7731_v25 = vpack.c.bf16 %v1302_v51, %v1294_v10  ;;  %v1232_v10 = vld [vmem:[#allocation8 + $0x410] sm:$0xff]  ;;  %v7752_v51 = vpack.c.bf16 %v1241_v59, %v1233_v57  ;;  %9604 = vst [vmem:[#allocation65_spill] sm:$0xff] %v7755_v24  ;;  %9606 = vst [vmem:[#allocation67_spill] sm:$0xff] %v7761_v39  ;;  %v1107_v59 = vld [vmem:[#allocation8 + $0x28] sm:$0xff] }
 0x11f   :  { %4943 = vmatprep.subr.bf16.mxu1 %v7678_v38  ;;  %v7759_v30 = vpack.c.bf16 %v1240_v14, %v1232_v10  ;;  %9607 = vst [vmem:[#allocation68_spill] sm:$0xff] %v7764_v55  ;;  %v1256_v57 = vld [vmem:[#allocation8 + $0x4d0] sm:$0xff]  ;;  %v1115_v0 = vld [vmem:[#allocation8 + $0x68] sm:$0xff]  ;;  %v1273_v4 = vld [vmem:[#allocation8 + $0x558] sm:$0xff] }
 0x120   :  { %4905 = vmatpush1.bf16.msra.mxu0 %v7682_v11  ;;  %9596 = vst [vmem:[#allocation57_spill] sm:$0xff] %v7731_v25  ;;  %9603 = vst [vmem:[#allocation64_spill] sm:$0xff] %v7752_v51  ;;  %v7771_v10 = vpack.c.bf16 %v1256_v57, %v1248_v46  ;;  %v7773_v14 = vpack.c.bf16 %v1115_v0, %v1107_v59  ;;  %v1264_v18 = vld [vmem:[#allocation8 + $0x510] sm:$0xff]  ;;  %v1106_v21 = vld [vmem:[#allocation8 + $0x20] sm:$0xff]  ;;  %v7776_v23 = vpack.c.bf16 %v1273_v4, %v1265_v3 }
 0x121   :  { %4907 = vmatprep.subr.bf16.mxu0 %v7688_v13  ;;  %9605 = vst [vmem:[#allocation66_spill] sm:$0xff] %v7759_v30  ;;  %v1114_v22 = vld [vmem:[#allocation8 + $0x60] sm:$0xff]  ;;  %v1280_v57 = vld [vmem:[#allocation8 + $0x590] sm:$0xff] }
 0x122   :  { %4945 = vmatpush1.bf16.msra.mxu1 %v7686_v12  ;;  %9609 = vst [vmem:[#allocation70_spill] sm:$0xff] %v7771_v10  ;;  %9610 = vst [vmem:[#allocation71_spill] sm:$0xff] %v7773_v14  ;;  %v1122_v59 = vld [vmem:[#allocation8 + $0xa0] sm:$0xff] }
 0x123   :  { %4947 = vmatprep.subr.bf16.mxu1 %v7691_v20  ;;  %9611 = vst [vmem:[#allocation72_spill] sm:$0xff] %v7776_v23  ;;  %v1130_v3 = vld [vmem:[#allocation8 + $0xe0] sm:$0xff] }
 0x124   :  { %4909 = vmatpush1.bf16.msra.mxu0 %v7695_v28 }
 0x125   :  { %4911 = vmatprep.subr.bf16.mxu0 %v7701_v32 }
 0x126   :  { %4949 = vmatpush1.bf16.msra.mxu1 %v7699_v29 }
 0x127   :  { %4951 = vmatprep.subr.bf16.mxu1 %v7704_v37 }
 0x128   :  { %4913 = vmatpush1.bf16.msra.mxu0 %v7707_v49 }
 0x129   :  { %4915 = vmatprep.subr.bf16.mxu0 %v7713_v52 }
 0x12a   :  { %4953 = vmatpush1.bf16.msra.mxu1 %v7711_v50 }
 0x12b   :  { %4955 = vmatprep.subr.bf16.mxu1 %v7716_v60 }
 0x12c   :  { %4917 = vmatpush1.bf16.msra.mxu0 %v7719_v6 }
 0x12d   :  { %4919 = vmatprep.subr.bf16.mxu0 %v7725_v9 }
 0x12e   :  { %4957 = vmatpush1.bf16.msra.mxu1 %v7723_v8 }
 0x12f   :  { %4959 = vmatprep.subr.bf16.mxu1 %v7728_v15 }
 0x130   :  { %4921 = vmatpush1.bf16.msra.mxu0 %v7731_v25 }
 0x131   :  { %4923 = vmatprep.subr.bf16.mxu0 %v7737_v36  ;;  %v1235_v36 = vld [vmem:[#allocation8 + $0x428] sm:$0xff] }
 0x132   :  { %4961 = vmatpush1.bf16.msra.mxu1 %v7735_v34 }
 0x133   :  { %4963 = vmatprep.subr.bf16.mxu1 %v7740_v40 }
 0x134   :  { %4925 = vmatpush1.bf16.msra.mxu0 %v7743_v61  ;;  %v1321_v61 = vld [vmem:[#allocation8 + $0x6d8] sm:$0xff] }
 0x135   :  { %4927 = vmatprep.subr.bf16.mxu0 %v7749_v2  ;;  %v1123_v2 = vld [vmem:[#allocation8 + $0xa8] sm:$0xff] }
 0x136   :  { %4965 = vmatpush1.bf16.msra.mxu1 %v7747_v63  ;;  %v7767_v63 = vpack.c.bf16 %v1350_v42, %v1342_v43  ;;  %v1281_v43 = vld [vmem:[#allocation8 + $0x598] sm:$0xff] }
 0x137   :  { %4967 = vmatprep.subr.bf16.mxu1 %v7752_v51  ;;  %v1272_v51 = vld [vmem:[#allocation8 + $0x550] sm:$0xff]  ;;  %v1289_v42 = vld [vmem:[#allocation8 + $0x5d8] sm:$0xff] }
 0x138   :  { %4929 = vmatpush1.bf16.msra.mxu0 %v7755_v24  ;;  %9608 = vst [vmem:[#allocation69_spill] sm:$0xff] %v7767_v63  ;;  %v1131_v24 = vld [vmem:[#allocation8 + $0xe8] sm:$0xff]  ;;  %v7783_v0 = vpack.c.bf16 %v1272_v51, %v1264_v18  ;;  %v7788_v4 = vpack.c.bf16 %v1289_v42, %v1281_v43  ;;  %v7792_v51 = vpack.c.bf16 %v1130_v3, %v1122_v59  ;;  %v1296_v18 = vld [vmem:[#allocation8 + $0x610] sm:$0xff]  ;;  %v1138_v43 = vld [vmem:[#allocation8 + $0x120] sm:$0xff] }
 0x139   :  { %4931 = vmatprep.subr.bf16.mxu0 %v7761_v39  ;;  %v7785_v46 = vpack.c.bf16 %v1131_v24, %v1123_v2  ;;  %v1139_v39 = vld [vmem:[#allocation8 + $0x128] sm:$0xff]  ;;  %v1146_v42 = vld [vmem:[#allocation8 + $0x160] sm:$0xff] }
 0x13a   :  { %4969 = vmatpush1.bf16.msra.mxu1 %v7759_v30  ;;  %v7779_v30 = vpack.c.bf16 %v1114_v22, %v1106_v21  ;;  %9613 = vst [vmem:[#allocation74_spill] sm:$0xff] %v7783_v0  ;;  %9615 = vst [vmem:[#allocation76_spill] sm:$0xff] %v7788_v4  ;;  %v9616_v21 = vmov 0.0   ;;  %v1297_v22 = vld [vmem:[#allocation8 + $0x618] sm:$0xff]  ;;  %v1155_v59 = vld [vmem:[#allocation8 + $0x1a8] sm:$0xff] }
 0x13b   :  { %4971 = vmatprep.subr.bf16.mxu1 %v7764_v55  ;;  %9614 = vst [vmem:[#allocation75_spill] sm:$0xff] %v7785_v46  ;;  %v1288_v55 = vld [vmem:[#allocation8 + $0x5d0] sm:$0xff]  ;;  %9617 = vst [vmem:[#allocation77_spill] sm:$0xff] %v7792_v51  ;;  %v1163_v3 = vld [vmem:[#allocation8 + $0x1e8] sm:$0xff] }
 0x13c   :  { %4933 = vmatpush1.bf16.msra.mxu0 %v7767_v63  ;;  %9612 = vst [vmem:[#allocation73_spill] sm:$0xff] %v7779_v30  ;;  %v1147_v63 = vld [vmem:[#allocation8 + $0x168] sm:$0xff]  ;;  %v7797_v2 = vpack.c.bf16 %v1288_v55, %v1280_v57  ;;  %v1312_v55 = vld [vmem:[#allocation8 + $0x690] sm:$0xff]  ;;  %v1162_v57 = vld [vmem:[#allocation8 + $0x1e0] sm:$0xff] }
 0x13d   :  { %4999 = vmatprep.subr.bf16.mxu0 %v7773_v14  ;;  %v7799_v24 = vpack.c.bf16 %v1147_v63, %v1139_v39  ;;  %v1313_v14 = vld [vmem:[#allocation8 + $0x698] sm:$0xff]  ;;  %v7811_v39 = vpack.c.bf16 %v1163_v3, %v1155_v59  ;;  %v1328_v59 = vld [vmem:[#allocation8 + $0x710] sm:$0xff] }
 0x13e   :  { %4973 = vmatpush1.bf16.msra.mxu1 %v7771_v10  ;;  %v1305_v10 = vld [vmem:[#allocation8 + $0x658] sm:$0xff]  ;;  %9618 = vst [vmem:[#allocation78_spill] sm:$0xff] %v7797_v2 }
 0x13f   :  { %4975 = vmatprep.subr.bf16.mxu1 %v7776_v23  ;;  %1423 = vmatmul.mubr.f32.vlgmr.msra.gmra.mrb[8].mxu0 %v9616_v21  ;;  %9619 = vst [vmem:[#allocation79_spill] sm:$0xff] %v7799_v24  ;;  %v7802_v23 = vpack.c.bf16 %v1305_v10, %v1297_v22  ;;  %9623 = vst [vmem:[#allocation83_spill] sm:$0xff] %v7811_v39  ;;  %v1154_v10 = vld [vmem:[#allocation8 + $0x1a0] sm:$0xff]  ;;  %v7814_v22 = vpack.c.bf16 %v1321_v61, %v1313_v14 }
 0x140   :  { %5001 = vmatpush1.bf16.msra.mxu0 %v7779_v30  ;;  %1564 = vmatprep.mubr.f32.mxu0 %v9616_v21  ;;  %v1304_v30 = vld [vmem:[#allocation8 + $0x650] sm:$0xff]  ;;  %v1170_v61 = vld [vmem:[#allocation8 + $0x220] sm:$0xff] }
 0x141   :  { %5003 = vmatprep.subr.bf16.mxu0 %v7785_v46  ;;  %9620 = vst [vmem:[#allocation80_spill] sm:$0xff] %v7802_v23  ;;  %v7809_v63 = vpack.c.bf16 %v1304_v30, %v1296_v18  ;;  %9624 = vst [vmem:[#allocation84_spill] sm:$0xff] %v7814_v22  ;;  %v1320_v46 = vld [vmem:[#allocation8 + $0x6d0] sm:$0xff]  ;;  %v1178_v14 = vld [vmem:[#allocation8 + $0x260] sm:$0xff] }
 0x142   :  { %4977 = vmatpush1.bf16.msra.mxu1 %v7783_v0  ;;  %v7805_v0 = vpack.c.bf16 %v1146_v42, %v1138_v43  ;;  %v1329_v43 = vld [vmem:[#allocation8 + $0x718] sm:$0xff]  ;;  %v7821_v30 = vpack.c.bf16 %v1320_v46, %v1312_v55  ;;  %v1186_v55 = vld [vmem:[#allocation8 + $0x2a0] sm:$0xff] }
 0x143   :  { %4979 = vmatprep.subr.bf16.mxu1 %v7788_v4  ;;  %9622 = vst [vmem:[#allocation82_spill] sm:$0xff] %v7809_v63  ;;  %v1171_v4 = vld [vmem:[#allocation8 + $0x228] sm:$0xff]  ;;  %v1337_v42 = vld [vmem:[#allocation8 + $0x758] sm:$0xff] }
 0x144   :  { %5005 = vmatpush1.bf16.msra.mxu0 %v7792_v51  ;;  %9621 = vst [vmem:[#allocation81_spill] sm:$0xff] %v7805_v0  ;;  %v1179_v51 = vld [vmem:[#allocation8 + $0x268] sm:$0xff]  ;;  %9626 = vst [vmem:[#allocation86_spill] sm:$0xff] %v7821_v30  ;;  %v7826_v3 = vpack.c.bf16 %v1337_v42, %v1329_v43  ;;  %v1194_v43 = vld [vmem:[#allocation8 + $0x2e0] sm:$0xff] }
 0x145   :  { %5007 = vmatprep.subr.bf16.mxu0 %v7799_v24  ;;  %v7823_v18 = vpack.c.bf16 %v1179_v51, %v1171_v4  ;;  %v1336_v24 = vld [vmem:[#allocation8 + $0x750] sm:$0xff] }
 0x146   :  { %4981 = vmatpush1.bf16.msra.mxu1 %v7797_v2  ;;  %v7817_v2 = vpack.c.bf16 %v1162_v57, %v1154_v10  ;;  %9628 = vst [vmem:[#allocation88_spill] sm:$0xff] %v7826_v3  ;;  %v1345_v10 = vld [vmem:[#allocation8 + $0x798] sm:$0xff]  ;;  %v7833_v46 = vpack.c.bf16 %v1336_v24, %v1328_v59  ;;  %v1344_v51 = vld [vmem:[#allocation8 + $0x790] sm:$0xff]  ;;  %v1202_v24 = vld [vmem:[#allocation8 + $0x320] sm:$0xff] }
 0x147   :  { %4983 = vmatprep.subr.bf16.mxu1 %v7802_v23  ;;  %9627 = vst [vmem:[#allocation87_spill] sm:$0xff] %v7823_v18  ;;  %v1187_v23 = vld [vmem:[#allocation8 + $0x2a8] sm:$0xff]  ;;  %v1353_v57 = vld [vmem:[#allocation8 + $0x7d8] sm:$0xff]  ;;  %v1210_v59 = vld [vmem:[#allocation8 + $0x360] sm:$0xff] }
 0x148   :  { %5009 = vmatpush1.bf16.msra.mxu0 %v7805_v0  ;;  %9625 = vst [vmem:[#allocation85_spill] sm:$0xff] %v7817_v2  ;;  %v1195_v0 = vld [vmem:[#allocation8 + $0x2e8] sm:$0xff]  ;;  %9630 = vst [vmem:[#allocation90_spill] sm:$0xff] %v7833_v46  ;;  %v7838_v42 = vpack.c.bf16 %v1353_v57, %v1345_v10  ;;  %v1108_v10 = vld [vmem:[#allocation8 + $0x30] sm:$0xff] }
 0x149   :  { %5011 = vmatprep.subr.bf16.mxu0 %v7811_v39  ;;  %v7835_v4 = vpack.c.bf16 %v1195_v0, %v1187_v23  ;;  %v1352_v39 = vld [vmem:[#allocation8 + $0x7d0] sm:$0xff] }
 0x14a   :  { %4985 = vmatpush1.bf16.msra.mxu1 %v7809_v63  ;;  %v7829_v63 = vpack.c.bf16 %v1178_v14, %v1170_v61  ;;  %9632 = vst [vmem:[#allocation92_spill] sm:$0xff] %v7838_v42  ;;  %v1109_v61 = vld [vmem:[#allocation8 + $0x38] sm:$0xff]  ;;  %v7845_v23 = vpack.c.bf16 %v1352_v39, %v1344_v51  ;;  %v1218_v51 = vld [vmem:[#allocation8 + $0x3a0] sm:$0xff] }
 0x14b   :  { %4987 = vmatprep.subr.bf16.mxu1 %v7814_v22  ;;  %9631 = vst [vmem:[#allocation91_spill] sm:$0xff] %v7835_v4  ;;  %v1203_v22 = vld [vmem:[#allocation8 + $0x328] sm:$0xff]  ;;  %v1117_v14 = vld [vmem:[#allocation8 + $0x78] sm:$0xff] }
 0x14c   :  { %5013 = vmatpush1.bf16.msra.mxu0 %v7817_v2  ;;  %9629 = vst [vmem:[#allocation89_spill] sm:$0xff] %v7829_v63  ;;  %v1211_v2 = vld [vmem:[#allocation8 + $0x368] sm:$0xff]  ;;  %9634 = vst [vmem:[#allocation94_spill] sm:$0xff] %v7845_v23  ;;  %v7850_v57 = vpack.c.bf16 %v1117_v14, %v1109_v61  ;;  %v1226_v61 = vld [vmem:[#allocation8 + $0x3e0] sm:$0xff] }
 0x14d   :  { %5015 = vmatprep.subr.bf16.mxu0 %v7823_v18  ;;  %v7847_v0 = vpack.c.bf16 %v1211_v2, %v1203_v22  ;;  %v1116_v18 = vld [vmem:[#allocation8 + $0x70] sm:$0xff]  ;;  %v7857_v2 = vpack.c.bf16 %v1210_v59, %v1202_v24  ;;  %v1141_v24 = vld [vmem:[#allocation8 + $0x138] sm:$0xff] }
 0x14e   :  { %4989 = vmatpush1.bf16.msra.mxu1 %v7821_v30  ;;  %v7841_v30 = vpack.c.bf16 %v1194_v43, %v1186_v55  ;;  %9636 = vst [vmem:[#allocation96_spill] sm:$0xff] %v7850_v57  ;;  %v1125_v43 = vld [vmem:[#allocation8 + $0xb8] sm:$0xff]  ;;  %v7861_v39 = vpack.c.bf16 %v1116_v18, %v1108_v10  ;;  %v1124_v14 = vld [vmem:[#allocation8 + $0xb0] sm:$0xff]  ;;  %v7870_v18 = vpack.c.bf16 %v1226_v61, %v1218_v51  ;;  %v1242_v10 = vld [vmem:[#allocation8 + $0x460] sm:$0xff] }
 0x14f   :  { %4991 = vmatprep.subr.bf16.mxu1 %v7826_v3  ;;  %9635 = vst [vmem:[#allocation95_spill] sm:$0xff] %v7847_v0  ;;  %v1219_v3 = vld [vmem:[#allocation8 + $0x3a8] sm:$0xff]  ;;  %9637 = vst [vmem:[#allocation97_spill] sm:$0xff] %v7857_v2  ;;  %v1149_v59 = vld [vmem:[#allocation8 + $0x178] sm:$0xff] }
 0x150   :  { %5017 = vmatpush1.bf16.msra.mxu0 %v7829_v63  ;;  %9633 = vst [vmem:[#allocation93_spill] sm:$0xff] %v7841_v30  ;;  %v1227_v63 = vld [vmem:[#allocation8 + $0x3e8] sm:$0xff]  ;;  %9638 = vst [vmem:[#allocation98_spill] sm:$0xff] %v7861_v39  ;;  %v1157_v51 = vld [vmem:[#allocation8 + $0x1b8] sm:$0xff] }
 0x151   :  { %5019 = vmatprep.subr.bf16.mxu0 %v7835_v4  ;;  %v7863_v22 = vpack.c.bf16 %v1227_v63, %v1219_v3  ;;  %9641 = vst [vmem:[#allocation101_spill] sm:$0xff] %v7870_v18  ;;  %v1165_v61 = vld [vmem:[#allocation8 + $0x1f8] sm:$0xff] }
 0x152   :  { %4993 = vmatpush1.bf16.msra.mxu1 %v7833_v46  ;;  %v1133_v46 = vld [vmem:[#allocation8 + $0xf8] sm:$0xff] }
 0x153   :  { %4995 = vmatprep.subr.bf16.mxu1 %v7838_v42  ;;  %9639 = vst [vmem:[#allocation99_spill] sm:$0xff] %v7863_v22  ;;  %v7866_v4 = vpack.c.bf16 %v1133_v46, %v1125_v43  ;;  %v1132_v42 = vld [vmem:[#allocation8 + $0xf0] sm:$0xff]  ;;  %v1234_v46 = vld [vmem:[#allocation8 + $0x420] sm:$0xff] }
 0x154   :  { %v7852_v55 = vpop.f32.mrb[0].mxu1  ;;  %5021 = vmatpush1.bf16.msra.mxu0 %v7841_v30  ;;  %v1243_v30 = vld [vmem:[#allocation8 + $0x468] sm:$0xff]  ;;  %v7874_v63 = vpack.c.bf16 %v1132_v42, %v1124_v14  ;;  %v1140_v43 = vld [vmem:[#allocation8 + $0x130] sm:$0xff]  ;;  %v7883_v42 = vpack.c.bf16 %v1242_v10, %v1234_v46  ;;  %v1250_v14 = vld [vmem:[#allocation8 + $0x4a0] sm:$0xff] }
 0x155   :  { %v7854_v40 = vpop.f32.mrb[1].mxu1  ;;  %5023 = vmatprep.subr.bf16.mxu0 %v7847_v0  ;;  %9640 = vst [vmem:[#allocation100_spill] sm:$0xff] %v7866_v4  ;;  %v7876_v3 = vpack.c.bf16 %v1243_v30, %v1235_v36  ;;  %v7879_v0 = vpack.c.bf16 %v1149_v59, %v1141_v24  ;;  %v1258_v24 = vld [vmem:[#allocation8 + $0x4e0] sm:$0xff]  ;;  %v1156_v59 = vld [vmem:[#allocation8 + $0x1b0] sm:$0xff]  ;;  %v1173_v46 = vld [vmem:[#allocation8 + $0x238] sm:$0xff] }
 0x156   :  { %4997 = vmatpush1.bf16.msra.mxu1 %v7845_v23  ;;  %9642 = vst [vmem:[#allocation102_spill] sm:$0xff] %v7874_v63  ;;  %v1251_v23 = vld [vmem:[#allocation8 + $0x4a8] sm:$0xff]  ;;  %9645 = vst [vmem:[#allocation105_spill] sm:$0xff] %v7883_v42  ;;  %v1181_v10 = vld [vmem:[#allocation8 + $0x278] sm:$0xff] }
 0x157   :  { %5063 = vmatprep.subr.bf16.mxu1 %v7850_v57  ;;  %9643 = vst [vmem:[#allocation103_spill] sm:$0xff] %v7876_v3  ;;  %9644 = vst [vmem:[#allocation104_spill] sm:$0xff] %v7879_v0  ;;  %v1148_v57 = vld [vmem:[#allocation8 + $0x170] sm:$0xff] }
 0x158   :  { %5025 = vmatpush1.bf16.msra.mxu0 %v7857_v2  ;;  %v1259_v2 = vld [vmem:[#allocation8 + $0x4e8] sm:$0xff]  ;;  %v7887_v36 = vpack.c.bf16 %v1148_v57, %v1140_v43  ;;  %v1274_v43 = vld [vmem:[#allocation8 + $0x560] sm:$0xff] }
 0x159   :  { %1494 = vmatmul.mubr.f32.vlgmr.msra.gmra.mrb[12].mxu1 %v9616_v21  ;;  %5027 = vmatprep.subr.bf16.mxu0 %v7863_v22  ;;  %v7889_v30 = vpack.c.bf16 %v1259_v2, %v1251_v23  ;;  %v7892_v22 = vpack.c.bf16 %v1165_v61, %v1157_v51  ;;  %v1266_v2 = vld [vmem:[#allocation8 + $0x520] sm:$0xff]  ;;  %v1172_v51 = vld [vmem:[#allocation8 + $0x230] sm:$0xff]  ;;  %v7904_v61 = vpack.c.bf16 %v1181_v10, %v1173_v46 }
 0x15a   :  { %5065 = vmatpush1.bf16.msra.mxu1 %v7861_v39  ;;  %1635 = vmatprep.mubr.f32.mxu1 %v9616_v21  ;;  %9646 = vst [vmem:[#allocation106_spill] sm:$0xff] %v7887_v36  ;;  %v1267_v39 = vld [vmem:[#allocation8 + $0x528] sm:$0xff]  ;;  %v1188_v46 = vld [vmem:[#allocation8 + $0x2b0] sm:$0xff] }
 0x15b   :  { %5067 = vmatprep.subr.bf16.mxu1 %v7866_v4  ;;  %9647 = vst [vmem:[#allocation107_spill] sm:$0xff] %v7889_v30  ;;  %9648 = vst [vmem:[#allocation108_spill] sm:$0xff] %v7892_v22  ;;  %v1164_v4 = vld [vmem:[#allocation8 + $0x1f0] sm:$0xff] }
 0x15c   :  { %5029 = vmatpush1.bf16.msra.mxu0 %v7870_v18  ;;  %v1275_v18 = vld [vmem:[#allocation8 + $0x568] sm:$0xff]  ;;  %v7899_v23 = vpack.c.bf16 %v1164_v4, %v1156_v59  ;;  %9652 = vst [vmem:[#allocation112_spill] sm:$0xff] %v7904_v61  ;;  %v1290_v59 = vld [vmem:[#allocation8 + $0x5e0] sm:$0xff] }
 0x15d   :  { %5031 = vmatprep.subr.bf16.mxu0 %v7876_v3  ;;  %v7901_v57 = vpack.c.bf16 %v1275_v18, %v1267_v39  ;;  %v1180_v3 = vld [vmem:[#allocation8 + $0x270] sm:$0xff]  ;;  %v1282_v18 = vld [vmem:[#allocation8 + $0x5a0] sm:$0xff] }
 0x15e   :  { %5069 = vmatpush1.bf16.msra.mxu1 %v7874_v63  ;;  %v7895_v63 = vpack.c.bf16 %v1258_v24, %v1250_v14  ;;  %9650 = vst [vmem:[#allocation110_spill] sm:$0xff] %v7899_v23  ;;  %v1189_v14 = vld [vmem:[#allocation8 + $0x2b8] sm:$0xff]  ;;  %v7911_v4 = vpack.c.bf16 %v1180_v3, %v1172_v51  ;;  %v1306_v51 = vld [vmem:[#allocation8 + $0x660] sm:$0xff] }
 0x15f   :  { %5071 = vmatprep.subr.bf16.mxu1 %v7879_v0  ;;  %9651 = vst [vmem:[#allocation111_spill] sm:$0xff] %v7901_v57  ;;  %v1283_v0 = vld [vmem:[#allocation8 + $0x5a8] sm:$0xff]  ;;  %v1197_v24 = vld [vmem:[#allocation8 + $0x2f8] sm:$0xff] }
 0x160   :  { %5033 = vmatpush1.bf16.msra.mxu0 %v7883_v42  ;;  %9649 = vst [vmem:[#allocation109_spill] sm:$0xff] %v7895_v63  ;;  %v1291_v42 = vld [vmem:[#allocation8 + $0x5e8] sm:$0xff]  ;;  %9654 = vst [vmem:[#allocation114_spill] sm:$0xff] %v7911_v4  ;;  %v7916_v10 = vpack.c.bf16 %v1197_v24, %v1189_v14  ;;  %v1204_v14 = vld [vmem:[#allocation8 + $0x330] sm:$0xff] }
 0x161   :  { %5035 = vmatprep.subr.bf16.mxu0 %v7889_v30  ;;  %v7913_v39 = vpack.c.bf16 %v1291_v42, %v1283_v0  ;;  %v1196_v30 = vld [vmem:[#allocation8 + $0x2f0] sm:$0xff]  ;;  %v1298_v42 = vld [vmem:[#allocation8 + $0x620] sm:$0xff] }
 0x162   :  { %5073 = vmatpush1.bf16.msra.mxu1 %v7887_v36  ;;  %v7907_v36 = vpack.c.bf16 %v1274_v43, %v1266_v2  ;;  %9656 = vst [vmem:[#allocation116_spill] sm:$0xff] %v7916_v10  ;;  %v1205_v2 = vld [vmem:[#allocation8 + $0x338] sm:$0xff]  ;;  %v7923_v0 = vpack.c.bf16 %v1196_v30, %v1188_v46  ;;  %v1314_v30 = vld [vmem:[#allocation8 + $0x6a0] sm:$0xff] }
 0x163   :  { %5075 = vmatprep.subr.bf16.mxu1 %v7892_v22  ;;  %9655 = vst [vmem:[#allocation115_spill] sm:$0xff] %v7913_v39  ;;  %v1299_v22 = vld [vmem:[#allocation8 + $0x628] sm:$0xff]  ;;  %v1213_v43 = vld [vmem:[#allocation8 + $0x378] sm:$0xff]  ;;  %v1322_v46 = vld [vmem:[#allocation8 + $0x6e0] sm:$0xff] }
 0x164   :  { %5037 = vmatpush1.bf16.msra.mxu0 %v7895_v63  ;;  %9653 = vst [vmem:[#allocation113_spill] sm:$0xff] %v7907_v36  ;;  %v1307_v63 = vld [vmem:[#allocation8 + $0x668] sm:$0xff]  ;;  %9658 = vst [vmem:[#allocation118_spill] sm:$0xff] %v7923_v0  ;;  %v7928_v24 = vpack.c.bf16 %v1213_v43, %v1205_v2  ;;  %v1220_v2 = vld [vmem:[#allocation8 + $0x3b0] sm:$0xff] }
 0x165   :  { %5039 = vmatprep.subr.bf16.mxu0 %v7901_v57  ;;  %v7925_v3 = vpack.c.bf16 %v1307_v63, %v1299_v22  ;;  %v1212_v57 = vld [vmem:[#allocation8 + $0x370] sm:$0xff] }
 0x166   :  { %5077 = vmatpush1.bf16.msra.mxu1 %v7899_v23  ;;  %v7919_v23 = vpack.c.bf16 %v1290_v59, %v1282_v18  ;;  %9660 = vst [vmem:[#allocation120_spill] sm:$0xff] %v7928_v24  ;;  %v1221_v18 = vld [vmem:[#allocation8 + $0x3b8] sm:$0xff]  ;;  %v7935_v22 = vpack.c.bf16 %v1212_v57, %v1204_v14  ;;  %v1338_v14 = vld [vmem:[#allocation8 + $0x760] sm:$0xff] }
 0x167   :  { %5079 = vmatprep.subr.bf16.mxu1 %v7904_v61  ;;  %9659 = vst [vmem:[#allocation119_spill] sm:$0xff] %v7925_v3  ;;  %v1315_v61 = vld [vmem:[#allocation8 + $0x6a8] sm:$0xff]  ;;  %v1229_v59 = vld [vmem:[#allocation8 + $0x3f8] sm:$0xff] }
 0x168   :  { %5041 = vmatpush1.bf16.msra.mxu0 %v7907_v36  ;;  %9657 = vst [vmem:[#allocation117_spill] sm:$0xff] %v7919_v23  ;;  %v1323_v36 = vld [vmem:[#allocation8 + $0x6e8] sm:$0xff]  ;;  %9662 = vst [vmem:[#allocation122_spill] sm:$0xff] %v7935_v22  ;;  %v7940_v43 = vpack.c.bf16 %v1229_v59, %v1221_v18  ;;  %v1236_v18 = vld [vmem:[#allocation8 + $0x430] sm:$0xff] }
 0x169   :  { %5043 = vmatprep.subr.bf16.mxu0 %v7913_v39  ;;  %v7937_v63 = vpack.c.bf16 %v1323_v36, %v1315_v61  ;;  %v1228_v39 = vld [vmem:[#allocation8 + $0x3f0] sm:$0xff]  ;;  %v1330_v61 = vld [vmem:[#allocation8 + $0x720] sm:$0xff] }
 0x16a   :  { %5081 = vmatpush1.bf16.msra.mxu1 %v7911_v4  ;;  %v7931_v4 = vpack.c.bf16 %v1306_v51, %v1298_v42  ;;  %9664 = vst [vmem:[#allocation124_spill] sm:$0xff] %v7940_v43  ;;  %v1237_v42 = vld [vmem:[#allocation8 + $0x438] sm:$0xff]  ;;  %v7947_v36 = vpack.c.bf16 %v1228_v39, %v1220_v2  ;;  %v1354_v2 = vld [vmem:[#allocation8 + $0x7e0] sm:$0xff] }
 0x16b   :  { %5083 = vmatprep.subr.bf16.mxu1 %v7916_v10  ;;  %9663 = vst [vmem:[#allocation123_spill] sm:$0xff] %v7937_v63  ;;  %v1331_v10 = vld [vmem:[#allocation8 + $0x728] sm:$0xff]  ;;  %v1245_v51 = vld [vmem:[#allocation8 + $0x478] sm:$0xff] }
 0x16c   :  { %5045 = vmatpush1.bf16.msra.mxu0 %v7919_v23  ;;  %9661 = vst [vmem:[#allocation121_spill] sm:$0xff] %v7931_v4  ;;  %v1339_v23 = vld [vmem:[#allocation8 + $0x768] sm:$0xff]  ;;  %9666 = vst [vmem:[#allocation126_spill] sm:$0xff] %v7947_v36  ;;  %v7952_v59 = vpack.c.bf16 %v1245_v51, %v1237_v42  ;;  %v7963_v42 = vpop.f32.mrb[2].mxu1 }
 0x16d   :  { %5047 = vmatprep.subr.bf16.mxu0 %v7925_v3  ;;  %v7949_v57 = vpack.c.bf16 %v1339_v23, %v1331_v10  ;;  %v1244_v3 = vld [vmem:[#allocation8 + $0x470] sm:$0xff]  ;;  %v1346_v10 = vld [vmem:[#allocation8 + $0x7a0] sm:$0xff] }
 0x16e   :  { %5085 = vmatpush1.bf16.msra.mxu1 %v7923_v0  ;;  %v7943_v0 = vpack.c.bf16 %v1322_v46, %v1314_v30  ;;  %9668 = vst [vmem:[#allocation128_spill] sm:$0xff] %v7952_v59  ;;  %v1253_v30 = vld [vmem:[#allocation8 + $0x4b8] sm:$0xff]  ;;  %v7959_v23 = vpack.c.bf16 %v1244_v3, %v1236_v18  ;;  %v7971_v3 = vpack.c.bf16 %v1354_v2, %v1346_v10  ;;  %v1268_v18 = vld [vmem:[#allocation8 + $0x530] sm:$0xff] }
 0x16f   :  { %5087 = vmatprep.subr.bf16.mxu1 %v7928_v24  ;;  %9667 = vst [vmem:[#allocation127_spill] sm:$0xff] %v7949_v57  ;;  %v1347_v24 = vld [vmem:[#allocation8 + $0x7a8] sm:$0xff]  ;;  %v1261_v46 = vld [vmem:[#allocation8 + $0x4f8] sm:$0xff] }
 0x170   :  { %5049 = vmatpush1.bf16.msra.mxu0 %v7931_v4  ;;  %9665 = vst [vmem:[#allocation125_spill] sm:$0xff] %v7943_v0  ;;  %v1355_v4 = vld [vmem:[#allocation8 + $0x7e8] sm:$0xff]  ;;  %9670 = vst [vmem:[#allocation130_spill] sm:$0xff] %v7959_v23  ;;  %v7966_v51 = vpack.c.bf16 %v1261_v46, %v1253_v30  ;;  %v1276_v30 = vld [vmem:[#allocation8 + $0x570] sm:$0xff] }
 0x171   :  { %5051 = vmatprep.subr.bf16.mxu0 %v7937_v63  ;;  %v7961_v39 = vpack.c.bf16 %v1355_v4, %v1347_v24  ;;  %v1252_v63 = vld [vmem:[#allocation8 + $0x4b0] sm:$0xff]  ;;  %9673 = vst [vmem:[#allocation133_spill] sm:$0xff] %v7971_v3  ;;  %v1285_v46 = vld [vmem:[#allocation8 + $0x5b8] sm:$0xff]  ;;  %v7984_v10 = vpack.c.bf16 %v1276_v30, %v1268_v18 }
 0x172   :  { %5089 = vmatpush1.bf16.msra.mxu1 %v7935_v22  ;;  %v7955_v22 = vpack.c.bf16 %v1338_v14, %v1330_v61  ;;  %9672 = vst [vmem:[#allocation132_spill] sm:$0xff] %v7966_v51  ;;  %v7968_v61 = vpop.f32.mrb[3].mxu1  ;;  %v1269_v14 = vld [vmem:[#allocation8 + $0x538] sm:$0xff]  ;;  %v1300_v30 = vld [vmem:[#allocation8 + $0x630] sm:$0xff] }
 0x173   :  { %5091 = vmatprep.subr.bf16.mxu1 %v7940_v43  ;;  %9671 = vst [vmem:[#allocation131_spill] sm:$0xff] %v7961_v39  ;;  %v414_v43 = vlaneseq  ;;  %9676 = vst [vmem:[#allocation136_spill] sm:$0xff] %v7984_v10 }
 0x174   :  { %5053 = vmatpush1.bf16.msra.mxu0 %v7943_v0  ;;  %9669 = vst [vmem:[#allocation129_spill] sm:$0xff] %v7955_v22  ;;  %v1260_v0 = vld [vmem:[#allocation8 + $0x4f0] sm:$0xff] }
 0x175   :  { %5055 = vmatprep.subr.bf16.mxu0 %v7949_v57  ;;  %v7975_v4 = vpack.c.bf16 %v1260_v0, %v1252_v63  ;;  %v1293_v57 = vld [vmem:[#allocation8 + $0x5f8] sm:$0xff]  ;;  %v1284_v63 = vld [vmem:[#allocation8 + $0x5b0] sm:$0xff] }
 0x176   :  { %5093 = vmatpush1.bf16.msra.mxu1 %v7947_v36  ;;  %v1277_v36 = vld [vmem:[#allocation8 + $0x578] sm:$0xff]  ;;  %v7988_v0 = vpack.c.bf16 %v1293_v57, %v1285_v46  ;;  %v1308_v46 = vld [vmem:[#allocation8 + $0x670] sm:$0xff] }
 0x177   :  { %5095 = vmatprep.subr.bf16.mxu1 %v7952_v59  ;;  %9674 = vst [vmem:[#allocation134_spill] sm:$0xff] %v7975_v4  ;;  %v7978_v24 = vpack.c.bf16 %v1277_v36, %v1269_v14  ;;  %v7980_v59 = vshrl.u32 %v414_v43, 7  ;;  %v1292_v36 = vld [vmem:[#allocation8 + $0x5f0] sm:$0xff]  ;;  %v1301_v43 = vld [vmem:[#allocation8 + $0x638] sm:$0xff] }
 0x178   :  { %5057 = vmatpush1.bf16.msra.mxu0 %v7955_v22  ;;  %9677 = vst [vmem:[#allocation137_spill] sm:$0xff] %v7988_v0  ;;  %v1309_v14 = vld [vmem:[#allocation8 + $0x678] sm:$0xff]  ;;  %v7997_v18 = vpack.c.bf16 %v1292_v36, %v1284_v63  ;;  %v8007_v63 = vpack.c.bf16 %v1308_v46, %v1300_v30 }
 0x179   :  { %5059 = vmatprep.subr.bf16.mxu0 %v7961_v39  ;;  %9675 = vst [vmem:[#allocation135_spill] sm:$0xff] %v7978_v24  ;;  %v416_v2 = vsub.s32 0, %v7980_v59  ;;  %v7992_v39 = vld [vmem:[#allocation7] sm:$0xff]  ;;  %v8001_v57 = vpack.c.bf16 %v1309_v14, %v1301_v43  ;;  %v1316_v14 = vld [vmem:[#allocation8 + $0x6b0] sm:$0xff] }
 0x17a   :  { %5097 = vmatpush1.bf16.msra.mxu1 %v7959_v23  ;;  %9678 = vst [vmem:[#allocation138_spill] sm:$0xff] %v7997_v18  ;;  %v1317_v22 = vld [vmem:[#allocation8 + $0x6b8] sm:$0xff]  ;;  %9680 = vst [vmem:[#allocation140_spill] sm:$0xff] %v8007_v63 }
 0x17b   :  { %5099 = vmatprep.subr.bf16.mxu1 %v7966_v51  ;;  %9679 = vst [vmem:[#allocation139_spill] sm:$0xff] %v8001_v57 }
 0x17c   :  { %5061 = vmatpush1.bf16.msra.mxu0 %v7971_v3  ;;  %v420_v3 = vsub.s32 1, %v7980_v59 }
 0x17d   :  { %5127 = vmatprep.subr.bf16.mxu0 %v7597_v16  ;;  %v417_v16 = vrot.slane %v7992_v39, %v416_v2 }
 0x17e   :  { %5101 = vmatpush1.bf16.msra.mxu1 %v7975_v4  ;;  %v421_v4 = vrot.slane %v7992_v39, %v420_v3 }
 0x17f   :  { %5103 = vmatprep.subr.bf16.mxu1 %v7978_v24  ;;  %1565 = vmatmul.mubr.f32.vlgmr.msra.gmra.mrb[10].mxu0 %v9616_v21  ;;  %v1325_v24 = vld [vmem:[#allocation8 + $0x6f8] sm:$0xff] }
 0x180   :  { %5129 = vmatpush1.bf16.msra.mxu0 %v7601_v27  ;;  %v8011_v43 = vpack.c.bf16 %v1325_v24, %v1317_v22 }
 0x181   :  { %5131 = vmatprep.subr.bf16.mxu0 %v7604_v31  ;;  %v1324_v31 = vld [vmem:[#allocation8 + $0x6f0] sm:$0xff] }
 0x182   :  { %5105 = vmatpush1.bf16.msra.mxu1 %v7984_v10  ;;  %9681 = vst [vmem:[#allocation141_spill] sm:$0xff] %v8011_v43  ;;  %v1341_v10 = vld [vmem:[#allocation8 + $0x778] sm:$0xff]  ;;  %v8018_v30 = vpack.c.bf16 %v1324_v31, %v1316_v14 }
 0x183   :  { %5107 = vmatprep.subr.bf16.mxu1 %v7988_v0  ;;  %v1333_v0 = vld [vmem:[#allocation8 + $0x738] sm:$0xff] }
 0x184   :  { %5133 = vmatpush1.bf16.msra.mxu0 %v7612_v41  ;;  %9682 = vst [vmem:[#allocation142_spill] sm:$0xff] %v8018_v30  ;;  %v8025_v46 = vpack.c.bf16 %v1341_v10, %v1333_v0  ;;  %v1348_v0 = vld [vmem:[#allocation8 + $0x7b0] sm:$0xff] }
 0x185   :  { %5135 = vmatprep.subr.bf16.mxu0 %v7615_v44 }
 0x186   :  { %5109 = vmatpush1.bf16.msra.mxu1 %v7997_v18  ;;  %v552_v36 = vpop.f32.mrb[0].mxu0  ;;  %9684 = vst [vmem:[#allocation144_spill] sm:$0xff] %v8025_v46 }
 0x187   :  { %5111 = vmatprep.subr.bf16.mxu1 %v8001_v57  ;;  %v553_v2 = vadd.f32 %v552_v36, %v417_v16  ;;  %v554_v27 = vpop.f32.mrb[1].mxu0  ;;  %v1340_v36 = vld [vmem:[#allocation8 + $0x770] sm:$0xff] }
 0x188   :  { %v555_v3 = vadd.f32 %v554_v27, %v421_v4  ;;  %5137 = vmatpush1.bf16.msra.mxu0 %v7620_v56  ;;  %v1332_v27 = vld [vmem:[#allocation8 + $0x730] sm:$0xff] }
 0x189   :  { %v8015_v41 = vadd.f32 %v7852_v55, %v553_v2  ;;  %5139 = vmatprep.subr.bf16.mxu0 %v7624_v58  ;;  %v1349_v55 = vld [vmem:[#allocation8 + $0x7b8] sm:$0xff] }
 0x18a   :  { %5113 = vmatpush1.bf16.msra.mxu1 %v8007_v63  ;;  %v8022_v22 = vadd.f32 %v7854_v40, %v555_v3  ;;  %v558_v24 = vpop.f32.mrb[2].mxu0  ;;  %v1357_v2 = vld [vmem:[#allocation8 + $0x7f8] sm:$0xff]  ;;  %v8032_v40 = vpack.c.bf16 %v1340_v36, %v1332_v27 }
 0x18b   :  { %5115 = vmatprep.subr.bf16.mxu1 %v8011_v43  ;;  %v559_v56 = vadd.f32 %v558_v24, %v417_v16  ;;  %v560_v44 = vpop.f32.mrb[3].mxu0  ;;  %v8039_v16 = vpack.c.bf16 %v1357_v2, %v1349_v55  ;;  %v9692_v55 = vld [vmem:[#allocation59_spill] sm:$0xff]  ;;  %v9693_v2 = vld [vmem:[#allocation60_spill] sm:$0xff] }
 0x18c   :  { %9683 = vst [vmem:[#allocation143_spill] sm:$0xff] %v8022_v22  ;;  %v561_v57 = vadd.f32 %v560_v44, %v421_v4  ;;  %5141 = vmatpush1.bf16.msra.mxu0 %v7627_v5  ;;  %9686 = vst [vmem:[#allocation146_spill] sm:$0xff] %v8032_v40  ;;  %v1356_v44 = vld [vmem:[#allocation8 + $0x7f0] sm:$0xff] }
 0x18d   :  { %v8030_v31 = vadd.f32 %v7963_v42, %v559_v56  ;;  %5143 = vmatprep.subr.bf16.mxu0 %v7630_v7  ;;  %9688 = vst [vmem:[#allocation148_spill] sm:$0xff] %v8039_v16  ;;  %v8043_v4 = vpack.c.bf16 %v1356_v44, %v1348_v0  ;;  %v424_v56 = vsub.s32 2, %v7980_v59  ;;  %v9694_v0 = vld [vmem:[#allocation61_spill] sm:$0xff]  ;;  %v9695_v44 = vld [vmem:[#allocation62_spill] sm:$0xff] }
 0x18e   :  { %5117 = vmatpush1.bf16.msra.mxu1 %v8018_v30  ;;  %v8036_v10 = vadd.f32 %v7968_v61, %v561_v57 }
 0x18f   :  { %9685 = vst [vmem:[#allocation145_spill] sm:$0xff] %v8030_v31  ;;  %5119 = vmatprep.subr.bf16.mxu1 %v8025_v46  ;;  %9689 = vst [vmem:[#allocation149_spill] sm:$0xff] %v8043_v4  ;;  %v8070_v57 = vrot.slane %v7992_v39, %v424_v56  ;;  %v9696_v56 = vld [vmem:[#allocation63_spill] sm:$0xff]  ;;  %v9703_v31 = vld [vmem:[#allocation70_spill] sm:$0xff] }
 0x190   :  { %9687 = vst [vmem:[#allocation147_spill] sm:$0xff] %v8036_v10  ;;  %5145 = vmatpush1.bf16.msra.mxu0 %v7634_v17  ;;  %v9702_v10 = vld [vmem:[#allocation69_spill] sm:$0xff] }
 0x191   :  { %5147 = vmatprep.subr.bf16.mxu0 %v7637_v19 }
 0x192   :  { %5121 = vmatpush1.bf16.msra.mxu1 %v8032_v40 }
 0x193   :  { %5123 = vmatprep.subr.bf16.mxu1 %v8039_v16 }
 0x194   :  { %5149 = vmatpush1.bf16.msra.mxu0 %v7642_v33 }
 0x195   :  { %5151 = vmatprep.subr.bf16.mxu0 %v7645_v35 }
 0x196   :  { %5125 = vmatpush1.bf16.msra.mxu1 %v8043_v4 }
 0x197   :  { %5191 = vmatprep.subr.bf16.mxu1 %v7650_v26 }
 0x198   :  { %5153 = vmatpush1.bf16.msra.mxu0 %v7653_v47 }
 0x199   :  { %1636 = vmatmul.mubr.f32.vlgmr.msra.gmra.mrb[14].mxu1 %v9616_v21  ;;  %5155 = vmatprep.subr.bf16.mxu0 %v7661_v53  ;;  %v428_v21 = vsub.s32 3, %v7980_v59 }
 0x19a   :  { %5193 = vmatpush1.bf16.msra.mxu1 %v7658_v48 }
 0x19b   :  { %5195 = vmatprep.subr.bf16.mxu1 %v7663_v54  ;;  %v8074_v14 = vrot.slane %v7992_v39, %v428_v21  ;;  %v9697_v21 = vld [vmem:[#allocation64_spill] sm:$0xff] }
 0x19c   :  { %5157 = vmatpush1.bf16.msra.mxu0 %v7668_v1 }
 0x19d   :  { %5159 = vmatprep.subr.bf16.mxu0 %v7674_v45 }
 0x19e   :  { %5197 = vmatpush1.bf16.msra.mxu1 %v7672_v62 }
 0x19f   :  { %5199 = vmatprep.subr.bf16.mxu1 %v7678_v38 }
 0x1a0   :  { %v8061_v42 = vpop.f32.mrb[4].mxu1  ;;  %5161 = vmatpush1.bf16.msra.mxu0 %v7682_v11 }
 0x1a1   :  { %v8064_v61 = vpop.f32.mrb[5].mxu1  ;;  %5163 = vmatprep.subr.bf16.mxu0 %v7688_v13 }
 0x1a2   :  { %5201 = vmatpush1.bf16.msra.mxu1 %v7686_v12 }
 0x1a3   :  { %5203 = vmatprep.subr.bf16.mxu1 %v7691_v20 }
 0x1a4   :  { %v789_v3 = vpop.f32.mrb[6].mxu1  ;;  %5165 = vmatpush1.bf16.msra.mxu0 %v7695_v28 }
 0x1a5   :  { %v8077_v24 = vadd.f32 %v789_v3, %v8070_v57  ;;  %v791_v27 = vpop.f32.mrb[7].mxu1  ;;  %5167 = vmatprep.subr.bf16.mxu0 %v7701_v32  ;;  %v9698_v3 = vld [vmem:[#allocation65_spill] sm:$0xff] }
 0x1a6   :  { %v8081_v36 = vadd.f32 %v791_v27, %v8074_v14  ;;  %5205 = vmatpush1.bf16.msra.mxu1 %v7699_v29  ;;  %v9699_v27 = vld [vmem:[#allocation66_spill] sm:$0xff] }
 0x1a7   :  { %9690 = vst [vmem:[#allocation150_spill] sm:$0xff] %v8077_v24  ;;  %5207 = vmatprep.subr.bf16.mxu1 %v7704_v37  ;;  %v9700_v24 = vld [vmem:[#allocation67_spill] sm:$0xff] }
 0x1a8   :  { %9691 = vst [vmem:[#allocation151_spill] sm:$0xff] %v8081_v36  ;;  %5169 = vmatpush1.bf16.msra.mxu0 %v7707_v49  ;;  %v9701_v36 = vld [vmem:[#allocation68_spill] sm:$0xff]  ;;  %v9712_v49 = vld [vmem:[#allocation86_spill] sm:$0xff] }
 0x1a9   :  { %5171 = vmatprep.subr.bf16.mxu0 %v7713_v52  ;;  %v436_v52 = vsub.s32 5, %v7980_v59 }
 0x1aa   :  { %5209 = vmatpush1.bf16.msra.mxu1 %v7711_v50 }
 0x1ab   :  { %5211 = vmatprep.subr.bf16.mxu1 %v7716_v60 }
 0x1ac   :  { %5173 = vmatpush1.bf16.msra.mxu0 %v7719_v6  ;;  %v9710_v6 = vld [vmem:[#allocation82_spill] sm:$0xff] }
 0x1ad   :  { %5175 = vmatprep.subr.bf16.mxu0 %v7725_v9  ;;  %v9708_v9 = vld [vmem:[#allocation78_spill] sm:$0xff] }
 0x1ae   :  { %5213 = vmatpush1.bf16.msra.mxu1 %v7723_v8 }
 0x1af   :  { %5215 = vmatprep.subr.bf16.mxu1 %v7728_v15 }
 0x1b0   :  { %5177 = vmatpush1.bf16.msra.mxu0 %v7731_v25  ;;  %v9706_v25 = vld [vmem:[#allocation74_spill] sm:$0xff] }
 0x1b1   :  { %5179 = vmatprep.subr.bf16.mxu0 %v9692_v55  ;;  %v9704_v55 = vld [vmem:[#allocation71_spill] sm:$0xff] }
 0x1b2   :  { %5217 = vmatpush1.bf16.msra.mxu1 %v7735_v34 }
 0x1b3   :  { %5219 = vmatprep.subr.bf16.mxu1 %v9693_v2 }
 0x1b4   :  { %5181 = vmatpush1.bf16.msra.mxu0 %v9694_v0  ;;  %v9705_v0 = vld [vmem:[#allocation72_spill] sm:$0xff] }
 0x1b5   :  { %5183 = vmatprep.subr.bf16.mxu0 %v9696_v56  ;;  %v9707_v56 = vld [vmem:[#allocation76_spill] sm:$0xff] }
 0x1b6   :  { %5221 = vmatpush1.bf16.msra.mxu1 %v9695_v44 }
 0x1b7   :  { %5223 = vmatprep.subr.bf16.mxu1 %v9697_v21 }
 0x1b8   :  { %5185 = vmatpush1.bf16.msra.mxu0 %v9698_v3  ;;  %v9709_v3 = vld [vmem:[#allocation80_spill] sm:$0xff] }
 0x1b9   :  { %5187 = vmatprep.subr.bf16.mxu0 %v9700_v24  ;;  %v9711_v24 = vld [vmem:[#allocation84_spill] sm:$0xff] }
 0x1ba   :  { %5225 = vmatpush1.bf16.msra.mxu1 %v9699_v27 }
 0x1bb   :  { %5227 = vmatprep.subr.bf16.mxu1 %v9701_v36 }
 0x1bc   :  { %5189 = vmatpush1.bf16.msra.mxu0 %v9702_v10  ;;  %v432_v10 = vsub.s32 4, %v7980_v59 }
 0x1bd   :  { %5255 = vmatprep.subr.bf16.mxu0 %v9704_v55  ;;  %v9713_v55 = vld [vmem:[#allocation88_spill] sm:$0xff] }
 0x1be   :  { %5229 = vmatpush1.bf16.msra.mxu1 %v9703_v31  ;;  %v9718_v31 = vld [vmem:[#allocation94_spill] sm:$0xff] }
 0x1bf   :  { %5231 = vmatprep.subr.bf16.mxu1 %v9705_v0  ;;  %v9714_v0 = vld [vmem:[#allocation90_spill] sm:$0xff] }
 0x1c2   :  { %5233 = vmatpush1.bf16.msra.mxu1 %v9706_v25  ;;  %v433_v25 = vrot.slane %v7992_v39, %v432_v10  ;;  %v440_v10 = vsub.s32 6, %v7980_v59 }
 0x1c3   :  { %5235 = vmatprep.subr.bf16.mxu1 %v9707_v56  ;;  %v437_v56 = vrot.slane %v7992_v39, %v436_v52  ;;  %v444_v52 = vsub.s32 7, %v7980_v59 }
 0x1c5   :  { %v8134_v36 = vrot.slane %v7992_v39, %v444_v52 }
 0x1c6   :  { %5237 = vmatpush1.bf16.msra.mxu1 %v9708_v9 }
 0x1c7   :  { %5239 = vmatprep.subr.bf16.mxu1 %v9709_v3  ;;  %v9715_v3 = vld [vmem:[#allocation92_spill] sm:$0xff] }
 0x1ca   :  { %5241 = vmatpush1.bf16.msra.mxu1 %v9710_v6 }
 0x1cb   :  { %5243 = vmatprep.subr.bf16.mxu1 %v9711_v24 }
 0x1ce   :  { %5245 = vmatpush1.bf16.msra.mxu1 %v9712_v49  ;;  %v9719_v49 = vld [vmem:[#allocation96_spill] sm:$0xff] }
 0x1cf   :  { %5247 = vmatprep.subr.bf16.mxu1 %v9713_v55 }
 0x1d2   :  { %5249 = vmatpush1.bf16.msra.mxu1 %v9714_v0  ;;  %v937_v9 = vpop.f32.mrb[4].mxu0  ;;  %v441_v0 = vrot.slane %v7992_v39, %v440_v10 }
 0x1d3   :  { %5251 = vmatprep.subr.bf16.mxu1 %v9715_v3  ;;  %v8124_v6 = vadd.f32 %v937_v9, %v433_v25  ;;  %v939_v24 = vpop.f32.mrb[5].mxu0 }
 0x1d4   :  { %v8126_v32 = vadd.f32 %v939_v24, %v437_v56 }
 0x1d5   :  { %9716 = vst [vmem:[#allocation152_spill] sm:$0xff] %v8124_v6 }
 0x1d6   :  { %9717 = vst [vmem:[#allocation153_spill] sm:$0xff] %v8126_v32  ;;  %5253 = vmatpush1.bf16.msra.mxu1 %v9718_v31  ;;  %v943_v28 = vpop.f32.mrb[6].mxu0 }
 0x1d7   :  { %5319 = vmatprep.subr.bf16.mxu1 %v9719_v49  ;;  %v945_v55 = vpop.f32.mrb[7].mxu0 }
 0x1ec   :  { %v1091_v9 = vpop.f32.mrb[8].mxu1 }
 0x1ed   :  { %v8136_v6 = vadd.f32 %v1091_v9, %v441_v0  ;;  %v1093_v24 = vpop.f32.mrb[9].mxu1 }
 0x1ee   :  { %v8139_v32 = vadd.f32 %v1093_v24, %v8134_v36  ;;  %v8145_v24 = vadd.f32 %v8061_v42, %v8070_v57 }
 0x1ef   :  { %9720 = vst [vmem:[#allocation154_spill] sm:$0xff] %v8136_v6 }
 0x1f0   :  { %9721 = vst [vmem:[#allocation155_spill] sm:$0xff] %v8139_v32  ;;  %v1097_v31 = vpop.f32.mrb[10].mxu1  ;;  %9722 = vst [vmem:[#allocation156_spill] sm:$0xff] %v8145_v24  ;;  %v8149_v32 = vadd.f32 %v8064_v61, %v8074_v14 }
 0x1f1   :  { %v1099_v3 = vpop.f32.mrb[11].mxu1 }
 0x1f2   :  { %9723 = vst [vmem:[#allocation157_spill] sm:$0xff] %v8149_v32 }
 0x212   :  { %v1424_v49 = vpop.f32.mrb[8].mxu0 }
 0x213   :  { %v1426_v13 = vpop.f32.mrb[9].mxu0  ;;  %v1642_v27 = vadd.f32 %v1424_v49, %v8015_v41 }
 0x214   :  { %v1643_v59 = vadd.f32 %v1426_v13, %v8022_v22 }
 0x215   :  { %v4471_v10 = vmul.f32 -1.442695, %v1642_v27 }
 0x216   :  { %v4472_v11 = vmul.f32 -1.442695, %v1643_v59 }
 0x218   :  { %6997 = vpow2.f32 %v4472_v11 }
 0x219   :  { %6999 = vpow2.f32 %v4471_v10 }
 0x222   :  { %v6998_v39 = vpop.eup %6997 }
 0x223   :  { %v7000_v52 = vpop.eup %6999  ;;  %v1671_v9 = vadd.f32 1.0, %v6998_v39 }
 0x224   :  { %v1665_v6 = vadd.f32 1.0, %v7000_v52 }
 0x225   :  { %7001 = vrcp.f32 %v1671_v9 }
 0x226   :  { %7003 = vrcp.f32 %v1665_v6 }
 0x22c   :  { %v1495_v21 = vpop.f32.mrb[12].mxu1 }
 0x22d   :  { %v1644_v13 = vadd.f32 %v8145_v24, %v1495_v21  ;;  %v1497_v49 = vpop.f32.mrb[13].mxu1 }
 0x22e   :  { %v1645_v11 = vadd.f32 %v8149_v32, %v1497_v49 }
 0x22f   :  { %7005 = vtanh.f32 %v1644_v13  ;;  %v7002_v59 = vpop.eup %7001 }
 0x230   :  { %v4473_v27 = vmul.f32 -1.442695, %v1645_v11  ;;  %v7004_v10 = vpop.eup %7003  ;;  %v1681_v42 = vmul.f32 0.0, %v7002_v59  ;;  %v8158_v11 = vadd.f32 %v943_v28, %v433_v25 }
 0x232   :  { %7007 = vpow2.f32 %v4473_v27  ;;  %v8160_v27 = vadd.f32 %v945_v55, %v437_v56  ;;  %v8167_v55 = vadd.f32 %v1099_v3, %v8134_v36 }
 0x239   :  { %v7006_v39 = vpop.eup %7005 }
 0x23a   :  { %v1682_v57 = vmul.f32 %v7006_v39, %v7004_v10 }
 0x23c   :  { %v7008_v52 = vpop.eup %7007  ;;  %v8153_v22 = vadd.f32 %v1682_v57, %v1681_v42 }
 0x23d   :  { %v1678_v61 = vadd.f32 1.0, %v7008_v52 }
 0x23e   :  { %9724 = vst [vmem:[#allocation158_spill] sm:$0xff] %v8153_v22  ;;  %7009 = vtanh.f32 %v8153_v22 }
 0x23f   :  { %7011 = vrcp.f32 %v1678_v61 }
 0x248   :  { %v7010_v14 = vpop.eup %7009 }
 0x249   :  { %v7012_v21 = vpop.eup %7011 }
 0x24a   :  { %v8156_v6 = vmul.f32 %v7012_v21, %v7010_v14 }
 0x24c   :  { %9725 = vst [vmem:[#allocation159_spill] sm:$0xff] %v8156_v6 }
 0x252   :  { %v1566_v9 = vpop.f32.mrb[10].mxu0 }
 0x253   :  { %v1650_v13 = vrot.slane %v1566_v9, 2  ;;  %v1568_v49 = vpop.f32.mrb[11].mxu0  ;;  %v8164_v9 = vadd.f32 %v1097_v31, %v441_v0 }
 0x254   :  { %v1651_v59 = vrot.slane %v1568_v49, 2 }
 0x255   :  { %v1658_v10 = vadd.f32 %v8158_v11, %v1650_v13 }
 0x256   :  { %v1659_v39 = vadd.f32 %v8160_v27, %v1651_v59 }
 0x257   :  { %v4474_v57 = vmul.f32 -1.442695, %v1658_v10 }
 0x258   :  { %v4475_v42 = vmul.f32 -1.442695, %v1659_v39 }
 0x25a   :  { %7013 = vpow2.f32 %v4475_v42 }
 0x25b   :  { %7015 = vpow2.f32 %v4474_v57 }
 0x264   :  { %v7014_v52 = vpop.eup %7013 }
 0x265   :  { %v7016_v61 = vpop.eup %7015  ;;  %v1695_v14 = vadd.f32 1.0, %v7014_v52 }
 0x266   :  { %v1689_v21 = vadd.f32 1.0, %v7016_v61 }
 0x267   :  { %7017 = vrcp.f32 %v1695_v14 }
 0x268   :  { %7019 = vrcp.f32 %v1689_v21  ;;  %v9727_v21 = vld [vmem:[#allocation73_spill] sm:$0xff] }
 0x26c   :  { %v1637_v22 = vpop.f32.mrb[14].mxu1 }
 0x26d   :  { %v1652_v28 = vrot.slane %v1637_v22, 2  ;;  %v1639_v25 = vpop.f32.mrb[15].mxu1 }
 0x26e   :  { %v1653_v56 = vrot.slane %v1639_v25, 2  ;;  %v9729_v25 = vld [vmem:[#allocation75_spill] sm:$0xff] }
 0x26f   :  { %v1660_v13 = vadd.f32 %v8164_v9, %v1652_v28  ;;  %v9728_v28 = vld [vmem:[#allocation98_spill] sm:$0xff] }
 0x270   :  { %v1661_v49 = vadd.f32 %v8167_v55, %v1653_v56  ;;  %v9730_v56 = vld [vmem:[#allocation100_spill] sm:$0xff] }
 0x271   :  { %7021 = vtanh.f32 %v1660_v13  ;;  %v7018_v10 = vpop.eup %7017  ;;  %v9731_v13 = vld [vmem:[#allocation77_spill] sm:$0xff] }
 0x272   :  { %v4476_v59 = vmul.f32 -1.442695, %v1661_v49  ;;  %v7020_v39 = vpop.eup %7019  ;;  %v1705_v31 = vmul.f32 0.0, %v7018_v10  ;;  %v9732_v49 = vld [vmem:[#allocation102_spill] sm:$0xff]  ;;  %v9734_v10 = vld [vmem:[#allocation104_spill] sm:$0xff] }
 0x274   :  { %7023 = vpow2.f32 %v4476_v59  ;;  %v9733_v59 = vld [vmem:[#allocation79_spill] sm:$0xff] }
 0x27b   :  { %v7022_v42 = vpop.eup %7021 }
 0x27c   :  { %v1706_v0 = vmul.f32 %v7022_v42, %v7020_v39  ;;  %v9735_v39 = vld [vmem:[#allocation81_spill] sm:$0xff]  ;;  %v9736_v42 = vld [vmem:[#allocation106_spill] sm:$0xff] }
 0x27e   :  { %v7024_v22 = vpop.eup %7023  ;;  %v8171_v57 = vadd.f32 %v1706_v0, %v1705_v31  ;;  %v9737_v31 = vld [vmem:[#allocation83_spill] sm:$0xff]  ;;  %v9738_v0 = vld [vmem:[#allocation108_spill] sm:$0xff] }
 0x27f   :  { %v1702_v36 = vadd.f32 1.0, %v7024_v22  ;;  %v9739_v22 = vld [vmem:[#allocation85_spill] sm:$0xff] }
 0x280   :  { %7025 = vtanh.f32 %v8171_v57 }
 0x281   :  { %7027 = vrcp.f32 %v1702_v36  ;;  %v9740_v36 = vld [vmem:[#allocation110_spill] sm:$0xff] }
 0x28a   :  { %v7026_v3 = vpop.eup %7025 }
 0x28b   :  { %v7028_v52 = vpop.eup %7027 }
 0x28c   :  { %v8174_v61 = vmul.f32 %v7028_v52, %v7026_v3  ;;  %v9741_v3 = vld [vmem:[#allocation87_spill] sm:$0xff]  ;;  %v9742_v52 = vld [vmem:[#allocation112_spill] sm:$0xff] }
 0x28e   :  { %9726 = vst [vmem:[#allocation160_spill] sm:$0xff] %v8174_v61  ;;  %v1711_v14 = vrot.slane %v8174_v61, 6  ;;  %v9744_v61 = vld [vmem:[#allocation114_spill] sm:$0xff] }
 0x290   :  { %1777 = vmatprep.mubr.f32.mxu0 %v1711_v14  ;;  %1848 = vmatprep.mubr.f32.mxu1 %v1711_v14 }
 0x291   :  { %1778 = vmatmul.mubr.f32.vlgmr.msra.gmra.mrb[12].mxu0 %v8156_v6  ;;  %1849 = vmatmul.mubr.f32.vlgmr.msra.gmra.mrb[16].mxu1 %v8156_v6 }
 0x292   :  { %5257 = vmatpush1.bf16.msra.mxu0 %v9727_v21  ;;  %5321 = vmatpush1.bf16.msra.mxu1 %v9728_v28 }
 0x293   :  { %1919 = vmatprep.mubr.f32.mxu0 %v1711_v14  ;;  %1990 = vmatprep.mubr.f32.mxu1 %v1711_v14  ;;  %v9743_v14 = vld [vmem:[#allocation89_spill] sm:$0xff] }
 0x294   :  { %5259 = vmatprep.subr.bf16.mxu0 %v9729_v25  ;;  %5323 = vmatprep.subr.bf16.mxu1 %v9730_v56 }
 0x296   :  { %5261 = vmatpush1.bf16.msra.mxu0 %v9731_v13  ;;  %5325 = vmatpush1.bf16.msra.mxu1 %v9732_v49 }
 0x297   :  { %5263 = vmatprep.subr.bf16.mxu0 %v9733_v59  ;;  %5327 = vmatprep.subr.bf16.mxu1 %v9734_v10  ;;  %v9745_v10 = vld [vmem:[#allocation91_spill] sm:$0xff] }
 0x29a   :  { %5265 = vmatpush1.bf16.msra.mxu0 %v9735_v39  ;;  %5329 = vmatpush1.bf16.msra.mxu1 %v9736_v42  ;;  %v9746_v39 = vld [vmem:[#allocation116_spill] sm:$0xff]  ;;  %v9747_v42 = vld [vmem:[#allocation93_spill] sm:$0xff] }
 0x29b   :  { %5267 = vmatprep.subr.bf16.mxu0 %v9737_v31  ;;  %5331 = vmatprep.subr.bf16.mxu1 %v9738_v0  ;;  %v9748_v31 = vld [vmem:[#allocation118_spill] sm:$0xff]  ;;  %v9749_v0 = vld [vmem:[#allocation95_spill] sm:$0xff] }
 0x29e   :  { %5269 = vmatpush1.bf16.msra.mxu0 %v9739_v22  ;;  %5333 = vmatpush1.bf16.msra.mxu1 %v9740_v36  ;;  %v9750_v22 = vld [vmem:[#allocation120_spill] sm:$0xff]  ;;  %v9751_v36 = vld [vmem:[#allocation97_spill] sm:$0xff] }
 0x29f   :  { %5271 = vmatprep.subr.bf16.mxu0 %v9741_v3  ;;  %5335 = vmatprep.subr.bf16.mxu1 %v9742_v52  ;;  %v9752_v3 = vld [vmem:[#allocation122_spill] sm:$0xff]  ;;  %v9753_v52 = vld [vmem:[#allocation99_spill] sm:$0xff] }
 0x2a2   :  { %5273 = vmatpush1.bf16.msra.mxu0 %v9743_v14  ;;  %5337 = vmatpush1.bf16.msra.mxu1 %v9744_v61  ;;  %v9754_v14 = vld [vmem:[#allocation124_spill] sm:$0xff]  ;;  %v9755_v61 = vld [vmem:[#allocation101_spill] sm:$0xff] }
 0x2a3   :  { %5275 = vmatprep.subr.bf16.mxu0 %v9745_v10  ;;  %5339 = vmatprep.subr.bf16.mxu1 %v9746_v39  ;;  %v9756_v10 = vld [vmem:[#allocation126_spill] sm:$0xff]  ;;  %v9757_v39 = vld [vmem:[#allocation103_spill] sm:$0xff] }
 0x2a6   :  { %5277 = vmatpush1.bf16.msra.mxu0 %v9747_v42  ;;  %5341 = vmatpush1.bf16.msra.mxu1 %v9748_v31  ;;  %v9758_v42 = vld [vmem:[#allocation128_spill] sm:$0xff]  ;;  %v9759_v31 = vld [vmem:[#allocation105_spill] sm:$0xff] }
 0x2a7   :  { %5279 = vmatprep.subr.bf16.mxu0 %v9749_v0  ;;  %5343 = vmatprep.subr.bf16.mxu1 %v9750_v22  ;;  %v9760_v22 = vld [vmem:[#allocation107_spill] sm:$0xff] }
 0x2aa   :  { %5281 = vmatpush1.bf16.msra.mxu0 %v9751_v36  ;;  %5345 = vmatpush1.bf16.msra.mxu1 %v9752_v3  ;;  %v9761_v3 = vld [vmem:[#allocation109_spill] sm:$0xff] }
 0x2ab   :  { %5283 = vmatprep.subr.bf16.mxu0 %v9753_v52  ;;  %5347 = vmatprep.subr.bf16.mxu1 %v9754_v14  ;;  %v9762_v52 = vld [vmem:[#allocation134_spill] sm:$0xff]  ;;  %v9763_v14 = vld [vmem:[#allocation111_spill] sm:$0xff] }
 0x2ae   :  { %5285 = vmatpush1.bf16.msra.mxu0 %v9755_v61  ;;  %5349 = vmatpush1.bf16.msra.mxu1 %v9756_v10  ;;  %v9764_v61 = vld [vmem:[#allocation135_spill] sm:$0xff]  ;;  %v9765_v10 = vld [vmem:[#allocation113_spill] sm:$0xff] }
 0x2af   :  { %5287 = vmatprep.subr.bf16.mxu0 %v9757_v39  ;;  %5351 = vmatprep.subr.bf16.mxu1 %v9758_v42  ;;  %v9766_v39 = vld [vmem:[#allocation136_spill] sm:$0xff]  ;;  %v9767_v42 = vld [vmem:[#allocation115_spill] sm:$0xff] }
 0x2b2   :  { %5289 = vmatpush1.bf16.msra.mxu0 %v9759_v31  ;;  %5353 = vmatpush1.bf16.msra.mxu1 %v7959_v23  ;;  %v9768_v31 = vld [vmem:[#allocation137_spill] sm:$0xff] }
 0x2b3   :  { %5291 = vmatprep.subr.bf16.mxu0 %v9760_v22  ;;  %5355 = vmatprep.subr.bf16.mxu1 %v7966_v51  ;;  %v9769_v23 = vld [vmem:[#allocation117_spill] sm:$0xff]  ;;  %v9770_v51 = vld [vmem:[#allocation119_spill] sm:$0xff] }
 0x2b6   :  { %5293 = vmatpush1.bf16.msra.mxu0 %v9761_v3  ;;  %5357 = vmatpush1.bf16.msra.mxu1 %v9762_v52  ;;  %v9771_v3 = vld [vmem:[#allocation139_spill] sm:$0xff]  ;;  %v9772_v52 = vld [vmem:[#allocation121_spill] sm:$0xff] }
 0x2b7   :  { %5295 = vmatprep.subr.bf16.mxu0 %v9763_v14  ;;  %5359 = vmatprep.subr.bf16.mxu1 %v9764_v61  ;;  %v9773_v61 = vld [vmem:[#allocation123_spill] sm:$0xff] }
 0x2ba   :  { %5297 = vmatpush1.bf16.msra.mxu0 %v9765_v10  ;;  %5361 = vmatpush1.bf16.msra.mxu1 %v9766_v39  ;;  %v9774_v39 = vld [vmem:[#allocation125_spill] sm:$0xff] }
 0x2bb   :  { %5299 = vmatprep.subr.bf16.mxu0 %v9767_v42  ;;  %5363 = vmatprep.subr.bf16.mxu1 %v9768_v31  ;;  %v9775_v31 = vld [vmem:[#allocation127_spill] sm:$0xff] }
 0x2be   :  { %5301 = vmatpush1.bf16.msra.mxu0 %v9769_v23  ;;  %5365 = vmatpush1.bf16.msra.mxu1 %v7997_v18  ;;  %v9776_v18 = vld [vmem:[#allocation129_spill] sm:$0xff] }
 0x2bf   :  { %5303 = vmatprep.subr.bf16.mxu0 %v9770_v51  ;;  %5367 = vmatprep.subr.bf16.mxu1 %v9771_v3  ;;  %v9777_v3 = vld [vmem:[#allocation131_spill] sm:$0xff] }
 0x2c2   :  { %5305 = vmatpush1.bf16.msra.mxu0 %v9772_v52  ;;  %5369 = vmatpush1.bf16.msra.mxu1 %v8007_v63  ;;  %v9778_v63 = vld [vmem:[#allocation133_spill] sm:$0xff] }
 0x2c3   :  { %5307 = vmatprep.subr.bf16.mxu0 %v9773_v61  ;;  %5371 = vmatprep.subr.bf16.mxu1 %v8011_v43  ;;  %v9779_v43 = vld [vmem:[#allocation19_spill] sm:$0xff] }
 0x2c6   :  { %5309 = vmatpush1.bf16.msra.mxu0 %v9774_v39  ;;  %5373 = vmatpush1.bf16.msra.mxu1 %v8018_v30 }
 0x2c7   :  { %5311 = vmatprep.subr.bf16.mxu0 %v9775_v31  ;;  %5375 = vmatprep.subr.bf16.mxu1 %v8025_v46  ;;  %v9780_v46 = vld [vmem:[#allocation20_spill] sm:$0xff] }
 0x2ca   :  { %5313 = vmatpush1.bf16.msra.mxu0 %v9776_v18  ;;  %5377 = vmatpush1.bf16.msra.mxu1 %v8032_v40  ;;  %v9781_v40 = vld [vmem:[#allocation21_spill] sm:$0xff] }
 0x2cb   :  { %5315 = vmatprep.subr.bf16.mxu0 %v9777_v3  ;;  %5379 = vmatprep.subr.bf16.mxu1 %v8039_v16  ;;  %v9782_v16 = vld [vmem:[#allocation22_spill] sm:$0xff] }
 0x2ce   :  { %5317 = vmatpush1.bf16.msra.mxu0 %v9778_v63  ;;  %5381 = vmatpush1.bf16.msra.mxu1 %v8043_v4  ;;  %v9783_v4 = vld [vmem:[#allocation23_spill] sm:$0xff] }
 0x2cf   :  { %5383 = vmatprep.subr.bf16.mxu0 %v9779_v43  ;;  %5447 = vmatprep.subr.bf16.mxu1 %v7650_v26  ;;  %v9784_v26 = vld [vmem:[#allocation24_spill] sm:$0xff] }
 0x2d1   :  { %1920 = vmatmul.mubr.f32.vlgmr.msra.gmra.mrb[14].mxu0 %v8156_v6  ;;  %1991 = vmatmul.mubr.f32.vlgmr.msra.gmra.mrb[18].mxu1 %v8156_v6  ;;  %v9785_v6 = vld [vmem:[#allocation64_spill] sm:$0xff] }
 0x2d2   :  { %5385 = vmatpush1.bf16.msra.mxu0 %v9780_v46  ;;  %5449 = vmatpush1.bf16.msra.mxu1 %v7658_v48 }
 0x2d3   :  { %5387 = vmatprep.subr.bf16.mxu0 %v9781_v40  ;;  %5451 = vmatprep.subr.bf16.mxu1 %v7663_v54 }
 0x2d6   :  { %5389 = vmatpush1.bf16.msra.mxu0 %v9782_v16  ;;  %5453 = vmatpush1.bf16.msra.mxu1 %v7672_v62 }
 0x2d7   :  { %5391 = vmatprep.subr.bf16.mxu0 %v9783_v4  ;;  %5455 = vmatprep.subr.bf16.mxu1 %v7678_v38 }
 0x2da   :  { %5393 = vmatpush1.bf16.msra.mxu0 %v9784_v26  ;;  %5457 = vmatpush1.bf16.msra.mxu1 %v7686_v12 }
 0x2db   :  { %5395 = vmatprep.subr.bf16.mxu0 %v7624_v58  ;;  %5459 = vmatprep.subr.bf16.mxu1 %v7691_v20 }
 0x2de   :  { %5397 = vmatpush1.bf16.msra.mxu0 %v7627_v5  ;;  %5461 = vmatpush1.bf16.msra.mxu1 %v7699_v29 }
 0x2df   :  { %5399 = vmatprep.subr.bf16.mxu0 %v7630_v7  ;;  %5463 = vmatprep.subr.bf16.mxu1 %v7704_v37 }
 0x2e2   :  { %5401 = vmatpush1.bf16.msra.mxu0 %v7634_v17  ;;  %5465 = vmatpush1.bf16.msra.mxu1 %v7711_v50 }
 0x2e3   :  { %5403 = vmatprep.subr.bf16.mxu0 %v7637_v19  ;;  %5467 = vmatprep.subr.bf16.mxu1 %v7716_v60  ;;  %v9818_v19 = vld [vmem:[#allocation143_spill] sm:$0xff] }
 0x2e6   :  { %5405 = vmatpush1.bf16.msra.mxu0 %v7642_v33  ;;  %5469 = vmatpush1.bf16.msra.mxu1 %v7723_v8  ;;  %v9786_v8 = vld [vmem:[#allocation41_spill] sm:$0xff] }
 0x2e7   :  { %5407 = vmatprep.subr.bf16.mxu0 %v7645_v35  ;;  %5471 = vmatprep.subr.bf16.mxu1 %v7728_v15  ;;  %v9787_v35 = vld [vmem:[#allocation66_spill] sm:$0xff]  ;;  %v9788_v15 = vld [vmem:[#allocation43_spill] sm:$0xff] }
 0x2ea   :  { %5409 = vmatpush1.bf16.msra.mxu0 %v7653_v47  ;;  %5473 = vmatpush1.bf16.msra.mxu1 %v7735_v34  ;;  %v9789_v47 = vld [vmem:[#allocation68_spill] sm:$0xff]  ;;  %v9790_v34 = vld [vmem:[#allocation45_spill] sm:$0xff] }
 0x2eb   :  { %5411 = vmatprep.subr.bf16.mxu0 %v7661_v53  ;;  %5475 = vmatprep.subr.bf16.mxu1 %v9693_v2  ;;  %v9791_v53 = vld [vmem:[#allocation70_spill] sm:$0xff]  ;;  %v9792_v2 = vld [vmem:[#allocation47_spill] sm:$0xff] }
 0x2ee   :  { %5413 = vmatpush1.bf16.msra.mxu0 %v7668_v1  ;;  %5477 = vmatpush1.bf16.msra.mxu1 %v9695_v44  ;;  %v9793_v1 = vld [vmem:[#allocation72_spill] sm:$0xff]  ;;  %v9794_v44 = vld [vmem:[#allocation49_spill] sm:$0xff] }
 0x2ef   :  { %5415 = vmatprep.subr.bf16.mxu0 %v7674_v45  ;;  %5479 = vmatprep.subr.bf16.mxu1 %v9785_v6  ;;  %v9795_v45 = vld [vmem:[#allocation74_spill] sm:$0xff]  ;;  %v9796_v6 = vld [vmem:[#allocation51_spill] sm:$0xff] }
 0x2f2   :  { %5417 = vmatpush1.bf16.msra.mxu0 %v9786_v8  ;;  %5481 = vmatpush1.bf16.msra.mxu1 %v9787_v35  ;;  %v9797_v8 = vld [vmem:[#allocation76_spill] sm:$0xff]  ;;  %v9798_v35 = vld [vmem:[#allocation53_spill] sm:$0xff] }
 0x2f3   :  { %5419 = vmatprep.subr.bf16.mxu0 %v9788_v15  ;;  %5483 = vmatprep.subr.bf16.mxu1 %v9789_v47  ;;  %v9799_v15 = vld [vmem:[#allocation78_spill] sm:$0xff]  ;;  %v9800_v47 = vld [vmem:[#allocation55_spill] sm:$0xff] }
 0x2f6   :  { %5421 = vmatpush1.bf16.msra.mxu0 %v9790_v34  ;;  %5485 = vmatpush1.bf16.msra.mxu1 %v9791_v53  ;;  %v9801_v34 = vld [vmem:[#allocation80_spill] sm:$0xff]  ;;  %v9802_v53 = vld [vmem:[#allocation57_spill] sm:$0xff] }
 0x2f7   :  { %5423 = vmatprep.subr.bf16.mxu0 %v9792_v2  ;;  %5487 = vmatprep.subr.bf16.mxu1 %v9793_v1  ;;  %v9803_v2 = vld [vmem:[#allocation82_spill] sm:$0xff]  ;;  %v9804_v1 = vld [vmem:[#allocation59_spill] sm:$0xff] }
 0x2fa   :  { %5425 = vmatpush1.bf16.msra.mxu0 %v9794_v44  ;;  %5489 = vmatpush1.bf16.msra.mxu1 %v9795_v45  ;;  %v9805_v44 = vld [vmem:[#allocation84_spill] sm:$0xff]  ;;  %v9806_v45 = vld [vmem:[#allocation61_spill] sm:$0xff] }
 0x2fb   :  { %5427 = vmatprep.subr.bf16.mxu0 %v9796_v6  ;;  %5491 = vmatprep.subr.bf16.mxu1 %v9797_v8  ;;  %v9807_v6 = vld [vmem:[#allocation86_spill] sm:$0xff]  ;;  %v9808_v8 = vld [vmem:[#allocation63_spill] sm:$0xff] }
 0x2fe   :  { %5429 = vmatpush1.bf16.msra.mxu0 %v9798_v35  ;;  %5493 = vmatpush1.bf16.msra.mxu1 %v9799_v15  ;;  %v9809_v35 = vld [vmem:[#allocation88_spill] sm:$0xff]  ;;  %v9810_v15 = vld [vmem:[#allocation65_spill] sm:$0xff] }
 0x2ff   :  { %5431 = vmatprep.subr.bf16.mxu0 %v9800_v47  ;;  %5495 = vmatprep.subr.bf16.mxu1 %v9801_v34  ;;  %v9811_v47 = vld [vmem:[#allocation90_spill] sm:$0xff]  ;;  %v9812_v34 = vld [vmem:[#allocation67_spill] sm:$0xff] }
 0x302   :  { %5433 = vmatpush1.bf16.msra.mxu0 %v9802_v53  ;;  %5497 = vmatpush1.bf16.msra.mxu1 %v9803_v2  ;;  %v9813_v53 = vld [vmem:[#allocation92_spill] sm:$0xff]  ;;  %v9814_v2 = vld [vmem:[#allocation69_spill] sm:$0xff] }
 0x303   :  { %5435 = vmatprep.subr.bf16.mxu0 %v9804_v1  ;;  %5499 = vmatprep.subr.bf16.mxu1 %v9805_v44  ;;  %v9815_v1 = vld [vmem:[#allocation94_spill] sm:$0xff]  ;;  %v9816_v44 = vld [vmem:[#allocation71_spill] sm:$0xff] }
 0x306   :  { %5437 = vmatpush1.bf16.msra.mxu0 %v9806_v45  ;;  %5501 = vmatpush1.bf16.msra.mxu1 %v9807_v6  ;;  %v9817_v45 = vld [vmem:[#allocation96_spill] sm:$0xff] }
 0x307   :  { %5439 = vmatprep.subr.bf16.mxu0 %v9808_v8  ;;  %5503 = vmatprep.subr.bf16.mxu1 %v9809_v35 }
 0x30a   :  { %5441 = vmatpush1.bf16.msra.mxu0 %v9810_v15  ;;  %5505 = vmatpush1.bf16.msra.mxu1 %v9811_v47 }
 0x30b   :  { %5443 = vmatprep.subr.bf16.mxu0 %v9812_v34  ;;  %5507 = vmatprep.subr.bf16.mxu1 %v9813_v53 }
 0x30e   :  { %5445 = vmatpush1.bf16.msra.mxu0 %v9814_v2  ;;  %5509 = vmatpush1.bf16.msra.mxu1 %v9815_v1 }
 0x30f   :  { %5511 = vmatprep.subr.bf16.mxu0 %v9816_v44  ;;  %5575 = vmatprep.subr.bf16.mxu1 %v9817_v45 }
 0x364   :  { %v1779_v6 = vpop.f32.mrb[12].mxu0  ;;  %v1850_v8 = vpop.f32.mrb[16].mxu1 }
 0x365   :  { %v2001_v33 = vrot.slane %v1779_v6, 6  ;;  %v1781_v35 = vpop.f32.mrb[13].mxu0  ;;  %v1852_v60 = vpop.f32.mrb[17].mxu1  ;;  %v2003_v44 = vrot.slane %v1850_v8, 6 }
 0x366   :  { %v2002_v15 = vrot.slane %v1781_v35, 6  ;;  %v2004_v17 = vrot.slane %v1852_v60, 6  ;;  %v9819_v60 = vld [vmem:[#allocation158_spill] sm:$0xff] }
 0x367   :  { %v2009_v47 = vadd.f32 %v2001_v33, %v8015_v41  ;;  %v2011_v45 = vadd.f32 %v8145_v24, %v2003_v44 }
 0x368   :  { %v2010_v34 = vadd.f32 %v2002_v15, %v9818_v19  ;;  %v2012_v1 = vadd.f32 %v8149_v32, %v2004_v17 }
 0x369   :  { %v4477_v50 = vmul.f32 -1.442695, %v2009_v47 }
 0x36a   :  { %v4478_v53 = vmul.f32 -1.442695, %v2010_v34  ;;  %v4479_v2 = vmul.f32 -1.442695, %v2012_v1 }
 0x36b   :  { %7029 = vpow2.f32 %v4477_v50  ;;  %v2049_v50 = vrot.slane %v9819_v60, 6 }
 0x36c   :  { %7031 = vpow2.f32 %v4478_v53 }
 0x36d   :  { %7033 = vpow2.f32 %v4479_v2 }
 0x36e   :  { %7035 = vtanh.f32 %v2011_v45 }
 0x375   :  { %v7030_v37 = vpop.eup %7029 }
 0x376   :  { %v7032_v6 = vpop.eup %7031  ;;  %v2032_v7 = vadd.f32 1.0, %v7030_v37 }
 0x377   :  { %v2038_v35 = vadd.f32 1.0, %v7032_v6  ;;  %v7034_v33 = vpop.eup %7033 }
 0x378   :  { %7037 = vrcp.f32 %v2032_v7  ;;  %v7036_v47 = vpop.eup %7035  ;;  %v2045_v17 = vadd.f32 1.0, %v7034_v33 }
 0x379   :  { %7039 = vrcp.f32 %v2038_v35 }
 0x37a   :  { %7041 = vrcp.f32 %v2045_v17 }
 0x382   :  { %v7038_v15 = vpop.eup %7037 }
 0x383   :  { %v7040_v53 = vpop.eup %7039  ;;  %v2052_v34 = vmul.f32 %v7038_v15, %v7036_v47 }
 0x384   :  { %v2051_v8 = vmul.f32 %v7040_v53, %v2049_v50  ;;  %v7042_v37 = vpop.eup %7041 }
 0x386   :  { %v8314_v1 = vadd.f32 %v2052_v34, %v2051_v8 }
 0x388   :  { %7043 = vtanh.f32 %v8314_v1 }
 0x392   :  { %v7044_v2 = vpop.eup %7043 }
 0x393   :  { %v8317_v45 = vmul.f32 %v7044_v2, %v7042_v37 }
 0x3a4   :  { %v1921_v7 = vpop.f32.mrb[14].mxu0  ;;  %v1992_v44 = vpop.f32.mrb[18].mxu1 }
 0x3a5   :  { %v2017_v6 = vrot.slane %v1921_v7, 4  ;;  %v1923_v35 = vpop.f32.mrb[15].mxu0  ;;  %v1994_v24 = vpop.f32.mrb[19].mxu1  ;;  %v2019_v34 = vrot.slane %v1992_v44, 4 }
 0x3a6   :  { %v2018_v32 = vrot.slane %v1923_v35, 4  ;;  %v2020_v50 = vrot.slane %v1994_v24, 4  ;;  %v2076_v24 = vrot.slane %v8171_v57, 2  ;;  %v9821_v57 = vld [vmem:[#allocation104_spill] sm:$0xff] }
 0x3a7   :  { %v2025_v60 = vadd.f32 %v8158_v11, %v2017_v6  ;;  %v2027_v8 = vadd.f32 %v8164_v9, %v2019_v34 }
 0x3a8   :  { %v2026_v33 = vadd.f32 %v8160_v27, %v2018_v32  ;;  %v2028_v53 = vadd.f32 %v8167_v55, %v2020_v50 }
 0x3a9   :  { %v4480_v47 = vmul.f32 -1.442695, %v2025_v60 }
 0x3aa   :  { %v4481_v15 = vmul.f32 -1.442695, %v2026_v33  ;;  %v4482_v17 = vmul.f32 -1.442695, %v2028_v53 }
 0x3ab   :  { %7045 = vpow2.f32 %v4480_v47 }
 0x3ac   :  { %7047 = vpow2.f32 %v4481_v15 }
 0x3ad   :  { %7049 = vpow2.f32 %v4482_v17 }
 0x3ae   :  { %7051 = vtanh.f32 %v2027_v8 }
 0x3b5   :  { %v7046_v37 = vpop.eup %7045 }
 0x3b6   :  { %v7048_v2 = vpop.eup %7047  ;;  %v2059_v7 = vadd.f32 1.0, %v7046_v37 }
 0x3b7   :  { %v2065_v35 = vadd.f32 1.0, %v7048_v2  ;;  %v7050_v32 = vpop.eup %7049  ;;  %v8331_v2 = vrot.slane %v8317_v45, 2 }
 0x3b8   :  { %7053 = vrcp.f32 %v2059_v7  ;;  %v7052_v6 = vpop.eup %7051  ;;  %v2072_v15 = vadd.f32 1.0, %v7050_v32  ;;  %v9822_v7 = vld [vmem:[#allocation81_spill] sm:$0xff]  ;;  %v9824_v32 = vld [vmem:[#allocation83_spill] sm:$0xff] }
 0x3b9   :  { %7055 = vrcp.f32 %v2065_v35  ;;  %v9823_v35 = vld [vmem:[#allocation106_spill] sm:$0xff] }
 0x3ba   :  { %7057 = vrcp.f32 %v2072_v15  ;;  %v9830_v15 = vld [vmem:[#allocation89_spill] sm:$0xff] }
 0x3c2   :  { %v7054_v60 = vpop.eup %7053 }
 0x3c3   :  { %v7056_v33 = vpop.eup %7055  ;;  %v2079_v47 = vmul.f32 %v7054_v60, %v7052_v6  ;;  %v9825_v6 = vld [vmem:[#allocation108_spill] sm:$0xff]  ;;  %v9826_v60 = vld [vmem:[#allocation85_spill] sm:$0xff] }
 0x3c4   :  { %v2078_v44 = vmul.f32 %v7056_v33, %v2076_v24  ;;  %v7058_v53 = vpop.eup %7057  ;;  %v9827_v24 = vld [vmem:[#allocation110_spill] sm:$0xff]  ;;  %v9828_v33 = vld [vmem:[#allocation87_spill] sm:$0xff] }
 0x3c6   :  { %v8324_v50 = vadd.f32 %v2079_v47, %v2078_v44  ;;  %v9829_v47 = vld [vmem:[#allocation112_spill] sm:$0xff]  ;;  %v9831_v44 = vld [vmem:[#allocation114_spill] sm:$0xff] }
 0x3c8   :  { %7059 = vtanh.f32 %v8324_v50 }
 0x3d2   :  { %v7060_v34 = vpop.eup %7059 }
 0x3d3   :  { %v8327_v17 = vmul.f32 %v7060_v34, %v7058_v53  ;;  %v9832_v53 = vld [vmem:[#allocation91_spill] sm:$0xff]  ;;  %v9833_v34 = vld [vmem:[#allocation116_spill] sm:$0xff] }
 0x3d5   :  { %9820 = vst [vmem:[#allocation73_spill] sm:$0xff] %v8327_v17  ;;  %v2084_v8 = vrot.slane %v8327_v17, 2  ;;  %v9836_v17 = vld [vmem:[#allocation120_spill] sm:$0xff] }
 0x3d7   :  { %v2087_v37 = vrot.slane %v2084_v8, 2  ;;  %v9834_v8 = vld [vmem:[#allocation93_spill] sm:$0xff] }
 0x3d9   :  { %2154 = vmatprep.mubr.f32.mxu0 %v2087_v37  ;;  %2225 = vmatprep.mubr.f32.mxu1 %v2087_v37 }
 0x3da   :  { %2155 = vmatmul.mubr.f32.vlgmr.msra.gmra.mrb[16].mxu0 %v8331_v2  ;;  %2226 = vmatmul.mubr.f32.vlgmr.msra.gmra.mrb[20].mxu1 %v8331_v2 }
 0x3db   :  { %5513 = vmatpush1.bf16.msra.mxu0 %v9727_v21  ;;  %5577 = vmatpush1.bf16.msra.mxu1 %v9728_v28 }
 0x3dc   :  { %2296 = vmatprep.mubr.f32.mxu0 %v2087_v37  ;;  %2367 = vmatprep.mubr.f32.mxu1 %v2087_v37  ;;  %v9835_v37 = vld [vmem:[#allocation118_spill] sm:$0xff] }
 0x3dd   :  { %5515 = vmatprep.subr.bf16.mxu0 %v9729_v25  ;;  %5579 = vmatprep.subr.bf16.mxu1 %v9730_v56 }
 0x3df   :  { %5517 = vmatpush1.bf16.msra.mxu0 %v9731_v13  ;;  %5581 = vmatpush1.bf16.msra.mxu1 %v9732_v49 }
 0x3e0   :  { %5519 = vmatprep.subr.bf16.mxu0 %v9733_v59  ;;  %5583 = vmatprep.subr.bf16.mxu1 %v9821_v57 }
 0x3e3   :  { %5521 = vmatpush1.bf16.msra.mxu0 %v9822_v7  ;;  %5585 = vmatpush1.bf16.msra.mxu1 %v9823_v35 }
 0x3e4   :  { %5523 = vmatprep.subr.bf16.mxu0 %v9824_v32  ;;  %5587 = vmatprep.subr.bf16.mxu1 %v9825_v6 }
 0x3e7   :  { %5525 = vmatpush1.bf16.msra.mxu0 %v9826_v60  ;;  %5589 = vmatpush1.bf16.msra.mxu1 %v9827_v24 }
 0x3e8   :  { %5527 = vmatprep.subr.bf16.mxu0 %v9828_v33  ;;  %5591 = vmatprep.subr.bf16.mxu1 %v9829_v47  ;;  %v9837_v33 = vld [vmem:[#allocation122_spill] sm:$0xff]  ;;  %v9838_v47 = vld [vmem:[#allocation99_spill] sm:$0xff] }
 0x3eb   :  { %5529 = vmatpush1.bf16.msra.mxu0 %v9830_v15  ;;  %5593 = vmatpush1.bf16.msra.mxu1 %v9831_v44  ;;  %v9839_v15 = vld [vmem:[#allocation124_spill] sm:$0xff]  ;;  %v9840_v44 = vld [vmem:[#allocation101_spill] sm:$0xff] }
 0x3ec   :  { %5531 = vmatprep.subr.bf16.mxu0 %v9832_v53  ;;  %5595 = vmatprep.subr.bf16.mxu1 %v9833_v34  ;;  %v9841_v53 = vld [vmem:[#allocation126_spill] sm:$0xff]  ;;  %v9842_v34 = vld [vmem:[#allocation103_spill] sm:$0xff] }
 0x3ef   :  { %5533 = vmatpush1.bf16.msra.mxu0 %v9834_v8  ;;  %5597 = vmatpush1.bf16.msra.mxu1 %v9835_v37  ;;  %v9843_v8 = vld [vmem:[#allocation128_spill] sm:$0xff]  ;;  %v9844_v37 = vld [vmem:[#allocation105_spill] sm:$0xff] }
 0x3f0   :  { %5535 = vmatprep.subr.bf16.mxu0 %v9749_v0  ;;  %5599 = vmatprep.subr.bf16.mxu1 %v9836_v17  ;;  %v9845_v0 = vld [vmem:[#allocation130_spill] sm:$0xff] }
 0x3f3   :  { %5537 = vmatpush1.bf16.msra.mxu0 %v9751_v36  ;;  %5601 = vmatpush1.bf16.msra.mxu1 %v9837_v33  ;;  %v9846_v36 = vld [vmem:[#allocation132_spill] sm:$0xff]  ;;  %v9847_v33 = vld [vmem:[#allocation109_spill] sm:$0xff] }
 0x3f4   :  { %5539 = vmatprep.subr.bf16.mxu0 %v9838_v47  ;;  %5603 = vmatprep.subr.bf16.mxu1 %v9839_v15  ;;  %v9848_v47 = vld [vmem:[#allocation134_spill] sm:$0xff] }
 0x3f7   :  { %5541 = vmatpush1.bf16.msra.mxu0 %v9840_v44  ;;  %5605 = vmatpush1.bf16.msra.mxu1 %v9841_v53  ;;  %v9849_v44 = vld [vmem:[#allocation135_spill] sm:$0xff] }
 0x3f8   :  { %5543 = vmatprep.subr.bf16.mxu0 %v9842_v34  ;;  %5607 = vmatprep.subr.bf16.mxu1 %v9843_v8  ;;  %v9850_v34 = vld [vmem:[#allocation136_spill] sm:$0xff] }
 0x3fb   :  { %5545 = vmatpush1.bf16.msra.mxu0 %v9844_v37  ;;  %5609 = vmatpush1.bf16.msra.mxu1 %v9845_v0  ;;  %v9851_v37 = vld [vmem:[#allocation137_spill] sm:$0xff] }
 0x3fc   :  { %5547 = vmatprep.subr.bf16.mxu0 %v9760_v22  ;;  %5611 = vmatprep.subr.bf16.mxu1 %v9846_v36  ;;  %v9852_v22 = vld [vmem:[#allocation138_spill] sm:$0xff] }
 0x3ff   :  { %5549 = vmatpush1.bf16.msra.mxu0 %v9847_v33  ;;  %5613 = vmatpush1.bf16.msra.mxu1 %v9848_v47  ;;  %v9853_v33 = vld [vmem:[#allocation139_spill] sm:$0xff] }
 0x400   :  { %5551 = vmatprep.subr.bf16.mxu0 %v9763_v14  ;;  %5615 = vmatprep.subr.bf16.mxu1 %v9849_v44  ;;  %v9854_v14 = vld [vmem:[#allocation140_spill] sm:$0xff] }
 0x403   :  { %5553 = vmatpush1.bf16.msra.mxu0 %v9765_v10  ;;  %5617 = vmatpush1.bf16.msra.mxu1 %v9850_v34  ;;  %v9855_v10 = vld [vmem:[#allocation141_spill] sm:$0xff] }
 0x404   :  { %5555 = vmatprep.subr.bf16.mxu0 %v9767_v42  ;;  %5619 = vmatprep.subr.bf16.mxu1 %v9851_v37 }
 0x407   :  { %5557 = vmatpush1.bf16.msra.mxu0 %v9769_v23  ;;  %5621 = vmatpush1.bf16.msra.mxu1 %v9852_v22  ;;  %v9856_v23 = vld [vmem:[#allocation144_spill] sm:$0xff] }
 0x408   :  { %5559 = vmatprep.subr.bf16.mxu0 %v9770_v51  ;;  %5623 = vmatprep.subr.bf16.mxu1 %v9853_v33  ;;  %v9857_v51 = vld [vmem:[#allocation146_spill] sm:$0xff] }
 0x40b   :  { %5561 = vmatpush1.bf16.msra.mxu0 %v9772_v52  ;;  %5625 = vmatpush1.bf16.msra.mxu1 %v9854_v14  ;;  %v9858_v52 = vld [vmem:[#allocation148_spill] sm:$0xff] }
 0x40c   :  { %5563 = vmatprep.subr.bf16.mxu0 %v9773_v61  ;;  %5627 = vmatprep.subr.bf16.mxu1 %v9855_v10  ;;  %v9859_v61 = vld [vmem:[#allocation149_spill] sm:$0xff] }
 0x40f   :  { %5565 = vmatpush1.bf16.msra.mxu0 %v9774_v39  ;;  %5629 = vmatpush1.bf16.msra.mxu1 %v8018_v30  ;;  %v9860_v39 = vld [vmem:[#allocation32_spill] sm:$0xff] }
 0x410   :  { %5567 = vmatprep.subr.bf16.mxu0 %v9775_v31  ;;  %5631 = vmatprep.subr.bf16.mxu1 %v9856_v23 }
 0x413   :  { %5569 = vmatpush1.bf16.msra.mxu0 %v9776_v18  ;;  %5633 = vmatpush1.bf16.msra.mxu1 %v9857_v51 }
 0x414   :  { %5571 = vmatprep.subr.bf16.mxu0 %v9777_v3  ;;  %5635 = vmatprep.subr.bf16.mxu1 %v9858_v52 }
 0x417   :  { %5573 = vmatpush1.bf16.msra.mxu0 %v9778_v63  ;;  %5637 = vmatpush1.bf16.msra.mxu1 %v9859_v61 }
 0x418   :  { %5639 = vmatprep.subr.bf16.mxu0 %v9779_v43  ;;  %5703 = vmatprep.subr.bf16.mxu1 %v9860_v39 }
 0x41a   :  { %2297 = vmatmul.mubr.f32.vlgmr.msra.gmra.mrb[18].mxu0 %v8331_v2  ;;  %2368 = vmatmul.mubr.f32.vlgmr.msra.gmra.mrb[22].mxu1 %v8331_v2  ;;  %v9861_v2 = vld [vmem:[#allocation27_spill] sm:$0xff] }
 0x41b   :  { %5641 = vmatpush1.bf16.msra.mxu0 %v9780_v46  ;;  %5705 = vmatpush1.bf16.msra.mxu1 %v7658_v48 }
 0x41c   :  { %5643 = vmatprep.subr.bf16.mxu0 %v9781_v40  ;;  %5707 = vmatprep.subr.bf16.mxu1 %v7663_v54 }
 0x41f   :  { %5645 = vmatpush1.bf16.msra.mxu0 %v9782_v16  ;;  %5709 = vmatpush1.bf16.msra.mxu1 %v7672_v62  ;;  %v9862_v16 = vld [vmem:[#allocation48_spill] sm:$0xff] }
 0x420   :  { %5647 = vmatprep.subr.bf16.mxu0 %v9783_v4  ;;  %5711 = vmatprep.subr.bf16.mxu1 %v7678_v38  ;;  %v9863_v62 = vld [vmem:[#allocation28_spill] sm:$0xff]  ;;  %v9864_v4 = vld [vmem:[#allocation50_spill] sm:$0xff]  ;;  %v9865_v38 = vld [vmem:[#allocation29_spill] sm:$0xff] }
 0x423   :  { %5649 = vmatpush1.bf16.msra.mxu0 %v9784_v26  ;;  %5713 = vmatpush1.bf16.msra.mxu1 %v7686_v12  ;;  %v9866_v26 = vld [vmem:[#allocation52_spill] sm:$0xff]  ;;  %v9867_v12 = vld [vmem:[#allocation30_spill] sm:$0xff] }
 0x424   :  { %5651 = vmatprep.subr.bf16.mxu0 %v7624_v58  ;;  %5715 = vmatprep.subr.bf16.mxu1 %v7691_v20  ;;  %v9868_v58 = vld [vmem:[#allocation54_spill] sm:$0xff]  ;;  %v9869_v20 = vld [vmem:[#allocation31_spill] sm:$0xff] }
 0x427   :  { %5653 = vmatpush1.bf16.msra.mxu0 %v7627_v5  ;;  %5717 = vmatpush1.bf16.msra.mxu1 %v7699_v29  ;;  %v9870_v5 = vld [vmem:[#allocation56_spill] sm:$0xff]  ;;  %v9871_v29 = vld [vmem:[#allocation33_spill] sm:$0xff] }
 0x428   :  { %5655 = vmatprep.subr.bf16.mxu0 %v9861_v2  ;;  %5719 = vmatprep.subr.bf16.mxu1 %v9862_v16  ;;  %v9872_v2 = vld [vmem:[#allocation58_spill] sm:$0xff]  ;;  %v9873_v16 = vld [vmem:[#allocation35_spill] sm:$0xff] }
 0x42b   :  { %5657 = vmatpush1.bf16.msra.mxu0 %v9863_v62  ;;  %5721 = vmatpush1.bf16.msra.mxu1 %v9864_v4  ;;  %v9874_v62 = vld [vmem:[#allocation60_spill] sm:$0xff]  ;;  %v9875_v4 = vld [vmem:[#allocation37_spill] sm:$0xff] }
 0x42c   :  { %5659 = vmatprep.subr.bf16.mxu0 %v9865_v38  ;;  %5723 = vmatprep.subr.bf16.mxu1 %v9866_v26  ;;  %v9876_v38 = vld [vmem:[#allocation62_spill] sm:$0xff]  ;;  %v9877_v26 = vld [vmem:[#allocation39_spill] sm:$0xff] }
 0x42f   :  { %5661 = vmatpush1.bf16.msra.mxu0 %v9867_v12  ;;  %5725 = vmatpush1.bf16.msra.mxu1 %v9868_v58  ;;  %v9878_v12 = vld [vmem:[#allocation64_spill] sm:$0xff]  ;;  %v9879_v58 = vld [vmem:[#allocation41_spill] sm:$0xff] }
 0x430   :  { %5663 = vmatprep.subr.bf16.mxu0 %v9869_v20  ;;  %5727 = vmatprep.subr.bf16.mxu1 %v9870_v5  ;;  %v9880_v20 = vld [vmem:[#allocation66_spill] sm:$0xff]  ;;  %v9881_v5 = vld [vmem:[#allocation43_spill] sm:$0xff] }
 0x433   :  { %5665 = vmatpush1.bf16.msra.mxu0 %v9871_v29  ;;  %5729 = vmatpush1.bf16.msra.mxu1 %v9872_v2  ;;  %v9882_v29 = vld [vmem:[#allocation68_spill] sm:$0xff]  ;;  %v9883_v2 = vld [vmem:[#allocation45_spill] sm:$0xff] }
 0x434   :  { %5667 = vmatprep.subr.bf16.mxu0 %v9873_v16  ;;  %5731 = vmatprep.subr.bf16.mxu1 %v9874_v62  ;;  %v9884_v16 = vld [vmem:[#allocation70_spill] sm:$0xff]  ;;  %v9885_v62 = vld [vmem:[#allocation47_spill] sm:$0xff] }
 0x437   :  { %5669 = vmatpush1.bf16.msra.mxu0 %v9875_v4  ;;  %5733 = vmatpush1.bf16.msra.mxu1 %v9876_v38  ;;  %v9886_v4 = vld [vmem:[#allocation72_spill] sm:$0xff]  ;;  %v9887_v38 = vld [vmem:[#allocation49_spill] sm:$0xff] }
 0x438   :  { %5671 = vmatprep.subr.bf16.mxu0 %v9877_v26  ;;  %5735 = vmatprep.subr.bf16.mxu1 %v9878_v12  ;;  %v9888_v26 = vld [vmem:[#allocation74_spill] sm:$0xff]  ;;  %v9889_v12 = vld [vmem:[#allocation51_spill] sm:$0xff] }
 0x43b   :  { %5673 = vmatpush1.bf16.msra.mxu0 %v9879_v58  ;;  %5737 = vmatpush1.bf16.msra.mxu1 %v9880_v20  ;;  %v9890_v58 = vld [vmem:[#allocation76_spill] sm:$0xff]  ;;  %v9891_v20 = vld [vmem:[#allocation53_spill] sm:$0xff] }
 0x43c   :  { %5675 = vmatprep.subr.bf16.mxu0 %v9881_v5  ;;  %5739 = vmatprep.subr.bf16.mxu1 %v9882_v29  ;;  %v9892_v5 = vld [vmem:[#allocation78_spill] sm:$0xff]  ;;  %v9893_v29 = vld [vmem:[#allocation55_spill] sm:$0xff] }
 0x43f   :  { %5677 = vmatpush1.bf16.msra.mxu0 %v9883_v2  ;;  %5741 = vmatpush1.bf16.msra.mxu1 %v9884_v16  ;;  %v9894_v2 = vld [vmem:[#allocation80_spill] sm:$0xff]  ;;  %v9895_v16 = vld [vmem:[#allocation57_spill] sm:$0xff] }
 0x440   :  { %5679 = vmatprep.subr.bf16.mxu0 %v9885_v62  ;;  %5743 = vmatprep.subr.bf16.mxu1 %v9886_v4  ;;  %v9896_v62 = vld [vmem:[#allocation82_spill] sm:$0xff]  ;;  %v9897_v4 = vld [vmem:[#allocation59_spill] sm:$0xff] }
 0x443   :  { %5681 = vmatpush1.bf16.msra.mxu0 %v9887_v38  ;;  %5745 = vmatpush1.bf16.msra.mxu1 %v9888_v26  ;;  %v9898_v38 = vld [vmem:[#allocation84_spill] sm:$0xff]  ;;  %v9899_v26 = vld [vmem:[#allocation61_spill] sm:$0xff] }
 0x444   :  { %5683 = vmatprep.subr.bf16.mxu0 %v9889_v12  ;;  %5747 = vmatprep.subr.bf16.mxu1 %v9890_v58  ;;  %v9900_v12 = vld [vmem:[#allocation86_spill] sm:$0xff]  ;;  %v9901_v58 = vld [vmem:[#allocation63_spill] sm:$0xff] }
 0x447   :  { %5685 = vmatpush1.bf16.msra.mxu0 %v9891_v20  ;;  %5749 = vmatpush1.bf16.msra.mxu1 %v9892_v5  ;;  %v9902_v20 = vld [vmem:[#allocation88_spill] sm:$0xff]  ;;  %v9903_v5 = vld [vmem:[#allocation65_spill] sm:$0xff] }
 0x448   :  { %5687 = vmatprep.subr.bf16.mxu0 %v9893_v29  ;;  %5751 = vmatprep.subr.bf16.mxu1 %v9894_v2  ;;  %v9904_v29 = vld [vmem:[#allocation90_spill] sm:$0xff]  ;;  %v9905_v2 = vld [vmem:[#allocation67_spill] sm:$0xff] }
 0x44b   :  { %5689 = vmatpush1.bf16.msra.mxu0 %v9895_v16  ;;  %5753 = vmatpush1.bf16.msra.mxu1 %v9896_v62  ;;  %v9906_v16 = vld [vmem:[#allocation92_spill] sm:$0xff]  ;;  %v9907_v62 = vld [vmem:[#allocation69_spill] sm:$0xff] }
 0x44c   :  { %5691 = vmatprep.subr.bf16.mxu0 %v9897_v4  ;;  %5755 = vmatprep.subr.bf16.mxu1 %v9898_v38  ;;  %v9908_v4 = vld [vmem:[#allocation94_spill] sm:$0xff]  ;;  %v9909_v38 = vld [vmem:[#allocation71_spill] sm:$0xff] }
 0x44f   :  { %5693 = vmatpush1.bf16.msra.mxu0 %v9899_v26  ;;  %5757 = vmatpush1.bf16.msra.mxu1 %v9900_v12  ;;  %v9910_v26 = vld [vmem:[#allocation96_spill] sm:$0xff] }
 0x450   :  { %5695 = vmatprep.subr.bf16.mxu0 %v9901_v58  ;;  %5759 = vmatprep.subr.bf16.mxu1 %v9902_v20 }
 0x453   :  { %5697 = vmatpush1.bf16.msra.mxu0 %v9903_v5  ;;  %5761 = vmatpush1.bf16.msra.mxu1 %v9904_v29 }
 0x454   :  { %5699 = vmatprep.subr.bf16.mxu0 %v9905_v2  ;;  %5763 = vmatprep.subr.bf16.mxu1 %v9906_v16 }
 0x457   :  { %5701 = vmatpush1.bf16.msra.mxu0 %v9907_v62  ;;  %5765 = vmatpush1.bf16.msra.mxu1 %v9908_v4  ;;  %v9911_v4 = vld [vmem:[#allocation157_spill] sm:$0xff] }
 0x458   :  { %5767 = vmatprep.subr.bf16.mxu0 %v9909_v38  ;;  %5831 = vmatprep.subr.bf16.mxu1 %v9910_v26  ;;  %v9912_v26 = vld [vmem:[#allocation156_spill] sm:$0xff] }
 0x4ad   :  { %v2156_v12 = vpop.f32.mrb[16].mxu0  ;;  %v2227_v58 = vpop.f32.mrb[20].mxu1 }
 0x4ae   :  { %v2378_v54 = vrot.slane %v2156_v12, 4  ;;  %v2158_v20 = vpop.f32.mrb[17].mxu0  ;;  %v2229_v40 = vpop.f32.mrb[21].mxu1  ;;  %v2380_v38 = vrot.slane %v2227_v58, 4 }
 0x4af   :  { %v2379_v5 = vrot.slane %v2158_v20, 4  ;;  %v2381_v46 = vrot.slane %v2229_v40, 4 }
 0x4b0   :  { %v2386_v29 = vadd.f32 %v2378_v54, %v8015_v41  ;;  %v2388_v43 = vadd.f32 %v9912_v26, %v2380_v38 }
 0x4b1   :  { %v2387_v2 = vadd.f32 %v2379_v5, %v9818_v19  ;;  %v2389_v62 = vadd.f32 %v9911_v4, %v2381_v46 }
 0x4b2   :  { %v4483_v48 = vmul.f32 -1.442695, %v2386_v29 }
 0x4b3   :  { %v4484_v16 = vmul.f32 -1.442695, %v2387_v2  ;;  %v4485_v39 = vmul.f32 -1.442695, %v2389_v62 }
 0x4b4   :  { %7061 = vpow2.f32 %v4483_v48  ;;  %v2426_v48 = vrot.slane %v8314_v1, 6 }
 0x4b5   :  { %7063 = vpow2.f32 %v4484_v16 }
 0x4b6   :  { %7065 = vpow2.f32 %v4485_v39 }
 0x4b7   :  { %7067 = vtanh.f32 %v2388_v43 }
 0x4be   :  { %v7062_v61 = vpop.eup %7061 }
 0x4bf   :  { %v7064_v12 = vpop.eup %7063  ;;  %v2409_v63 = vadd.f32 1.0, %v7062_v61 }
 0x4c0   :  { %v2415_v20 = vadd.f32 1.0, %v7064_v12  ;;  %v7066_v5 = vpop.eup %7065 }
 0x4c1   :  { %7069 = vrcp.f32 %v2409_v63  ;;  %v7068_v54 = vpop.eup %7067  ;;  %v2422_v46 = vadd.f32 1.0, %v7066_v5  ;;  %v9913_v63 = vld [vmem:[#allocation159_spill] sm:$0xff] }
 0x4c2   :  { %7071 = vrcp.f32 %v2415_v20  ;;  %v4306_v39 = vsel %vm4305_vm4, %v9913_v63, %v8317_v45 }
 0x4c3   :  { %7073 = vrcp.f32 %v2422_v46 }
 0x4cb   :  { %v7070_v29 = vpop.eup %7069 }
 0x4cc   :  { %v7072_v40 = vpop.eup %7071  ;;  %v2429_v16 = vmul.f32 %v7070_v29, %v7068_v54 }
 0x4cd   :  { %v2428_v58 = vmul.f32 %v7072_v40, %v2426_v48  ;;  %v7074_v38 = vpop.eup %7073 }
 0x4cf   :  { %v8470_v62 = vadd.f32 %v2429_v16, %v2428_v58 }
 0x4d1   :  { %7075 = vtanh.f32 %v8470_v62 }
 0x4db   :  { %v7076_v43 = vpop.eup %7075 }
 0x4dc   :  { %v2432_v61 = vmul.f32 %v7076_v43, %v7074_v38 }
 0x4de   :  { %v8477_v2 = vsel %vm461_vm0, %v4306_v39, %v2432_v61 }
 0x4df   :  { %9914 = vst [vmem:[#allocation98_spill] sm:$0xff] %v8477_v2 }
 0x4ed   :  { %v2298_v1 = vpop.f32.mrb[18].mxu0  ;;  %v2369_v12 = vpop.f32.mrb[22].mxu1 }
 0x4ee   :  { %v2394_v20 = vrot.slane %v2298_v1, 6  ;;  %v2300_v5 = vpop.f32.mrb[19].mxu0  ;;  %v2371_v54 = vpop.f32.mrb[23].mxu1  ;;  %v2396_v38 = vrot.slane %v2369_v12, 6 }
 0x4ef   :  { %v2395_v29 = vrot.slane %v2300_v5, 6  ;;  %v2397_v58 = vrot.slane %v2371_v54, 6  ;;  %v2453_v54 = vrot.slane %v8324_v50, 2  ;;  %v9916_v50 = vld [vmem:[#allocation87_spill] sm:$0xff] }
 0x4f0   :  { %v2402_v48 = vadd.f32 %v8158_v11, %v2394_v20  ;;  %v2404_v63 = vadd.f32 %v8164_v9, %v2396_v38 }
 0x4f1   :  { %v2403_v40 = vadd.f32 %v8160_v27, %v2395_v29  ;;  %v2405_v45 = vadd.f32 %v8167_v55, %v2397_v58 }
 0x4f2   :  { %v4486_v16 = vmul.f32 -1.442695, %v2402_v48 }
 0x4f3   :  { %v4487_v46 = vmul.f32 -1.442695, %v2403_v40  ;;  %v4488_v43 = vmul.f32 -1.442695, %v2405_v45 }
 0x4f4   :  { %7077 = vpow2.f32 %v4486_v16 }
 0x4f5   :  { %7079 = vpow2.f32 %v4487_v46 }
 0x4f6   :  { %7081 = vpow2.f32 %v4488_v43 }
 0x4f7   :  { %7083 = vtanh.f32 %v2404_v63 }
 0x4fe   :  { %v7078_v39 = vpop.eup %7077 }
 0x4ff   :  { %v7080_v1 = vpop.eup %7079  ;;  %v2436_v2 = vadd.f32 1.0, %v7078_v39  ;;  %v8490_v39 = vrot.slane %v2432_v61, 4  ;;  %v9917_v61 = vld [vmem:[#allocation112_spill] sm:$0xff] }
 0x500   :  { %v2442_v5 = vadd.f32 1.0, %v7080_v1  ;;  %v7082_v20 = vpop.eup %7081  ;;  %v9918_v1 = vld [vmem:[#allocation89_spill] sm:$0xff] }
 0x501   :  { %7085 = vrcp.f32 %v2436_v2  ;;  %v7084_v29 = vpop.eup %7083  ;;  %v2449_v46 = vadd.f32 1.0, %v7082_v20  ;;  %v9920_v20 = vld [vmem:[#allocation91_spill] sm:$0xff] }
 0x502   :  { %7087 = vrcp.f32 %v2442_v5  ;;  %v9919_v5 = vld [vmem:[#allocation114_spill] sm:$0xff] }
 0x503   :  { %7089 = vrcp.f32 %v2449_v46  ;;  %v9926_v46 = vld [vmem:[#allocation122_spill] sm:$0xff] }
 0x50b   :  { %v7086_v48 = vpop.eup %7085 }
 0x50c   :  { %v7088_v40 = vpop.eup %7087  ;;  %v2456_v16 = vmul.f32 %v7086_v48, %v7084_v29  ;;  %v9921_v29 = vld [vmem:[#allocation116_spill] sm:$0xff]  ;;  %v9922_v48 = vld [vmem:[#allocation93_spill] sm:$0xff] }
 0x50d   :  { %v2455_v12 = vmul.f32 %v7088_v40, %v2453_v54  ;;  %v7090_v45 = vpop.eup %7089  ;;  %v9923_v54 = vld [vmem:[#allocation118_spill] sm:$0xff]  ;;  %v9924_v40 = vld [vmem:[#allocation95_spill] sm:$0xff] }
 0x50f   :  { %v8484_v58 = vadd.f32 %v2456_v16, %v2455_v12  ;;  %v9925_v16 = vld [vmem:[#allocation97_spill] sm:$0xff]  ;;  %v9927_v12 = vld [vmem:[#allocation99_spill] sm:$0xff] }
 0x511   :  { %7091 = vtanh.f32 %v8484_v58 }
 0x51b   :  { %v7092_v38 = vpop.eup %7091 }
 0x51c   :  { %v8487_v43 = vmul.f32 %v7092_v38, %v7090_v45  ;;  %v9928_v45 = vld [vmem:[#allocation101_spill] sm:$0xff]  ;;  %v9929_v38 = vld [vmem:[#allocation103_spill] sm:$0xff] }
 0x51e   :  { %9915 = vst [vmem:[#allocation75_spill] sm:$0xff] %v8487_v43  ;;  %v2461_v2 = vrot.slane %v8487_v43, 6  ;;  %v9932_v43 = vld [vmem:[#allocation109_spill] sm:$0xff] }
 0x520   :  { %v2464_v63 = vrot.slane %v2461_v2, 4  ;;  %v9930_v2 = vld [vmem:[#allocation105_spill] sm:$0xff] }
 0x522   :  { %2531 = vmatprep.mubr.f32.mxu0 %v2464_v63  ;;  %2602 = vmatprep.mubr.f32.mxu1 %v2464_v63 }
 0x523   :  { %2532 = vmatmul.mubr.f32.vlgmr.msra.gmra.mrb[20].mxu0 %v8490_v39  ;;  %2603 = vmatmul.mubr.f32.vlgmr.msra.gmra.mrb[24].mxu1 %v8490_v39 }
 0x524   :  { %5769 = vmatpush1.bf16.msra.mxu0 %v9727_v21  ;;  %5833 = vmatpush1.bf16.msra.mxu1 %v9728_v28 }
 0x525   :  { %2673 = vmatprep.mubr.f32.mxu0 %v2464_v63  ;;  %2744 = vmatprep.mubr.f32.mxu1 %v2464_v63  ;;  %v9931_v63 = vld [vmem:[#allocation107_spill] sm:$0xff] }
 0x526   :  { %5771 = vmatprep.subr.bf16.mxu0 %v9729_v25  ;;  %5835 = vmatprep.subr.bf16.mxu1 %v9730_v56 }
 0x528   :  { %5773 = vmatpush1.bf16.msra.mxu0 %v9731_v13  ;;  %5837 = vmatpush1.bf16.msra.mxu1 %v9732_v49 }
 0x529   :  { %5775 = vmatprep.subr.bf16.mxu0 %v9733_v59  ;;  %5839 = vmatprep.subr.bf16.mxu1 %v9821_v57 }
 0x52c   :  { %5777 = vmatpush1.bf16.msra.mxu0 %v9822_v7  ;;  %5841 = vmatpush1.bf16.msra.mxu1 %v9823_v35 }
 0x52d   :  { %5779 = vmatprep.subr.bf16.mxu0 %v9824_v32  ;;  %5843 = vmatprep.subr.bf16.mxu1 %v9825_v6 }
 0x530   :  { %5781 = vmatpush1.bf16.msra.mxu0 %v9826_v60  ;;  %5845 = vmatpush1.bf16.msra.mxu1 %v9827_v24 }
 0x531   :  { %5783 = vmatprep.subr.bf16.mxu0 %v9916_v50  ;;  %5847 = vmatprep.subr.bf16.mxu1 %v9917_v61 }
 0x534   :  { %5785 = vmatpush1.bf16.msra.mxu0 %v9918_v1  ;;  %5849 = vmatpush1.bf16.msra.mxu1 %v9919_v5 }
 0x535   :  { %5787 = vmatprep.subr.bf16.mxu0 %v9920_v20  ;;  %5851 = vmatprep.subr.bf16.mxu1 %v9921_v29 }
 0x538   :  { %5789 = vmatpush1.bf16.msra.mxu0 %v9922_v48  ;;  %5853 = vmatpush1.bf16.msra.mxu1 %v9923_v54 }
 0x539   :  { %5791 = vmatprep.subr.bf16.mxu0 %v9924_v40  ;;  %5855 = vmatprep.subr.bf16.mxu1 %v9836_v17 }
 0x53c   :  { %5793 = vmatpush1.bf16.msra.mxu0 %v9925_v16  ;;  %5857 = vmatpush1.bf16.msra.mxu1 %v9926_v46 }
 0x53d   :  { %5795 = vmatprep.subr.bf16.mxu0 %v9927_v12  ;;  %5859 = vmatprep.subr.bf16.mxu1 %v9839_v15  ;;  %v9933_v15 = vld [vmem:[#allocation111_spill] sm:$0xff] }
 0x540   :  { %5797 = vmatpush1.bf16.msra.mxu0 %v9928_v45  ;;  %5861 = vmatpush1.bf16.msra.mxu1 %v9841_v53  ;;  %v9934_v53 = vld [vmem:[#allocation113_spill] sm:$0xff] }
 0x541   :  { %5799 = vmatprep.subr.bf16.mxu0 %v9929_v38  ;;  %5863 = vmatprep.subr.bf16.mxu1 %v9843_v8 }
 0x544   :  { %5801 = vmatpush1.bf16.msra.mxu0 %v9930_v2  ;;  %5865 = vmatpush1.bf16.msra.mxu1 %v9845_v0  ;;  %v9935_v0 = vld [vmem:[#allocation117_spill] sm:$0xff] }
 0x545   :  { %5803 = vmatprep.subr.bf16.mxu0 %v9931_v63  ;;  %5867 = vmatprep.subr.bf16.mxu1 %v9846_v36  ;;  %v9936_v36 = vld [vmem:[#allocation119_spill] sm:$0xff] }
 0x548   :  { %5805 = vmatpush1.bf16.msra.mxu0 %v9932_v43  ;;  %5869 = vmatpush1.bf16.msra.mxu1 %v9848_v47  ;;  %v9937_v47 = vld [vmem:[#allocation121_spill] sm:$0xff] }
 0x549   :  { %5807 = vmatprep.subr.bf16.mxu0 %v9933_v15  ;;  %5871 = vmatprep.subr.bf16.mxu1 %v9849_v44  ;;  %v9938_v44 = vld [vmem:[#allocation123_spill] sm:$0xff] }
 0x54c   :  { %5809 = vmatpush1.bf16.msra.mxu0 %v9934_v53  ;;  %5873 = vmatpush1.bf16.msra.mxu1 %v9850_v34  ;;  %v9939_v34 = vld [vmem:[#allocation125_spill] sm:$0xff] }
 0x54d   :  { %5811 = vmatprep.subr.bf16.mxu0 %v9767_v42  ;;  %5875 = vmatprep.subr.bf16.mxu1 %v9851_v37 }
 0x550   :  { %5813 = vmatpush1.bf16.msra.mxu0 %v9935_v0  ;;  %5877 = vmatpush1.bf16.msra.mxu1 %v9852_v22 }
 0x551   :  { %5815 = vmatprep.subr.bf16.mxu0 %v9936_v36  ;;  %5879 = vmatprep.subr.bf16.mxu1 %v9853_v33 }
 0x554   :  { %5817 = vmatpush1.bf16.msra.mxu0 %v9937_v47  ;;  %5881 = vmatpush1.bf16.msra.mxu1 %v9854_v14  ;;  %v9940_v14 = vld [vmem:[#allocation133_spill] sm:$0xff] }
 0x555   :  { %5819 = vmatprep.subr.bf16.mxu0 %v9938_v44  ;;  %5883 = vmatprep.subr.bf16.mxu1 %v9855_v10  ;;  %v9941_v44 = vld [vmem:[#allocation149_spill] sm:$0xff]  ;;  %v9942_v10 = vld [vmem:[#allocation19_spill] sm:$0xff] }
 0x558   :  { %5821 = vmatpush1.bf16.msra.mxu0 %v9939_v34  ;;  %5885 = vmatpush1.bf16.msra.mxu1 %v8018_v30  ;;  %v9943_v34 = vld [vmem:[#allocation32_spill] sm:$0xff] }
 0x559   :  { %5823 = vmatprep.subr.bf16.mxu0 %v9775_v31  ;;  %5887 = vmatprep.subr.bf16.mxu1 %v9856_v23  ;;  %v9944_v23 = vld [vmem:[#allocation20_spill] sm:$0xff]  ;;  %v9953_v31 = vld [vmem:[#allocation42_spill] sm:$0xff] }
 0x55c   :  { %5825 = vmatpush1.bf16.msra.mxu0 %v9776_v18  ;;  %5889 = vmatpush1.bf16.msra.mxu1 %v9857_v51  ;;  %v9945_v18 = vld [vmem:[#allocation34_spill] sm:$0xff]  ;;  %v9946_v51 = vld [vmem:[#allocation21_spill] sm:$0xff] }
 0x55d   :  { %5827 = vmatprep.subr.bf16.mxu0 %v9777_v3  ;;  %5891 = vmatprep.subr.bf16.mxu1 %v9858_v52  ;;  %v9947_v3 = vld [vmem:[#allocation36_spill] sm:$0xff]  ;;  %v9948_v52 = vld [vmem:[#allocation22_spill] sm:$0xff] }
 0x560   :  { %5829 = vmatpush1.bf16.msra.mxu0 %v9940_v14  ;;  %5893 = vmatpush1.bf16.msra.mxu1 %v9941_v44  ;;  %v9949_v14 = vld [vmem:[#allocation38_spill] sm:$0xff]  ;;  %v9950_v44 = vld [vmem:[#allocation23_spill] sm:$0xff] }
 0x561   :  { %5895 = vmatprep.subr.bf16.mxu0 %v9942_v10  ;;  %5959 = vmatprep.subr.bf16.mxu1 %v9943_v34  ;;  %v9951_v10 = vld [vmem:[#allocation40_spill] sm:$0xff] }
 0x562   :  { %v9952_v34 = vld [vmem:[#allocation24_spill] sm:$0xff] }
 0x563   :  { %2674 = vmatmul.mubr.f32.vlgmr.msra.gmra.mrb[22].mxu0 %v8490_v39  ;;  %2745 = vmatmul.mubr.f32.vlgmr.msra.gmra.mrb[26].mxu1 %v8490_v39  ;;  %v9954_v39 = vld [vmem:[#allocation25_spill] sm:$0xff] }
 0x564   :  { %5897 = vmatpush1.bf16.msra.mxu0 %v9944_v23  ;;  %5961 = vmatpush1.bf16.msra.mxu1 %v9945_v18  ;;  %v9955_v23 = vld [vmem:[#allocation44_spill] sm:$0xff]  ;;  %v9956_v18 = vld [vmem:[#allocation26_spill] sm:$0xff] }
 0x565   :  { %5899 = vmatprep.subr.bf16.mxu0 %v9946_v51  ;;  %5963 = vmatprep.subr.bf16.mxu1 %v9947_v3  ;;  %v9957_v51 = vld [vmem:[#allocation46_spill] sm:$0xff]  ;;  %v9958_v3 = vld [vmem:[#allocation27_spill] sm:$0xff] }
 0x568   :  { %5901 = vmatpush1.bf16.msra.mxu0 %v9948_v52  ;;  %5965 = vmatpush1.bf16.msra.mxu1 %v9949_v14  ;;  %v9959_v52 = vld [vmem:[#allocation48_spill] sm:$0xff] }
 0x569   :  { %5903 = vmatprep.subr.bf16.mxu0 %v9950_v44  ;;  %5967 = vmatprep.subr.bf16.mxu1 %v9951_v10  ;;  %v9960_v14 = vld [vmem:[#allocation28_spill] sm:$0xff]  ;;  %v9961_v44 = vld [vmem:[#allocation50_spill] sm:$0xff]  ;;  %v9962_v10 = vld [vmem:[#allocation29_spill] sm:$0xff] }
 0x56c   :  { %5905 = vmatpush1.bf16.msra.mxu0 %v9952_v34  ;;  %5969 = vmatpush1.bf16.msra.mxu1 %v9953_v31  ;;  %v9963_v34 = vld [vmem:[#allocation52_spill] sm:$0xff]  ;;  %v9964_v31 = vld [vmem:[#allocation30_spill] sm:$0xff] }
 0x56d   :  { %5907 = vmatprep.subr.bf16.mxu0 %v9954_v39  ;;  %5971 = vmatprep.subr.bf16.mxu1 %v9955_v23  ;;  %v9965_v39 = vld [vmem:[#allocation54_spill] sm:$0xff]  ;;  %v9966_v23 = vld [vmem:[#allocation31_spill] sm:$0xff] }
 0x570   :  { %5909 = vmatpush1.bf16.msra.mxu0 %v9956_v18  ;;  %5973 = vmatpush1.bf16.msra.mxu1 %v9957_v51  ;;  %v9967_v18 = vld [vmem:[#allocation56_spill] sm:$0xff]  ;;  %v9968_v51 = vld [vmem:[#allocation33_spill] sm:$0xff] }
 0x571   :  { %5911 = vmatprep.subr.bf16.mxu0 %v9958_v3  ;;  %5975 = vmatprep.subr.bf16.mxu1 %v9959_v52  ;;  %v9969_v3 = vld [vmem:[#allocation58_spill] sm:$0xff]  ;;  %v9970_v52 = vld [vmem:[#allocation35_spill] sm:$0xff] }
 0x574   :  { %5913 = vmatpush1.bf16.msra.mxu0 %v9960_v14  ;;  %5977 = vmatpush1.bf16.msra.mxu1 %v9961_v44  ;;  %v9971_v14 = vld [vmem:[#allocation60_spill] sm:$0xff]  ;;  %v9972_v44 = vld [vmem:[#allocation37_spill] sm:$0xff] }
 0x575   :  { %5915 = vmatprep.subr.bf16.mxu0 %v9962_v10  ;;  %5979 = vmatprep.subr.bf16.mxu1 %v9963_v34  ;;  %v9973_v10 = vld [vmem:[#allocation62_spill] sm:$0xff]  ;;  %v9974_v34 = vld [vmem:[#allocation39_spill] sm:$0xff] }
 0x578   :  { %5917 = vmatpush1.bf16.msra.mxu0 %v9964_v31  ;;  %5981 = vmatpush1.bf16.msra.mxu1 %v9965_v39  ;;  %v9975_v31 = vld [vmem:[#allocation64_spill] sm:$0xff]  ;;  %v9976_v39 = vld [vmem:[#allocation41_spill] sm:$0xff] }
 0x579   :  { %5919 = vmatprep.subr.bf16.mxu0 %v9966_v23  ;;  %5983 = vmatprep.subr.bf16.mxu1 %v9967_v18  ;;  %v9977_v23 = vld [vmem:[#allocation66_spill] sm:$0xff]  ;;  %v9978_v18 = vld [vmem:[#allocation43_spill] sm:$0xff] }
 0x57c   :  { %5921 = vmatpush1.bf16.msra.mxu0 %v9968_v51  ;;  %5985 = vmatpush1.bf16.msra.mxu1 %v9969_v3  ;;  %v9979_v51 = vld [vmem:[#allocation68_spill] sm:$0xff]  ;;  %v9980_v3 = vld [vmem:[#allocation45_spill] sm:$0xff] }
 0x57d   :  { %5923 = vmatprep.subr.bf16.mxu0 %v9970_v52  ;;  %5987 = vmatprep.subr.bf16.mxu1 %v9971_v14  ;;  %v9981_v52 = vld [vmem:[#allocation70_spill] sm:$0xff]  ;;  %v9982_v14 = vld [vmem:[#allocation47_spill] sm:$0xff] }
 0x580   :  { %5925 = vmatpush1.bf16.msra.mxu0 %v9972_v44  ;;  %5989 = vmatpush1.bf16.msra.mxu1 %v9973_v10  ;;  %v9983_v44 = vld [vmem:[#allocation72_spill] sm:$0xff]  ;;  %v9984_v10 = vld [vmem:[#allocation49_spill] sm:$0xff] }
 0x581   :  { %5927 = vmatprep.subr.bf16.mxu0 %v9974_v34  ;;  %5991 = vmatprep.subr.bf16.mxu1 %v9975_v31  ;;  %v9985_v34 = vld [vmem:[#allocation74_spill] sm:$0xff]  ;;  %v9986_v31 = vld [vmem:[#allocation51_spill] sm:$0xff] }
 0x584   :  { %5929 = vmatpush1.bf16.msra.mxu0 %v9976_v39  ;;  %5993 = vmatpush1.bf16.msra.mxu1 %v9977_v23  ;;  %v9987_v39 = vld [vmem:[#allocation76_spill] sm:$0xff]  ;;  %v9988_v23 = vld [vmem:[#allocation53_spill] sm:$0xff] }
 0x585   :  { %5931 = vmatprep.subr.bf16.mxu0 %v9978_v18  ;;  %5995 = vmatprep.subr.bf16.mxu1 %v9979_v51  ;;  %v9989_v18 = vld [vmem:[#allocation78_spill] sm:$0xff]  ;;  %v9990_v51 = vld [vmem:[#allocation55_spill] sm:$0xff] }
 0x588   :  { %5933 = vmatpush1.bf16.msra.mxu0 %v9980_v3  ;;  %5997 = vmatpush1.bf16.msra.mxu1 %v9981_v52  ;;  %v9991_v3 = vld [vmem:[#allocation80_spill] sm:$0xff]  ;;  %v9992_v52 = vld [vmem:[#allocation57_spill] sm:$0xff] }
 0x589   :  { %5935 = vmatprep.subr.bf16.mxu0 %v9982_v14  ;;  %5999 = vmatprep.subr.bf16.mxu1 %v9983_v44  ;;  %v9993_v14 = vld [vmem:[#allocation82_spill] sm:$0xff]  ;;  %v9994_v44 = vld [vmem:[#allocation59_spill] sm:$0xff] }
 0x58c   :  { %5937 = vmatpush1.bf16.msra.mxu0 %v9984_v10  ;;  %6001 = vmatpush1.bf16.msra.mxu1 %v9985_v34  ;;  %v9995_v10 = vld [vmem:[#allocation84_spill] sm:$0xff]  ;;  %v9996_v34 = vld [vmem:[#allocation61_spill] sm:$0xff] }
 0x58d   :  { %5939 = vmatprep.subr.bf16.mxu0 %v9986_v31  ;;  %6003 = vmatprep.subr.bf16.mxu1 %v9987_v39  ;;  %v9997_v31 = vld [vmem:[#allocation86_spill] sm:$0xff]  ;;  %v9998_v39 = vld [vmem:[#allocation63_spill] sm:$0xff] }
 0x590   :  { %5941 = vmatpush1.bf16.msra.mxu0 %v9988_v23  ;;  %6005 = vmatpush1.bf16.msra.mxu1 %v9989_v18  ;;  %v9999_v23 = vld [vmem:[#allocation88_spill] sm:$0xff]  ;;  %v10000_v18 = vld [vmem:[#allocation65_spill] sm:$0xff] }
 0x591   :  { %5943 = vmatprep.subr.bf16.mxu0 %v9990_v51  ;;  %6007 = vmatprep.subr.bf16.mxu1 %v9991_v3  ;;  %v10001_v51 = vld [vmem:[#allocation90_spill] sm:$0xff]  ;;  %v10002_v3 = vld [vmem:[#allocation67_spill] sm:$0xff] }
 0x594   :  { %5945 = vmatpush1.bf16.msra.mxu0 %v9992_v52  ;;  %6009 = vmatpush1.bf16.msra.mxu1 %v9993_v14  ;;  %v10003_v52 = vld [vmem:[#allocation92_spill] sm:$0xff]  ;;  %v10004_v14 = vld [vmem:[#allocation69_spill] sm:$0xff] }
 0x595   :  { %5947 = vmatprep.subr.bf16.mxu0 %v9994_v44  ;;  %6011 = vmatprep.subr.bf16.mxu1 %v9995_v10  ;;  %v10005_v44 = vld [vmem:[#allocation94_spill] sm:$0xff]  ;;  %v10006_v10 = vld [vmem:[#allocation71_spill] sm:$0xff] }
 0x598   :  { %5949 = vmatpush1.bf16.msra.mxu0 %v9996_v34  ;;  %6013 = vmatpush1.bf16.msra.mxu1 %v9997_v31  ;;  %v10007_v34 = vld [vmem:[#allocation96_spill] sm:$0xff] }
 0x599   :  { %5951 = vmatprep.subr.bf16.mxu0 %v9998_v39  ;;  %6015 = vmatprep.subr.bf16.mxu1 %v9999_v23 }
 0x59c   :  { %5953 = vmatpush1.bf16.msra.mxu0 %v10000_v18  ;;  %6017 = vmatpush1.bf16.msra.mxu1 %v10001_v51 }
 0x59d   :  { %5955 = vmatprep.subr.bf16.mxu0 %v10002_v3  ;;  %6019 = vmatprep.subr.bf16.mxu1 %v10003_v52 }
 0x5a0   :  { %5957 = vmatpush1.bf16.msra.mxu0 %v10004_v14  ;;  %6021 = vmatpush1.bf16.msra.mxu1 %v10005_v44 }
 0x5a1   :  { %6023 = vmatprep.subr.bf16.mxu0 %v10006_v10  ;;  %6087 = vmatprep.subr.bf16.mxu1 %v10007_v34 }
 0x5f6   :  { %v2533_v31 = vpop.f32.mrb[20].mxu0  ;;  %v2604_v39 = vpop.f32.mrb[24].mxu1 }
 0x5f7   :  { %v2755_v30 = vrot.slane %v2533_v31, 2  ;;  %v2535_v23 = vpop.f32.mrb[21].mxu0  ;;  %v2606_v47 = vpop.f32.mrb[25].mxu1  ;;  %v2757_v10 = vrot.slane %v2604_v39, 2 }
 0x5f8   :  { %v2756_v18 = vrot.slane %v2535_v23, 2  ;;  %v2758_v36 = vrot.slane %v2606_v47, 2 }
 0x5f9   :  { %v2763_v51 = vadd.f32 %v2755_v30, %v8015_v41  ;;  %v2765_v34 = vadd.f32 %v9912_v26, %v2757_v10 }
 0x5fa   :  { %v2764_v3 = vadd.f32 %v2756_v18, %v9818_v19  ;;  %v2766_v44 = vadd.f32 %v9911_v4, %v2758_v36  ;;  %v2791_v18 = vrot.slane %v8470_v62, 6 }
 0x5fb   :  { %v4489_v33 = vmul.f32 -1.442695, %v2763_v51 }
 0x5fc   :  { %v4490_v52 = vmul.f32 -1.442695, %v2764_v3  ;;  %v4491_v14 = vmul.f32 -1.442695, %v2766_v44 }
 0x5fd   :  { %7093 = vpow2.f32 %v4489_v33 }
 0x5fe   :  { %7095 = vpow2.f32 %v4490_v52 }
 0x5ff   :  { %7097 = vpow2.f32 %v4491_v14 }
 0x600   :  { %7099 = vtanh.f32 %v2765_v34 }
 0x607   :  { %v7094_v22 = vpop.eup %7093 }
 0x608   :  { %v7096_v31 = vpop.eup %7095  ;;  %v2774_v0 = vadd.f32 1.0, %v7094_v22 }
 0x609   :  { %v2780_v23 = vadd.f32 1.0, %v7096_v31  ;;  %v7098_v41 = vpop.eup %7097 }
 0x60a   :  { %7101 = vrcp.f32 %v2774_v0  ;;  %v7100_v19 = vpop.eup %7099  ;;  %v2787_v4 = vadd.f32 1.0, %v7098_v41  ;;  %v10008_v0 = vld [vmem:[#allocation98_spill] sm:$0xff] }
 0x60b   :  { %7103 = vrcp.f32 %v2780_v23 }
 0x60c   :  { %7105 = vrcp.f32 %v2787_v4 }
 0x614   :  { %v7102_v51 = vpop.eup %7101 }
 0x615   :  { %v7104_v30 = vpop.eup %7103  ;;  %v2794_v3 = vmul.f32 %v7102_v51, %v7100_v19 }
 0x616   :  { %v2793_v36 = vmul.f32 %v7104_v30, %v2791_v18  ;;  %v7106_v26 = vpop.eup %7105 }
 0x618   :  { %v8629_v52 = vadd.f32 %v2794_v3, %v2793_v36 }
 0x61a   :  { %7107 = vtanh.f32 %v8629_v52 }
 0x624   :  { %v7108_v10 = vpop.eup %7107 }
 0x625   :  { %v2797_v22 = vmul.f32 %v7108_v10, %v7106_v26  ;;  %v2818_v26 = vrot.slane %v8484_v58, 2  ;;  %v10011_v58 = vld [vmem:[#allocation124_spill] sm:$0xff] }
 0x627   :  { %v8634_v14 = vsel %vm4310_vm5, %v10008_v0, %v2797_v22 }
 0x628   :  { %10009 = vst [vmem:[#allocation100_spill] sm:$0xff] %v8634_v14  ;;  %v10033_v14 = vld [vmem:[#allocation148_spill] sm:$0xff] }
 0x636   :  { %v2675_v33 = vpop.f32.mrb[22].mxu0  ;;  %v2746_v47 = vpop.f32.mrb[26].mxu1 }
 0x637   :  { %v2767_v44 = vadd.f32 %v8158_v11, %v2675_v33  ;;  %v2677_v34 = vpop.f32.mrb[23].mxu0  ;;  %v2748_v62 = vpop.f32.mrb[27].mxu1  ;;  %v2769_v51 = vadd.f32 %v8164_v9, %v2746_v47 }
 0x638   :  { %v2768_v39 = vadd.f32 %v8160_v27, %v2677_v34  ;;  %v2770_v41 = vadd.f32 %v8167_v55, %v2748_v62 }
 0x639   :  { %v4492_v31 = vmul.f32 -1.442695, %v2767_v44 }
 0x63a   :  { %v4493_v23 = vmul.f32 -1.442695, %v2768_v39  ;;  %v4494_v19 = vmul.f32 -1.442695, %v2770_v41  ;;  %v10014_v41 = vld [vmem:[#allocation132_spill] sm:$0xff] }
 0x63b   :  { %7109 = vpow2.f32 %v4492_v31  ;;  %v8647_v31 = vrot.slane %v2797_v22, 6  ;;  %v10012_v22 = vld [vmem:[#allocation126_spill] sm:$0xff] }
 0x63c   :  { %7111 = vpow2.f32 %v4493_v23  ;;  %v10013_v23 = vld [vmem:[#allocation130_spill] sm:$0xff] }
 0x63d   :  { %7113 = vpow2.f32 %v4494_v19  ;;  %v10015_v19 = vld [vmem:[#allocation134_spill] sm:$0xff] }
 0x63e   :  { %7115 = vtanh.f32 %v2769_v51  ;;  %v10016_v51 = vld [vmem:[#allocation135_spill] sm:$0xff] }
 0x645   :  { %v7110_v18 = vpop.eup %7109 }
 0x646   :  { %v7112_v30 = vpop.eup %7111  ;;  %v2801_v3 = vadd.f32 1.0, %v7110_v18  ;;  %v10017_v18 = vld [vmem:[#allocation136_spill] sm:$0xff] }
 0x647   :  { %v2807_v4 = vadd.f32 1.0, %v7112_v30  ;;  %v7114_v11 = vpop.eup %7113  ;;  %v10018_v30 = vld [vmem:[#allocation117_spill] sm:$0xff] }
 0x648   :  { %7117 = vrcp.f32 %v2801_v3  ;;  %v7116_v36 = vpop.eup %7115  ;;  %v2814_v33 = vadd.f32 1.0, %v7114_v11  ;;  %v10019_v3 = vld [vmem:[#allocation138_spill] sm:$0xff]  ;;  %v10021_v11 = vld [vmem:[#allocation139_spill] sm:$0xff] }
 0x649   :  { %7119 = vrcp.f32 %v2807_v4  ;;  %v10020_v4 = vld [vmem:[#allocation119_spill] sm:$0xff] }
 0x64a   :  { %7121 = vrcp.f32 %v2814_v33  ;;  %v10027_v33 = vld [vmem:[#allocation142_spill] sm:$0xff] }
 0x652   :  { %v7118_v27 = vpop.eup %7117 }
 0x653   :  { %v7120_v10 = vpop.eup %7119  ;;  %v2821_v0 = vmul.f32 %v7118_v27, %v7116_v36  ;;  %v10022_v36 = vld [vmem:[#allocation121_spill] sm:$0xff]  ;;  %v10023_v27 = vld [vmem:[#allocation140_spill] sm:$0xff] }
 0x654   :  { %v2820_v55 = vmul.f32 %v7120_v10, %v2818_v26  ;;  %v7122_v9 = vpop.eup %7121  ;;  %v10024_v26 = vld [vmem:[#allocation123_spill] sm:$0xff]  ;;  %v10025_v10 = vld [vmem:[#allocation141_spill] sm:$0xff] }
 0x656   :  { %v8641_v44 = vadd.f32 %v2821_v0, %v2820_v55  ;;  %v10026_v0 = vld [vmem:[#allocation125_spill] sm:$0xff]  ;;  %v10028_v55 = vld [vmem:[#allocation127_spill] sm:$0xff] }
 0x658   :  { %7123 = vtanh.f32 %v8641_v44 }
 0x662   :  { %v7124_v47 = vpop.eup %7123 }
 0x663   :  { %v8644_v34 = vmul.f32 %v7124_v47, %v7122_v9  ;;  %v10029_v9 = vld [vmem:[#allocation144_spill] sm:$0xff]  ;;  %v10030_v47 = vld [vmem:[#allocation129_spill] sm:$0xff] }
 0x665   :  { %10010 = vst [vmem:[#allocation77_spill] sm:$0xff] %v8644_v34  ;;  %v2826_v62 = vrot.slane %v8644_v34, 2  ;;  %v10034_v34 = vld [vmem:[#allocation133_spill] sm:$0xff] }
 0x667   :  { %v2829_v39 = vrot.slane %v2826_v62, 6  ;;  %v10031_v62 = vld [vmem:[#allocation146_spill] sm:$0xff] }
 0x669   :  { %2896 = vmatprep.mubr.f32.mxu0 %v2829_v39  ;;  %2967 = vmatprep.mubr.f32.mxu1 %v2829_v39 }
 0x66a   :  { %2897 = vmatmul.mubr.f32.vlgmr.msra.gmra.mrb[24].mxu0 %v8647_v31  ;;  %2968 = vmatmul.mubr.f32.vlgmr.msra.gmra.mrb[28].mxu1 %v8647_v31 }
 0x66b   :  { %6025 = vmatpush1.bf16.msra.mxu0 %v9727_v21  ;;  %6089 = vmatpush1.bf16.msra.mxu1 %v9728_v28 }
 0x66c   :  { %3038 = vmatprep.mubr.f32.mxu0 %v2829_v39  ;;  %3109 = vmatprep.mubr.f32.mxu1 %v2829_v39  ;;  %v10032_v39 = vld [vmem:[#allocation131_spill] sm:$0xff] }
 0x66d   :  { %6027 = vmatprep.subr.bf16.mxu0 %v9729_v25  ;;  %6091 = vmatprep.subr.bf16.mxu1 %v9730_v56 }
 0x66f   :  { %6029 = vmatpush1.bf16.msra.mxu0 %v9731_v13  ;;  %6093 = vmatpush1.bf16.msra.mxu1 %v9732_v49 }
 0x670   :  { %6031 = vmatprep.subr.bf16.mxu0 %v9733_v59  ;;  %6095 = vmatprep.subr.bf16.mxu1 %v9821_v57 }
 0x673   :  { %6033 = vmatpush1.bf16.msra.mxu0 %v9822_v7  ;;  %6097 = vmatpush1.bf16.msra.mxu1 %v9823_v35 }
 0x674   :  { %6035 = vmatprep.subr.bf16.mxu0 %v9824_v32  ;;  %6099 = vmatprep.subr.bf16.mxu1 %v9825_v6 }
 0x677   :  { %6037 = vmatpush1.bf16.msra.mxu0 %v9826_v60  ;;  %6101 = vmatpush1.bf16.msra.mxu1 %v9827_v24 }
 0x678   :  { %6039 = vmatprep.subr.bf16.mxu0 %v9916_v50  ;;  %6103 = vmatprep.subr.bf16.mxu1 %v9917_v61 }
 0x67b   :  { %6041 = vmatpush1.bf16.msra.mxu0 %v9918_v1  ;;  %6105 = vmatpush1.bf16.msra.mxu1 %v9919_v5 }
 0x67c   :  { %6043 = vmatprep.subr.bf16.mxu0 %v9920_v20  ;;  %6107 = vmatprep.subr.bf16.mxu1 %v9921_v29 }
 0x67f   :  { %6045 = vmatpush1.bf16.msra.mxu0 %v9922_v48  ;;  %6109 = vmatpush1.bf16.msra.mxu1 %v9923_v54 }
 0x680   :  { %6047 = vmatprep.subr.bf16.mxu0 %v9924_v40  ;;  %6111 = vmatprep.subr.bf16.mxu1 %v9836_v17 }
 0x683   :  { %6049 = vmatpush1.bf16.msra.mxu0 %v9925_v16  ;;  %6113 = vmatpush1.bf16.msra.mxu1 %v9926_v46 }
 0x684   :  { %6051 = vmatprep.subr.bf16.mxu0 %v9927_v12  ;;  %6115 = vmatprep.subr.bf16.mxu1 %v10011_v58 }
 0x687   :  { %6053 = vmatpush1.bf16.msra.mxu0 %v9928_v45  ;;  %6117 = vmatpush1.bf16.msra.mxu1 %v10012_v22 }
 0x688   :  { %6055 = vmatprep.subr.bf16.mxu0 %v9929_v38  ;;  %6119 = vmatprep.subr.bf16.mxu1 %v9843_v8 }
 0x68b   :  { %6057 = vmatpush1.bf16.msra.mxu0 %v9930_v2  ;;  %6121 = vmatpush1.bf16.msra.mxu1 %v10013_v23 }
 0x68c   :  { %6059 = vmatprep.subr.bf16.mxu0 %v9931_v63  ;;  %6123 = vmatprep.subr.bf16.mxu1 %v10014_v41 }
 0x68f   :  { %6061 = vmatpush1.bf16.msra.mxu0 %v9932_v43  ;;  %6125 = vmatpush1.bf16.msra.mxu1 %v10015_v19 }
 0x690   :  { %6063 = vmatprep.subr.bf16.mxu0 %v9933_v15  ;;  %6127 = vmatprep.subr.bf16.mxu1 %v10016_v51 }
 0x693   :  { %6065 = vmatpush1.bf16.msra.mxu0 %v9934_v53  ;;  %6129 = vmatpush1.bf16.msra.mxu1 %v10017_v18 }
 0x694   :  { %6067 = vmatprep.subr.bf16.mxu0 %v9767_v42  ;;  %6131 = vmatprep.subr.bf16.mxu1 %v9851_v37 }
 0x697   :  { %6069 = vmatpush1.bf16.msra.mxu0 %v10018_v30  ;;  %6133 = vmatpush1.bf16.msra.mxu1 %v10019_v3 }
 0x698   :  { %6071 = vmatprep.subr.bf16.mxu0 %v10020_v4  ;;  %6135 = vmatprep.subr.bf16.mxu1 %v10021_v11 }
 0x69b   :  { %6073 = vmatpush1.bf16.msra.mxu0 %v10022_v36  ;;  %6137 = vmatpush1.bf16.msra.mxu1 %v10023_v27  ;;  %v10103_v36 = vld [vmem:[#allocation147_spill] sm:$0xff] }
 0x69c   :  { %6075 = vmatprep.subr.bf16.mxu0 %v10024_v26  ;;  %6139 = vmatprep.subr.bf16.mxu1 %v10025_v10  ;;  %v10035_v26 = vld [vmem:[#allocation149_spill] sm:$0xff]  ;;  %v10036_v10 = vld [vmem:[#allocation19_spill] sm:$0xff] }
 0x69f   :  { %6077 = vmatpush1.bf16.msra.mxu0 %v10026_v0  ;;  %6141 = vmatpush1.bf16.msra.mxu1 %v10027_v33  ;;  %v10037_v0 = vld [vmem:[#allocation32_spill] sm:$0xff]  ;;  %v10102_v33 = vld [vmem:[#allocation145_spill] sm:$0xff] }
 0x6a0   :  { %6079 = vmatprep.subr.bf16.mxu0 %v10028_v55  ;;  %6143 = vmatprep.subr.bf16.mxu1 %v10029_v9  ;;  %v10038_v9 = vld [vmem:[#allocation20_spill] sm:$0xff]  ;;  %v10047_v55 = vld [vmem:[#allocation42_spill] sm:$0xff] }
 0x6a3   :  { %6081 = vmatpush1.bf16.msra.mxu0 %v10030_v47  ;;  %6145 = vmatpush1.bf16.msra.mxu1 %v10031_v62  ;;  %v10039_v47 = vld [vmem:[#allocation34_spill] sm:$0xff]  ;;  %v10040_v62 = vld [vmem:[#allocation21_spill] sm:$0xff] }
 0x6a4   :  { %6083 = vmatprep.subr.bf16.mxu0 %v10032_v39  ;;  %6147 = vmatprep.subr.bf16.mxu1 %v10033_v14  ;;  %v10041_v39 = vld [vmem:[#allocation36_spill] sm:$0xff]  ;;  %v10042_v14 = vld [vmem:[#allocation22_spill] sm:$0xff] }
 0x6a7   :  { %6085 = vmatpush1.bf16.msra.mxu0 %v10034_v34  ;;  %6149 = vmatpush1.bf16.msra.mxu1 %v10035_v26  ;;  %v10043_v34 = vld [vmem:[#allocation38_spill] sm:$0xff]  ;;  %v10044_v26 = vld [vmem:[#allocation23_spill] sm:$0xff] }
 0x6a8   :  { %6151 = vmatprep.subr.bf16.mxu0 %v10036_v10  ;;  %6215 = vmatprep.subr.bf16.mxu1 %v10037_v0  ;;  %v10045_v10 = vld [vmem:[#allocation40_spill] sm:$0xff] }
 0x6a9   :  { %v10046_v0 = vld [vmem:[#allocation24_spill] sm:$0xff] }
 0x6aa   :  { %3039 = vmatmul.mubr.f32.vlgmr.msra.gmra.mrb[26].mxu0 %v8647_v31  ;;  %3110 = vmatmul.mubr.f32.vlgmr.msra.gmra.mrb[30].mxu1 %v8647_v31  ;;  %v10048_v31 = vld [vmem:[#allocation25_spill] sm:$0xff] }
 0x6ab   :  { %6153 = vmatpush1.bf16.msra.mxu0 %v10038_v9  ;;  %6217 = vmatpush1.bf16.msra.mxu1 %v10039_v47  ;;  %v10049_v9 = vld [vmem:[#allocation44_spill] sm:$0xff]  ;;  %v10050_v47 = vld [vmem:[#allocation26_spill] sm:$0xff] }
 0x6ac   :  { %6155 = vmatprep.subr.bf16.mxu0 %v10040_v62  ;;  %6219 = vmatprep.subr.bf16.mxu1 %v10041_v39  ;;  %v10051_v62 = vld [vmem:[#allocation46_spill] sm:$0xff]  ;;  %v10052_v39 = vld [vmem:[#allocation27_spill] sm:$0xff] }
 0x6af   :  { %6157 = vmatpush1.bf16.msra.mxu0 %v10042_v14  ;;  %6221 = vmatpush1.bf16.msra.mxu1 %v10043_v34  ;;  %v10053_v14 = vld [vmem:[#allocation48_spill] sm:$0xff] }
 0x6b0   :  { %6159 = vmatprep.subr.bf16.mxu0 %v10044_v26  ;;  %6223 = vmatprep.subr.bf16.mxu1 %v10045_v10  ;;  %v10054_v34 = vld [vmem:[#allocation28_spill] sm:$0xff]  ;;  %v10055_v26 = vld [vmem:[#allocation50_spill] sm:$0xff]  ;;  %v10056_v10 = vld [vmem:[#allocation29_spill] sm:$0xff] }
 0x6b3   :  { %6161 = vmatpush1.bf16.msra.mxu0 %v10046_v0  ;;  %6225 = vmatpush1.bf16.msra.mxu1 %v10047_v55  ;;  %v10057_v0 = vld [vmem:[#allocation52_spill] sm:$0xff]  ;;  %v10058_v55 = vld [vmem:[#allocation30_spill] sm:$0xff] }
 0x6b4   :  { %6163 = vmatprep.subr.bf16.mxu0 %v10048_v31  ;;  %6227 = vmatprep.subr.bf16.mxu1 %v10049_v9  ;;  %v10059_v31 = vld [vmem:[#allocation54_spill] sm:$0xff]  ;;  %v10060_v9 = vld [vmem:[#allocation31_spill] sm:$0xff] }
 0x6b7   :  { %6165 = vmatpush1.bf16.msra.mxu0 %v10050_v47  ;;  %6229 = vmatpush1.bf16.msra.mxu1 %v10051_v62  ;;  %v10061_v47 = vld [vmem:[#allocation56_spill] sm:$0xff]  ;;  %v10062_v62 = vld [vmem:[#allocation33_spill] sm:$0xff] }
 0x6b8   :  { %6167 = vmatprep.subr.bf16.mxu0 %v10052_v39  ;;  %6231 = vmatprep.subr.bf16.mxu1 %v10053_v14  ;;  %v10063_v39 = vld [vmem:[#allocation58_spill] sm:$0xff]  ;;  %v10064_v14 = vld [vmem:[#allocation35_spill] sm:$0xff] }
 0x6bb   :  { %6169 = vmatpush1.bf16.msra.mxu0 %v10054_v34  ;;  %6233 = vmatpush1.bf16.msra.mxu1 %v10055_v26  ;;  %v10065_v34 = vld [vmem:[#allocation60_spill] sm:$0xff]  ;;  %v10066_v26 = vld [vmem:[#allocation37_spill] sm:$0xff] }
 0x6bc   :  { %6171 = vmatprep.subr.bf16.mxu0 %v10056_v10  ;;  %6235 = vmatprep.subr.bf16.mxu1 %v10057_v0  ;;  %v10067_v10 = vld [vmem:[#allocation62_spill] sm:$0xff]  ;;  %v10068_v0 = vld [vmem:[#allocation39_spill] sm:$0xff] }
 0x6bf   :  { %6173 = vmatpush1.bf16.msra.mxu0 %v10058_v55  ;;  %6237 = vmatpush1.bf16.msra.mxu1 %v10059_v31  ;;  %v10069_v55 = vld [vmem:[#allocation64_spill] sm:$0xff]  ;;  %v10070_v31 = vld [vmem:[#allocation41_spill] sm:$0xff] }
 0x6c0   :  { %6175 = vmatprep.subr.bf16.mxu0 %v10060_v9  ;;  %6239 = vmatprep.subr.bf16.mxu1 %v10061_v47  ;;  %v10071_v9 = vld [vmem:[#allocation66_spill] sm:$0xff]  ;;  %v10072_v47 = vld [vmem:[#allocation43_spill] sm:$0xff] }
 0x6c3   :  { %6177 = vmatpush1.bf16.msra.mxu0 %v10062_v62  ;;  %6241 = vmatpush1.bf16.msra.mxu1 %v10063_v39  ;;  %v10073_v62 = vld [vmem:[#allocation68_spill] sm:$0xff]  ;;  %v10074_v39 = vld [vmem:[#allocation45_spill] sm:$0xff] }
 0x6c4   :  { %6179 = vmatprep.subr.bf16.mxu0 %v10064_v14  ;;  %6243 = vmatprep.subr.bf16.mxu1 %v10065_v34  ;;  %v10075_v14 = vld [vmem:[#allocation70_spill] sm:$0xff]  ;;  %v10076_v34 = vld [vmem:[#allocation47_spill] sm:$0xff] }
 0x6c7   :  { %6181 = vmatpush1.bf16.msra.mxu0 %v10066_v26  ;;  %6245 = vmatpush1.bf16.msra.mxu1 %v10067_v10  ;;  %v10077_v26 = vld [vmem:[#allocation72_spill] sm:$0xff]  ;;  %v10078_v10 = vld [vmem:[#allocation49_spill] sm:$0xff] }
 0x6c8   :  { %6183 = vmatprep.subr.bf16.mxu0 %v10068_v0  ;;  %6247 = vmatprep.subr.bf16.mxu1 %v10069_v55  ;;  %v10079_v0 = vld [vmem:[#allocation74_spill] sm:$0xff]  ;;  %v10080_v55 = vld [vmem:[#allocation51_spill] sm:$0xff] }
 0x6cb   :  { %6185 = vmatpush1.bf16.msra.mxu0 %v10070_v31  ;;  %6249 = vmatpush1.bf16.msra.mxu1 %v10071_v9  ;;  %v10081_v31 = vld [vmem:[#allocation76_spill] sm:$0xff]  ;;  %v10082_v9 = vld [vmem:[#allocation53_spill] sm:$0xff] }
 0x6cc   :  { %6187 = vmatprep.subr.bf16.mxu0 %v10072_v47  ;;  %6251 = vmatprep.subr.bf16.mxu1 %v10073_v62  ;;  %v10083_v47 = vld [vmem:[#allocation78_spill] sm:$0xff]  ;;  %v10084_v62 = vld [vmem:[#allocation55_spill] sm:$0xff] }
 0x6cf   :  { %6189 = vmatpush1.bf16.msra.mxu0 %v10074_v39  ;;  %6253 = vmatpush1.bf16.msra.mxu1 %v10075_v14  ;;  %v10085_v39 = vld [vmem:[#allocation80_spill] sm:$0xff]  ;;  %v10086_v14 = vld [vmem:[#allocation57_spill] sm:$0xff] }
 0x6d0   :  { %6191 = vmatprep.subr.bf16.mxu0 %v10076_v34  ;;  %6255 = vmatprep.subr.bf16.mxu1 %v10077_v26  ;;  %v10087_v34 = vld [vmem:[#allocation82_spill] sm:$0xff]  ;;  %v10088_v26 = vld [vmem:[#allocation59_spill] sm:$0xff] }
 0x6d3   :  { %6193 = vmatpush1.bf16.msra.mxu0 %v10078_v10  ;;  %6257 = vmatpush1.bf16.msra.mxu1 %v10079_v0  ;;  %v10089_v10 = vld [vmem:[#allocation84_spill] sm:$0xff]  ;;  %v10090_v0 = vld [vmem:[#allocation61_spill] sm:$0xff] }
 0x6d4   :  { %6195 = vmatprep.subr.bf16.mxu0 %v10080_v55  ;;  %6259 = vmatprep.subr.bf16.mxu1 %v10081_v31  ;;  %v10091_v55 = vld [vmem:[#allocation86_spill] sm:$0xff]  ;;  %v10092_v31 = vld [vmem:[#allocation63_spill] sm:$0xff] }
 0x6d7   :  { %6197 = vmatpush1.bf16.msra.mxu0 %v10082_v9  ;;  %6261 = vmatpush1.bf16.msra.mxu1 %v10083_v47  ;;  %v10093_v9 = vld [vmem:[#allocation88_spill] sm:$0xff]  ;;  %v10094_v47 = vld [vmem:[#allocation65_spill] sm:$0xff] }
 0x6d8   :  { %6199 = vmatprep.subr.bf16.mxu0 %v10084_v62  ;;  %6263 = vmatprep.subr.bf16.mxu1 %v10085_v39  ;;  %v10095_v62 = vld [vmem:[#allocation90_spill] sm:$0xff]  ;;  %v10096_v39 = vld [vmem:[#allocation67_spill] sm:$0xff] }
 0x6db   :  { %6201 = vmatpush1.bf16.msra.mxu0 %v10086_v14  ;;  %6265 = vmatpush1.bf16.msra.mxu1 %v10087_v34  ;;  %v10097_v14 = vld [vmem:[#allocation92_spill] sm:$0xff]  ;;  %v10098_v34 = vld [vmem:[#allocation69_spill] sm:$0xff] }
 0x6dc   :  { %6203 = vmatprep.subr.bf16.mxu0 %v10088_v26  ;;  %6267 = vmatprep.subr.bf16.mxu1 %v10089_v10  ;;  %v10099_v26 = vld [vmem:[#allocation94_spill] sm:$0xff]  ;;  %v10100_v10 = vld [vmem:[#allocation71_spill] sm:$0xff] }
 0x6df   :  { %6205 = vmatpush1.bf16.msra.mxu0 %v10090_v0  ;;  %6269 = vmatpush1.bf16.msra.mxu1 %v10091_v55  ;;  %v10101_v0 = vld [vmem:[#allocation96_spill] sm:$0xff] }
 0x6e0   :  { %6207 = vmatprep.subr.bf16.mxu0 %v10092_v31  ;;  %6271 = vmatprep.subr.bf16.mxu1 %v10093_v9 }
 0x6e3   :  { %6209 = vmatpush1.bf16.msra.mxu0 %v10094_v47  ;;  %6273 = vmatpush1.bf16.msra.mxu1 %v10095_v62 }
 0x6e4   :  { %6211 = vmatprep.subr.bf16.mxu0 %v10096_v39  ;;  %6275 = vmatprep.subr.bf16.mxu1 %v10097_v14  ;;  %v10104_v14 = vld [vmem:[#allocation151_spill] sm:$0xff] }
 0x6e7   :  { %6213 = vmatpush1.bf16.msra.mxu0 %v10098_v34  ;;  %6277 = vmatpush1.bf16.msra.mxu1 %v10099_v26  ;;  %v10105_v26 = vld [vmem:[#allocation150_spill] sm:$0xff] }
 0x6e8   :  { %6279 = vmatprep.subr.bf16.mxu0 %v10100_v10  ;;  %6343 = vmatprep.subr.bf16.mxu1 %v10101_v0 }
 0x73d   :  { %v2898_v55 = vpop.f32.mrb[24].mxu0  ;;  %v2969_v31 = vpop.f32.mrb[28].mxu1 }
 0x73e   :  { %v3116_v9 = vadd.f32 %v2898_v55, %v10102_v33  ;;  %v2900_v27 = vpop.f32.mrb[25].mxu0  ;;  %v2971_v47 = vpop.f32.mrb[29].mxu1  ;;  %v3118_v3 = vadd.f32 %v10105_v26, %v2969_v31 }
 0x73f   :  { %v3117_v62 = vadd.f32 %v2900_v27, %v10103_v36  ;;  %v3119_v34 = vadd.f32 %v10104_v14, %v2971_v47 }
 0x740   :  { %v4495_v11 = vmul.f32 -1.442695, %v3116_v9  ;;  %v3156_v9 = vrot.slane %v8629_v52, 6  ;;  %v10108_v52 = vld [vmem:[#allocation152_spill] sm:$0xff] }
 0x741   :  { %v4496_v39 = vmul.f32 -1.442695, %v3117_v62  ;;  %v4497_v4 = vmul.f32 -1.442695, %v3119_v34 }
 0x742   :  { %7125 = vpow2.f32 %v4495_v11 }
 0x743   :  { %7127 = vpow2.f32 %v4496_v39 }
 0x744   :  { %7129 = vpow2.f32 %v4497_v4 }
 0x745   :  { %7131 = vtanh.f32 %v3118_v3 }
 0x74c   :  { %v7126_v10 = vpop.eup %7125 }
 0x74d   :  { %v7128_v30 = vpop.eup %7127  ;;  %v3139_v0 = vadd.f32 1.0, %v7126_v10 }
 0x74e   :  { %v3145_v37 = vadd.f32 1.0, %v7128_v30  ;;  %v7130_v55 = vpop.eup %7129 }
 0x74f   :  { %7133 = vrcp.f32 %v3139_v0  ;;  %v7132_v33 = vpop.eup %7131  ;;  %v3152_v39 = vadd.f32 1.0, %v7130_v55 }
 0x750   :  { %7135 = vrcp.f32 %v3145_v37 }
 0x751   :  { %7137 = vrcp.f32 %v3152_v39 }
 0x759   :  { %v7134_v27 = vpop.eup %7133 }
 0x75a   :  { %v7136_v11 = vpop.eup %7135  ;;  %v3159_v62 = vmul.f32 %v7134_v27, %v7132_v33  ;;  %v10109_v33 = vld [vmem:[#allocation153_spill] sm:$0xff] }
 0x75b   :  { %v3158_v47 = vmul.f32 %v7136_v11, %v3156_v9  ;;  %v7138_v10 = vpop.eup %7137 }
 0x75d   :  { %v8786_v34 = vadd.f32 %v3159_v62, %v3158_v47  ;;  %v10110_v62 = vld [vmem:[#allocation155_spill] sm:$0xff] }
 0x75f   :  { %10106 = vst [vmem:[#allocation102_spill] sm:$0xff] %v8786_v34  ;;  %7139 = vtanh.f32 %v8786_v34 }
 0x769   :  { %v7140_v4 = vpop.eup %7139 }
 0x76a   :  { %v8789_v3 = vmul.f32 %v7140_v4, %v7138_v10  ;;  %v10111_v4 = vld [vmem:[#allocation154_spill] sm:$0xff] }
 0x76c   :  { %10107 = vst [vmem:[#allocation79_spill] sm:$0xff] %v8789_v3 }
 0x77d   :  { %v3040_v30 = vpop.f32.mrb[26].mxu0  ;;  %v3111_v37 = vpop.f32.mrb[30].mxu1 }
 0x77e   :  { %v3124_v0 = vrot.slane %v3040_v30, 2  ;;  %v3042_v31 = vpop.f32.mrb[27].mxu0  ;;  %v3113_v26 = vpop.f32.mrb[31].mxu1  ;;  %v3126_v47 = vrot.slane %v3111_v37, 2 }
 0x77f   :  { %v3125_v14 = vrot.slane %v3042_v31, 2  ;;  %v3127_v11 = vrot.slane %v3113_v26, 2  ;;  %v3183_v26 = vrot.slane %v8641_v44, 2  ;;  %v10113_v44 = vld [vmem:[#allocation136_spill] sm:$0xff] }
 0x780   :  { %v3132_v36 = vadd.f32 %v10108_v52, %v3124_v0  ;;  %v3134_v34 = vadd.f32 %v10111_v4, %v3126_v47  ;;  %v10114_v47 = vld [vmem:[#allocation115_spill] sm:$0xff] }
 0x781   :  { %v3133_v55 = vadd.f32 %v10109_v33, %v3125_v14  ;;  %v3135_v39 = vadd.f32 %v10110_v62, %v3127_v11 }
 0x782   :  { %v4498_v27 = vmul.f32 -1.442695, %v3132_v36 }
 0x783   :  { %v4499_v9 = vmul.f32 -1.442695, %v3133_v55  ;;  %v4500_v10 = vmul.f32 -1.442695, %v3135_v39 }
 0x784   :  { %7141 = vpow2.f32 %v4498_v27 }
 0x785   :  { %7143 = vpow2.f32 %v4499_v9 }
 0x786   :  { %7145 = vpow2.f32 %v4500_v10  ;;  %v10115_v10 = vld [vmem:[#allocation137_spill] sm:$0xff] }
 0x787   :  { %7147 = vtanh.f32 %v3134_v34 }
 0x78e   :  { %v7142_v42 = vpop.eup %7141 }
 0x78f   :  { %v7144_v30 = vpop.eup %7143  ;;  %v3166_v18 = vadd.f32 1.0, %v7142_v42 }
 0x790   :  { %v3172_v31 = vadd.f32 1.0, %v7144_v30  ;;  %v7146_v14 = vpop.eup %7145  ;;  %v10116_v30 = vld [vmem:[#allocation117_spill] sm:$0xff] }
 0x791   :  { %7149 = vrcp.f32 %v3166_v18  ;;  %v7148_v36 = vpop.eup %7147  ;;  %v3179_v9 = vadd.f32 1.0, %v7146_v14  ;;  %v10118_v14 = vld [vmem:[#allocation119_spill] sm:$0xff] }
 0x792   :  { %7151 = vrcp.f32 %v3172_v31  ;;  %v10117_v31 = vld [vmem:[#allocation138_spill] sm:$0xff] }
 0x793   :  { %7153 = vrcp.f32 %v3179_v9  ;;  %v10124_v9 = vld [vmem:[#allocation125_spill] sm:$0xff] }
 0x79b   :  { %v7150_v0 = vpop.eup %7149 }
 0x79c   :  { %v7152_v55 = vpop.eup %7151  ;;  %v3186_v27 = vmul.f32 %v7150_v0, %v7148_v36  ;;  %v10119_v36 = vld [vmem:[#allocation139_spill] sm:$0xff]  ;;  %v10120_v0 = vld [vmem:[#allocation121_spill] sm:$0xff] }
 0x79d   :  { %v3185_v37 = vmul.f32 %v7152_v55, %v3183_v26  ;;  %v7154_v42 = vpop.eup %7153  ;;  %v10121_v26 = vld [vmem:[#allocation140_spill] sm:$0xff]  ;;  %v10122_v55 = vld [vmem:[#allocation123_spill] sm:$0xff] }
 0x79f   :  { %v8796_v11 = vadd.f32 %v3186_v27, %v3185_v37  ;;  %v10123_v27 = vld [vmem:[#allocation141_spill] sm:$0xff]  ;;  %v10125_v37 = vld [vmem:[#allocation142_spill] sm:$0xff] }
 0x7a1   :  { %7155 = vtanh.f32 %v8796_v11 }
 0x7ab   :  { %v7156_v39 = vpop.eup %7155 }
 0x7ac   :  { %v8799_v34 = vmul.f32 %v7156_v39, %v7154_v42  ;;  %v10126_v42 = vld [vmem:[#allocation127_spill] sm:$0xff]  ;;  %v10127_v39 = vld [vmem:[#allocation144_spill] sm:$0xff] }
 0x7ae   :  { %10112 = vst [vmem:[#allocation143_spill] sm:$0xff] %v8799_v34  ;;  %v3191_v18 = vrot.slane %v8799_v34, 6  ;;  %v10129_v34 = vld [vmem:[#allocation146_spill] sm:$0xff] }
 0x7b0   :  { %3257 = vmatprep.mubr.f32.mxu0 %v3191_v18  ;;  %3328 = vmatprep.mubr.f32.mxu1 %v3191_v18 }
 0x7b1   :  { %3258 = vmatmul.mubr.f32.vlgmr.msra.gmra.mrb[28].mxu0 %v8789_v3  ;;  %3329 = vmatmul.mubr.f32.vlgmr.msra.gmra.mrb[32].mxu1 %v8789_v3 }
 0x7b2   :  { %6281 = vmatpush1.bf16.msra.mxu0 %v9727_v21  ;;  %6345 = vmatpush1.bf16.msra.mxu1 %v9728_v28 }
 0x7b3   :  { %3399 = vmatprep.mubr.f32.mxu0 %v3191_v18  ;;  %3470 = vmatprep.mubr.f32.mxu1 %v3191_v18  ;;  %v10128_v18 = vld [vmem:[#allocation129_spill] sm:$0xff] }
 0x7b4   :  { %6283 = vmatprep.subr.bf16.mxu0 %v9729_v25  ;;  %6347 = vmatprep.subr.bf16.mxu1 %v9730_v56 }
 0x7b6   :  { %6285 = vmatpush1.bf16.msra.mxu0 %v9731_v13  ;;  %6349 = vmatpush1.bf16.msra.mxu1 %v9732_v49 }
 0x7b7   :  { %6287 = vmatprep.subr.bf16.mxu0 %v9733_v59  ;;  %6351 = vmatprep.subr.bf16.mxu1 %v9821_v57 }
 0x7ba   :  { %6289 = vmatpush1.bf16.msra.mxu0 %v9822_v7  ;;  %6353 = vmatpush1.bf16.msra.mxu1 %v9823_v35 }
 0x7bb   :  { %6291 = vmatprep.subr.bf16.mxu0 %v9824_v32  ;;  %6355 = vmatprep.subr.bf16.mxu1 %v9825_v6 }
 0x7be   :  { %6293 = vmatpush1.bf16.msra.mxu0 %v9826_v60  ;;  %6357 = vmatpush1.bf16.msra.mxu1 %v9827_v24 }
 0x7bf   :  { %6295 = vmatprep.subr.bf16.mxu0 %v9916_v50  ;;  %6359 = vmatprep.subr.bf16.mxu1 %v9917_v61 }
 0x7c2   :  { %6297 = vmatpush1.bf16.msra.mxu0 %v9918_v1  ;;  %6361 = vmatpush1.bf16.msra.mxu1 %v9919_v5 }
 0x7c3   :  { %6299 = vmatprep.subr.bf16.mxu0 %v9920_v20  ;;  %6363 = vmatprep.subr.bf16.mxu1 %v9921_v29 }
 0x7c6   :  { %6301 = vmatpush1.bf16.msra.mxu0 %v9922_v48  ;;  %6365 = vmatpush1.bf16.msra.mxu1 %v9923_v54 }
 0x7c7   :  { %6303 = vmatprep.subr.bf16.mxu0 %v9924_v40  ;;  %6367 = vmatprep.subr.bf16.mxu1 %v9836_v17 }
 0x7ca   :  { %6305 = vmatpush1.bf16.msra.mxu0 %v9925_v16  ;;  %6369 = vmatpush1.bf16.msra.mxu1 %v9926_v46 }
 0x7cb   :  { %6307 = vmatprep.subr.bf16.mxu0 %v9927_v12  ;;  %6371 = vmatprep.subr.bf16.mxu1 %v10011_v58 }
 0x7ce   :  { %6309 = vmatpush1.bf16.msra.mxu0 %v9928_v45  ;;  %6373 = vmatpush1.bf16.msra.mxu1 %v10012_v22 }
 0x7cf   :  { %6311 = vmatprep.subr.bf16.mxu0 %v9929_v38  ;;  %6375 = vmatprep.subr.bf16.mxu1 %v9843_v8 }
 0x7d2   :  { %6313 = vmatpush1.bf16.msra.mxu0 %v9930_v2  ;;  %6377 = vmatpush1.bf16.msra.mxu1 %v10013_v23 }
 0x7d3   :  { %6315 = vmatprep.subr.bf16.mxu0 %v9931_v63  ;;  %6379 = vmatprep.subr.bf16.mxu1 %v10014_v41 }
 0x7d6   :  { %6317 = vmatpush1.bf16.msra.mxu0 %v9932_v43  ;;  %6381 = vmatpush1.bf16.msra.mxu1 %v10015_v19 }
 0x7d7   :  { %6319 = vmatprep.subr.bf16.mxu0 %v9933_v15  ;;  %6383 = vmatprep.subr.bf16.mxu1 %v10016_v51 }
 0x7da   :  { %6321 = vmatpush1.bf16.msra.mxu0 %v9934_v53  ;;  %6385 = vmatpush1.bf16.msra.mxu1 %v10113_v44 }
 0x7db   :  { %6323 = vmatprep.subr.bf16.mxu0 %v10114_v47  ;;  %6387 = vmatprep.subr.bf16.mxu1 %v10115_v10 }
 0x7de   :  { %6325 = vmatpush1.bf16.msra.mxu0 %v10116_v30  ;;  %6389 = vmatpush1.bf16.msra.mxu1 %v10117_v31  ;;  %v10200_v31 = vld [vmem:[#allocation145_spill] sm:$0xff]  ;;  %v10201_v30 = vld [vmem:[#allocation147_spill] sm:$0xff] }
 0x7df   :  { %6327 = vmatprep.subr.bf16.mxu0 %v10118_v14  ;;  %6391 = vmatprep.subr.bf16.mxu1 %v10119_v36  ;;  %v10130_v36 = vld [vmem:[#allocation131_spill] sm:$0xff] }
 0x7e2   :  { %6329 = vmatpush1.bf16.msra.mxu0 %v10120_v0  ;;  %6393 = vmatpush1.bf16.msra.mxu1 %v10121_v26  ;;  %v10131_v0 = vld [vmem:[#allocation148_spill] sm:$0xff]  ;;  %v10132_v26 = vld [vmem:[#allocation133_spill] sm:$0xff] }
 0x7e3   :  { %6331 = vmatprep.subr.bf16.mxu0 %v10122_v55  ;;  %6395 = vmatprep.subr.bf16.mxu1 %v10123_v27  ;;  %v10133_v55 = vld [vmem:[#allocation149_spill] sm:$0xff]  ;;  %v10134_v27 = vld [vmem:[#allocation19_spill] sm:$0xff] }
 0x7e6   :  { %6333 = vmatpush1.bf16.msra.mxu0 %v10124_v9  ;;  %6397 = vmatpush1.bf16.msra.mxu1 %v10125_v37  ;;  %v10135_v9 = vld [vmem:[#allocation32_spill] sm:$0xff] }
 0x7e7   :  { %6335 = vmatprep.subr.bf16.mxu0 %v10126_v42  ;;  %6399 = vmatprep.subr.bf16.mxu1 %v10127_v39  ;;  %v10136_v39 = vld [vmem:[#allocation20_spill] sm:$0xff]  ;;  %v10145_v42 = vld [vmem:[#allocation42_spill] sm:$0xff] }
 0x7ea   :  { %6337 = vmatpush1.bf16.msra.mxu0 %v10128_v18  ;;  %6401 = vmatpush1.bf16.msra.mxu1 %v10129_v34  ;;  %v10137_v18 = vld [vmem:[#allocation34_spill] sm:$0xff]  ;;  %v10138_v34 = vld [vmem:[#allocation21_spill] sm:$0xff] }
 0x7eb   :  { %6339 = vmatprep.subr.bf16.mxu0 %v10130_v36  ;;  %6403 = vmatprep.subr.bf16.mxu1 %v10131_v0  ;;  %v10139_v36 = vld [vmem:[#allocation36_spill] sm:$0xff]  ;;  %v10140_v0 = vld [vmem:[#allocation22_spill] sm:$0xff] }
 0x7ee   :  { %6341 = vmatpush1.bf16.msra.mxu0 %v10132_v26  ;;  %6405 = vmatpush1.bf16.msra.mxu1 %v10133_v55  ;;  %v10141_v26 = vld [vmem:[#allocation38_spill] sm:$0xff]  ;;  %v10142_v55 = vld [vmem:[#allocation23_spill] sm:$0xff] }
 0x7ef   :  { %6407 = vmatprep.subr.bf16.mxu0 %v10134_v27  ;;  %6471 = vmatprep.subr.bf16.mxu1 %v10135_v9  ;;  %v10143_v27 = vld [vmem:[#allocation40_spill] sm:$0xff] }
 0x7f0   :  { %v10144_v9 = vld [vmem:[#allocation24_spill] sm:$0xff] }
 0x7f1   :  { %3400 = vmatmul.mubr.f32.vlgmr.msra.gmra.mrb[30].mxu0 %v8789_v3  ;;  %3471 = vmatmul.mubr.f32.vlgmr.msra.gmra.mrb[34].mxu1 %v8789_v3  ;;  %v10146_v3 = vld [vmem:[#allocation25_spill] sm:$0xff] }
 0x7f2   :  { %6409 = vmatpush1.bf16.msra.mxu0 %v10136_v39  ;;  %6473 = vmatpush1.bf16.msra.mxu1 %v10137_v18  ;;  %v10147_v39 = vld [vmem:[#allocation44_spill] sm:$0xff]  ;;  %v10148_v18 = vld [vmem:[#allocation26_spill] sm:$0xff] }
 0x7f3   :  { %6411 = vmatprep.subr.bf16.mxu0 %v10138_v34  ;;  %6475 = vmatprep.subr.bf16.mxu1 %v10139_v36  ;;  %v10149_v34 = vld [vmem:[#allocation46_spill] sm:$0xff]  ;;  %v10150_v36 = vld [vmem:[#allocation27_spill] sm:$0xff] }
 0x7f6   :  { %6413 = vmatpush1.bf16.msra.mxu0 %v10140_v0  ;;  %6477 = vmatpush1.bf16.msra.mxu1 %v10141_v26  ;;  %v10151_v0 = vld [vmem:[#allocation48_spill] sm:$0xff] }
 0x7f7   :  { %6415 = vmatprep.subr.bf16.mxu0 %v10142_v55  ;;  %6479 = vmatprep.subr.bf16.mxu1 %v10143_v27  ;;  %v10152_v26 = vld [vmem:[#allocation28_spill] sm:$0xff]  ;;  %v10153_v55 = vld [vmem:[#allocation50_spill] sm:$0xff]  ;;  %v10154_v27 = vld [vmem:[#allocation29_spill] sm:$0xff] }
 0x7fa   :  { %6417 = vmatpush1.bf16.msra.mxu0 %v10144_v9  ;;  %6481 = vmatpush1.bf16.msra.mxu1 %v10145_v42  ;;  %v10155_v9 = vld [vmem:[#allocation52_spill] sm:$0xff]  ;;  %v10156_v42 = vld [vmem:[#allocation30_spill] sm:$0xff] }
 0x7fb   :  { %6419 = vmatprep.subr.bf16.mxu0 %v10146_v3  ;;  %6483 = vmatprep.subr.bf16.mxu1 %v10147_v39  ;;  %v10157_v3 = vld [vmem:[#allocation54_spill] sm:$0xff]  ;;  %v10158_v39 = vld [vmem:[#allocation31_spill] sm:$0xff] }
 0x7fe   :  { %6421 = vmatpush1.bf16.msra.mxu0 %v10148_v18  ;;  %6485 = vmatpush1.bf16.msra.mxu1 %v10149_v34  ;;  %v10159_v18 = vld [vmem:[#allocation56_spill] sm:$0xff]  ;;  %v10160_v34 = vld [vmem:[#allocation33_spill] sm:$0xff] }
 0x7ff   :  { %6423 = vmatprep.subr.bf16.mxu0 %v10150_v36  ;;  %6487 = vmatprep.subr.bf16.mxu1 %v10151_v0  ;;  %v10161_v36 = vld [vmem:[#allocation58_spill] sm:$0xff]  ;;  %v10162_v0 = vld [vmem:[#allocation35_spill] sm:$0xff] }
 0x802   :  { %6425 = vmatpush1.bf16.msra.mxu0 %v10152_v26  ;;  %6489 = vmatpush1.bf16.msra.mxu1 %v10153_v55  ;;  %v10163_v26 = vld [vmem:[#allocation60_spill] sm:$0xff]  ;;  %v10164_v55 = vld [vmem:[#allocation37_spill] sm:$0xff] }
 0x803   :  { %6427 = vmatprep.subr.bf16.mxu0 %v10154_v27  ;;  %6491 = vmatprep.subr.bf16.mxu1 %v10155_v9  ;;  %v10165_v27 = vld [vmem:[#allocation62_spill] sm:$0xff]  ;;  %v10166_v9 = vld [vmem:[#allocation39_spill] sm:$0xff] }
 0x806   :  { %6429 = vmatpush1.bf16.msra.mxu0 %v10156_v42  ;;  %6493 = vmatpush1.bf16.msra.mxu1 %v10157_v3  ;;  %v10167_v42 = vld [vmem:[#allocation64_spill] sm:$0xff]  ;;  %v10168_v3 = vld [vmem:[#allocation41_spill] sm:$0xff] }
 0x807   :  { %6431 = vmatprep.subr.bf16.mxu0 %v10158_v39  ;;  %6495 = vmatprep.subr.bf16.mxu1 %v10159_v18  ;;  %v10169_v39 = vld [vmem:[#allocation66_spill] sm:$0xff]  ;;  %v10170_v18 = vld [vmem:[#allocation43_spill] sm:$0xff] }
 0x80a   :  { %6433 = vmatpush1.bf16.msra.mxu0 %v10160_v34  ;;  %6497 = vmatpush1.bf16.msra.mxu1 %v10161_v36  ;;  %v10171_v34 = vld [vmem:[#allocation68_spill] sm:$0xff]  ;;  %v10172_v36 = vld [vmem:[#allocation45_spill] sm:$0xff] }
 0x80b   :  { %6435 = vmatprep.subr.bf16.mxu0 %v10162_v0  ;;  %6499 = vmatprep.subr.bf16.mxu1 %v10163_v26  ;;  %v10173_v0 = vld [vmem:[#allocation70_spill] sm:$0xff]  ;;  %v10174_v26 = vld [vmem:[#allocation47_spill] sm:$0xff] }
 0x80e   :  { %6437 = vmatpush1.bf16.msra.mxu0 %v10164_v55  ;;  %6501 = vmatpush1.bf16.msra.mxu1 %v10165_v27  ;;  %v10175_v55 = vld [vmem:[#allocation72_spill] sm:$0xff]  ;;  %v10176_v27 = vld [vmem:[#allocation49_spill] sm:$0xff] }
 0x80f   :  { %6439 = vmatprep.subr.bf16.mxu0 %v10166_v9  ;;  %6503 = vmatprep.subr.bf16.mxu1 %v10167_v42  ;;  %v10177_v9 = vld [vmem:[#allocation74_spill] sm:$0xff]  ;;  %v10178_v42 = vld [vmem:[#allocation51_spill] sm:$0xff] }
 0x812   :  { %6441 = vmatpush1.bf16.msra.mxu0 %v10168_v3  ;;  %6505 = vmatpush1.bf16.msra.mxu1 %v10169_v39  ;;  %v10179_v3 = vld [vmem:[#allocation76_spill] sm:$0xff]  ;;  %v10180_v39 = vld [vmem:[#allocation53_spill] sm:$0xff] }
 0x813   :  { %6443 = vmatprep.subr.bf16.mxu0 %v10170_v18  ;;  %6507 = vmatprep.subr.bf16.mxu1 %v10171_v34  ;;  %v10181_v18 = vld [vmem:[#allocation78_spill] sm:$0xff]  ;;  %v10182_v34 = vld [vmem:[#allocation55_spill] sm:$0xff] }
 0x816   :  { %6445 = vmatpush1.bf16.msra.mxu0 %v10172_v36  ;;  %6509 = vmatpush1.bf16.msra.mxu1 %v10173_v0  ;;  %v10183_v36 = vld [vmem:[#allocation80_spill] sm:$0xff]  ;;  %v10184_v0 = vld [vmem:[#allocation57_spill] sm:$0xff] }
 0x817   :  { %6447 = vmatprep.subr.bf16.mxu0 %v10174_v26  ;;  %6511 = vmatprep.subr.bf16.mxu1 %v10175_v55  ;;  %v10185_v26 = vld [vmem:[#allocation82_spill] sm:$0xff]  ;;  %v10186_v55 = vld [vmem:[#allocation59_spill] sm:$0xff] }
 0x81a   :  { %6449 = vmatpush1.bf16.msra.mxu0 %v10176_v27  ;;  %6513 = vmatpush1.bf16.msra.mxu1 %v10177_v9  ;;  %v10187_v27 = vld [vmem:[#allocation84_spill] sm:$0xff]  ;;  %v10188_v9 = vld [vmem:[#allocation61_spill] sm:$0xff] }
 0x81b   :  { %6451 = vmatprep.subr.bf16.mxu0 %v10178_v42  ;;  %6515 = vmatprep.subr.bf16.mxu1 %v10179_v3  ;;  %v10189_v42 = vld [vmem:[#allocation86_spill] sm:$0xff]  ;;  %v10190_v3 = vld [vmem:[#allocation63_spill] sm:$0xff] }
 0x81e   :  { %6453 = vmatpush1.bf16.msra.mxu0 %v10180_v39  ;;  %6517 = vmatpush1.bf16.msra.mxu1 %v10181_v18  ;;  %v10191_v39 = vld [vmem:[#allocation88_spill] sm:$0xff]  ;;  %v10192_v18 = vld [vmem:[#allocation65_spill] sm:$0xff] }
 0x81f   :  { %6455 = vmatprep.subr.bf16.mxu0 %v10182_v34  ;;  %6519 = vmatprep.subr.bf16.mxu1 %v10183_v36  ;;  %v10193_v34 = vld [vmem:[#allocation90_spill] sm:$0xff]  ;;  %v10194_v36 = vld [vmem:[#allocation67_spill] sm:$0xff] }
 0x822   :  { %6457 = vmatpush1.bf16.msra.mxu0 %v10184_v0  ;;  %6521 = vmatpush1.bf16.msra.mxu1 %v10185_v26  ;;  %v10195_v0 = vld [vmem:[#allocation92_spill] sm:$0xff]  ;;  %v10196_v26 = vld [vmem:[#allocation69_spill] sm:$0xff] }
 0x823   :  { %6459 = vmatprep.subr.bf16.mxu0 %v10186_v55  ;;  %6523 = vmatprep.subr.bf16.mxu1 %v10187_v27  ;;  %v10197_v55 = vld [vmem:[#allocation94_spill] sm:$0xff]  ;;  %v10198_v27 = vld [vmem:[#allocation71_spill] sm:$0xff] }
 0x826   :  { %6461 = vmatpush1.bf16.msra.mxu0 %v10188_v9  ;;  %6525 = vmatpush1.bf16.msra.mxu1 %v10189_v42  ;;  %v10199_v9 = vld [vmem:[#allocation96_spill] sm:$0xff] }
 0x827   :  { %6463 = vmatprep.subr.bf16.mxu0 %v10190_v3  ;;  %6527 = vmatprep.subr.bf16.mxu1 %v10191_v39 }
 0x82a   :  { %6465 = vmatpush1.bf16.msra.mxu0 %v10192_v18  ;;  %6529 = vmatpush1.bf16.msra.mxu1 %v10193_v34 }
 0x82b   :  { %6467 = vmatprep.subr.bf16.mxu0 %v10194_v36  ;;  %6531 = vmatprep.subr.bf16.mxu1 %v10195_v0 }
 0x82e   :  { %6469 = vmatpush1.bf16.msra.mxu0 %v10196_v26  ;;  %6533 = vmatpush1.bf16.msra.mxu1 %v10197_v55  ;;  %v10202_v55 = vld [vmem:[#allocation151_spill] sm:$0xff] }
 0x82f   :  { %6535 = vmatprep.subr.bf16.mxu0 %v10198_v27  ;;  %6599 = vmatprep.subr.bf16.mxu1 %v10199_v9  ;;  %v10203_v9 = vld [vmem:[#allocation150_spill] sm:$0xff] }
 0x884   :  { %v3259_v42 = vpop.f32.mrb[28].mxu0  ;;  %v3330_v3 = vpop.f32.mrb[32].mxu1 }
 0x885   :  { %v3481_v37 = vrot.slane %v3259_v42, 6  ;;  %v3261_v39 = vpop.f32.mrb[29].mxu0  ;;  %v3332_v14 = vpop.f32.mrb[33].mxu1  ;;  %v3483_v27 = vrot.slane %v3330_v3, 6 }
 0x886   :  { %v3482_v18 = vrot.slane %v3261_v39, 6  ;;  %v3484_v47 = vrot.slane %v3332_v14, 6  ;;  %v10204_v14 = vld [vmem:[#allocation102_spill] sm:$0xff] }
 0x887   :  { %v3489_v34 = vadd.f32 %v3481_v37, %v10200_v31  ;;  %v3491_v53 = vadd.f32 %v10203_v9, %v3483_v27 }
 0x888   :  { %v3490_v36 = vadd.f32 %v3482_v18, %v10201_v30  ;;  %v3492_v26 = vadd.f32 %v10202_v55, %v3484_v47 }
 0x889   :  { %v4501_v10 = vmul.f32 -1.442695, %v3489_v34 }
 0x88a   :  { %v4502_v0 = vmul.f32 -1.442695, %v3490_v36  ;;  %v4503_v44 = vmul.f32 -1.442695, %v3492_v26 }
 0x88b   :  { %7157 = vpow2.f32 %v4501_v10  ;;  %v3529_v10 = vrot.slane %v10204_v14, 6 }
 0x88c   :  { %7159 = vpow2.f32 %v4502_v0 }
 0x88d   :  { %7161 = vpow2.f32 %v4503_v44 }
 0x88e   :  { %7163 = vtanh.f32 %v3491_v53 }
 0x895   :  { %v7158_v51 = vpop.eup %7157 }
 0x896   :  { %v7160_v42 = vpop.eup %7159  ;;  %v3512_v15 = vadd.f32 1.0, %v7158_v51 }
 0x897   :  { %v3518_v39 = vadd.f32 1.0, %v7160_v42  ;;  %v7162_v37 = vpop.eup %7161 }
 0x898   :  { %7165 = vrcp.f32 %v3512_v15  ;;  %v7164_v34 = vpop.eup %7163  ;;  %v3525_v47 = vadd.f32 1.0, %v7162_v37 }
 0x899   :  { %7167 = vrcp.f32 %v3518_v39 }
 0x89a   :  { %7169 = vrcp.f32 %v3525_v47 }
 0x8a2   :  { %v7166_v36 = vpop.eup %7165 }
 0x8a3   :  { %v7168_v0 = vpop.eup %7167  ;;  %v3532_v18 = vmul.f32 %v7166_v36, %v7164_v34 }
 0x8a4   :  { %v3531_v3 = vmul.f32 %v7168_v0, %v3529_v10  ;;  %v7170_v51 = vpop.eup %7169 }
 0x8a6   :  { %v8939_v26 = vadd.f32 %v3532_v18, %v3531_v3 }
 0x8a8   :  { %7171 = vtanh.f32 %v8939_v26 }
 0x8b2   :  { %v7172_v44 = vpop.eup %7171 }
 0x8b3   :  { %v8942_v53 = vmul.f32 %v7172_v44, %v7170_v51 }
 0x8c4   :  { %v3401_v15 = vpop.f32.mrb[30].mxu0  ;;  %v3472_v27 = vpop.f32.mrb[34].mxu1 }
 0x8c5   :  { %v3497_v42 = vrot.slane %v3401_v15, 4  ;;  %v3403_v39 = vpop.f32.mrb[31].mxu0  ;;  %v3474_v9 = vpop.f32.mrb[35].mxu1  ;;  %v3499_v18 = vrot.slane %v3472_v27, 4 }
 0x8c6   :  { %v3498_v55 = vrot.slane %v3403_v39, 4  ;;  %v3500_v10 = vrot.slane %v3474_v9, 4  ;;  %v3556_v9 = vrot.slane %v8796_v11, 2  ;;  %v10206_v11 = vld [vmem:[#allocation111_spill] sm:$0xff] }
 0x8c7   :  { %v3505_v14 = vadd.f32 %v10108_v52, %v3497_v42  ;;  %v3507_v3 = vadd.f32 %v10111_v4, %v3499_v18 }
 0x8c8   :  { %v3506_v37 = vadd.f32 %v10109_v33, %v3498_v55  ;;  %v3508_v0 = vadd.f32 %v10110_v62, %v3500_v10 }
 0x8c9   :  { %v4504_v34 = vmul.f32 -1.442695, %v3505_v14 }
 0x8ca   :  { %v4505_v36 = vmul.f32 -1.442695, %v3506_v37  ;;  %v4506_v47 = vmul.f32 -1.442695, %v3508_v0 }
 0x8cb   :  { %7173 = vpow2.f32 %v4504_v34 }
 0x8cc   :  { %7175 = vpow2.f32 %v4505_v36 }
 0x8cd   :  { %7177 = vpow2.f32 %v4506_v47 }
 0x8ce   :  { %7179 = vtanh.f32 %v3507_v3 }
 0x8d5   :  { %v7174_v51 = vpop.eup %7173 }
 0x8d6   :  { %v7176_v44 = vpop.eup %7175  ;;  %v3539_v15 = vadd.f32 1.0, %v7174_v51 }
 0x8d7   :  { %v3545_v39 = vadd.f32 1.0, %v7176_v44  ;;  %v7178_v55 = vpop.eup %7177  ;;  %v8956_v44 = vrot.slane %v8942_v53, 2 }
 0x8d8   :  { %7181 = vrcp.f32 %v3539_v15  ;;  %v7180_v42 = vpop.eup %7179  ;;  %v3552_v36 = vadd.f32 1.0, %v7178_v55  ;;  %v10207_v15 = vld [vmem:[#allocation135_spill] sm:$0xff]  ;;  %v10209_v55 = vld [vmem:[#allocation136_spill] sm:$0xff] }
 0x8d9   :  { %7183 = vrcp.f32 %v3545_v39  ;;  %v10208_v39 = vld [vmem:[#allocation113_spill] sm:$0xff] }
 0x8da   :  { %7185 = vrcp.f32 %v3552_v36  ;;  %v10215_v36 = vld [vmem:[#allocation139_spill] sm:$0xff] }
 0x8e2   :  { %v7182_v14 = vpop.eup %7181 }
 0x8e3   :  { %v7184_v37 = vpop.eup %7183  ;;  %v3559_v34 = vmul.f32 %v7182_v14, %v7180_v42  ;;  %v10210_v42 = vld [vmem:[#allocation115_spill] sm:$0xff]  ;;  %v10211_v14 = vld [vmem:[#allocation137_spill] sm:$0xff] }
 0x8e4   :  { %v3558_v27 = vmul.f32 %v7184_v37, %v3556_v9  ;;  %v7186_v0 = vpop.eup %7185  ;;  %v10212_v9 = vld [vmem:[#allocation117_spill] sm:$0xff]  ;;  %v10213_v37 = vld [vmem:[#allocation138_spill] sm:$0xff] }
 0x8e6   :  { %v8949_v10 = vadd.f32 %v3559_v34, %v3558_v27  ;;  %v10214_v34 = vld [vmem:[#allocation119_spill] sm:$0xff]  ;;  %v10216_v27 = vld [vmem:[#allocation121_spill] sm:$0xff] }
 0x8e8   :  { %7187 = vtanh.f32 %v8949_v10 }
 0x8f2   :  { %v7188_v18 = vpop.eup %7187 }
 0x8f3   :  { %v8952_v47 = vmul.f32 %v7188_v18, %v7186_v0  ;;  %v10217_v0 = vld [vmem:[#allocation140_spill] sm:$0xff]  ;;  %v10218_v18 = vld [vmem:[#allocation123_spill] sm:$0xff] }
 0x8f5   :  { %10205 = vst [vmem:[#allocation158_spill] sm:$0xff] %v8952_v47  ;;  %v3564_v3 = vrot.slane %v8952_v47, 2  ;;  %v10221_v47 = vld [vmem:[#allocation142_spill] sm:$0xff] }
 0x8f7   :  { %v3567_v51 = vrot.slane %v3564_v3, 2  ;;  %v10219_v3 = vld [vmem:[#allocation141_spill] sm:$0xff] }
 0x8f9   :  { %3634 = vmatprep.mubr.f32.mxu0 %v3567_v51  ;;  %3705 = vmatprep.mubr.f32.mxu1 %v3567_v51 }
 0x8fa   :  { %3635 = vmatmul.mubr.f32.vlgmr.msra.gmra.mrb[32].mxu0 %v8956_v44  ;;  %3706 = vmatmul.mubr.f32.vlgmr.msra.gmra.mrb[36].mxu1 %v8956_v44 }
 0x8fb   :  { %6537 = vmatpush1.bf16.msra.mxu0 %v9727_v21  ;;  %6601 = vmatpush1.bf16.msra.mxu1 %v9728_v28 }
 0x8fc   :  { %3776 = vmatprep.mubr.f32.mxu0 %v3567_v51  ;;  %3847 = vmatprep.mubr.f32.mxu1 %v3567_v51  ;;  %v10220_v51 = vld [vmem:[#allocation125_spill] sm:$0xff] }
 0x8fd   :  { %6539 = vmatprep.subr.bf16.mxu0 %v9729_v25  ;;  %6603 = vmatprep.subr.bf16.mxu1 %v9730_v56 }
 0x8ff   :  { %6541 = vmatpush1.bf16.msra.mxu0 %v9731_v13  ;;  %6605 = vmatpush1.bf16.msra.mxu1 %v9732_v49 }
 0x900   :  { %6543 = vmatprep.subr.bf16.mxu0 %v9733_v59  ;;  %6607 = vmatprep.subr.bf16.mxu1 %v9821_v57 }
 0x903   :  { %6545 = vmatpush1.bf16.msra.mxu0 %v9822_v7  ;;  %6609 = vmatpush1.bf16.msra.mxu1 %v9823_v35 }
 0x904   :  { %6547 = vmatprep.subr.bf16.mxu0 %v9824_v32  ;;  %6611 = vmatprep.subr.bf16.mxu1 %v9825_v6 }
 0x907   :  { %6549 = vmatpush1.bf16.msra.mxu0 %v9826_v60  ;;  %6613 = vmatpush1.bf16.msra.mxu1 %v9827_v24 }
 0x908   :  { %6551 = vmatprep.subr.bf16.mxu0 %v9916_v50  ;;  %6615 = vmatprep.subr.bf16.mxu1 %v9917_v61 }
 0x90b   :  { %6553 = vmatpush1.bf16.msra.mxu0 %v9918_v1  ;;  %6617 = vmatpush1.bf16.msra.mxu1 %v9919_v5 }
 0x90c   :  { %6555 = vmatprep.subr.bf16.mxu0 %v9920_v20  ;;  %6619 = vmatprep.subr.bf16.mxu1 %v9921_v29 }
 0x90f   :  { %6557 = vmatpush1.bf16.msra.mxu0 %v9922_v48  ;;  %6621 = vmatpush1.bf16.msra.mxu1 %v9923_v54 }
 0x910   :  { %6559 = vmatprep.subr.bf16.mxu0 %v9924_v40  ;;  %6623 = vmatprep.subr.bf16.mxu1 %v9836_v17 }
 0x913   :  { %6561 = vmatpush1.bf16.msra.mxu0 %v9925_v16  ;;  %6625 = vmatpush1.bf16.msra.mxu1 %v9926_v46 }
 0x914   :  { %6563 = vmatprep.subr.bf16.mxu0 %v9927_v12  ;;  %6627 = vmatprep.subr.bf16.mxu1 %v10011_v58 }
 0x917   :  { %6565 = vmatpush1.bf16.msra.mxu0 %v9928_v45  ;;  %6629 = vmatpush1.bf16.msra.mxu1 %v10012_v22 }
 0x918   :  { %6567 = vmatprep.subr.bf16.mxu0 %v9929_v38  ;;  %6631 = vmatprep.subr.bf16.mxu1 %v9843_v8 }
 0x91b   :  { %6569 = vmatpush1.bf16.msra.mxu0 %v9930_v2  ;;  %6633 = vmatpush1.bf16.msra.mxu1 %v10013_v23 }
 0x91c   :  { %6571 = vmatprep.subr.bf16.mxu0 %v9931_v63  ;;  %6635 = vmatprep.subr.bf16.mxu1 %v10014_v41 }
 0x91f   :  { %6573 = vmatpush1.bf16.msra.mxu0 %v9932_v43  ;;  %6637 = vmatpush1.bf16.msra.mxu1 %v10015_v19 }
 0x920   :  { %6575 = vmatprep.subr.bf16.mxu0 %v10206_v11  ;;  %6639 = vmatprep.subr.bf16.mxu1 %v10207_v15 }
 0x923   :  { %6577 = vmatpush1.bf16.msra.mxu0 %v10208_v39  ;;  %6641 = vmatpush1.bf16.msra.mxu1 %v10209_v55 }
 0x924   :  { %6579 = vmatprep.subr.bf16.mxu0 %v10210_v42  ;;  %6643 = vmatprep.subr.bf16.mxu1 %v10211_v14  ;;  %v10222_v14 = vld [vmem:[#allocation127_spill] sm:$0xff] }
 0x927   :  { %6581 = vmatpush1.bf16.msra.mxu0 %v10212_v9  ;;  %6645 = vmatpush1.bf16.msra.mxu1 %v10213_v37  ;;  %v10223_v9 = vld [vmem:[#allocation144_spill] sm:$0xff]  ;;  %v10224_v37 = vld [vmem:[#allocation129_spill] sm:$0xff] }
 0x928   :  { %6583 = vmatprep.subr.bf16.mxu0 %v10214_v34  ;;  %6647 = vmatprep.subr.bf16.mxu1 %v10215_v36  ;;  %v10225_v34 = vld [vmem:[#allocation146_spill] sm:$0xff]  ;;  %v10226_v36 = vld [vmem:[#allocation131_spill] sm:$0xff] }
 0x92b   :  { %6585 = vmatpush1.bf16.msra.mxu0 %v10216_v27  ;;  %6649 = vmatpush1.bf16.msra.mxu1 %v10217_v0  ;;  %v10227_v27 = vld [vmem:[#allocation148_spill] sm:$0xff]  ;;  %v10228_v0 = vld [vmem:[#allocation133_spill] sm:$0xff] }
 0x92c   :  { %6587 = vmatprep.subr.bf16.mxu0 %v10218_v18  ;;  %6651 = vmatprep.subr.bf16.mxu1 %v10219_v3  ;;  %v10229_v18 = vld [vmem:[#allocation149_spill] sm:$0xff]  ;;  %v10230_v3 = vld [vmem:[#allocation19_spill] sm:$0xff] }
 0x92f   :  { %6589 = vmatpush1.bf16.msra.mxu0 %v10220_v51  ;;  %6653 = vmatpush1.bf16.msra.mxu1 %v10221_v47  ;;  %v10231_v51 = vld [vmem:[#allocation32_spill] sm:$0xff] }
 0x930   :  { %6591 = vmatprep.subr.bf16.mxu0 %v10222_v14  ;;  %6655 = vmatprep.subr.bf16.mxu1 %v10223_v9  ;;  %v10232_v9 = vld [vmem:[#allocation20_spill] sm:$0xff]  ;;  %v10241_v14 = vld [vmem:[#allocation42_spill] sm:$0xff] }
 0x933   :  { %6593 = vmatpush1.bf16.msra.mxu0 %v10224_v37  ;;  %6657 = vmatpush1.bf16.msra.mxu1 %v10225_v34  ;;  %v10233_v37 = vld [vmem:[#allocation34_spill] sm:$0xff]  ;;  %v10234_v34 = vld [vmem:[#allocation21_spill] sm:$0xff] }
 0x934   :  { %6595 = vmatprep.subr.bf16.mxu0 %v10226_v36  ;;  %6659 = vmatprep.subr.bf16.mxu1 %v10227_v27  ;;  %v10235_v36 = vld [vmem:[#allocation36_spill] sm:$0xff]  ;;  %v10236_v27 = vld [vmem:[#allocation22_spill] sm:$0xff] }
 0x937   :  { %6597 = vmatpush1.bf16.msra.mxu0 %v10228_v0  ;;  %6661 = vmatpush1.bf16.msra.mxu1 %v10229_v18  ;;  %v10237_v0 = vld [vmem:[#allocation38_spill] sm:$0xff]  ;;  %v10238_v18 = vld [vmem:[#allocation23_spill] sm:$0xff] }
 0x938   :  { %6663 = vmatprep.subr.bf16.mxu0 %v10230_v3  ;;  %6727 = vmatprep.subr.bf16.mxu1 %v10231_v51  ;;  %v10239_v3 = vld [vmem:[#allocation40_spill] sm:$0xff] }
 0x939   :  { %v10240_v51 = vld [vmem:[#allocation24_spill] sm:$0xff] }
 0x93a   :  { %3777 = vmatmul.mubr.f32.vlgmr.msra.gmra.mrb[34].mxu0 %v8956_v44  ;;  %3848 = vmatmul.mubr.f32.vlgmr.msra.gmra.mrb[38].mxu1 %v8956_v44  ;;  %v10242_v44 = vld [vmem:[#allocation25_spill] sm:$0xff] }
 0x93b   :  { %6665 = vmatpush1.bf16.msra.mxu0 %v10232_v9  ;;  %6729 = vmatpush1.bf16.msra.mxu1 %v10233_v37  ;;  %v10243_v9 = vld [vmem:[#allocation44_spill] sm:$0xff]  ;;  %v10244_v37 = vld [vmem:[#allocation26_spill] sm:$0xff] }
 0x93c   :  { %6667 = vmatprep.subr.bf16.mxu0 %v10234_v34  ;;  %6731 = vmatprep.subr.bf16.mxu1 %v10235_v36  ;;  %v10245_v34 = vld [vmem:[#allocation46_spill] sm:$0xff]  ;;  %v10246_v36 = vld [vmem:[#allocation27_spill] sm:$0xff] }
 0x93f   :  { %6669 = vmatpush1.bf16.msra.mxu0 %v10236_v27  ;;  %6733 = vmatpush1.bf16.msra.mxu1 %v10237_v0  ;;  %v10247_v27 = vld [vmem:[#allocation48_spill] sm:$0xff] }
 0x940   :  { %6671 = vmatprep.subr.bf16.mxu0 %v10238_v18  ;;  %6735 = vmatprep.subr.bf16.mxu1 %v10239_v3  ;;  %v10248_v0 = vld [vmem:[#allocation28_spill] sm:$0xff]  ;;  %v10249_v18 = vld [vmem:[#allocation50_spill] sm:$0xff]  ;;  %v10250_v3 = vld [vmem:[#allocation29_spill] sm:$0xff] }
 0x943   :  { %6673 = vmatpush1.bf16.msra.mxu0 %v10240_v51  ;;  %6737 = vmatpush1.bf16.msra.mxu1 %v10241_v14  ;;  %v10251_v51 = vld [vmem:[#allocation52_spill] sm:$0xff]  ;;  %v10252_v14 = vld [vmem:[#allocation30_spill] sm:$0xff] }
 0x944   :  { %6675 = vmatprep.subr.bf16.mxu0 %v10242_v44  ;;  %6739 = vmatprep.subr.bf16.mxu1 %v10243_v9  ;;  %v10253_v44 = vld [vmem:[#allocation54_spill] sm:$0xff]  ;;  %v10254_v9 = vld [vmem:[#allocation31_spill] sm:$0xff] }
 0x947   :  { %6677 = vmatpush1.bf16.msra.mxu0 %v10244_v37  ;;  %6741 = vmatpush1.bf16.msra.mxu1 %v10245_v34  ;;  %v10255_v37 = vld [vmem:[#allocation56_spill] sm:$0xff]  ;;  %v10256_v34 = vld [vmem:[#allocation33_spill] sm:$0xff] }
 0x948   :  { %6679 = vmatprep.subr.bf16.mxu0 %v10246_v36  ;;  %6743 = vmatprep.subr.bf16.mxu1 %v10247_v27  ;;  %v10257_v36 = vld [vmem:[#allocation58_spill] sm:$0xff]  ;;  %v10258_v27 = vld [vmem:[#allocation35_spill] sm:$0xff] }
 0x94b   :  { %6681 = vmatpush1.bf16.msra.mxu0 %v10248_v0  ;;  %6745 = vmatpush1.bf16.msra.mxu1 %v10249_v18  ;;  %v10259_v0 = vld [vmem:[#allocation60_spill] sm:$0xff]  ;;  %v10260_v18 = vld [vmem:[#allocation37_spill] sm:$0xff] }
 0x94c   :  { %6683 = vmatprep.subr.bf16.mxu0 %v10250_v3  ;;  %6747 = vmatprep.subr.bf16.mxu1 %v10251_v51  ;;  %v10261_v3 = vld [vmem:[#allocation62_spill] sm:$0xff]  ;;  %v10262_v51 = vld [vmem:[#allocation39_spill] sm:$0xff] }
 0x94f   :  { %6685 = vmatpush1.bf16.msra.mxu0 %v10252_v14  ;;  %6749 = vmatpush1.bf16.msra.mxu1 %v10253_v44  ;;  %v10263_v14 = vld [vmem:[#allocation64_spill] sm:$0xff]  ;;  %v10264_v44 = vld [vmem:[#allocation41_spill] sm:$0xff] }
 0x950   :  { %6687 = vmatprep.subr.bf16.mxu0 %v10254_v9  ;;  %6751 = vmatprep.subr.bf16.mxu1 %v10255_v37  ;;  %v10265_v9 = vld [vmem:[#allocation66_spill] sm:$0xff]  ;;  %v10266_v37 = vld [vmem:[#allocation43_spill] sm:$0xff] }
 0x953   :  { %6689 = vmatpush1.bf16.msra.mxu0 %v10256_v34  ;;  %6753 = vmatpush1.bf16.msra.mxu1 %v10257_v36  ;;  %v10267_v34 = vld [vmem:[#allocation68_spill] sm:$0xff]  ;;  %v10268_v36 = vld [vmem:[#allocation45_spill] sm:$0xff] }
 0x954   :  { %6691 = vmatprep.subr.bf16.mxu0 %v10258_v27  ;;  %6755 = vmatprep.subr.bf16.mxu1 %v10259_v0  ;;  %v10269_v27 = vld [vmem:[#allocation70_spill] sm:$0xff]  ;;  %v10270_v0 = vld [vmem:[#allocation47_spill] sm:$0xff] }
 0x957   :  { %6693 = vmatpush1.bf16.msra.mxu0 %v10260_v18  ;;  %6757 = vmatpush1.bf16.msra.mxu1 %v10261_v3  ;;  %v10271_v18 = vld [vmem:[#allocation72_spill] sm:$0xff]  ;;  %v10272_v3 = vld [vmem:[#allocation49_spill] sm:$0xff] }
 0x958   :  { %6695 = vmatprep.subr.bf16.mxu0 %v10262_v51  ;;  %6759 = vmatprep.subr.bf16.mxu1 %v10263_v14  ;;  %v10273_v51 = vld [vmem:[#allocation74_spill] sm:$0xff]  ;;  %v10274_v14 = vld [vmem:[#allocation51_spill] sm:$0xff] }
 0x95b   :  { %6697 = vmatpush1.bf16.msra.mxu0 %v10264_v44  ;;  %6761 = vmatpush1.bf16.msra.mxu1 %v10265_v9  ;;  %v10275_v44 = vld [vmem:[#allocation76_spill] sm:$0xff]  ;;  %v10276_v9 = vld [vmem:[#allocation53_spill] sm:$0xff] }
 0x95c   :  { %6699 = vmatprep.subr.bf16.mxu0 %v10266_v37  ;;  %6763 = vmatprep.subr.bf16.mxu1 %v10267_v34  ;;  %v10277_v37 = vld [vmem:[#allocation78_spill] sm:$0xff]  ;;  %v10278_v34 = vld [vmem:[#allocation55_spill] sm:$0xff] }
 0x95f   :  { %6701 = vmatpush1.bf16.msra.mxu0 %v10268_v36  ;;  %6765 = vmatpush1.bf16.msra.mxu1 %v10269_v27  ;;  %v10279_v36 = vld [vmem:[#allocation80_spill] sm:$0xff]  ;;  %v10280_v27 = vld [vmem:[#allocation57_spill] sm:$0xff] }
 0x960   :  { %6703 = vmatprep.subr.bf16.mxu0 %v10270_v0  ;;  %6767 = vmatprep.subr.bf16.mxu1 %v10271_v18  ;;  %v10281_v0 = vld [vmem:[#allocation82_spill] sm:$0xff]  ;;  %v10282_v18 = vld [vmem:[#allocation59_spill] sm:$0xff] }
 0x963   :  { %6705 = vmatpush1.bf16.msra.mxu0 %v10272_v3  ;;  %6769 = vmatpush1.bf16.msra.mxu1 %v10273_v51  ;;  %v10283_v3 = vld [vmem:[#allocation84_spill] sm:$0xff]  ;;  %v10284_v51 = vld [vmem:[#allocation61_spill] sm:$0xff] }
 0x964   :  { %6707 = vmatprep.subr.bf16.mxu0 %v10274_v14  ;;  %6771 = vmatprep.subr.bf16.mxu1 %v10275_v44  ;;  %v10285_v14 = vld [vmem:[#allocation86_spill] sm:$0xff]  ;;  %v10286_v44 = vld [vmem:[#allocation63_spill] sm:$0xff] }
 0x967   :  { %6709 = vmatpush1.bf16.msra.mxu0 %v10276_v9  ;;  %6773 = vmatpush1.bf16.msra.mxu1 %v10277_v37  ;;  %v10287_v9 = vld [vmem:[#allocation88_spill] sm:$0xff]  ;;  %v10288_v37 = vld [vmem:[#allocation65_spill] sm:$0xff] }
 0x968   :  { %6711 = vmatprep.subr.bf16.mxu0 %v10278_v34  ;;  %6775 = vmatprep.subr.bf16.mxu1 %v10279_v36  ;;  %v10289_v34 = vld [vmem:[#allocation90_spill] sm:$0xff]  ;;  %v10290_v36 = vld [vmem:[#allocation67_spill] sm:$0xff] }
 0x96b   :  { %6713 = vmatpush1.bf16.msra.mxu0 %v10280_v27  ;;  %6777 = vmatpush1.bf16.msra.mxu1 %v10281_v0  ;;  %v10291_v27 = vld [vmem:[#allocation92_spill] sm:$0xff]  ;;  %v10292_v0 = vld [vmem:[#allocation69_spill] sm:$0xff] }
 0x96c   :  { %6715 = vmatprep.subr.bf16.mxu0 %v10282_v18  ;;  %6779 = vmatprep.subr.bf16.mxu1 %v10283_v3  ;;  %v10293_v18 = vld [vmem:[#allocation94_spill] sm:$0xff]  ;;  %v10294_v3 = vld [vmem:[#allocation71_spill] sm:$0xff] }
 0x96f   :  { %6717 = vmatpush1.bf16.msra.mxu0 %v10284_v51  ;;  %6781 = vmatpush1.bf16.msra.mxu1 %v10285_v14  ;;  %v10295_v51 = vld [vmem:[#allocation96_spill] sm:$0xff] }
 0x970   :  { %6719 = vmatprep.subr.bf16.mxu0 %v10286_v44  ;;  %6783 = vmatprep.subr.bf16.mxu1 %v10287_v9 }
 0x973   :  { %6721 = vmatpush1.bf16.msra.mxu0 %v10288_v37  ;;  %6785 = vmatpush1.bf16.msra.mxu1 %v10289_v34 }
 0x974   :  { %6723 = vmatprep.subr.bf16.mxu0 %v10290_v36  ;;  %6787 = vmatprep.subr.bf16.mxu1 %v10291_v27 }
 0x977   :  { %6725 = vmatpush1.bf16.msra.mxu0 %v10292_v0  ;;  %6789 = vmatpush1.bf16.msra.mxu1 %v10293_v18  ;;  %v10296_v0 = vld [vmem:[#allocation151_spill] sm:$0xff] }
 0x978   :  { %6791 = vmatprep.subr.bf16.mxu0 %v10294_v3  ;;  %6855 = vmatprep.subr.bf16.mxu1 %v10295_v51  ;;  %v10297_v51 = vld [vmem:[#allocation150_spill] sm:$0xff] }
 0x9cd   :  { %v3636_v14 = vpop.f32.mrb[32].mxu0  ;;  %v3707_v44 = vpop.f32.mrb[36].mxu1 }
 0x9ce   :  { %v3858_v47 = vrot.slane %v3636_v14, 4  ;;  %v3638_v9 = vpop.f32.mrb[33].mxu0  ;;  %v3709_v42 = vpop.f32.mrb[37].mxu1  ;;  %v3860_v3 = vrot.slane %v3707_v44, 4 }
 0x9cf   :  { %v3859_v37 = vrot.slane %v3638_v9, 4  ;;  %v3861_v39 = vrot.slane %v3709_v42, 4 }
 0x9d0   :  { %v3866_v34 = vadd.f32 %v3858_v47, %v10200_v31  ;;  %v3868_v11 = vadd.f32 %v10297_v51, %v3860_v3 }
 0x9d1   :  { %v3867_v36 = vadd.f32 %v3859_v37, %v10201_v30  ;;  %v3869_v18 = vadd.f32 %v10296_v0, %v3861_v39 }
 0x9d2   :  { %v4507_v55 = vmul.f32 -1.442695, %v3866_v34 }
 0x9d3   :  { %v4508_v27 = vmul.f32 -1.442695, %v3867_v36  ;;  %v4509_v15 = vmul.f32 -1.442695, %v3869_v18 }
 0x9d4   :  { %7189 = vpow2.f32 %v4507_v55  ;;  %v3906_v55 = vrot.slane %v8939_v26, 6 }
 0x9d5   :  { %7191 = vpow2.f32 %v4508_v27 }
 0x9d6   :  { %7193 = vpow2.f32 %v4509_v15 }
 0x9d7   :  { %7195 = vtanh.f32 %v3868_v11 }
 0x9de   :  { %v7190_v19 = vpop.eup %7189 }
 0x9df   :  { %v7192_v14 = vpop.eup %7191  ;;  %v3889_v43 = vadd.f32 1.0, %v7190_v19 }
 0x9e0   :  { %v3895_v9 = vadd.f32 1.0, %v7192_v14  ;;  %v7194_v47 = vpop.eup %7193 }
 0x9e1   :  { %7197 = vrcp.f32 %v3889_v43  ;;  %v7196_v37 = vpop.eup %7195  ;;  %v3902_v39 = vadd.f32 1.0, %v7194_v47  ;;  %v10298_v43 = vld [vmem:[#allocation79_spill] sm:$0xff] }
 0x9e2   :  { %7199 = vrcp.f32 %v3895_v9  ;;  %v4313_v18 = vsel %vm4305_vm4, %v10298_v43, %v8942_v53 }
 0x9e3   :  { %7201 = vrcp.f32 %v3902_v39 }
 0x9eb   :  { %v7198_v34 = vpop.eup %7197 }
 0x9ec   :  { %v7200_v42 = vpop.eup %7199  ;;  %v3909_v36 = vmul.f32 %v7198_v34, %v7196_v37 }
 0x9ed   :  { %v3908_v44 = vmul.f32 %v7200_v42, %v3906_v55  ;;  %v7202_v19 = vpop.eup %7201 }
 0x9ef   :  { %v9095_v27 = vadd.f32 %v3909_v36, %v3908_v44 }
 0x9f1   :  { %7203 = vtanh.f32 %v9095_v27 }
 0x9fb   :  { %v7204_v15 = vpop.eup %7203 }
 0x9fc   :  { %v3912_v11 = vmul.f32 %v7204_v15, %v7202_v19 }
 0x9fe   :  { %v9102_v3 = vsel %vm461_vm0, %v4313_v18, %v3912_v11 }
 0x9ff   :  { %10299 = vst [vmem:[#allocation104_spill] sm:$0xff] %v9102_v3 }
 0xa0d   :  { %v3778_v26 = vpop.f32.mrb[34].mxu0  ;;  %v3849_v14 = vpop.f32.mrb[38].mxu1 }
 0xa0e   :  { %v3874_v9 = vrot.slane %v3778_v26, 6  ;;  %v3780_v47 = vpop.f32.mrb[35].mxu0  ;;  %v3851_v37 = vpop.f32.mrb[39].mxu1  ;;  %v3876_v19 = vrot.slane %v3849_v14, 6 }
 0xa0f   :  { %v3875_v34 = vrot.slane %v3780_v47, 6  ;;  %v3877_v44 = vrot.slane %v3851_v37, 6  ;;  %v3933_v37 = vrot.slane %v8949_v10, 2  ;;  %v4322_v10 = vld [vmem:[#allocation10 + $0x18] sm:$0xff] }
 0xa10   :  { %v3882_v55 = vadd.f32 %v10108_v52, %v3874_v9  ;;  %v3884_v43 = vadd.f32 %v10111_v4, %v3876_v19 }
 0xa11   :  { %v3883_v42 = vadd.f32 %v10109_v33, %v3875_v34  ;;  %v3885_v53 = vadd.f32 %v10110_v62, %v3877_v44 }
 0xa12   :  { %v4510_v36 = vmul.f32 -1.442695, %v3882_v55 }
 0xa13   :  { %v4511_v39 = vmul.f32 -1.442695, %v3883_v42  ;;  %v4512_v15 = vmul.f32 -1.442695, %v3885_v53 }
 0xa14   :  { %7205 = vpow2.f32 %v4510_v36 }
 0xa15   :  { %7207 = vpow2.f32 %v4511_v39 }
 0xa16   :  { %7209 = vpow2.f32 %v4512_v15 }
 0xa17   :  { %7211 = vtanh.f32 %v3884_v43 }
 0xa1e   :  { %v7206_v18 = vpop.eup %7205 }
 0xa1f   :  { %v7208_v26 = vpop.eup %7207  ;;  %v3916_v3 = vadd.f32 1.0, %v7206_v18  ;;  %v9115_v18 = vrot.slane %v3912_v11, 4 }
 0xa20   :  { %v3922_v47 = vadd.f32 1.0, %v7208_v26  ;;  %v7210_v9 = vpop.eup %7209  ;;  %v4339_v26 = vld [vmem:[#allocation10 + $0xa0] sm:$0xff] }
 0xa21   :  { %7213 = vrcp.f32 %v3916_v3  ;;  %v7212_v34 = vpop.eup %7211  ;;  %v3929_v39 = vadd.f32 1.0, %v7210_v9 }
 0xa22   :  { %7215 = vrcp.f32 %v3922_v47  ;;  %v4340_v47 = vld [vmem:[#allocation10 + $0xa8] sm:$0xff] }
 0xa23   :  { %7217 = vrcp.f32 %v3929_v39  ;;  %v6926_v9 = vpack.c.bf16 %v4340_v47, %v4339_v26 }
 0xa2b   :  { %v7214_v55 = vpop.eup %7213 }
 0xa2c   :  { %v7216_v42 = vpop.eup %7215  ;;  %v3936_v36 = vmul.f32 %v7214_v55, %v7212_v34  ;;  %v4323_v34 = vld [vmem:[#allocation10 + $0x20] sm:$0xff]  ;;  %v4324_v55 = vld [vmem:[#allocation10 + $0x28] sm:$0xff] }
 0xa2d   :  { %v3935_v14 = vmul.f32 %v7216_v42, %v3933_v37  ;;  %v7218_v53 = vpop.eup %7217  ;;  %v6928_v37 = vpack.c.bf16 %v4324_v55, %v4323_v34  ;;  %v4341_v42 = vld [vmem:[#allocation10 + $0xb0] sm:$0xff]  ;;  %v4271_v34 = vrot.slane %v9095_v27, 6 }
 0xa2f   :  { %v9109_v44 = vadd.f32 %v3936_v36, %v3935_v14  ;;  %v4342_v36 = vld [vmem:[#allocation10 + $0xb8] sm:$0xff]  ;;  %v4325_v14 = vld [vmem:[#allocation10 + $0x30] sm:$0xff] }
 0xa30   :  { %v6930_v39 = vpack.c.bf16 %v4342_v36, %v4341_v42 }
 0xa31   :  { %7219 = vtanh.f32 %v9109_v44 }
 0xa3b   :  { %v7220_v19 = vpop.eup %7219 }
 0xa3c   :  { %v9112_v15 = vmul.f32 %v7220_v19, %v7218_v53  ;;  %v4326_v53 = vld [vmem:[#allocation10 + $0x38] sm:$0xff] }
 0xa3d   :  { %v6932_v19 = vpack.c.bf16 %v4326_v53, %v4325_v14  ;;  %v10326_v53 = vld [vmem:[#allocation104_spill] sm:$0xff] }
 0xa3e   :  { %v3941_v3 = vrot.slane %v9112_v15, 6 }
 0xa40   :  { %v3944_v43 = vrot.slane %v3941_v3, 4  ;;  %v4343_v3 = vld [vmem:[#allocation10 + $0xc0] sm:$0xff] }
 0xa42   :  { %4011 = vmatprep.mubr.f32.mxu0 %v3944_v43  ;;  %4082 = vmatprep.mubr.f32.mxu1 %v3944_v43 }
 0xa43   :  { %4012 = vmatmul.mubr.f32.vlgmr.msra.gmra.mrb[36].mxu0 %v9115_v18  ;;  %4083 = vmatmul.mubr.f32.vlgmr.msra.gmra.mrb[40].mxu1 %v9115_v18 }
 0xa44   :  { %6793 = vmatpush1.bf16.msra.mxu0 %v9727_v21  ;;  %6857 = vmatpush1.bf16.msra.mxu1 %v9728_v28  ;;  %v10300_v21 = vld [vmem:[#allocation109_spill] sm:$0xff]  ;;  %v10301_v28 = vld [vmem:[#allocation134_spill] sm:$0xff] }
 0xa45   :  { %4153 = vmatprep.mubr.f32.mxu0 %v3944_v43  ;;  %4224 = vmatprep.mubr.f32.mxu1 %v3944_v43  ;;  %v4344_v43 = vld [vmem:[#allocation10 + $0xc8] sm:$0xff] }
 0xa46   :  { %6795 = vmatprep.subr.bf16.mxu0 %v9729_v25  ;;  %6859 = vmatprep.subr.bf16.mxu1 %v9730_v56  ;;  %v10302_v25 = vld [vmem:[#allocation111_spill] sm:$0xff] }
 0xa47   :  { %v10303_v56 = vld [vmem:[#allocation135_spill] sm:$0xff] }
 0xa48   :  { %6797 = vmatpush1.bf16.msra.mxu0 %v9731_v13  ;;  %6861 = vmatpush1.bf16.msra.mxu1 %v9732_v49  ;;  %v10304_v13 = vld [vmem:[#allocation113_spill] sm:$0xff]  ;;  %v10305_v49 = vld [vmem:[#allocation136_spill] sm:$0xff] }
 0xa49   :  { %6799 = vmatprep.subr.bf16.mxu0 %v9733_v59  ;;  %6863 = vmatprep.subr.bf16.mxu1 %v9821_v57  ;;  %v10306_v59 = vld [vmem:[#allocation115_spill] sm:$0xff]  ;;  %v10308_v57 = vld [vmem:[#allocation117_spill] sm:$0xff] }
 0xa4c   :  { %6801 = vmatpush1.bf16.msra.mxu0 %v9822_v7  ;;  %6865 = vmatpush1.bf16.msra.mxu1 %v9823_v35  ;;  %v10309_v7 = vld [vmem:[#allocation138_spill] sm:$0xff]  ;;  %v10310_v35 = vld [vmem:[#allocation119_spill] sm:$0xff] }
 0xa4d   :  { %6803 = vmatprep.subr.bf16.mxu0 %v9824_v32  ;;  %6867 = vmatprep.subr.bf16.mxu1 %v9825_v6  ;;  %v10311_v32 = vld [vmem:[#allocation139_spill] sm:$0xff]  ;;  %v10312_v6 = vld [vmem:[#allocation121_spill] sm:$0xff] }
 0xa50   :  { %6805 = vmatpush1.bf16.msra.mxu0 %v9826_v60  ;;  %6869 = vmatpush1.bf16.msra.mxu1 %v9827_v24  ;;  %v10313_v60 = vld [vmem:[#allocation140_spill] sm:$0xff]  ;;  %v10314_v24 = vld [vmem:[#allocation123_spill] sm:$0xff] }
 0xa51   :  { %6807 = vmatprep.subr.bf16.mxu0 %v9916_v50  ;;  %6871 = vmatprep.subr.bf16.mxu1 %v9917_v61  ;;  %v10316_v50 = vld [vmem:[#allocation125_spill] sm:$0xff]  ;;  %v10317_v61 = vld [vmem:[#allocation142_spill] sm:$0xff] }
 0xa54   :  { %6809 = vmatpush1.bf16.msra.mxu0 %v9918_v1  ;;  %6873 = vmatpush1.bf16.msra.mxu1 %v9919_v5  ;;  %v10318_v1 = vld [vmem:[#allocation127_spill] sm:$0xff]  ;;  %v10319_v5 = vld [vmem:[#allocation144_spill] sm:$0xff] }
 0xa55   :  { %6811 = vmatprep.subr.bf16.mxu0 %v9920_v20  ;;  %6875 = vmatprep.subr.bf16.mxu1 %v9921_v29  ;;  %v10320_v20 = vld [vmem:[#allocation129_spill] sm:$0xff]  ;;  %v10321_v29 = vld [vmem:[#allocation146_spill] sm:$0xff] }
 0xa58   :  { %6813 = vmatpush1.bf16.msra.mxu0 %v9922_v48  ;;  %6877 = vmatpush1.bf16.msra.mxu1 %v9923_v54  ;;  %v10322_v48 = vld [vmem:[#allocation131_spill] sm:$0xff]  ;;  %v10323_v54 = vld [vmem:[#allocation148_spill] sm:$0xff] }
 0xa59   :  { %6815 = vmatprep.subr.bf16.mxu0 %v9924_v40  ;;  %6879 = vmatprep.subr.bf16.mxu1 %v9836_v17  ;;  %v10307_v17 = vld [vmem:[#allocation137_spill] sm:$0xff] }
 0xa5a   :  { %v10324_v40 = vld [vmem:[#allocation133_spill] sm:$0xff] }
 0xa5c   :  { %6817 = vmatpush1.bf16.msra.mxu0 %v9925_v16  ;;  %6881 = vmatpush1.bf16.msra.mxu1 %v9926_v46  ;;  %v10325_v16 = vld [vmem:[#allocation149_spill] sm:$0xff] }
 0xa5d   :  { %6819 = vmatprep.subr.bf16.mxu0 %v9927_v12  ;;  %6883 = vmatprep.subr.bf16.mxu1 %v10011_v58  ;;  %v4335_v46 = vld [vmem:[#allocation10 + $0x80] sm:$0xff]  ;;  %v4336_v12 = vld [vmem:[#allocation10 + $0x88] sm:$0xff]  ;;  %v4337_v58 = vld [vmem:[#allocation10 + $0x90] sm:$0xff] }
 0xa60   :  { %6821 = vmatpush1.bf16.msra.mxu0 %v9928_v45  ;;  %6885 = vmatpush1.bf16.msra.mxu1 %v10012_v22  ;;  %v6918_v45 = vpack.c.bf16 %v4336_v12, %v4335_v46  ;;  %v4338_v22 = vld [vmem:[#allocation10 + $0x98] sm:$0xff] }
 0xa61   :  { %6823 = vmatprep.subr.bf16.mxu0 %v9929_v38  ;;  %6887 = vmatprep.subr.bf16.mxu1 %v9843_v8  ;;  %v10315_v8 = vld [vmem:[#allocation141_spill] sm:$0xff] }
 0xa62   :  { %v4319_v38 = vld [vmem:[#allocation10] sm:$0xff] }
 0xa64   :  { %6825 = vmatpush1.bf16.msra.mxu0 %v9930_v2  ;;  %6889 = vmatpush1.bf16.msra.mxu1 %v10013_v23  ;;  %v4320_v2 = vld [vmem:[#allocation10 + $0x8] sm:$0xff]  ;;  %v6922_v23 = vpack.c.bf16 %v4338_v22, %v4337_v58 }
 0xa65   :  { %6827 = vmatprep.subr.bf16.mxu0 %v9931_v63  ;;  %6891 = vmatprep.subr.bf16.mxu1 %v10014_v41  ;;  %v6920_v63 = vpack.c.bf16 %v4320_v2, %v4319_v38  ;;  %v4321_v41 = vld [vmem:[#allocation10 + $0x10] sm:$0xff] }
 0xa66   :  { %v6924_v11 = vpack.c.bf16 %v4322_v10, %v4321_v41 }
 0xa68   :  { %6829 = vmatpush1.bf16.msra.mxu0 %v10300_v21  ;;  %6893 = vmatpush1.bf16.msra.mxu1 %v10301_v28  ;;  %v4327_v21 = vld [vmem:[#allocation10 + $0x40] sm:$0xff]  ;;  %v4328_v28 = vld [vmem:[#allocation10 + $0x48] sm:$0xff] }
 0xa69   :  { %6831 = vmatprep.subr.bf16.mxu0 %v10302_v25  ;;  %6895 = vmatprep.subr.bf16.mxu1 %v10303_v56  ;;  %v4345_v25 = vld [vmem:[#allocation10 + $0xd0] sm:$0xff]  ;;  %v6936_v56 = vpack.c.bf16 %v4328_v28, %v4327_v21 }
 0xa6c   :  { %6833 = vmatpush1.bf16.msra.mxu0 %v10304_v13  ;;  %6897 = vmatpush1.bf16.msra.mxu1 %v10305_v49  ;;  %v4346_v13 = vld [vmem:[#allocation10 + $0xd8] sm:$0xff]  ;;  %v4329_v49 = vld [vmem:[#allocation10 + $0x50] sm:$0xff] }
 0xa6d   :  { %6835 = vmatprep.subr.bf16.mxu0 %v10306_v59  ;;  %6899 = vmatprep.subr.bf16.mxu1 %v10307_v17  ;;  %v4330_v59 = vld [vmem:[#allocation10 + $0x58] sm:$0xff]  ;;  %v6938_v17 = vpack.c.bf16 %v4346_v13, %v4345_v25 }
 0xa70   :  { %6837 = vmatpush1.bf16.msra.mxu0 %v10308_v57  ;;  %6901 = vmatpush1.bf16.msra.mxu1 %v10309_v7  ;;  %v4347_v57 = vld [vmem:[#allocation10 + $0xe0] sm:$0xff]  ;;  %v4348_v7 = vld [vmem:[#allocation10 + $0xe8] sm:$0xff] }
 0xa71   :  { %6839 = vmatprep.subr.bf16.mxu0 %v10310_v35  ;;  %6903 = vmatprep.subr.bf16.mxu1 %v10311_v32  ;;  %v6940_v35 = vpack.c.bf16 %v4330_v59, %v4329_v49  ;;  %v6942_v32 = vpack.c.bf16 %v4348_v7, %v4347_v57 }
 0xa74   :  { %6841 = vmatpush1.bf16.msra.mxu0 %v10312_v6  ;;  %6905 = vmatpush1.bf16.msra.mxu1 %v10313_v60  ;;  %v4331_v6 = vld [vmem:[#allocation10 + $0x60] sm:$0xff]  ;;  %v4332_v60 = vld [vmem:[#allocation10 + $0x68] sm:$0xff] }
 0xa75   :  { %6843 = vmatprep.subr.bf16.mxu0 %v10314_v24  ;;  %6907 = vmatprep.subr.bf16.mxu1 %v10315_v8  ;;  %v4349_v24 = vld [vmem:[#allocation10 + $0xf0] sm:$0xff]  ;;  %v4350_v8 = vld [vmem:[#allocation10 + $0xf8] sm:$0xff] }
 0xa78   :  { %6845 = vmatpush1.bf16.msra.mxu0 %v10316_v50  ;;  %6909 = vmatpush1.bf16.msra.mxu1 %v10317_v61  ;;  %v6944_v50 = vpack.c.bf16 %v4332_v60, %v4331_v6  ;;  %v6946_v61 = vpack.c.bf16 %v4350_v8, %v4349_v24  ;;  %v4298_v6 = vrot.slane %v9109_v44, 2 }
 0xa79   :  { %6847 = vmatprep.subr.bf16.mxu0 %v10318_v1  ;;  %6911 = vmatprep.subr.bf16.mxu1 %v10319_v5  ;;  %v4333_v1 = vld [vmem:[#allocation10 + $0x70] sm:$0xff]  ;;  %v4334_v5 = vld [vmem:[#allocation10 + $0x78] sm:$0xff] }
 0xa7c   :  { %6849 = vmatpush1.bf16.msra.mxu0 %v10320_v20  ;;  %6913 = vmatpush1.bf16.msra.mxu1 %v10321_v29  ;;  %v6948_v20 = vpack.c.bf16 %v4334_v5, %v4333_v1  ;;  %v10327_v5 = vld [vmem:[#allocation75_spill] sm:$0xff] }
 0xa7d   :  { %6851 = vmatprep.subr.bf16.mxu0 %v10322_v48  ;;  %6915 = vmatprep.subr.bf16.mxu1 %v10323_v54 }
 0xa80   :  { %6853 = vmatpush1.bf16.msra.mxu0 %v10324_v40  ;;  %6917 = vmatpush1.bf16.msra.mxu1 %v10325_v16 }
 0xa81   :  { %6919 = vmatprep.subr.bf16.mxu0 %v6918_v45 }
 0xa83   :  { %4154 = vmatmul.mubr.f32.vlgmr.msra.gmra.mrb[38].mxu0 %v9115_v18  ;;  %4225 = vmatmul.mubr.f32.vlgmr.msra.gmra.mrb[42].mxu1 %v9115_v18  ;;  %v6934_v18 = vpack.c.bf16 %v4344_v43, %v4343_v3 }
 0xa84   :  { %6921 = vmatpush3.bf16.msra.mxu0 %v6920_v63 }
 0xa85   :  { %6923 = vmatprep.subr.bf16.mxu0 %v6922_v23 }
 0xa88   :  { %6925 = vmatpush3.bf16.msra.mxu0 %v6924_v11 }
 0xa89   :  { %6927 = vmatprep.subr.bf16.mxu0 %v6926_v9 }
 0xa8c   :  { %6929 = vmatpush3.bf16.msra.mxu0 %v6928_v37 }
 0xa8d   :  { %6931 = vmatprep.subr.bf16.mxu0 %v6930_v39 }
 0xa90   :  { %6933 = vmatpush3.bf16.msra.mxu0 %v6932_v19 }
 0xa91   :  { %6935 = vmatprep.subr.bf16.mxu0 %v6934_v18 }
 0xa94   :  { %6937 = vmatpush3.bf16.msra.mxu0 %v6936_v56 }
 0xa95   :  { %6939 = vmatprep.subr.bf16.mxu0 %v6938_v17 }
 0xa98   :  { %6941 = vmatpush3.bf16.msra.mxu0 %v6940_v35 }
 0xa99   :  { %6943 = vmatprep.subr.bf16.mxu0 %v6942_v32 }
 0xa9c   :  { %6945 = vmatpush3.bf16.msra.mxu0 %v6944_v50 }
 0xa9d   :  { %6947 = vmatprep.subr.bf16.mxu0 %v6946_v61 }
 0xaa0   :  { %6949 = vmatpush3.bf16.msra.mxu0 %v6948_v20  ;;  %v10328_v20 = vld [vmem:[#allocation77_spill] sm:$0xff] }
 0xb16   :  { %v4013_v29 = vpop.f32.mrb[36].mxu0  ;;  %v4084_v48 = vpop.f32.mrb[40].mxu1 }
 0xb17   :  { %v4235_v54 = vrot.slane %v4013_v29, 2  ;;  %v4015_v40 = vpop.f32.mrb[37].mxu0  ;;  %v4086_v16 = vpop.f32.mrb[41].mxu1  ;;  %v4237_v22 = vrot.slane %v4084_v48, 2  ;;  %v4314_v29 = vsel %vm4305_vm4, %v10328_v20, %v10327_v5 }
 0xb18   :  { %v4236_v46 = vrot.slane %v4015_v40, 2  ;;  %v4238_v63 = vrot.slane %v4086_v16, 2  ;;  %v10330_v40 = vld [vmem:[#allocation73_spill] sm:$0xff] }
 0xb19   :  { %v4243_v12 = vadd.f32 %v4235_v54, %v10200_v31  ;;  %v4245_v41 = vadd.f32 %v10297_v51, %v4237_v22  ;;  %v10329_v54 = vld [vmem:[#allocation158_spill] sm:$0xff]  ;;  %v4316_v16 = vsel %vm461_vm0, %v4314_v29, %v10330_v40 }
 0xb1a   :  { %v4244_v45 = vadd.f32 %v4236_v46, %v10201_v30  ;;  %v4246_v58 = vadd.f32 %v10296_v0, %v4238_v63  ;;  %v10331_v46 = vld [vmem:[#allocation143_spill] sm:$0xff] }
 0xb1b   :  { %v4513_v38 = vmul.f32 -1.442695, %v4243_v12 }
 0xb1c   :  { %v4514_v2 = vmul.f32 -1.442695, %v4244_v45  ;;  %v4515_v23 = vmul.f32 -1.442695, %v4246_v58  ;;  %v10332_v45 = vld [vmem:[#allocation100_spill] sm:$0xff] }
 0xb1d   :  { %7221 = vpow2.f32 %v4513_v38  ;;  %v10333_v38 = vld [vmem:[#allocation160_spill] sm:$0xff] }
 0xb1e   :  { %7223 = vpow2.f32 %v4514_v2  ;;  %v4318_v2 = vsel %vm4310_vm5, %v4316_v16, %v10333_v38  ;;  %v4519_v58 = vld [vmem:[#allocation11] ss:$0 sm:$0xff] }
 0xb1f   :  { %7225 = vpow2.f32 %v4515_v23 }
 0xb20   :  { %7227 = vtanh.f32 %v4245_v41 }
 0xb27   :  { %v7222_v10 = vpop.eup %7221 }
 0xb28   :  { %v7224_v11 = vpop.eup %7223  ;;  %v4254_v26 = vadd.f32 1.0, %v7222_v10 }
 0xb29   :  { %v4260_v47 = vadd.f32 1.0, %v7224_v11  ;;  %v7226_v30 = vpop.eup %7225 }
 0xb2a   :  { %7229 = vrcp.f32 %v4254_v26  ;;  %v7228_v31 = vpop.eup %7227  ;;  %v4267_v0 = vadd.f32 1.0, %v7226_v30 }
 0xb2b   :  { %7231 = vrcp.f32 %v4260_v47 }
 0xb2c   :  { %7233 = vrcp.f32 %v4267_v0 }
 0xb34   :  { %v7230_v9 = vpop.eup %7229 }
 0xb35   :  { %v7232_v55 = vpop.eup %7231  ;;  %v4274_v37 = vmul.f32 %v7230_v9, %v7228_v31 }
 0xb36   :  { %v4273_v42 = vmul.f32 %v7232_v55, %v4271_v34  ;;  %v7234_v51 = vpop.eup %7233 }
 0xb38   :  { %v4275_v36 = vadd.f32 %v4274_v37, %v4273_v42 }
 0xb3a   :  { %7235 = vtanh.f32 %v4275_v36 }
 0xb44   :  { %v7236_v39 = vpop.eup %7235 }
 0xb45   :  { %v4277_v14 = vmul.f32 %v7236_v39, %v7234_v51 }
 0xb47   :  { %v4317_v19 = vsel %vm4310_vm5, %v10326_v53, %v4277_v14 }
 0xb56   :  { %v4155_v3 = vpop.f32.mrb[38].mxu0  ;;  %v4226_v43 = vpop.f32.mrb[42].mxu1 }
 0xb57   :  { %v4247_v18 = vadd.f32 %v10108_v52, %v4155_v3  ;;  %v4157_v21 = vpop.f32.mrb[39].mxu0  ;;  %v4228_v28 = vpop.f32.mrb[43].mxu1  ;;  %v4249_v59 = vadd.f32 %v10111_v4, %v4226_v43 }
 0xb58   :  { %v4248_v27 = vadd.f32 %v10109_v33, %v4157_v21  ;;  %v4250_v13 = vadd.f32 %v10110_v62, %v4228_v28 }
 0xb59   :  { %v4516_v25 = vmul.f32 -1.442695, %v4247_v18 }
 0xb5a   :  { %v4517_v56 = vmul.f32 -1.442695, %v4248_v27  ;;  %v4518_v49 = vmul.f32 -1.442695, %v4250_v13 }
 0xb5b   :  { %7237 = vpow2.f32 %v4516_v25 }
 0xb5c   :  { %7239 = vpow2.f32 %v4517_v56 }
 0xb5d   :  { %7241 = vpow2.f32 %v4518_v49 }
 0xb5e   :  { %7243 = vtanh.f32 %v4249_v59 }
 0xb65   :  { %v7238_v17 = vpop.eup %7237 }
 0xb66   :  { %v7240_v57 = vpop.eup %7239  ;;  %v4281_v7 = vadd.f32 1.0, %v7238_v17 }
 0xb67   :  { %v4287_v35 = vadd.f32 1.0, %v7240_v57  ;;  %v7242_v52 = vpop.eup %7241 }
 0xb68   :  { %7245 = vrcp.f32 %v4281_v7  ;;  %v7244_v32 = vpop.eup %7243  ;;  %v4294_v8 = vadd.f32 1.0, %v7242_v52 }
 0xb69   :  { %7247 = vrcp.f32 %v4287_v35 }
 0xb6a   :  { %7249 = vrcp.f32 %v4294_v8 }
 0xb72   :  { %v7246_v33 = vpop.eup %7245 }
 0xb73   :  { %v7248_v60 = vpop.eup %7247  ;;  %v4301_v24 = vmul.f32 %v7246_v33, %v7244_v32 }
 0xb74   :  { %v4300_v62 = vmul.f32 %v7248_v60, %v4298_v6  ;;  %v7250_v4 = vpop.eup %7249 }
 0xb76   :  { %v4302_v50 = vadd.f32 %v4301_v24, %v4300_v62 }
 0xb78   :  { %7251 = vtanh.f32 %v4302_v50 }
 0xb82   :  { %v7252_v61 = vpop.eup %7251 }
 0xb83   :  { %v4304_v1 = vmul.f32 %v7252_v61, %v7250_v4 }
 0xb85   :  { %v4307_v48 = vsel %vm4305_vm4, %v4304_v1, %v9112_v15 }
 0xb86   :  { %v4309_v44 = vsel %vm461_vm0, %v4307_v48, %v10329_v54 }
 0xb87   :  { %v4312_v12 = vsel %vm4310_vm5, %v4309_v44, %v10331_v46 }
 0xb88   :  { %4422 = vmatprep.mubr.f32.mxu0 %v4312_v12 }
 0xb89   :  { %4423 = vmatmul.mubr.f32.vlgmr.msra.gmra.mrb[40].mxu0 %v10332_v45 }
 0xb8a   :  { %4427 = vmatprep.mubr.f32.mxu0 %v4318_v2 }
 0xb8d   :  { %4428 = vmatmul.mubr.f32.gmra.mrb[42].mxu0 %v4317_v19 }
 0xc5c   :  { %v4552_v63 = vpop.f32.mrb[40].mxu0 }
 0xc5d   :  { %v4553_v15 = vpop.f32.mrb[41].mxu0 }
 0xc5e   :  { %v4554_v22 = vadd.f32 %v4553_v15, %v4552_v63 }
 0xc60   :  { %v4425_v23 = vadd.f32 %v4554_v22, %v4519_v58  ;;  %v4555_v41 = vpop.f32.mrb[42].mxu0 }
 0xc61   :  { %v4556_v10 = vpop.f32.mrb[43].mxu0 }
 0xc62   :  { %4433 = vst [vmem:[#allocation13] sm:$0xff] %v4425_v23  ;;  %v4557_v11 = vadd.f32 %v4556_v10, %v4555_v41 }
 0xc64   :  { %v4430_v26 = vadd.f32 %v4557_v11, %v4519_v58 }
 0xc66   :  { %4434 = vst [vmem:[#allocation13 + $0x8] sm:$0xff] %v4430_v26 }
 0xc67   :  { %7398 = shalt.err (!%p7395_p10)
}
 0xc68   :  { %s7399_s23 = scalar_lea.hbm %s9230_s6, 256 }
 0xc69   :  { %p7400_p11 = scmp.ne.s32.totalorder %s9230_s6, %s7399_s23  ;;  %p7403_p12 = scmp.lt.u32.totalorder %s7399_s23, %s9230_s6 }
 0xc6b   :  { %p7405_p13 = pnand %p7403_p12, %p7400_p11 }
 0xc6d   :  { %7408 = shalt.err (!%p7405_p13)
}
 0xc6e   :  { %4446 = dma.vmem_to_hbm [thread:$0]  %s4441_s1, 256, %s9230_s6, [#allocation4], %s7428_s2, %s7428_s2, %s7429_s9  }
 0xc6f   :  { %7417 = dma.done.wait [#allocation4], 256  }
 0xc70   :  { %7418 = vsyncadd [#allocation4], 4294967040 }
 0xc71   :  { %4450 = vsyncpa [#allocation3], 1 }
 0xc72   :  { %4451 = vsyncpa [#allocation6], 1 }
 0xc73   :  { %4452 = vsyncpa [#allocation9], 1 }
 0xc74   :  { %4453 = vsyncpa [#allocation12], 1 }
 0xc75   :  { %4454 = vsyncpa [#allocation4], 1 }

</bundles_post_ra>
